<compile_context>
chip_gen: v6e
topology: v6e:2x2x1
jax: 0.10.0
libtpu: 0.0.40
codegen_flags: <defaults>
</compile_context>

<pallas_src>
import numpy as np

import jax
import jax.numpy as jnp
from jax.experimental import pallas as pl
from jax.experimental.pallas import tpu as pltpu


def _round_up(x, m):
    return ((x + m - 1) // m) * m


def _cdiv(a, b):
    return (a + b - 1) // b


# ----------------------------- Pallas kernels -----------------------------

def _conv_pool_kernel(xlhs_ref, c1w_ref, c1b_ref, c2w_ref, c2b_ref, ph_ref,
                      out_ref):
    """Fused conv1+relu+conv2+relu+maxpool2x2 for a block of B samples.

    xlhs_ref: (3, B*28, 84)   row-tap im2row of the images (bf16)
                              xlhs[d, b*28+h, dj*28+w] = x[b, h+d+dj, w]
    c1w_ref : (84, 832)       stacked conv1 band matrix (bf16)
    c1b_ref : (1, 832)        conv1 bias tiled over w (f32), lane = w*32+c
    c2w_ref : (3, 192, 256)   conv2 chunked band matrices, one per row tap
    c2b_ref : (1, 256)        conv2 bias tiled over the 4 chunk columns (f32)
    ph_ref  : (2, B*12, B*28) 0/1 even/odd row-selection matrices (bf16)
    out_ref : (B*12, 768)     pooled activation, row b*12+i, lane j*64+c
    """
    b1 = c1b_ref[...]
    b2 = c2b_ref[...]
    w1 = c1w_ref[...]

    # conv1: three row-shifted activations A1[d][r] == conv1relu row (h+d).
    # One (B*28, 84) x (84, 832) matmul each; everything 8-sublane aligned.
    a1 = []
    for d in range(3):
        acc = jnp.dot(xlhs_ref[d], w1, preferred_element_type=jnp.float32)
        a1.append(jnp.maximum(acc + b1, 0.0).astype(jnp.bfloat16))

    w2_0 = c2w_ref[0]
    w2_1 = c2w_ref[1]
    w2_2 = c2w_ref[2]

    # conv2 + bias + relu + w-maxpool, 6 chunks of 4 output columns each.
    # Chunk lanes are parity-major: col = parity*128 + j'*64 + c2.
    pooled = []
    for ci in range(6):
        lane0 = 128 * ci                                    # = (4*ci)*32
        acc2 = jnp.dot(a1[0][:, lane0:lane0 + 192], w2_0,
                       preferred_element_type=jnp.float32)
        acc2 += jnp.dot(a1[1][:, lane0:lane0 + 192], w2_1,
                        preferred_element_type=jnp.float32)
        acc2 += jnp.dot(a1[2][:, lane0:lane0 + 192], w2_2,
                        preferred_element_type=jnp.float32)
        acc2 = jnp.maximum(acc2 + b2, 0.0)                  # (B*28, 256)
        # w-maxpool: the two aligned 128-lane halves are the w parities.
        pooled.append(jnp.maximum(acc2[:, 0:128], acc2[:, 128:256]))

    pw = jnp.concatenate(pooled, axis=1).astype(jnp.bfloat16)  # (B*28, 768)

    # h-maxpool + per-sample row compaction via two exact 0/1 selection
    # matmuls (even rows / odd rows), then a single lane-dense 768-wide store.
    ev = jnp.dot(ph_ref[0], pw, preferred_element_type=jnp.float32)
    od = jnp.dot(ph_ref[1], pw, preferred_element_type=jnp.float32)
    out_ref[...] = jnp.maximum(ev, od).astype(out_ref.dtype)   # (B*12, 768)


def _fc_kernel(x_ref, w1_ref, b1_ref, w2_ref, b2_ref, out_ref):
    """Fused fc1 + relu + fc2 + log_softmax for one M tile (no K grid axis)."""
    h = jnp.dot(x_ref[...], w1_ref[...], preferred_element_type=jnp.float32)
    h = jnp.maximum(h + b1_ref[...], 0.0)                   # (tm, 128)
    logits = jnp.dot(h.astype(jnp.bfloat16), w2_ref[...],
                     preferred_element_type=jnp.float32) + b2_ref[...]
    m = jnp.max(logits, axis=-1, keepdims=True)
    s = logits - m
    lse = jnp.log(jnp.sum(jnp.exp(s), axis=-1, keepdims=True))
    out_ref[...] = s - lse                                  # (tm, 128)


# ----------------------------- wrappers ------------------------------------

def _pool_select(block_b):
    """0/1 matrices selecting even / odd conv2-output rows of each sample."""
    m = np.zeros((2, block_b * 12, block_b * 28), np.float32)
    for s in range(block_b):
        for i in range(12):
            m[0, s * 12 + i, s * 28 + 2 * i] = 1.0
            m[1, s * 12 + i, s * 28 + 2 * i + 1] = 1.0
    return jnp.asarray(m, jnp.bfloat16)


def conv_pool(x_nchw, prep, block_b):
    """(N,1,28,28) -> (n_pad*12, 768) bf16 pooled activation, NHWC order."""
    n = x_nchw.shape[0]
    n_pad = _round_up(n, block_b)
    xs = x_nchw.reshape(n, 28, 28)
    if n_pad != n:
        xs = jnp.pad(xs, ((0, n_pad - n), (0, 0), (0, 0)))

    # Row-tap im2row, built once in XLA on tiny data (14 KB / sample, bf16):
    #   xlhs[d, b*28+h, dj*28+w] = x[b, h+d+dj, w]   (zero past the image).
    def shift_rows(a, d):
        return jnp.pad(a[:, d:], ((0, 0), (0, d), (0, 0))) if d else a

    xlhs = jnp.stack(
        [jnp.concatenate([shift_rows(xs, d), shift_rows(xs, d + 1),
                          shift_rows(xs, d + 2)], axis=-1)
         for d in range(3)], axis=0)
    xlhs = xlhs.reshape(3, n_pad * 28, 84).astype(jnp.bfloat16)

    ph = _pool_select(block_b)
    grid = (n_pad // block_b,)

    return pl.pallas_call(
        _conv_pool_kernel,
        out_shape=jax.ShapeDtypeStruct((n_pad * 12, 768), jnp.bfloat16),
        grid=grid,
        in_specs=[
            pl.BlockSpec((3, block_b * 28, 84), lambda i: (0, i, 0)),
            pl.BlockSpec((84, 832), lambda i: (0, 0)),
            pl.BlockSpec((1, 832), lambda i: (0, 0)),
            pl.BlockSpec((3, 192, 256), lambda i: (0, 0, 0)),
            pl.BlockSpec((1, 256), lambda i: (0, 0)),
            pl.BlockSpec((2, block_b * 12, block_b * 28),
                         lambda i: (0, 0, 0)),
        ],
        out_specs=pl.BlockSpec((block_b * 12, 768), lambda i: (i, 0)),
        compiler_params=pltpu.CompilerParams(
            dimension_semantics=("parallel",),
            vmem_limit_bytes=32 * 1024 * 1024),
    )(xlhs, prep["conv1_w_stack"], prep["conv1_b_row"],
      prep["conv2_w_bands"], prep["conv2_b_row"], ph)


def _fc_m_tiling(n):
    """Pick (tm, m_pad): tm ~256 rows and >=2 M tiles for larger batches."""
    tiles = max(1, _cdiv(n, 256))
    if n >= 32 and tiles < 2:
        tiles = 2                       # let the parallel axis span 2 TCs
    tm = _round_up(_cdiv(n, tiles), 16)
    return tm, tm * tiles


def fc_head(feats, prep):
    """feats: (N, 9216) bf16 -> (N, 10) f32 log-probs."""
    n = feats.shape[0]
    tm, m_pad = _fc_m_tiling(n)
    if m_pad != n:
        feats = jnp.pad(feats, ((0, m_pad - n), (0, 0)))
    out = pl.pallas_call(
        _fc_kernel,
        out_shape=jax.ShapeDtypeStruct((m_pad, 128), jnp.float32),
        grid=(m_pad // tm,),
        in_specs=[
            pl.BlockSpec((tm, 9216), lambda i: (i, 0)),
            pl.BlockSpec((9216, 128), lambda i: (0, 0)),
            pl.BlockSpec((1, 128), lambda i: (0, 0)),
            pl.BlockSpec((128, 128), lambda i: (0, 0)),
            pl.BlockSpec((1, 128), lambda i: (0, 0)),
        ],
        out_specs=pl.BlockSpec((tm, 128), lambda i: (i, 0)),
        compiler_params=pltpu.CompilerParams(
            dimension_semantics=("parallel",),
            vmem_limit_bytes=32 * 1024 * 1024),
    )(feats, prep["fc1_w"], prep["fc1_b"], prep["fc2_w"], prep["fc2_b"])
    return out[:n, :10]


# ----------------------------- parameters ----------------------------------

def init_params(key):
    ks = jax.random.split(key, 8)

    def u(k, shape, fan_in):
        bound = 1.0 / jnp.sqrt(jnp.float32(fan_in))
        return jax.random.uniform(k, shape, jnp.float32, -bound, bound)

    return {
        "conv1_w": u(ks[0], (32, 1, 3, 3), 1 * 3 * 3),
        "conv1_b": u(ks[1], (32,), 1 * 3 * 3),
        "conv2_w": u(ks[2], (64, 32, 3, 3), 32 * 3 * 3),
        "conv2_b": u(ks[3], (64,), 32 * 3 * 3),
        "fc1_w": u(ks[4], (128, 9216), 9216),
        "fc1_b": u(ks[5], (128,), 9216),
        "fc2_w": u(ks[6], (10, 128), 128),
        "fc2_b": u(ks[7], (10,), 128),
    }


def prepare_params(params):
    """One-time host-side weight re-layout (folds im2col/flatten/transposes)."""
    w1 = np.asarray(params["conv1_w"], np.float32)   # (32, 1, 3, 3)
    b1 = np.asarray(params["conv1_b"], np.float32)   # (32,)
    w2 = np.asarray(params["conv2_w"], np.float32)   # (64, 32, 3, 3)
    b2 = np.asarray(params["conv2_b"], np.float32)   # (64,)
    fc1_w = np.asarray(params["fc1_w"], np.float32)  # (128, 9216)
    fc1_b = np.asarray(params["fc1_b"], np.float32)  # (128,)
    fc2_w = np.asarray(params["fc2_w"], np.float32)  # (10, 128)
    fc2_b = np.asarray(params["fc2_b"], np.float32)  # (10,)

    # conv1 band matrices, stacked over the column tap dj:
    #   stack[dj*28 + win, w*32 + c] = w1[c, 0, dj, win - w]
    conv1_bands = np.zeros((3, 28, 26 * 32), np.float32)
    for dj in range(3):
        for w in range(26):
            for t in range(3):
                conv1_bands[dj, w + t, w * 32:(w + 1) * 32] = w1[:, 0, dj, t]
    conv1_stack = conv1_bands.reshape(84, 832)
    conv1_bias = np.tile(b1, 26)[None, :]            # (1, 832)

    # conv2 chunked band matrices (4 output cols per chunk, parity-major):
    #   R[di][(w'+dj)*32 + c, p*128 + j'*64 + c2] = w2[c2, c, di, dj],
    #   with w' = 2*j' + p.
    conv2_bands = np.zeros((3, 192, 256), np.float32)
    for di in range(3):
        for jp in range(2):
            for p in range(2):
                wp = 2 * jp + p
                col0 = p * 128 + jp * 64
                for dj in range(3):
                    row0 = (wp + dj) * 32
                    conv2_bands[di, row0:row0 + 32, col0:col0 + 64] = \
                        w2[:, :, di, dj].T
    conv2_bias = np.tile(b2, 4)[None, :]             # (1, 256)

    # fc1: fold the NCHW flatten -> NHWC permutation into the weight and
    # pre-transpose to (K, 128); fc2: transpose, pad to 128 lane-dense cols.
    fc1_wp = (fc1_w.reshape(128, 64, 12, 12)
              .transpose(0, 2, 3, 1)                 # [out, i, j, c]
              .reshape(128, 9216).T.copy())          # (9216, 128)
    fc2_wp = np.zeros((128, 128), np.float32)
    fc2_wp[:, :10] = fc2_w.T
    fc2_bp = np.full((1, 128), -1e30, np.float32)    # pads never win softmax
    fc2_bp[0, :10] = fc2_b

    return {
        "conv1_w_stack": jnp.asarray(conv1_stack, jnp.bfloat16),
        "conv1_b_row": jnp.asarray(conv1_bias, jnp.float32),
        "conv2_w_bands": jnp.asarray(conv2_bands, jnp.bfloat16),
        "conv2_b_row": jnp.asarray(conv2_bias, jnp.float32),
        "fc1_w": jnp.asarray(fc1_wp, jnp.bfloat16),
        "fc1_b": jnp.asarray(fc1_b[None, :], jnp.float32),
        "fc2_w": jnp.asarray(fc2_wp, jnp.bfloat16),
        "fc2_b": jnp.asarray(fc2_bp, jnp.float32),
    }


# ----------------------------- the network ---------------------------------

def net_forward(prep, x_nchw):
    """Pallas forward.  x_nchw: (N, 1, 28, 28) f32 -> (N, 10) log-probs."""
    n = x_nchw.shape[0]
    # 8 samples/block -> stacked M = 224 (good for the 256-row MXU of
    # v6e/v7x; v5e would also be fine with 4).  Small batches use 4.
    block_b = 8 if n >= 8 else 4
    pooled = conv_pool(x_nchw, prep, block_b)        # (n_pad*12, 768) bf16
    # dropout1: identity (inference)
    feats = pooled[: n * 12].reshape(n, 9216)        # NHWC flatten (folded)
    out = fc_head(feats, prep)                       # (N, 10)
    # dropout2: identity (inference)
    return out


def net_forward_ref(params, x):
    """Pure-JAX reference matching PyTorch semantics (f32)."""
    y = jax.lax.conv_general_dilated(
        x, params["conv1_w"], (1, 1), "VALID",
        dimension_numbers=("NCHW", "OIHW", "NCHW"))
    y = jax.nn.relu(y + params["conv1_b"][None, :, None, None])
    y = jax.lax.conv_general_dilated(
        y, params["conv2_w"], (1, 1), "VALID",
        dimension_numbers=("NCHW", "OIHW", "NCHW"))
    y = jax.nn.relu(y + params["conv2_b"][None, :, None, None])
    y = jax.lax.reduce_window(y, -jnp.inf, jax.lax.max,
                              (1, 1, 2, 2), (1, 1, 2, 2), "VALID")
    y = y.reshape(y.shape[0], -1)
    y = jax.nn.relu(y @ params["fc1_w"].T + params["fc1_b"])
    y = y @ params["fc2_w"].T + params["fc2_b"]
    return jax.nn.log_softmax(y, axis=-1)


if __name__ == "__main__":
    key = jax.random.PRNGKey(0)
    k_params, k_x = jax.random.split(key)
    params = init_params(k_params)
    prep = prepare_params(params)
    x = jax.random.normal(k_x, (2, 1, 28, 28), jnp.float32)

    fwd = jax.jit(net_forward)
    out = jax.block_until_ready(fwd(prep, x))
    ref = jax.block_until_ready(net_forward_ref(params, x))

    assert out.shape == (2, 10), out.shape
    err = float(jnp.max(jnp.abs(out - ref)))
    # bf16 weights/activations -> looser tolerance than the f32 reference.
    assert jnp.allclose(out, ref, atol=5e-2, rtol=5e-2), err
    print("KERNEL_OK")
</pallas_src>

<mosaic_0001>
module attributes {stable_mosaic.version = 11 : i64} {
  func.func @_conv_pool_kernel(%arg0: i32, %arg1: memref<3x112x84xbf16, #tpu.memory_space<vmem>>, %arg2: memref<84x832xbf16, #tpu.memory_space<vmem>>, %arg3: memref<1x832xf32, #tpu.memory_space<vmem>>, %arg4: memref<3x192x256xbf16, #tpu.memory_space<vmem>>, %arg5: memref<1x256xf32, #tpu.memory_space<vmem>>, %arg6: memref<2x48x112xbf16, #tpu.memory_space<vmem>>, %arg7: memref<48x768xbf16, #tpu.memory_space<vmem>>) attributes {dimension_semantics = [#tpu.dimension_semantics<parallel>], iteration_bounds = array<i64: 1>, scalar_prefetch = 0 : i64, scratch_operands = 0 : i64, tpu.core_type = #tpu.core_type<tc>, window_params = [{transform_indices = @transform_0, window_bounds = array<i64: 3, 112, 84>}, {pipeline_mode = #tpu.pipeline_mode<synchronous>, transform_indices = @transform_1, window_bounds = array<i64: 84, 832>}, {pipeline_mode = #tpu.pipeline_mode<synchronous>, transform_indices = @transform_2, window_bounds = array<i64: 1, 832>}, {pipeline_mode = #tpu.pipeline_mode<synchronous>, transform_indices = @transform_3, window_bounds = array<i64: 3, 192, 256>}, {pipeline_mode = #tpu.pipeline_mode<synchronous>, transform_indices = @transform_4, window_bounds = array<i64: 1, 256>}, {pipeline_mode = #tpu.pipeline_mode<synchronous>, transform_indices = @transform_5, window_bounds = array<i64: 2, 48, 112>}, {transform_indices = @transform_6, window_bounds = array<i64: 48, 768>}]} {
    %c0 = arith.constant 0 : index
    %c0_0 = arith.constant 0 : index
    %0 = vector.load %arg3[%c0, %c0_0] : memref<1x832xf32, #tpu.memory_space<vmem>>, vector<1x832xf32>
    %c0_1 = arith.constant 0 : index
    %c0_2 = arith.constant 0 : index
    %1 = vector.load %arg5[%c0_1, %c0_2] : memref<1x256xf32, #tpu.memory_space<vmem>>, vector<1x256xf32>
    %c0_3 = arith.constant 0 : index
    %c0_4 = arith.constant 0 : index
    %2 = vector.load %arg2[%c0_3, %c0_4] : memref<84x832xbf16, #tpu.memory_space<vmem>>, vector<84x832xbf16>
    %c0_5 = arith.constant 0 : index
    %c0_6 = arith.constant 0 : index
    %c0_7 = arith.constant 0 : index
    %3 = vector.load %arg1[%c0_5, %c0_6, %c0_7] : memref<3x112x84xbf16, #tpu.memory_space<vmem>>, vector<1x112x84xbf16>
    %4 = vector.shape_cast %3 : vector<1x112x84xbf16> to vector<112x84xbf16>
    %cst = arith.constant dense<0.000000e+00> : vector<112x832xf32>
    %5 = tpu.matmul %4, %2, %cst {dimension_numbers = #tpu.dot_dimension_numbers<[1], [0], [0], [1], [0, 0, 1, 1], [], []>} : vector<112x84xbf16>, vector<84x832xbf16>, vector<112x832xf32> -> vector<112x832xf32>
    %6 = vector.broadcast %0 : vector<1x832xf32> to vector<112x832xf32>
    %7 = arith.addf %5, %6 : vector<112x832xf32>
    %cst_8 = arith.constant 0.000000e+00 : f32
    %8 = vector.broadcast %cst_8 : f32 to vector<112x832xf32>
    %9 = arith.maximumf %7, %8 : vector<112x832xf32>
    %10 = arith.truncf %9 : vector<112x832xf32> to vector<112x832xbf16>
    %c1 = arith.constant 1 : index
    %c0_9 = arith.constant 0 : index
    %c0_10 = arith.constant 0 : index
    %11 = vector.load %arg1[%c1, %c0_9, %c0_10] : memref<3x112x84xbf16, #tpu.memory_space<vmem>>, vector<1x112x84xbf16>
    %12 = vector.shape_cast %11 : vector<1x112x84xbf16> to vector<112x84xbf16>
    %cst_11 = arith.constant dense<0.000000e+00> : vector<112x832xf32>
    %13 = tpu.matmul %12, %2, %cst_11 {dimension_numbers = #tpu.dot_dimension_numbers<[1], [0], [0], [1], [0, 0, 1, 1], [], []>} : vector<112x84xbf16>, vector<84x832xbf16>, vector<112x832xf32> -> vector<112x832xf32>
    %14 = vector.broadcast %0 : vector<1x832xf32> to vector<112x832xf32>
    %15 = arith.addf %13, %14 : vector<112x832xf32>
    %cst_12 = arith.constant 0.000000e+00 : f32
    %16 = vector.broadcast %cst_12 : f32 to vector<112x832xf32>
    %17 = arith.maximumf %15, %16 : vector<112x832xf32>
    %18 = arith.truncf %17 : vector<112x832xf32> to vector<112x832xbf16>
    %c2 = arith.constant 2 : index
    %c0_13 = arith.constant 0 : index
    %c0_14 = arith.constant 0 : index
    %19 = vector.load %arg1[%c2, %c0_13, %c0_14] : memref<3x112x84xbf16, #tpu.memory_space<vmem>>, vector<1x112x84xbf16>
    %20 = vector.shape_cast %19 : vector<1x112x84xbf16> to vector<112x84xbf16>
    %cst_15 = arith.constant dense<0.000000e+00> : vector<112x832xf32>
    %21 = tpu.matmul %20, %2, %cst_15 {dimension_numbers = #tpu.dot_dimension_numbers<[1], [0], [0], [1], [0, 0, 1, 1], [], []>} : vector<112x84xbf16>, vector<84x832xbf16>, vector<112x832xf32> -> vector<112x832xf32>
    %22 = vector.broadcast %0 : vector<1x832xf32> to vector<112x832xf32>
    %23 = arith.addf %21, %22 : vector<112x832xf32>
    %cst_16 = arith.constant 0.000000e+00 : f32
    %24 = vector.broadcast %cst_16 : f32 to vector<112x832xf32>
    %25 = arith.maximumf %23, %24 : vector<112x832xf32>
    %26 = arith.truncf %25 : vector<112x832xf32> to vector<112x832xbf16>
    %c0_17 = arith.constant 0 : index
    %c0_18 = arith.constant 0 : index
    %c0_19 = arith.constant 0 : index
    %27 = vector.load %arg4[%c0_17, %c0_18, %c0_19] : memref<3x192x256xbf16, #tpu.memory_space<vmem>>, vector<1x192x256xbf16>
    %28 = vector.shape_cast %27 : vector<1x192x256xbf16> to vector<192x256xbf16>
    %c1_20 = arith.constant 1 : index
    %c0_21 = arith.constant 0 : index
    %c0_22 = arith.constant 0 : index
    %29 = vector.load %arg4[%c1_20, %c0_21, %c0_22] : memref<3x192x256xbf16, #tpu.memory_space<vmem>>, vector<1x192x256xbf16>
    %30 = vector.shape_cast %29 : vector<1x192x256xbf16> to vector<192x256xbf16>
    %c2_23 = arith.constant 2 : index
    %c0_24 = arith.constant 0 : index
    %c0_25 = arith.constant 0 : index
    %31 = vector.load %arg4[%c2_23, %c0_24, %c0_25] : memref<3x192x256xbf16, #tpu.memory_space<vmem>>, vector<1x192x256xbf16>
    %32 = vector.shape_cast %31 : vector<1x192x256xbf16> to vector<192x256xbf16>
    %33 = vector.extract_strided_slice %10 {offsets = [0, 0], sizes = [112, 192], strides = [1, 1]} : vector<112x832xbf16> to vector<112x192xbf16>
    %cst_26 = arith.constant dense<0.000000e+00> : vector<112x256xf32>
    %34 = tpu.matmul %33, %28, %cst_26 {dimension_numbers = #tpu.dot_dimension_numbers<[1], [0], [0], [1], [0, 0, 1, 1], [], []>} : vector<112x192xbf16>, vector<192x256xbf16>, vector<112x256xf32> -> vector<112x256xf32>
    %35 = vector.extract_strided_slice %18 {offsets = [0, 0], sizes = [112, 192], strides = [1, 1]} : vector<112x832xbf16> to vector<112x192xbf16>
    %cst_27 = arith.constant dense<0.000000e+00> : vector<112x256xf32>
    %36 = tpu.matmul %35, %30, %cst_27 {dimension_numbers = #tpu.dot_dimension_numbers<[1], [0], [0], [1], [0, 0, 1, 1], [], []>} : vector<112x192xbf16>, vector<192x256xbf16>, vector<112x256xf32> -> vector<112x256xf32>
    %37 = arith.addf %34, %36 : vector<112x256xf32>
    %38 = vector.extract_strided_slice %26 {offsets = [0, 0], sizes = [112, 192], strides = [1, 1]} : vector<112x832xbf16> to vector<112x192xbf16>
    %cst_28 = arith.constant dense<0.000000e+00> : vector<112x256xf32>
    %39 = tpu.matmul %38, %32, %cst_28 {dimension_numbers = #tpu.dot_dimension_numbers<[1], [0], [0], [1], [0, 0, 1, 1], [], []>} : vector<112x192xbf16>, vector<192x256xbf16>, vector<112x256xf32> -> vector<112x256xf32>
    %40 = arith.addf %37, %39 : vector<112x256xf32>
    %41 = vector.broadcast %1 : vector<1x256xf32> to vector<112x256xf32>
    %42 = arith.addf %40, %41 : vector<112x256xf32>
    %cst_29 = arith.constant 0.000000e+00 : f32
    %43 = vector.broadcast %cst_29 : f32 to vector<112x256xf32>
    %44 = arith.maximumf %42, %43 : vector<112x256xf32>
    %45 = vector.extract_strided_slice %44 {offsets = [0, 0], sizes = [112, 128], strides = [1, 1]} : vector<112x256xf32> to vector<112x128xf32>
    %46 = vector.extract_strided_slice %44 {offsets = [0, 128], sizes = [112, 128], strides = [1, 1]} : vector<112x256xf32> to vector<112x128xf32>
    %47 = arith.maximumf %45, %46 : vector<112x128xf32>
    %48 = vector.extract_strided_slice %10 {offsets = [0, 128], sizes = [112, 192], strides = [1, 1]} : vector<112x832xbf16> to vector<112x192xbf16>
    %cst_30 = arith.constant dense<0.000000e+00> : vector<112x256xf32>
    %49 = tpu.matmul %48, %28, %cst_30 {dimension_numbers = #tpu.dot_dimension_numbers<[1], [0], [0], [1], [0, 0, 1, 1], [], []>} : vector<112x192xbf16>, vector<192x256xbf16>, vector<112x256xf32> -> vector<112x256xf32>
    %50 = vector.extract_strided_slice %18 {offsets = [0, 128], sizes = [112, 192], strides = [1, 1]} : vector<112x832xbf16> to vector<112x192xbf16>
    %cst_31 = arith.constant dense<0.000000e+00> : vector<112x256xf32>
    %51 = tpu.matmul %50, %30, %cst_31 {dimension_numbers = #tpu.dot_dimension_numbers<[1], [0], [0], [1], [0, 0, 1, 1], [], []>} : vector<112x192xbf16>, vector<192x256xbf16>, vector<112x256xf32> -> vector<112x256xf32>
    %52 = arith.addf %49, %51 : vector<112x256xf32>
    %53 = vector.extract_strided_slice %26 {offsets = [0, 128], sizes = [112, 192], strides = [1, 1]} : vector<112x832xbf16> to vector<112x192xbf16>
    %cst_32 = arith.constant dense<0.000000e+00> : vector<112x256xf32>
    %54 = tpu.matmul %53, %32, %cst_32 {dimension_numbers = #tpu.dot_dimension_numbers<[1], [0], [0], [1], [0, 0, 1, 1], [], []>} : vector<112x192xbf16>, vector<192x256xbf16>, vector<112x256xf32> -> vector<112x256xf32>
    %55 = arith.addf %52, %54 : vector<112x256xf32>
    %56 = vector.broadcast %1 : vector<1x256xf32> to vector<112x256xf32>
    %57 = arith.addf %55, %56 : vector<112x256xf32>
    %cst_33 = arith.constant 0.000000e+00 : f32
    %58 = vector.broadcast %cst_33 : f32 to vector<112x256xf32>
    %59 = arith.maximumf %57, %58 : vector<112x256xf32>
    %60 = vector.extract_strided_slice %59 {offsets = [0, 0], sizes = [112, 128], strides = [1, 1]} : vector<112x256xf32> to vector<112x128xf32>
    %61 = vector.extract_strided_slice %59 {offsets = [0, 128], sizes = [112, 128], strides = [1, 1]} : vector<112x256xf32> to vector<112x128xf32>
    %62 = arith.maximumf %60, %61 : vector<112x128xf32>
    %63 = vector.extract_strided_slice %10 {offsets = [0, 256], sizes = [112, 192], strides = [1, 1]} : vector<112x832xbf16> to vector<112x192xbf16>
    %cst_34 = arith.constant dense<0.000000e+00> : vector<112x256xf32>
    %64 = tpu.matmul %63, %28, %cst_34 {dimension_numbers = #tpu.dot_dimension_numbers<[1], [0], [0], [1], [0, 0, 1, 1], [], []>} : vector<112x192xbf16>, vector<192x256xbf16>, vector<112x256xf32> -> vector<112x256xf32>
    %65 = vector.extract_strided_slice %18 {offsets = [0, 256], sizes = [112, 192], strides = [1, 1]} : vector<112x832xbf16> to vector<112x192xbf16>
    %cst_35 = arith.constant dense<0.000000e+00> : vector<112x256xf32>
    %66 = tpu.matmul %65, %30, %cst_35 {dimension_numbers = #tpu.dot_dimension_numbers<[1], [0], [0], [1], [0, 0, 1, 1], [], []>} : vector<112x192xbf16>, vector<192x256xbf16>, vector<112x256xf32> -> vector<112x256xf32>
    %67 = arith.addf %64, %66 : vector<112x256xf32>
    %68 = vector.extract_strided_slice %26 {offsets = [0, 256], sizes = [112, 192], strides = [1, 1]} : vector<112x832xbf16> to vector<112x192xbf16>
    %cst_36 = arith.constant dense<0.000000e+00> : vector<112x256xf32>
    %69 = tpu.matmul %68, %32, %cst_36 {dimension_numbers = #tpu.dot_dimension_numbers<[1], [0], [0], [1], [0, 0, 1, 1], [], []>} : vector<112x192xbf16>, vector<192x256xbf16>, vector<112x256xf32> -> vector<112x256xf32>
    %70 = arith.addf %67, %69 : vector<112x256xf32>
    %71 = vector.broadcast %1 : vector<1x256xf32> to vector<112x256xf32>
    %72 = arith.addf %70, %71 : vector<112x256xf32>
    %cst_37 = arith.constant 0.000000e+00 : f32
    %73 = vector.broadcast %cst_37 : f32 to vector<112x256xf32>
    %74 = arith.maximumf %72, %73 : vector<112x256xf32>
    %75 = vector.extract_strided_slice %74 {offsets = [0, 0], sizes = [112, 128], strides = [1, 1]} : vector<112x256xf32> to vector<112x128xf32>
    %76 = vector.extract_strided_slice %74 {offsets = [0, 128], sizes = [112, 128], strides = [1, 1]} : vector<112x256xf32> to vector<112x128xf32>
    %77 = arith.maximumf %75, %76 : vector<112x128xf32>
    %78 = vector.extract_strided_slice %10 {offsets = [0, 384], sizes = [112, 192], strides = [1, 1]} : vector<112x832xbf16> to vector<112x192xbf16>
    %cst_38 = arith.constant dense<0.000000e+00> : vector<112x256xf32>
    %79 = tpu.matmul %78, %28, %cst_38 {dimension_numbers = #tpu.dot_dimension_numbers<[1], [0], [0], [1], [0, 0, 1, 1], [], []>} : vector<112x192xbf16>, vector<192x256xbf16>, vector<112x256xf32> -> vector<112x256xf32>
    %80 = vector.extract_strided_slice %18 {offsets = [0, 384], sizes = [112, 192], strides = [1, 1]} : vector<112x832xbf16> to vector<112x192xbf16>
    %cst_39 = arith.constant dense<0.000000e+00> : vector<112x256xf32>
    %81 = tpu.matmul %80, %30, %cst_39 {dimension_numbers = #tpu.dot_dimension_numbers<[1], [0], [0], [1], [0, 0, 1, 1], [], []>} : vector<112x192xbf16>, vector<192x256xbf16>, vector<112x256xf32> -> vector<112x256xf32>
    %82 = arith.addf %79, %81 : vector<112x256xf32>
    %83 = vector.extract_strided_slice %26 {offsets = [0, 384], sizes = [112, 192], strides = [1, 1]} : vector<112x832xbf16> to vector<112x192xbf16>
    %cst_40 = arith.constant dense<0.000000e+00> : vector<112x256xf32>
    %84 = tpu.matmul %83, %32, %cst_40 {dimension_numbers = #tpu.dot_dimension_numbers<[1], [0], [0], [1], [0, 0, 1, 1], [], []>} : vector<112x192xbf16>, vector<192x256xbf16>, vector<112x256xf32> -> vector<112x256xf32>
    %85 = arith.addf %82, %84 : vector<112x256xf32>
    %86 = vector.broadcast %1 : vector<1x256xf32> to vector<112x256xf32>
    %87 = arith.addf %85, %86 : vector<112x256xf32>
    %cst_41 = arith.constant 0.000000e+00 : f32
    %88 = vector.broadcast %cst_41 : f32 to vector<112x256xf32>
    %89 = arith.maximumf %87, %88 : vector<112x256xf32>
    %90 = vector.extract_strided_slice %89 {offsets = [0, 0], sizes = [112, 128], strides = [1, 1]} : vector<112x256xf32> to vector<112x128xf32>
    %91 = vector.extract_strided_slice %89 {offsets = [0, 128], sizes = [112, 128], strides = [1, 1]} : vector<112x256xf32> to vector<112x128xf32>
    %92 = arith.maximumf %90, %91 : vector<112x128xf32>
    %93 = vector.extract_strided_slice %10 {offsets = [0, 512], sizes = [112, 192], strides = [1, 1]} : vector<112x832xbf16> to vector<112x192xbf16>
    %cst_42 = arith.constant dense<0.000000e+00> : vector<112x256xf32>
    %94 = tpu.matmul %93, %28, %cst_42 {dimension_numbers = #tpu.dot_dimension_numbers<[1], [0], [0], [1], [0, 0, 1, 1], [], []>} : vector<112x192xbf16>, vector<192x256xbf16>, vector<112x256xf32> -> vector<112x256xf32>
    %95 = vector.extract_strided_slice %18 {offsets = [0, 512], sizes = [112, 192], strides = [1, 1]} : vector<112x832xbf16> to vector<112x192xbf16>
    %cst_43 = arith.constant dense<0.000000e+00> : vector<112x256xf32>
    %96 = tpu.matmul %95, %30, %cst_43 {dimension_numbers = #tpu.dot_dimension_numbers<[1], [0], [0], [1], [0, 0, 1, 1], [], []>} : vector<112x192xbf16>, vector<192x256xbf16>, vector<112x256xf32> -> vector<112x256xf32>
    %97 = arith.addf %94, %96 : vector<112x256xf32>
    %98 = vector.extract_strided_slice %26 {offsets = [0, 512], sizes = [112, 192], strides = [1, 1]} : vector<112x832xbf16> to vector<112x192xbf16>
    %cst_44 = arith.constant dense<0.000000e+00> : vector<112x256xf32>
    %99 = tpu.matmul %98, %32, %cst_44 {dimension_numbers = #tpu.dot_dimension_numbers<[1], [0], [0], [1], [0, 0, 1, 1], [], []>} : vector<112x192xbf16>, vector<192x256xbf16>, vector<112x256xf32> -> vector<112x256xf32>
    %100 = arith.addf %97, %99 : vector<112x256xf32>
    %101 = vector.broadcast %1 : vector<1x256xf32> to vector<112x256xf32>
    %102 = arith.addf %100, %101 : vector<112x256xf32>
    %cst_45 = arith.constant 0.000000e+00 : f32
    %103 = vector.broadcast %cst_45 : f32 to vector<112x256xf32>
    %104 = arith.maximumf %102, %103 : vector<112x256xf32>
    %105 = vector.extract_strided_slice %104 {offsets = [0, 0], sizes = [112, 128], strides = [1, 1]} : vector<112x256xf32> to vector<112x128xf32>
    %106 = vector.extract_strided_slice %104 {offsets = [0, 128], sizes = [112, 128], strides = [1, 1]} : vector<112x256xf32> to vector<112x128xf32>
    %107 = arith.maximumf %105, %106 : vector<112x128xf32>
    %108 = vector.extract_strided_slice %10 {offsets = [0, 640], sizes = [112, 192], strides = [1, 1]} : vector<112x832xbf16> to vector<112x192xbf16>
    %cst_46 = arith.constant dense<0.000000e+00> : vector<112x256xf32>
    %109 = tpu.matmul %108, %28, %cst_46 {dimension_numbers = #tpu.dot_dimension_numbers<[1], [0], [0], [1], [0, 0, 1, 1], [], []>} : vector<112x192xbf16>, vector<192x256xbf16>, vector<112x256xf32> -> vector<112x256xf32>
    %110 = vector.extract_strided_slice %18 {offsets = [0, 640], sizes = [112, 192], strides = [1, 1]} : vector<112x832xbf16> to vector<112x192xbf16>
    %cst_47 = arith.constant dense<0.000000e+00> : vector<112x256xf32>
    %111 = tpu.matmul %110, %30, %cst_47 {dimension_numbers = #tpu.dot_dimension_numbers<[1], [0], [0], [1], [0, 0, 1, 1], [], []>} : vector<112x192xbf16>, vector<192x256xbf16>, vector<112x256xf32> -> vector<112x256xf32>
    %112 = arith.addf %109, %111 : vector<112x256xf32>
    %113 = vector.extract_strided_slice %26 {offsets = [0, 640], sizes = [112, 192], strides = [1, 1]} : vector<112x832xbf16> to vector<112x192xbf16>
    %cst_48 = arith.constant dense<0.000000e+00> : vector<112x256xf32>
    %114 = tpu.matmul %113, %32, %cst_48 {dimension_numbers = #tpu.dot_dimension_numbers<[1], [0], [0], [1], [0, 0, 1, 1], [], []>} : vector<112x192xbf16>, vector<192x256xbf16>, vector<112x256xf32> -> vector<112x256xf32>
    %115 = arith.addf %112, %114 : vector<112x256xf32>
    %116 = vector.broadcast %1 : vector<1x256xf32> to vector<112x256xf32>
    %117 = arith.addf %115, %116 : vector<112x256xf32>
    %cst_49 = arith.constant 0.000000e+00 : f32
    %118 = vector.broadcast %cst_49 : f32 to vector<112x256xf32>
    %119 = arith.maximumf %117, %118 : vector<112x256xf32>
    %120 = vector.extract_strided_slice %119 {offsets = [0, 0], sizes = [112, 128], strides = [1, 1]} : vector<112x256xf32> to vector<112x128xf32>
    %121 = vector.extract_strided_slice %119 {offsets = [0, 128], sizes = [112, 128], strides = [1, 1]} : vector<112x256xf32> to vector<112x128xf32>
    %122 = arith.maximumf %120, %121 : vector<112x128xf32>
    %123 = tpu.concatenate %47, %62, %77, %92, %107, %122 in 1 : vector<112x128xf32>, vector<112x128xf32>, vector<112x128xf32>, vector<112x128xf32>, vector<112x128xf32>, vector<112x128xf32> -> vector<112x768xf32>
    %124 = arith.truncf %123 : vector<112x768xf32> to vector<112x768xbf16>
    %c0_50 = arith.constant 0 : index
    %c0_51 = arith.constant 0 : index
    %c0_52 = arith.constant 0 : index
    %125 = vector.load %arg6[%c0_50, %c0_51, %c0_52] : memref<2x48x112xbf16, #tpu.memory_space<vmem>>, vector<1x48x112xbf16>
    %126 = vector.shape_cast %125 : vector<1x48x112xbf16> to vector<48x112xbf16>
    %cst_53 = arith.constant dense<0.000000e+00> : vector<48x768xf32>
    %127 = tpu.matmul %126, %124, %cst_53 {dimension_numbers = #tpu.dot_dimension_numbers<[1], [0], [0], [1], [0, 0, 1, 1], [], []>} : vector<48x112xbf16>, vector<112x768xbf16>, vector<48x768xf32> -> vector<48x768xf32>
    %c1_54 = arith.constant 1 : index
    %c0_55 = arith.constant 0 : index
    %c0_56 = arith.constant 0 : index
    %128 = vector.load %arg6[%c1_54, %c0_55, %c0_56] : memref<2x48x112xbf16, #tpu.memory_space<vmem>>, vector<1x48x112xbf16>
    %129 = vector.shape_cast %128 : vector<1x48x112xbf16> to vector<48x112xbf16>
    %cst_57 = arith.constant dense<0.000000e+00> : vector<48x768xf32>
    %130 = tpu.matmul %129, %124, %cst_57 {dimension_numbers = #tpu.dot_dimension_numbers<[1], [0], [0], [1], [0, 0, 1, 1], [], []>} : vector<48x112xbf16>, vector<112x768xbf16>, vector<48x768xf32> -> vector<48x768xf32>
    %131 = arith.maximumf %127, %130 : vector<48x768xf32>
    %132 = arith.truncf %131 : vector<48x768xf32> to vector<48x768xbf16>
    %c0_58 = arith.constant 0 : index
    %c0_59 = arith.constant 0 : index
    %133 = vector.load %arg7[%c0_58, %c0_59] : memref<48x768xbf16, #tpu.memory_space<vmem>>, vector<48x768xbf16>
    tpu.vector_store %arg7[%c0_58, %c0_59], %132 {strides = array<i32>} : memref<48x768xbf16, #tpu.memory_space<vmem>>, vector<48x768xbf16>,
    return
  }
  func.func @transform_0(%arg0: i32) -> (i32, i32, i32) {
    %c0_i32 = arith.constant 0 : i32
    %c0_i32_0 = arith.constant 0 : i32
    %c0_i32_1 = arith.constant 0 : i32
    return %c0_i32, %arg0, %c0_i32_0 : i32, i32, i32
  }
  func.func @transform_1(%arg0: i32) -> (i32, i32) {
    %c0_i32 = arith.constant 0 : i32
    %c0_i32_0 = arith.constant 0 : i32
    %c0_i32_1 = arith.constant 0 : i32
    return %c0_i32, %c0_i32_0 : i32, i32
  }
  func.func @transform_2(%arg0: i32) -> (i32, i32) {
    %c0_i32 = arith.constant 0 : i32
    %c0_i32_0 = arith.constant 0 : i32
    %c0_i32_1 = arith.constant 0 : i32
    return %c0_i32, %c0_i32_0 : i32, i32
  }
  func.func @transform_3(%arg0: i32) -> (i32, i32, i32) {
    %c0_i32 = arith.constant 0 : i32
    %c0_i32_0 = arith.constant 0 : i32
    %c0_i32_1 = arith.constant 0 : i32
    %c0_i32_2 = arith.constant 0 : i32
    return %c0_i32, %c0_i32_0, %c0_i32_1 : i32, i32, i32
  }
  func.func @transform_4(%arg0: i32) -> (i32, i32) {
    %c0_i32 = arith.constant 0 : i32
    %c0_i32_0 = arith.constant 0 : i32
    %c0_i32_1 = arith.constant 0 : i32
    return %c0_i32, %c0_i32_0 : i32, i32
  }
  func.func @transform_5(%arg0: i32) -> (i32, i32, i32) {
    %c0_i32 = arith.constant 0 : i32
    %c0_i32_0 = arith.constant 0 : i32
    %c0_i32_1 = arith.constant 0 : i32
    %c0_i32_2 = arith.constant 0 : i32
    return %c0_i32, %c0_i32_0, %c0_i32_1 : i32, i32, i32
  }
  func.func @transform_6(%arg0: i32) -> (i32, i32) {
    %c0_i32 = arith.constant 0 : i32
    %c0_i32_0 = arith.constant 0 : i32
    return %arg0, %c0_i32 : i32, i32
  }
}

module attributes {stable_mosaic.version = 11 : i64} {
  func.func @_fc_kernel(%arg0: i32, %arg1: memref<16x9216xbf16, #tpu.memory_space<vmem>>, %arg2: memref<9216x128xbf16, #tpu.memory_space<vmem>>, %arg3: memref<1x128xf32, #tpu.memory_space<vmem>>, %arg4: memref<128x128xbf16, #tpu.memory_space<vmem>>, %arg5: memref<1x128xf32, #tpu.memory_space<vmem>>, %arg6: memref<16x128xf32, #tpu.memory_space<vmem>>) attributes {dimension_semantics = [#tpu.dimension_semantics<parallel>], iteration_bounds = array<i64: 1>, scalar_prefetch = 0 : i64, scratch_operands = 0 : i64, tpu.core_type = #tpu.core_type<tc>, window_params = [{transform_indices = @transform_0, window_bounds = array<i64: 16, 9216>}, {pipeline_mode = #tpu.pipeline_mode<synchronous>, transform_indices = @transform_1, window_bounds = array<i64: 9216, 128>}, {pipeline_mode = #tpu.pipeline_mode<synchronous>, transform_indices = @transform_2, window_bounds = array<i64: 1, 128>}, {pipeline_mode = #tpu.pipeline_mode<synchronous>, transform_indices = @transform_3, window_bounds = array<i64: 128, 128>}, {pipeline_mode = #tpu.pipeline_mode<synchronous>, transform_indices = @transform_4, window_bounds = array<i64: 1, 128>}, {transform_indices = @transform_5, window_bounds = array<i64: 16, 128>}]} {
    %c0 = arith.constant 0 : index
    %c0_0 = arith.constant 0 : index
    %0 = vector.load %arg1[%c0, %c0_0] : memref<16x9216xbf16, #tpu.memory_space<vmem>>, vector<16x9216xbf16>
    %c0_1 = arith.constant 0 : index
    %c0_2 = arith.constant 0 : index
    %1 = vector.load %arg2[%c0_1, %c0_2] : memref<9216x128xbf16, #tpu.memory_space<vmem>>, vector<9216x128xbf16>
    %cst = arith.constant dense<0.000000e+00> : vector<16x128xf32>
    %2 = tpu.matmul %0, %1, %cst {dimension_numbers = #tpu.dot_dimension_numbers<[1], [0], [0], [1], [0, 0, 1, 1], [], []>} : vector<16x9216xbf16>, vector<9216x128xbf16>, vector<16x128xf32> -> vector<16x128xf32>
    %c0_3 = arith.constant 0 : index
    %c0_4 = arith.constant 0 : index
    %3 = vector.load %arg3[%c0_3, %c0_4] : memref<1x128xf32, #tpu.memory_space<vmem>>, vector<1x128xf32>
    %4 = vector.broadcast %3 : vector<1x128xf32> to vector<16x128xf32>
    %5 = arith.addf %2, %4 : vector<16x128xf32>
    %cst_5 = arith.constant 0.000000e+00 : f32
    %6 = vector.broadcast %cst_5 : f32 to vector<16x128xf32>
    %7 = arith.maximumf %5, %6 : vector<16x128xf32>
    %8 = arith.truncf %7 : vector<16x128xf32> to vector<16x128xbf16>
    %c0_6 = arith.constant 0 : index
    %c0_7 = arith.constant 0 : index
    %9 = vector.load %arg4[%c0_6, %c0_7] : memref<128x128xbf16, #tpu.memory_space<vmem>>, vector<128x128xbf16>
    %cst_8 = arith.constant dense<0.000000e+00> : vector<16x128xf32>
    %10 = tpu.matmul %8, %9, %cst_8 {dimension_numbers = #tpu.dot_dimension_numbers<[1], [0], [0], [1], [0, 0, 1, 1], [], []>} : vector<16x128xbf16>, vector<128x128xbf16>, vector<16x128xf32> -> vector<16x128xf32>
    %c0_9 = arith.constant 0 : index
    %c0_10 = arith.constant 0 : index
    %11 = vector.load %arg5[%c0_9, %c0_10] : memref<1x128xf32, #tpu.memory_space<vmem>>, vector<1x128xf32>
    %12 = vector.broadcast %11 : vector<1x128xf32> to vector<16x128xf32>
    %13 = arith.addf %10, %12 : vector<16x128xf32>
    %cst_11 = arith.constant dense<0xFF800000> : vector<16xf32>
    %14 = vector.multi_reduction <maximumf>, %13, %cst_11 [1] : vector<16x128xf32> to vector<16xf32>
    %15 = vector.shape_cast %14 : vector<16xf32> to vector<16x1xf32>
    %16 = vector.broadcast %15 : vector<16x1xf32> to vector<16x128xf32>
    %17 = arith.subf %13, %16 : vector<16x128xf32>
    %18 = math.exp %17 : vector<16x128xf32>
    %cst_12 = arith.constant dense<0.000000e+00> : vector<16xf32>
    %19 = vector.multi_reduction <add>, %18, %cst_12 [1] : vector<16x128xf32> to vector<16xf32>
    %20 = vector.shape_cast %19 : vector<16xf32> to vector<16x1xf32>
    %21 = math.log %20 : vector<16x1xf32>
    %22 = vector.broadcast %21 : vector<16x1xf32> to vector<16x128xf32>
    %23 = arith.subf %17, %22 : vector<16x128xf32>
    %c0_13 = arith.constant 0 : index
    %c0_14 = arith.constant 0 : index
    %24 = vector.load %arg6[%c0_13, %c0_14] : memref<16x128xf32, #tpu.memory_space<vmem>>, vector<16x128xf32>
    tpu.vector_store %arg6[%c0_13, %c0_14], %23 {strides = array<i32>} : memref<16x128xf32, #tpu.memory_space<vmem>>, vector<16x128xf32>,
    return
  }
  func.func @transform_0(%arg0: i32) -> (i32, i32) {
    %c0_i32 = arith.constant 0 : i32
    %c0_i32_0 = arith.constant 0 : i32
    return %arg0, %c0_i32 : i32, i32
  }
  func.func @transform_1(%arg0: i32) -> (i32, i32) {
    %c0_i32 = arith.constant 0 : i32
    %c0_i32_0 = arith.constant 0 : i32
    %c0_i32_1 = arith.constant 0 : i32
    return %c0_i32, %c0_i32_0 : i32, i32
  }
  func.func @transform_2(%arg0: i32) -> (i32, i32) {
    %c0_i32 = arith.constant 0 : i32
    %c0_i32_0 = arith.constant 0 : i32
    %c0_i32_1 = arith.constant 0 : i32
    return %c0_i32, %c0_i32_0 : i32, i32
  }
  func.func @transform_3(%arg0: i32) -> (i32, i32) {
    %c0_i32 = arith.constant 0 : i32
    %c0_i32_0 = arith.constant 0 : i32
    %c0_i32_1 = arith.constant 0 : i32
    return %c0_i32, %c0_i32_0 : i32, i32
  }
  func.func @transform_4(%arg0: i32) -> (i32, i32) {
    %c0_i32 = arith.constant 0 : i32
    %c0_i32_0 = arith.constant 0 : i32
    %c0_i32_1 = arith.constant 0 : i32
    return %c0_i32, %c0_i32_0 : i32, i32
  }
  func.func @transform_5(%arg0: i32) -> (i32, i32) {
    %c0_i32 = arith.constant 0 : i32
    %c0_i32_0 = arith.constant 0 : i32
    return %arg0, %c0_i32 : i32, i32
  }
}

</mosaic_0001>

<bundles_post_ra>
// kernel: net_forward.2
= control target key start
LH: loop header
LB: loop body
LE: loop exit
PB: predicated region body
PF: predicated region fallthrough
CT: control target
= control target key end

     0   :  { %11 = vsyncpa [#allocation3], 0  ;;  %s10962_s0 = inlined_call_operand.vmem [shape: bf16[3,112,84], index: 0, kind: input, shape index: {}]   ;;  %s10963_s1 = inlined_call_operand.hbm [shape: bf16[84,832], index: 1, kind: input, shape index: {}]   ;;  %s10964_s2 = inlined_call_operand.hbm [shape: f32[1,832], index: 2, kind: input, shape index: {}]   ;;  %s10965_s3 = inlined_call_operand.hbm [shape: bf16[3,192,256], index: 3, kind: input, shape index: {}]   ;;  %s10966_s4 = inlined_call_operand.hbm [shape: f32[1,256], index: 4, kind: input, shape index: {}]   ;;  %s10967_s5 = inlined_call_operand.hbm [shape: bf16[2,48,112], index: 5, kind: input, shape index: {}]   ;;  %s10968_s6 = inlined_call_operand.vmem [shape: bf16[48,768], index: 6, kind: output, shape index: {}]  }
   0x1   :  { %12 = vsyncpa [#allocation5], 0 }
   0x2   :  { %13 = vsyncpa [#allocation8], 0  ;;  %s7246_s21 = smov [#allocation4]   ;;  %s7247_s23 = smov [#allocation7]  }
   0x3   :  { %s34_s22 = sshll.u32 %s7246_s21, 4  ;;  %s56_s24 = sshll.u32 %s7247_s23, 4  ;;  %s35_s22 = int_to_ptr.vmem [resolvable:$true] %s34_s22  ;;  %s57_s24 = int_to_ptr.vmem [resolvable:$true] %s56_s24 }
   0x4   :  { %s7148_s25 = scalar_lea.vmem %s35_s22, 112  ;;  %s7152_s26 = scalar_lea.vmem %s35_s22, 128 }
   0x5   :  { %p7149_p0 = scmp.ne.s32.totalorder %s35_s22, %s7148_s25  ;;  %p7153_p1 = scmp.lt.s32.totalorder %s35_s22, %s35_s22 }
   0x6   :  { %p7154_p2 = scmp.lt.s32.totalorder %s7152_s26, %s7148_s25 }
   0x8   :  { %p7155_p3 = por %p7154_p2, %p7153_p1 }
   0xa   :  { %p7156_p4 = pnand %p7155_p3, %p7149_p0 }
   0xc   :  { %7159 = shalt.err (!%p7156_p4)
}
   0xd   :  { %37 = dma.hbm_to_vmem [thread:$0]  %s10964_s2, 112, %s35_s22, [#allocation5]  }
   0xe   :  { %s7168_s29 = scalar_lea.vmem %s57_s24, 32  ;;  %p7173_p6 = scmp.lt.s32.totalorder %s57_s24, %s57_s24 }
   0xf   :  { %p7169_p5 = scmp.ne.s32.totalorder %s57_s24, %s7168_s29  ;;  %p7174_p7 = scmp.lt.s32.totalorder %s7168_s29, %s7168_s29 }
  0x11   :  { %p7175_p8 = por %p7174_p7, %p7173_p6 }
  0x13   :  { %p7176_p9 = pnand %p7175_p8, %p7169_p5 }
  0x15   :  { %7179 = shalt.err (!%p7176_p9)
}
  0x16   :  { %59 = dma.hbm_to_vmem [thread:$0]  %s10966_s4, 32, %s57_s24, [#allocation8]  }
  0x17   :  { %s7248_s8 = smov [#allocation2]  }
  0x18   :  { %s21_s9 = sshll.u32 %s7248_s8, 4  ;;  %s22_s9 = int_to_ptr.vmem [resolvable:$true] %s21_s9 }
  0x19   :  { %s7188_s10 = scalar_lea.vmem %s22_s9, 4928  ;;  %p7193_p11 = scmp.lt.s32.totalorder %s22_s9, %s22_s9 }
  0x1a   :  { %p7189_p10 = scmp.ne.s32.totalorder %s22_s9, %s7188_s10  ;;  %p7194_p12 = scmp.lt.s32.totalorder %s7188_s10, %s7188_s10 }
  0x1c   :  { %p7195_p13 = por %p7194_p12, %p7193_p11 }
  0x1e   :  { %p7196_p0 = pnand %p7195_p13, %p7189_p10 }
  0x20   :  { %7199 = shalt.err (!%p7196_p0)
}
  0x21   :  { %s7249_s2 = smov 448   ;;  %s7250_s11 = smov 28  }
  0x22   :  { %27 = dma.hbm_to_vmem [thread:$0]  %s10963_s1, 4928, %s22_s9, [#allocation3], %s7249_s2, %s7249_s2, %s7250_s11  }
  0x23   :  { %s7251_s14 = smov [#allocation6]  }
  0x24   :  { %s43_s15 = sshll.u32 %s7251_s14, 4  ;;  %s44_s15 = int_to_ptr.vmem [resolvable:$true] %s43_s15 }
  0x25   :  { %s7208_s4 = scalar_lea.vmem %s44_s15, 9216  ;;  %p7213_p2 = scmp.lt.s32.totalorder %s44_s15, %s44_s15 }
  0x26   :  { %p7209_p1 = scmp.ne.s32.totalorder %s44_s15, %s7208_s4  ;;  %p7214_p3 = scmp.lt.s32.totalorder %s7208_s4, %s7208_s4 }
  0x28   :  { %p7215_p4 = por %p7214_p3, %p7213_p2 }
  0x2a   :  { %p7216_p5 = pnand %p7215_p4, %p7209_p1 }
  0x2c   :  { %7219 = shalt.err (!%p7216_p5)
}
  0x2d   :  { %s7252_s16 = smov 128   ;;  %s7253_s17 = smov 8  }
  0x2e   :  { %49 = dma.hbm_to_vmem [thread:$0]  %s10965_s3, 9216, %s44_s15, [#allocation5], %s7252_s16, %s7252_s16, %s7253_s17  }
  0x2f   :  { %s7254_s20 = smov [#allocation9]  }
  0x30   :  { %s65_s21 = sshll.u32 %s7254_s20, 4  ;;  %s66_s21 = int_to_ptr.vmem [resolvable:$true] %s65_s21 }
  0x31   :  { %s7228_s1 = scalar_lea.vmem %s66_s21, 768  ;;  %p7233_p7 = scmp.lt.s32.totalorder %s66_s21, %s66_s21 }
  0x32   :  { %p7229_p6 = scmp.ne.s32.totalorder %s66_s21, %s7228_s1  ;;  %p7234_p8 = scmp.lt.s32.totalorder %s7228_s1, %s7228_s1 }
  0x34   :  { %p7235_p9 = por %p7234_p8, %p7233_p7 }
  0x36   :  { %p7236_p10 = pnand %p7235_p9, %p7229_p6 }
  0x38   :  { %7239 = shalt.err (!%p7236_p10)
}
  0x39   :  { %s7255_s22 = smov 64   ;;  %s7256_s23 = smov 4  }
  0x3a   :  { %71 = dma.hbm_to_vmem [thread:$0]  %s10967_s5, 768, %s66_s21, [#allocation8], %s7255_s22, %s7255_s22, %s7256_s23  }
  0x3b   :  { %7240 = dma.done.wait [#allocation3], 4928  }
  0x3c   :  { %7241 = vsyncadd [#allocation3], 4294962368 }
  0x3d   :  { %7242 = dma.done.wait [#allocation5], 9328  }
  0x3e   :  { %7243 = vsyncadd [#allocation5], 4294957968 }
  0x3f   :  { %7244 = dma.done.wait [#allocation8], 800  }
  0x40   :  { %7245 = vsyncadd [#allocation8], 4294966496  ;;  %v10974_v0 = vmov 0   ;;  %v130_v1 = vld [vmem:[#allocation2 + $0x118] sm:$0x33]  ;;  %vm439_vm0 = vcmask 1041408   ;;  %v149_v58 = vlaneseq }
  0x41   :  { %493 = vmatprep.mubr.bf16.mxu0 %v10974_v0  ;;  %596 = vmatprep.mubr.bf16.mxu1 %v10974_v0  ;;  %v131_v2 = vld [vmem:[#allocation2 + $0x120] sm:$0x33]  ;;  %v7312_v3 = vcombine.high %v130_v1, %v130_v1  ;;  %v6197_v5 = vcombine.low %v130_v1, %v130_v1  ;;  %v7318_v8 = vld [vmem:[#allocation2 + $0xec] ss:$28 sps:$4 sm:$0xff]   ;;  %v7340_v14 = vld [vmem:[#allocation2 + $0xb4] ss:$28 sps:$4 sm:$0xff]  }
  0x42   :  { %v7314_v4 = vcombine.high %v131_v2, %v131_v2  ;;  %v6199_v6 = vcombine.low %v131_v2, %v131_v2  ;;  %v7316_v7 = vld [vmem:[#allocation2 + $0xe4] ss:$28 sps:$4 sm:$0xff]   ;;  %v7338_v13 = vld [vmem:[#allocation2 + $0xac] ss:$28 sps:$4 sm:$0xff]   ;;  %v7348_v17 = vld [vmem:[#allocation2 + $0x74] ss:$28 sps:$4 sm:$0xff]  }
  0x43   :  { %6204 = vmatprep.subr.msk.bf16.mxu0 %vm439_vm0, %v7312_v3  ;;  %v7325_v9 = vsel %vm439_vm0, %v6197_v5, 0  ;;  %v7330_v11 = vld [vmem:[#allocation2 + $0xe0] ss:$28 sps:$4 sm:$0xff]   ;;  %v7334_v12 = vld [vmem:[#allocation2 + $0xe8] ss:$28 sps:$4 sm:$0xff]   ;;  %vm417_vm1 = vcmask 687104  }
  0x44   :  { %6212 = vmatprep.subr.msk.bf16.mxu1 %vm439_vm0, %v7314_v4  ;;  %v7328_v10 = vsel %vm439_vm0, %v6199_v6, 0  ;;  %466 = vmatpush1.bf16.msra.mxu0 %v7325_v9  ;;  %v7342_v15 = vld [vmem:[#allocation2 + $0xa8] ss:$28 sps:$4 sm:$0xff]   ;;  %v7346_v16 = vld [vmem:[#allocation2 + $0xb0] ss:$28 sps:$4 sm:$0xff]   ;;  %v10971_v36 = vmov 0.0  }
  0x45   :  { %569 = vmatpush1.bf16.msra.mxu1 %v7328_v10  ;;  %467 = vmatprep.subr.bf16.mxu0 %v7316_v7  ;;  %v7352_v18 = vld [vmem:[#allocation2 + $0x7c] ss:$28 sps:$4 sm:$0xff]   ;;  %v7354_v19 = vld [vmem:[#allocation2 + $0x70] ss:$28 sps:$4 sm:$0xff]   ;;  %v7364_v22 = vld [vmem:[#allocation2 + $0x44] ss:$28 sps:$4 sm:$0xff]  }
  0x46   :  { %570 = vmatprep.subr.bf16.mxu1 %v7318_v8  ;;  %v7358_v20 = vld [vmem:[#allocation2 + $0x78] ss:$28 sps:$4 sm:$0xff]   ;;  %v7370_v24 = vld [vmem:[#allocation2 + $0x40] ss:$28 sps:$4 sm:$0xff]   ;;  %v7376_v26 = vld [vmem:[#allocation2 + $0xc] ss:$28 sps:$4 sm:$0xff]  }
  0x47   :  { %v7362_v21 = vld [vmem:[#allocation2 + $0x3c] ss:$28 sps:$4 sm:$0xff]   ;;  %v7374_v25 = vld [vmem:[#allocation2 + $0x4] ss:$28 sps:$4 sm:$0xff]   ;;  %v132_v27 = vld [vmem:[#allocation2 + $0x128] sm:$0x33] }
  0x48   :  { %468 = vmatpush1.bf16.msra.mxu0 %v7330_v11  ;;  %v7366_v23 = vld [vmem:[#allocation2 + $0x38] ss:$28 sps:$4 sm:$0xff]   ;;  %v7378_v28 = vld [vmem:[#allocation2] ss:$28 sps:$4 sm:$0xff]   ;;  %v7382_v29 = vld [vmem:[#allocation2 + $0x8] ss:$28 sps:$4 sm:$0xff]   ;;  %v7386_v30 = vcombine.high %v132_v27, %v132_v27  ;;  %v6201_v31 = vcombine.low %v132_v27, %v132_v27 }
  0x49   :  { %571 = vmatpush1.bf16.msra.mxu1 %v7334_v12  ;;  %469 = vmatprep.subr.bf16.mxu0 %v7338_v13  ;;  %v7391_v32 = vld [vmem:[%s10962_s0] sm:$0xff]   ;;  %v6820_v33 = vld [vmem:[#allocation2 + $0x130] ss:$0 sps:$4 sm:$0x33]   ;;  %v7416_v39 = vld [vmem:[#allocation2 + $0xbc] ss:$28 sps:$4 sm:$0xff]  }
  0x4a   :  { %572 = vmatprep.subr.bf16.mxu1 %v7340_v14  ;;  %v7398_v34 = vsel %vm439_vm0, %v6201_v31, 0  ;;  %v7400_v35 = vld [vmem:[#allocation2 + $0xf4] ss:$28 sps:$4 sm:$0xff]   ;;  %v7408_v37 = vsel %vm439_vm0, %v6820_v33, 0  ;;  %v7424_v41 = vld [vmem:[%s10962_s0 + $0x8] sm:$0xff]   ;;  %v7480_v54 = vld [vmem:[%s10962_s0 + $0x18] sm:$0xff]  }
  0x4b   :  { %v7412_v38 = vld [vmem:[#allocation2 + $0xf0] ss:$28 sps:$4 sm:$0xff]   ;;  %v7419_v40 = vld [vmem:[#allocation2 + $0xf8] ss:$28 sps:$4 sm:$0xff]   ;;  %v7431_v43 = vld [vmem:[#allocation2 + $0x84] ss:$28 sps:$4 sm:$0xff]  }
  0x4c   :  { %470 = vmatpush1.bf16.msra.mxu0 %v7342_v15  ;;  %v7428_v42 = vld [vmem:[#allocation2 + $0xb8] ss:$28 sps:$4 sm:$0xff]   ;;  %v7434_v44 = vld [vmem:[#allocation2 + $0xc0] ss:$28 sps:$4 sm:$0xff]   ;;  %v7450_v47 = vld [vmem:[#allocation2 + $0x4c] ss:$28 sps:$4 sm:$0xff]  }
  0x4d   :  { %573 = vmatpush1.bf16.msra.mxu1 %v7346_v16  ;;  %471 = vmatprep.subr.bf16.mxu0 %v7348_v17  ;;  %v7442_v45 = vld [vmem:[#allocation2 + $0x80] ss:$28 sps:$4 sm:$0xff]   ;;  %v7447_v46 = vld [vmem:[%s10962_s0 + $0x10] sm:$0xff]   ;;  %v7455_v48 = vld [vmem:[#allocation2 + $0x88] ss:$28 sps:$4 sm:$0xff]   ;;  %vm7259_vm2 = vmmov 0  }
  0x4e   :  { %574 = vmatprep.subr.bf16.mxu1 %v7352_v18  ;;  %v7457_v49 = vld [vmem:[#allocation2 + $0x48] ss:$28 sps:$4 sm:$0xff]   ;;  %v7460_v50 = vld [vmem:[#allocation2 + $0x14] ss:$28 sps:$4 sm:$0xff]   ;;  %v7550_v59 = vshrl.u32 %v149_v58, 7  ;;  %v7605_v63 = vld [vmem:[%s10962_s0 + $0x38] sm:$0xff]  }
  0x4f   :  { %v7462_v51 = vld [vmem:[#allocation2 + $0x50] ss:$28 sps:$4 sm:$0xff]   ;;  %v7475_v53 = vld [vmem:[#allocation2 + $0x18] ss:$28 sps:$4 sm:$0xff]   ;;  %v7500_v55 = vld [vmem:[%s10962_s0 + $0x20] sm:$0xff]   ;;  %vm2432_vm3 = vcmask 523264  }
  0x50   :  { %472 = vmatpush1.bf16.msra.mxu0 %v7354_v19  ;;  %v7471_v52 = vld [vmem:[#allocation2 + $0x10] ss:$28 sps:$4 sm:$0xff]   ;;  %11103 = vst [vmem:[#allocation13_spill] sm:$0xff] %v7550_v59  ;;  %v163_v60 = vsub.s32 3, %v7550_v59  ;;  %v7555_v61 = vld [vmem:[#allocation4] sm:$0x7f] }
  0x51   :  { %575 = vmatpush1.bf16.msra.mxu1 %v7358_v20  ;;  %473 = vmatprep.subr.bf16.mxu0 %v7362_v21  ;;  %v6825_v56 = vld [vmem:[%s10962_s0 + $0x28] sm:$0xff]   ;;  %v6831_v57 = vld [vmem:[%s10962_s0 + $0x30] sm:$0xff]   ;;  %v7619_v1 = vld [vmem:[%s10962_s0 + $0x40] sm:$0xff]   ;;  %v167_v2 = vsub.s32 4, %v7550_v59  ;;  %v171_v6 = vsub.s32 5, %v7550_v59  ;;  %vm5567_vm4 = vcmask 916480  }
  0x52   :  { %576 = vmatprep.subr.bf16.mxu1 %v7364_v22  ;;  %v7560_v62 = vrot.slane %v7555_v61, %v163_v60  ;;  %v7646_v31 = vld [vmem:[%s10962_s0 + $0x48] sm:$0xff]  }
  0x53   :  { %v7631_v5 = vrot.slane %v7555_v61, %v167_v2  ;;  %v7639_v27 = vrot.slane %v7555_v61, %v171_v6 }
  0x54   :  { %474 = vmatpush1.bf16.msra.mxu0 %v7366_v23 }
  0x55   :  { %577 = vmatpush1.bf16.msra.mxu1 %v7370_v24  ;;  %475 = vmatprep.subr.bf16.mxu0 %v7374_v25 }
  0x56   :  { %578 = vmatprep.subr.bf16.mxu1 %v7376_v26 }
  0x58   :  { %476 = vmatpush1.bf16.msra.mxu0 %v7378_v28 }
  0x59   :  { %579 = vmatpush1.bf16.msra.mxu1 %v7382_v29  ;;  %6220 = vmatprep.subr.msk.bf16.mxu0 %vm439_vm0, %v7386_v30 }
  0x5a   :  { %6636 = vmatprep.subr.bf16.mxu1 %v10971_v36 }
  0x5b   :  { %6205 = vmatmul.mubr.msk.bf16.vlgmr.msra.gmra.mxu0 %vm417_vm1, %v7391_v32 }
  0x5c   :  { %6213 = vmatmul.mubr.msk.bf16.vlgmr.msra.gmra.mxu1 %vm417_vm1, %v7391_v32  ;;  %672 = vmatpush1.bf16.msra.mxu0 %v7398_v34 }
  0x5d   :  { %503 = vmatprep.mubr.bf16.mxu0 %v10974_v0  ;;  %606 = vmatprep.mubr.bf16.mxu1 %v10974_v0 }
  0x5e   :  { %673 = vmatprep.subr.bf16.mxu0 %v7400_v35  ;;  %6637 = vmatpush3.bf16.msra.mxu1 %v7408_v37 }
  0x5f   :  { %6638 = vmatprep.subr.bf16.mxu1 %v10971_v36 }
  0x60   :  { %674 = vmatpush1.bf16.msra.mxu0 %v7412_v38 }
  0x61   :  { %675 = vmatprep.subr.bf16.mxu0 %v7416_v39 }
  0x62   :  { %6639 = vmatpush3.bf16.msra.mxu1 %v7419_v40 }
  0x63   :  { %6206 = vmatmul.mubr.msk.bf16.gmra.mxu0 %vm417_vm1, %v7424_v41  ;;  %6640 = vmatprep.subr.bf16.mxu1 %v10971_v36 }
  0x64   :  { %6214 = vmatmul.mubr.msk.bf16.gmra.mxu1 %vm417_vm1, %v7424_v41  ;;  %513 = vmatprep.mubr.bf16.mxu0 %v10974_v0 }
  0x65   :  { %616 = vmatprep.mubr.bf16.mxu1 %v10974_v0  ;;  %676 = vmatpush1.bf16.msra.mxu0 %v7428_v42 }
  0x66   :  { %677 = vmatprep.subr.bf16.mxu0 %v7431_v43  ;;  %6641 = vmatpush3.bf16.msra.mxu1 %v7434_v44 }
  0x67   :  { %6642 = vmatprep.subr.bf16.mxu1 %v10971_v36 }
  0x69   :  { %678 = vmatpush1.bf16.msra.mxu0 %v7442_v45 }
  0x6a   :  { %679 = vmatprep.subr.bf16.mxu0 %v7450_v47  ;;  %6643 = vmatpush3.bf16.msra.mxu1 %v7455_v48 }
  0x6b   :  { %6207 = vmatmul.mubr.msk.bf16.gmra.mxu0 %vm417_vm1, %v7447_v46  ;;  %6644 = vmatprep.subr.bf16.mxu1 %v10971_v36 }
  0x6c   :  { %6215 = vmatmul.mubr.msk.bf16.gmra.mxu1 %vm417_vm1, %v7447_v46  ;;  %523 = vmatprep.mubr.bf16.mxu0 %v10974_v0 }
  0x6d   :  { %626 = vmatprep.mubr.bf16.mxu1 %v10974_v0  ;;  %680 = vmatpush1.bf16.msra.mxu0 %v7457_v49 }
  0x6e   :  { %681 = vmatprep.subr.bf16.mxu0 %v7460_v50  ;;  %6645 = vmatpush3.bf16.msra.mxu1 %v7462_v51 }
  0x6f   :  { %6646 = vmatprep.subr.bf16.mxu1 %v10971_v36 }
  0x71   :  { %682 = vmatpush1.bf16.msra.mxu0 %v7471_v52 }
  0x72   :  { %6647 = vmatpush3.bf16.msra.mxu1 %v7475_v53  ;;  %6256 = vmatprep.subr.msk.bf16.mxu0 %vm439_vm0, %v7312_v3 }
  0x73   :  { %6208 = vmatmul.mubr.msk.bf16.gmra.mxu0 %vm417_vm1, %v7480_v54  ;;  %6264 = vmatprep.subr.msk.bf16.mxu1 %vm439_vm0, %v7314_v4 }
  0x74   :  { %6216 = vmatmul.mubr.msk.bf16.gmra.mxu1 %vm417_vm1, %v7480_v54  ;;  %533 = vmatprep.mubr.bf16.mxu0 %v10974_v0 }
  0x75   :  { %636 = vmatprep.mubr.bf16.mxu1 %v10974_v0 }
  0x7b   :  { %6209 = vmatmul.mubr.msk.bf16.gmra.mxu0 %vm417_vm1, %v7500_v55 }
  0x7c   :  { %6217 = vmatmul.mubr.msk.bf16.gmra.mxu1 %vm417_vm1, %v7500_v55  ;;  %543 = vmatprep.mubr.bf16.mxu0 %v10974_v0 }
  0x7d   :  { %646 = vmatprep.mubr.bf16.mxu1 %v10974_v0 }
  0x83   :  { %6210 = vmatmul.mubr.msk.bf16.gmra.mxu0 %vm417_vm1, %v6825_v56 }
  0x84   :  { %6218 = vmatmul.mubr.msk.bf16.gmra.mxu1 %vm417_vm1, %v6825_v56  ;;  %553 = vmatprep.mubr.bf16.mxu0 %v10974_v0 }
  0x85   :  { %656 = vmatprep.mubr.bf16.mxu1 %v10974_v0 }
  0x8b   :  { %6211 = vmatmul.mubr.msk.bf16.gmra.mxu0 %vm417_vm1, %v6831_v57 }
  0x8c   :  { %6219 = vmatmul.mubr.msk.bf16.gmra.mxu1 %vm417_vm1, %v6831_v57  ;;  %699 = vmatprep.mubr.bf16.mxu0 %v10974_v0 }
  0x8d   :  { %6648 = vmatprep.mubr.msk.bf16.mxu1 %vm7259_vm2, %v10971_v36 }
  0x93   :  { %6221 = vmatmul.mubr.msk.bf16.vlgmr.msra.gmra.mxu0 %vm417_vm1, %v7391_v32 }
  0x94   :  { %6649 = vmatmul.mubr.msk.bf16.vlgmr.msra.gmra.mxu1 %vm417_vm1, %v7391_v32  ;;  %1082 = vmatpush1.bf16.msra.mxu0 %v7325_v9  ;;  %v175_v32 = vsub.s32 6, %v7550_v59 }
  0x95   :  { %709 = vmatprep.mubr.bf16.mxu0 %v10974_v0  ;;  %6652 = vmatprep.mubr.msk.bf16.mxu1 %vm7259_vm2, %v10971_v36 }
  0x96   :  { %1083 = vmatprep.subr.bf16.mxu0 %v7316_v7  ;;  %1185 = vmatpush1.bf16.msra.mxu1 %v7328_v10  ;;  %v7652_v33 = vrot.slane %v7555_v61, %v175_v32 }
  0x97   :  { %1186 = vmatprep.subr.bf16.mxu1 %v7318_v8 }
  0x98   :  { %1084 = vmatpush1.bf16.msra.mxu0 %v7330_v11 }
  0x99   :  { %1085 = vmatprep.subr.bf16.mxu0 %v7338_v13 }
  0x9a   :  { %1187 = vmatpush1.bf16.msra.mxu1 %v7334_v12 }
  0x9b   :  { %6222 = vmatmul.mubr.msk.bf16.gmra.mxu0 %vm417_vm1, %v7424_v41  ;;  %1188 = vmatprep.subr.bf16.mxu1 %v7340_v14 }
  0x9c   :  { %6653 = vmatmul.mubr.msk.bf16.gmra.mxu1 %vm417_vm1, %v7424_v41  ;;  %719 = vmatprep.mubr.bf16.mxu0 %v10974_v0  ;;  %v7669_v41 = vld [vmem:[%s10962_s0 + $0x50] sm:$0xff]  }
  0x9d   :  { %6656 = vmatprep.mubr.msk.bf16.mxu1 %vm7259_vm2, %v10971_v36  ;;  %1086 = vmatpush1.bf16.msra.mxu0 %v7342_v15 }
  0x9e   :  { %1087 = vmatprep.subr.bf16.mxu0 %v7348_v17  ;;  %1189 = vmatpush1.bf16.msra.mxu1 %v7346_v16 }
  0x9f   :  { %1190 = vmatprep.subr.bf16.mxu1 %v7352_v18 }
  0xa1   :  { %1088 = vmatpush1.bf16.msra.mxu0 %v7354_v19 }
  0xa2   :  { %1089 = vmatprep.subr.bf16.mxu0 %v7362_v21  ;;  %1191 = vmatpush1.bf16.msra.mxu1 %v7358_v20 }
  0xa3   :  { %6223 = vmatmul.mubr.msk.bf16.gmra.mxu0 %vm417_vm1, %v7447_v46  ;;  %1192 = vmatprep.subr.bf16.mxu1 %v7364_v22 }
  0xa4   :  { %6657 = vmatmul.mubr.msk.bf16.gmra.mxu1 %vm417_vm1, %v7447_v46  ;;  %729 = vmatprep.mubr.bf16.mxu0 %v10974_v0 }
  0xa5   :  { %6660 = vmatprep.mubr.msk.bf16.mxu1 %vm7259_vm2, %v10971_v36  ;;  %1090 = vmatpush1.bf16.msra.mxu0 %v7366_v23 }
  0xa6   :  { %1091 = vmatprep.subr.bf16.mxu0 %v7374_v25  ;;  %1193 = vmatpush1.bf16.msra.mxu1 %v7370_v24 }
  0xa7   :  { %1194 = vmatprep.subr.bf16.mxu1 %v7376_v26 }
  0xa9   :  { %1092 = vmatpush1.bf16.msra.mxu0 %v7378_v28 }
  0xaa   :  { %1195 = vmatpush1.bf16.msra.mxu1 %v7382_v29  ;;  %6272 = vmatprep.subr.msk.bf16.mxu0 %vm439_vm0, %v7386_v30 }
  0xab   :  { %6224 = vmatmul.mubr.msk.bf16.gmra.mxu0 %vm417_vm1, %v7480_v54  ;;  %6676 = vmatprep.subr.bf16.mxu1 %v10971_v36 }
  0xac   :  { %6661 = vmatmul.mubr.msk.bf16.gmra.mxu1 %vm417_vm1, %v7480_v54  ;;  %739 = vmatprep.mubr.bf16.mxu0 %v10974_v0 }
  0xad   :  { %6664 = vmatprep.mubr.msk.bf16.mxu1 %vm7259_vm2, %v10971_v36 }
  0xb3   :  { %6225 = vmatmul.mubr.msk.bf16.gmra.mxu0 %vm417_vm1, %v7500_v55 }
  0xb4   :  { %6665 = vmatmul.mubr.msk.bf16.gmra.mxu1 %vm417_vm1, %v7500_v55  ;;  %749 = vmatprep.mubr.bf16.mxu0 %v10974_v0 }
  0xb5   :  { %6668 = vmatprep.mubr.msk.bf16.mxu1 %vm7259_vm2, %v10971_v36 }
  0xbb   :  { %6226 = vmatmul.mubr.msk.bf16.gmra.mxu0 %vm417_vm1, %v6825_v56 }
  0xbc   :  { %6669 = vmatmul.mubr.msk.bf16.gmra.mxu1 %vm417_vm1, %v6825_v56  ;;  %759 = vmatprep.mubr.bf16.mxu0 %v10974_v0 }
  0xbd   :  { %6672 = vmatprep.mubr.msk.bf16.mxu1 %vm7259_vm2, %v10971_v36 }
  0xc3   :  { %6227 = vmatmul.mubr.msk.bf16.gmra.mxu0 %vm417_vm1, %v6831_v57 }
  0xc4   :  { %6673 = vmatmul.mubr.msk.bf16.gmra.mxu1 %vm417_vm1, %v6831_v57  ;;  %1109 = vmatprep.mubr.bf16.mxu0 %v10974_v0 }
  0xc5   :  { %1212 = vmatprep.mubr.bf16.mxu1 %v10974_v0 }
  0xcb   :  { %6257 = vmatmul.mubr.msk.bf16.vlgmr.msra.gmra.mxu0 %vm417_vm1, %v7605_v63 }
  0xcc   :  { %6265 = vmatmul.mubr.msk.bf16.vlgmr.msra.gmra.mxu1 %vm417_vm1, %v7605_v63  ;;  %1288 = vmatpush1.bf16.msra.mxu0 %v7398_v34 }
  0xcd   :  { %1119 = vmatprep.mubr.bf16.mxu0 %v10974_v0  ;;  %1222 = vmatprep.mubr.bf16.mxu1 %v10974_v0 }
  0xce   :  { %1289 = vmatprep.subr.bf16.mxu0 %v7400_v35  ;;  %6677 = vmatpush3.bf16.msra.mxu1 %v7408_v37 }
  0xcf   :  { %6678 = vmatprep.subr.bf16.mxu1 %v10971_v36 }
  0xd0   :  { %1290 = vmatpush1.bf16.msra.mxu0 %v7412_v38 }
  0xd1   :  { %1291 = vmatprep.subr.bf16.mxu0 %v7416_v39 }
  0xd2   :  { %6679 = vmatpush3.bf16.msra.mxu1 %v7419_v40 }
  0xd3   :  { %6258 = vmatmul.mubr.msk.bf16.gmra.mxu0 %vm417_vm1, %v7619_v1  ;;  %6680 = vmatprep.subr.bf16.mxu1 %v10971_v36 }
  0xd4   :  { %6266 = vmatmul.mubr.msk.bf16.gmra.mxu1 %vm417_vm1, %v7619_v1  ;;  %1129 = vmatprep.mubr.bf16.mxu0 %v10974_v0 }
  0xd5   :  { %1232 = vmatprep.mubr.bf16.mxu1 %v10974_v0  ;;  %1292 = vmatpush1.bf16.msra.mxu0 %v7428_v42  ;;  %v7687_v42 = vld [vmem:[%s10962_s0 + $0x58] sm:$0xff]  }
  0xd6   :  { %1293 = vmatprep.subr.bf16.mxu0 %v7431_v43  ;;  %6681 = vmatpush3.bf16.msra.mxu1 %v7434_v44 }
  0xd7   :  { %6682 = vmatprep.subr.bf16.mxu1 %v10971_v36 }
  0xd9   :  { %1294 = vmatpush1.bf16.msra.mxu0 %v7442_v45 }
  0xda   :  { %1295 = vmatprep.subr.bf16.mxu0 %v7450_v47  ;;  %6683 = vmatpush3.bf16.msra.mxu1 %v7455_v48 }
  0xdb   :  { %6259 = vmatmul.mubr.msk.bf16.gmra.mxu0 %vm417_vm1, %v7646_v31  ;;  %6684 = vmatprep.subr.bf16.mxu1 %v10971_v36 }
  0xdc   :  { %6267 = vmatmul.mubr.msk.bf16.gmra.mxu1 %vm417_vm1, %v7646_v31  ;;  %1139 = vmatprep.mubr.bf16.mxu0 %v10974_v0 }
  0xdd   :  { %1242 = vmatprep.mubr.bf16.mxu1 %v10974_v0  ;;  %1296 = vmatpush1.bf16.msra.mxu0 %v7457_v49 }
  0xde   :  { %1297 = vmatprep.subr.bf16.mxu0 %v7460_v50  ;;  %6685 = vmatpush3.bf16.msra.mxu1 %v7462_v51 }
  0xdf   :  { %6686 = vmatprep.subr.bf16.mxu1 %v10971_v36 }
  0xe1   :  { %1298 = vmatpush1.bf16.msra.mxu0 %v7471_v52 }
  0xe2   :  { %6687 = vmatpush3.bf16.msra.mxu1 %v7475_v53  ;;  %6308 = vmatprep.subr.msk.bf16.mxu0 %vm439_vm0, %v7312_v3  ;;  %v7698_v3 = vld [vmem:[%s10962_s0 + $0x60] sm:$0xff]  }
  0xe3   :  { %6260 = vmatmul.mubr.msk.bf16.gmra.mxu0 %vm417_vm1, %v7669_v41  ;;  %6316 = vmatprep.subr.msk.bf16.mxu1 %vm439_vm0, %v7314_v4  ;;  %v7709_v4 = vld [vmem:[%s10962_s0 + $0x68] sm:$0xff]  }
  0xe4   :  { %6268 = vmatmul.mubr.msk.bf16.gmra.mxu1 %vm417_vm1, %v7669_v41  ;;  %1149 = vmatprep.mubr.bf16.mxu0 %v10974_v0 }
  0xe5   :  { %1252 = vmatprep.mubr.bf16.mxu1 %v10974_v0 }
  0xeb   :  { %6261 = vmatmul.mubr.msk.bf16.gmra.mxu0 %vm417_vm1, %v7687_v42 }
  0xec   :  { %6269 = vmatmul.mubr.msk.bf16.gmra.mxu1 %vm417_vm1, %v7687_v42  ;;  %1159 = vmatprep.mubr.bf16.mxu0 %v10974_v0 }
  0xed   :  { %1262 = vmatprep.mubr.bf16.mxu1 %v10974_v0 }
  0xf3   :  { %6262 = vmatmul.mubr.msk.bf16.gmra.mxu0 %vm417_vm1, %v7698_v3 }
  0xf4   :  { %6270 = vmatmul.mubr.msk.bf16.gmra.mxu1 %vm417_vm1, %v7698_v3  ;;  %1169 = vmatprep.mubr.bf16.mxu0 %v10974_v0 }
  0xf5   :  { %1272 = vmatprep.mubr.bf16.mxu1 %v10974_v0 }
  0xfb   :  { %6263 = vmatmul.mubr.msk.bf16.gmra.mxu0 %vm417_vm1, %v7709_v4 }
  0xfc   :  { %6271 = vmatmul.mubr.msk.bf16.gmra.mxu1 %vm417_vm1, %v7709_v4  ;;  %1315 = vmatprep.mubr.bf16.mxu0 %v10974_v0 }
  0xfd   :  { %6688 = vmatprep.mubr.msk.bf16.mxu1 %vm7259_vm2, %v10971_v36 }
 0x103   :  { %6273 = vmatmul.mubr.msk.bf16.vlgmr.msra.gmra.mxu0 %vm417_vm1, %v7605_v63 }
 0x104   :  { %6689 = vmatmul.mubr.msk.bf16.vlgmr.msra.gmra.mxu1 %vm417_vm1, %v7605_v63  ;;  %1698 = vmatpush1.bf16.msra.mxu0 %v7325_v9  ;;  %v10969_v9 = vsub.s32 1, %v7550_v59 }
 0x105   :  { %1325 = vmatprep.mubr.bf16.mxu0 %v10974_v0  ;;  %6692 = vmatprep.mubr.msk.bf16.mxu1 %vm7259_vm2, %v10971_v36 }
 0x106   :  { %1699 = vmatprep.subr.bf16.mxu0 %v7316_v7  ;;  %1801 = vmatpush1.bf16.msra.mxu1 %v7328_v10  ;;  %v159_v7 = vsub.s32 2, %v7550_v59 }
 0x107   :  { %1802 = vmatprep.subr.bf16.mxu1 %v7318_v8  ;;  %v10970_v8 = vsub.s32 0, %v7550_v59  ;;  %v8056_v59 = vld [vmem:[#allocation6 + $0x124] ss:$8 sps:$4 sm:$0xff]  }
 0x108   :  { %1700 = vmatpush1.bf16.msra.mxu0 %v7330_v11  ;;  %v7763_v10 = vrot.slane %v7555_v61, %v159_v7 }
 0x109   :  { %1701 = vmatprep.subr.bf16.mxu0 %v7338_v13  ;;  %v7768_v11 = vrot.slane %v7555_v61, %v10970_v8 }
 0x10a   :  { %1803 = vmatpush1.bf16.msra.mxu1 %v7334_v12 }
 0x10b   :  { %6274 = vmatmul.mubr.msk.bf16.gmra.mxu0 %vm417_vm1, %v7619_v1  ;;  %1804 = vmatprep.subr.bf16.mxu1 %v7340_v14  ;;  %v7781_v14 = vrot.slane %v7555_v61, %v10969_v9 }
 0x10c   :  { %6693 = vmatmul.mubr.msk.bf16.gmra.mxu1 %vm417_vm1, %v7619_v1  ;;  %1335 = vmatprep.mubr.bf16.mxu0 %v10974_v0 }
 0x10d   :  { %6696 = vmatprep.mubr.msk.bf16.mxu1 %vm7259_vm2, %v10971_v36  ;;  %1702 = vmatpush1.bf16.msra.mxu0 %v7342_v15 }
 0x10e   :  { %1703 = vmatprep.subr.bf16.mxu0 %v7348_v17  ;;  %1805 = vmatpush1.bf16.msra.mxu1 %v7346_v16 }
 0x10f   :  { %1806 = vmatprep.subr.bf16.mxu1 %v7352_v18 }
 0x111   :  { %1704 = vmatpush1.bf16.msra.mxu0 %v7354_v19 }
 0x112   :  { %1705 = vmatprep.subr.bf16.mxu0 %v7362_v21  ;;  %1807 = vmatpush1.bf16.msra.mxu1 %v7358_v20 }
 0x113   :  { %6275 = vmatmul.mubr.msk.bf16.gmra.mxu0 %vm417_vm1, %v7646_v31  ;;  %1808 = vmatprep.subr.bf16.mxu1 %v7364_v22 }
 0x114   :  { %6697 = vmatmul.mubr.msk.bf16.gmra.mxu1 %vm417_vm1, %v7646_v31  ;;  %1345 = vmatprep.mubr.bf16.mxu0 %v10974_v0 }
 0x115   :  { %6700 = vmatprep.mubr.msk.bf16.mxu1 %vm7259_vm2, %v10971_v36  ;;  %1706 = vmatpush1.bf16.msra.mxu0 %v7366_v23 }
 0x116   :  { %1707 = vmatprep.subr.bf16.mxu0 %v7374_v25  ;;  %1809 = vmatpush1.bf16.msra.mxu1 %v7370_v24 }
 0x117   :  { %1810 = vmatprep.subr.bf16.mxu1 %v7376_v26 }
 0x119   :  { %1708 = vmatpush1.bf16.msra.mxu0 %v7378_v28 }
 0x11a   :  { %1811 = vmatpush1.bf16.msra.mxu1 %v7382_v29  ;;  %6324 = vmatprep.subr.msk.bf16.mxu0 %vm439_vm0, %v7386_v30 }
 0x11b   :  { %v495_v12 = vpop.f32.mrf.mxu0  ;;  %6276 = vmatmul.mubr.msk.bf16.gmra.mxu0 %vm417_vm1, %v7669_v41  ;;  %6716 = vmatprep.subr.bf16.mxu1 %v10971_v36 }
 0x11c   :  { %v598_v13 = vpop.f32.mrf.mxu1  ;;  %6701 = vmatmul.mubr.msk.bf16.gmra.mxu1 %vm417_vm1, %v7669_v41  ;;  %1355 = vmatprep.mubr.bf16.mxu0 %v10974_v0  ;;  %v496_v16 = vadd.f32 %v495_v12, %v7768_v11 }
 0x11d   :  { %v599_v15 = vadd.f32 %v598_v13, %v7763_v10  ;;  %6704 = vmatprep.mubr.msk.bf16.mxu1 %vm7259_vm2, %v10971_v36  ;;  %v497_v17 = vpop.f32.mrf.mxu0 }
 0x11e   :  { %v600_v18 = vpop.f32.mrf.mxu1  ;;  %v498_v20 = vadd.f32 %v497_v17, %v7781_v14  ;;  %v859_v26 = vmax.f32 %v496_v16, 0.0 }
 0x11f   :  { %v601_v19 = vadd.f32 %v600_v18, %v7560_v62  ;;  %v499_v21 = vpop.f32.mrf.mxu0  ;;  %v861_v23 = vmax.f32 %v599_v15, 0.0 }
 0x120   :  { %v602_v22 = vpop.f32.mrf.mxu1  ;;  %v500_v24 = vadd.f32 %v499_v21, %v7768_v11  ;;  %v860_v49 = vmax.f32 %v498_v20, 0.0 }
 0x121   :  { %v603_v25 = vadd.f32 %v602_v22, %v7763_v10  ;;  %v862_v28 = vmax.f32 %v601_v19, 0.0  ;;  %v501_v29 = vpop.f32.mrf.mxu0 }
 0x122   :  { %v604_v30 = vpop.f32.mrf.mxu1  ;;  %v866_v43 = vmax.f32 %v500_v24, 0.0  ;;  %v502_v46 = vadd.f32 %v501_v29, %v7781_v14 }
 0x123   :  { %v868_v45 = vmax.f32 %v603_v25, 0.0  ;;  %v605_v47 = vadd.f32 %v604_v30, %v7560_v62  ;;  %v505_v50 = vpop.f32.mrf.mxu0  ;;  %6277 = vmatmul.mubr.msk.bf16.gmra.mxu0 %vm417_vm1, %v7687_v42 }
 0x124   :  { %v608_v51 = vpop.f32.mrf.mxu1  ;;  %6705 = vmatmul.mubr.msk.bf16.gmra.mxu1 %vm417_vm1, %v7687_v42  ;;  %v7799_v52 = vpack.c.bf16 %v866_v43, %v859_v26  ;;  %v867_v54 = vmax.f32 %v502_v46, 0.0  ;;  %1365 = vmatprep.mubr.bf16.mxu0 %v10974_v0  ;;  %v506_v56 = vadd.f32 %v505_v50, %v7768_v11 }
 0x125   :  { %v7801_v53 = vpack.c.bf16 %v868_v45, %v861_v23  ;;  %v869_v55 = vmax.f32 %v605_v47, 0.0  ;;  %6708 = vmatprep.mubr.msk.bf16.mxu1 %vm7259_vm2, %v10971_v36  ;;  %v609_v57 = vadd.f32 %v608_v51, %v7763_v10  ;;  %v507_v58 = vpop.f32.mrf.mxu0 }
 0x126   :  { %v610_v60 = vpop.f32.mrf.mxu1  ;;  %v7808_v61 = vpack.c.bf16 %v867_v54, %v860_v49  ;;  %v508_v2 = vadd.f32 %v507_v58, %v7781_v14  ;;  %v873_v7 = vmax.f32 %v506_v56, 0.0 }
 0x127   :  { %11104 = vst [vmem:[#allocation14_spill] sm:$0xff] %v7801_v53  ;;  %v7810_v63 = vpack.c.bf16 %v869_v55, %v862_v28  ;;  %v611_v1 = vadd.f32 %v610_v60, %v7560_v62  ;;  %v509_v6 = vpop.f32.mrf.mxu0  ;;  %v875_v32 = vmax.f32 %v609_v57, 0.0 }
 0x128   :  { %11105 = vst [vmem:[#allocation15_spill] sm:$0xff] %v7808_v61  ;;  %v612_v31 = vpop.f32.mrf.mxu1  ;;  %v510_v41 = vadd.f32 %v509_v6, %v7768_v11  ;;  %v874_v20 = vmax.f32 %v508_v2, 0.0 }
 0x129   :  { %11106 = vst [vmem:[#allocation16_spill] sm:$0xff] %v7810_v63  ;;  %v613_v42 = vadd.f32 %v612_v31, %v7763_v10  ;;  %v876_v12 = vmax.f32 %v611_v1, 0.0  ;;  %v511_v13 = vpop.f32.mrf.mxu0  ;;  %v8185_v63 = vld [vmem:[#allocation6 + $0x164] ss:$8 sps:$4 sm:$0xff]  }
 0x12a   :  { %v614_v15 = vpop.f32.mrf.mxu1  ;;  %v880_v16 = vmax.f32 %v510_v41, 0.0  ;;  %v512_v18 = vadd.f32 %v511_v13, %v7781_v14  ;;  %11149 = vst [vmem:[#allocation57_spill] sm:$0xff] %v8185_v63 }
 0x12b   :  { %v882_v17 = vmax.f32 %v613_v42, 0.0  ;;  %v615_v19 = vadd.f32 %v614_v15, %v7560_v62  ;;  %v515_v21 = vpop.f32.mrf.mxu0  ;;  %6278 = vmatmul.mubr.msk.bf16.gmra.mxu0 %vm417_vm1, %v7698_v3 }
 0x12c   :  { %v618_v22 = vpop.f32.mrf.mxu1  ;;  %6709 = vmatmul.mubr.msk.bf16.gmra.mxu1 %vm417_vm1, %v7698_v3  ;;  %v7822_v23 = vpack.c.bf16 %v880_v16, %v873_v7  ;;  %v881_v25 = vmax.f32 %v512_v18, 0.0  ;;  %1375 = vmatprep.mubr.bf16.mxu0 %v10974_v0  ;;  %v516_v28 = vadd.f32 %v515_v21, %v7768_v11 }
 0x12d   :  { %v7824_v24 = vpack.c.bf16 %v882_v17, %v875_v32  ;;  %v883_v26 = vmax.f32 %v615_v19, 0.0  ;;  %6712 = vmatprep.mubr.msk.bf16.mxu1 %vm7259_vm2, %v10971_v36  ;;  %v619_v29 = vadd.f32 %v618_v22, %v7763_v10  ;;  %v517_v30 = vpop.f32.mrf.mxu0 }
 0x12e   :  { %v620_v43 = vpop.f32.mrf.mxu1  ;;  %v7831_v45 = vpack.c.bf16 %v881_v25, %v874_v20  ;;  %v518_v47 = vadd.f32 %v517_v30, %v7781_v14  ;;  %v887_v56 = vmax.f32 %v516_v28, 0.0  ;;  %v7862_v28 = vld [vmem:[%s10962_s0 + $0x70] sm:$0xff]  }
 0x12f   :  { %11107 = vst [vmem:[#allocation17_spill] sm:$0xff] %v7824_v24  ;;  %v7833_v3 = vpack.c.bf16 %v883_v26, %v876_v12  ;;  %v621_v46 = vadd.f32 %v620_v43, %v7560_v62  ;;  %v519_v49 = vpop.f32.mrf.mxu0  ;;  %v889_v51 = vmax.f32 %v619_v29, 0.0  ;;  %v8202_v24 = vld [vmem:[#allocation6 + $0x160] ss:$8 sps:$4 sm:$0xff]  }
 0x130   :  { %11108 = vst [vmem:[#allocation18_spill] sm:$0xff] %v7831_v45  ;;  %v622_v50 = vpop.f32.mrf.mxu1  ;;  %v520_v54 = vadd.f32 %v519_v49, %v7768_v11  ;;  %v888_v32 = vmax.f32 %v518_v47, 0.0  ;;  %11151 = vst [vmem:[#allocation59_spill] sm:$0xff] %v8202_v24 }
 0x131   :  { %11109 = vst [vmem:[#allocation19_spill] sm:$0xff] %v7833_v3  ;;  %v623_v55 = vadd.f32 %v622_v50, %v7763_v10  ;;  %v890_v57 = vmax.f32 %v621_v46, 0.0  ;;  %v521_v58 = vpop.f32.mrf.mxu0 }
 0x132   :  { %v624_v60 = vpop.f32.mrf.mxu1  ;;  %v894_v1 = vmax.f32 %v520_v54, 0.0  ;;  %v522_v6 = vadd.f32 %v521_v58, %v7781_v14 }
 0x133   :  { %v896_v2 = vmax.f32 %v623_v55, 0.0  ;;  %v625_v31 = vadd.f32 %v624_v60, %v7560_v62  ;;  %v525_v41 = vpop.f32.mrf.mxu0  ;;  %6279 = vmatmul.mubr.msk.bf16.gmra.mxu0 %vm417_vm1, %v7709_v4 }
 0x134   :  { %v628_v42 = vpop.f32.mrf.mxu1  ;;  %6713 = vmatmul.mubr.msk.bf16.gmra.mxu1 %vm417_vm1, %v7709_v4  ;;  %v7845_v7 = vpack.c.bf16 %v894_v1, %v887_v56  ;;  %v895_v13 = vmax.f32 %v522_v6, 0.0  ;;  %1725 = vmatprep.mubr.bf16.mxu0 %v10974_v0  ;;  %v526_v16 = vadd.f32 %v525_v41, %v7768_v11 }
 0x135   :  { %v7847_v12 = vpack.c.bf16 %v896_v2, %v889_v51  ;;  %v897_v15 = vmax.f32 %v625_v31, 0.0  ;;  %1828 = vmatprep.mubr.bf16.mxu1 %v10974_v0  ;;  %v629_v17 = vadd.f32 %v628_v42, %v7763_v10  ;;  %v527_v18 = vpop.f32.mrf.mxu0 }
 0x136   :  { %v630_v19 = vpop.f32.mrf.mxu1  ;;  %v7853_v20 = vpack.c.bf16 %v895_v13, %v888_v32  ;;  %v528_v22 = vadd.f32 %v527_v18, %v7781_v14  ;;  %v901_v46 = vmax.f32 %v526_v16, 0.0 }
 0x137   :  { %11110 = vst [vmem:[#allocation20_spill] sm:$0xff] %v7847_v12  ;;  %v7855_v21 = vpack.c.bf16 %v897_v15, %v890_v57  ;;  %v631_v4 = vadd.f32 %v630_v19, %v7560_v62  ;;  %v529_v25 = vpop.f32.mrf.mxu0  ;;  %v903_v29 = vmax.f32 %v629_v17, 0.0 }
 0x138   :  { %v632_v26 = vpop.f32.mrf.mxu1  ;;  %v530_v30 = vadd.f32 %v529_v25, %v7768_v11  ;;  %v902_v57 = vmax.f32 %v528_v22, 0.0  ;;  %v7892_v22 = vld [vmem:[%s10962_s0 + $0x78] sm:$0xff]  }
 0x139   :  { %11111 = vst [vmem:[#allocation21_spill] sm:$0xff] %v7855_v21  ;;  %v633_v43 = vadd.f32 %v632_v26, %v7763_v10  ;;  %v904_v47 = vmax.f32 %v631_v4, 0.0  ;;  %v531_v49 = vpop.f32.mrf.mxu0  ;;  %v8134_v21 = vld [vmem:[#allocation6 + $0xe0] ss:$8 sps:$4 sm:$0xff]  }
 0x13a   :  { %v634_v50 = vpop.f32.mrf.mxu1  ;;  %v908_v51 = vmax.f32 %v530_v30, 0.0  ;;  %v532_v55 = vadd.f32 %v531_v49, %v7781_v14 }
 0x13b   :  { %v910_v54 = vmax.f32 %v633_v43, 0.0  ;;  %v635_v56 = vadd.f32 %v634_v50, %v7560_v62  ;;  %v535_v58 = vpop.f32.mrf.mxu0  ;;  %6309 = vmatmul.mubr.msk.bf16.vlgmr.msra.gmra.mxu0 %vm417_vm1, %v7862_v28 }
 0x13c   :  { %v638_v60 = vpop.f32.mrf.mxu1  ;;  %6317 = vmatmul.mubr.msk.bf16.vlgmr.msra.gmra.mxu1 %vm417_vm1, %v7862_v28  ;;  %v7872_v1 = vpack.c.bf16 %v908_v51, %v901_v46  ;;  %v909_v6 = vmax.f32 %v532_v55, 0.0  ;;  %1735 = vmatprep.mubr.bf16.mxu0 %v10974_v0  ;;  %v536_v32 = vadd.f32 %v535_v58, %v7768_v11 }
 0x13d   :  { %v7874_v2 = vpack.c.bf16 %v910_v54, %v903_v29  ;;  %v911_v31 = vmax.f32 %v635_v56, 0.0  ;;  %1838 = vmatprep.mubr.bf16.mxu1 %v10974_v0  ;;  %v639_v41 = vadd.f32 %v638_v60, %v7763_v10  ;;  %v537_v42 = vpop.f32.mrf.mxu0  ;;  %1904 = vmatpush1.bf16.msra.mxu0 %v7398_v34 }
 0x13e   :  { %v640_v13 = vpop.f32.mrf.mxu1  ;;  %6717 = vmatpush3.bf16.msra.mxu1 %v7408_v37  ;;  %v7882_v15 = vpack.c.bf16 %v909_v6, %v902_v57  ;;  %1905 = vmatprep.subr.bf16.mxu0 %v7400_v35  ;;  %v538_v18 = vadd.f32 %v537_v42, %v7781_v14  ;;  %v915_v26 = vmax.f32 %v536_v32, 0.0  ;;  %v6962_v6 = vld [vmem:[#allocation2 + $0xb8] ss:$28 sps:$4 sm:$0xff]   ;;  %v6963_v42 = vld [vmem:[#allocation2 + $0x84] ss:$28 sps:$4 sm:$0xff]  }
 0x13f   :  { %11112 = vst [vmem:[#allocation22_spill] sm:$0xff] %v7874_v2  ;;  %v7884_v16 = vpack.c.bf16 %v911_v31, %v904_v47  ;;  %v641_v17 = vadd.f32 %v640_v13, %v7560_v62  ;;  %v539_v19 = vpop.f32.mrf.mxu0  ;;  %6718 = vmatprep.subr.bf16.mxu1 %v10971_v36  ;;  %v917_v34 = vmax.f32 %v639_v41, 0.0 }
 0x140   :  { %11113 = vst [vmem:[#allocation23_spill] sm:$0xff] %v7882_v15  ;;  %v642_v4 = vpop.f32.mrf.mxu1  ;;  %v540_v37 = vadd.f32 %v539_v19, %v7768_v11  ;;  %v916_v50 = vmax.f32 %v538_v18, 0.0  ;;  %v7925_v19 = vld [vmem:[%s10962_s0 + $0x80] sm:$0xff]  }
 0x141   :  { %11114 = vst [vmem:[#allocation24_spill] sm:$0xff] %v7884_v16  ;;  %v643_v25 = vadd.f32 %v642_v4, %v7763_v10  ;;  %v918_v29 = vmax.f32 %v641_v17, 0.0  ;;  %v541_v30 = vpop.f32.mrf.mxu0  ;;  %1906 = vmatpush1.bf16.msra.mxu0 %v7412_v38 }
 0x142   :  { %v644_v35 = vpop.f32.mrf.mxu1  ;;  %6719 = vmatpush3.bf16.msra.mxu1 %v7419_v40  ;;  %v922_v43 = vmax.f32 %v540_v37, 0.0  ;;  %v542_v47 = vadd.f32 %v541_v30, %v7781_v14  ;;  %1907 = vmatprep.subr.bf16.mxu0 %v7416_v39  ;;  %v6964_v30 = vld [vmem:[#allocation2 + $0x80] ss:$28 sps:$4 sm:$0xff]  }
 0x143   :  { %v924_v46 = vmax.f32 %v643_v25, 0.0  ;;  %v645_v49 = vadd.f32 %v644_v35, %v7560_v62  ;;  %6720 = vmatprep.subr.bf16.mxu1 %v10971_v36  ;;  %v545_v51 = vpop.f32.mrf.mxu0  ;;  %6310 = vmatmul.mubr.msk.bf16.gmra.mxu0 %vm417_vm1, %v7892_v22 }
 0x144   :  { %v648_v54 = vpop.f32.mrf.mxu1  ;;  %6318 = vmatmul.mubr.msk.bf16.gmra.mxu1 %vm417_vm1, %v7892_v22  ;;  %v7907_v38 = vpack.c.bf16 %v922_v43, %v915_v26  ;;  %v923_v55 = vmax.f32 %v542_v47, 0.0  ;;  %1745 = vmatprep.mubr.bf16.mxu0 %v10974_v0  ;;  %v546_v39 = vadd.f32 %v545_v51, %v7768_v11 }
 0x145   :  { %v7909_v40 = vpack.c.bf16 %v924_v46, %v917_v34  ;;  %v925_v56 = vmax.f32 %v645_v49, 0.0  ;;  %1848 = vmatprep.mubr.bf16.mxu1 %v10974_v0  ;;  %v649_v57 = vadd.f32 %v648_v54, %v7763_v10  ;;  %v547_v58 = vpop.f32.mrf.mxu0  ;;  %1908 = vmatpush1.bf16.msra.mxu0 %v6962_v6  ;;  %v6965_v49 = vld [vmem:[#allocation2 + $0x4c] ss:$28 sps:$4 sm:$0xff]  }
 0x146   :  { %v650_v60 = vpop.f32.mrf.mxu1  ;;  %6721 = vmatpush3.bf16.msra.mxu1 %v7434_v44  ;;  %v7916_v31 = vpack.c.bf16 %v923_v55, %v916_v50  ;;  %1909 = vmatprep.subr.bf16.mxu0 %v6963_v42  ;;  %v548_v13 = vadd.f32 %v547_v58, %v7781_v14  ;;  %v929_v37 = vmax.f32 %v546_v39, 0.0  ;;  %v6967_v42 = vld [vmem:[#allocation2 + $0x50] ss:$28 sps:$4 sm:$0xff]  }
 0x147   :  { %11115 = vst [vmem:[#allocation25_spill] sm:$0xff] %v7909_v40  ;;  %v7918_v32 = vpack.c.bf16 %v925_v56, %v918_v29  ;;  %v651_v41 = vadd.f32 %v650_v60, %v7560_v62  ;;  %v549_v17 = vpop.f32.mrf.mxu0  ;;  %6722 = vmatprep.subr.bf16.mxu1 %v10971_v36  ;;  %v931_v44 = vmax.f32 %v649_v57, 0.0 }
 0x148   :  { %11116 = vst [vmem:[#allocation26_spill] sm:$0xff] %v7916_v31  ;;  %v652_v18 = vpop.f32.mrf.mxu1  ;;  %v550_v4 = vadd.f32 %v549_v17, %v7768_v11  ;;  %v930_v50 = vmax.f32 %v548_v13, 0.0 }
 0x149   :  { %11117 = vst [vmem:[#allocation27_spill] sm:$0xff] %v7918_v32  ;;  %v653_v34 = vadd.f32 %v652_v18, %v7763_v10  ;;  %v932_v25 = vmax.f32 %v651_v41, 0.0  ;;  %v551_v26 = vpop.f32.mrf.mxu0  ;;  %1910 = vmatpush1.bf16.msra.mxu0 %v6964_v30  ;;  %v6966_v41 = vld [vmem:[#allocation2 + $0x48] ss:$28 sps:$4 sm:$0xff]  }
 0x14a   :  { %v654_v29 = vpop.f32.mrf.mxu1  ;;  %6723 = vmatpush3.bf16.msra.mxu1 %v7455_v48  ;;  %v936_v35 = vmax.f32 %v550_v4, 0.0  ;;  %v552_v46 = vadd.f32 %v551_v26, %v7781_v14  ;;  %1911 = vmatprep.subr.bf16.mxu0 %v6965_v49  ;;  %v7951_v4 = vld [vmem:[#allocation6 + $0x134] ss:$8 sps:$4 sm:$0xff]   ;;  %v7957_v30 = vld [vmem:[%s10962_s0 + $0x88] sm:$0xff]  }
 0x14b   :  { %v938_v43 = vmax.f32 %v653_v34, 0.0  ;;  %v655_v47 = vadd.f32 %v654_v29, %v7560_v62  ;;  %6724 = vmatprep.subr.bf16.mxu1 %v10971_v36  ;;  %v555_v51 = vpop.f32.mrf.mxu0  ;;  %6311 = vmatmul.mubr.msk.bf16.gmra.mxu0 %vm417_vm1, %v7925_v19  ;;  %v6850_v34 = vld [vmem:[#allocation6 + $0x74] ss:$8 sps:$4 sm:$0xff]  }
 0x14c   :  { %v658_v54 = vpop.f32.mrf.mxu1  ;;  %6319 = vmatmul.mubr.msk.bf16.gmra.mxu1 %vm417_vm1, %v7925_v19  ;;  %v7938_v48 = vpack.c.bf16 %v936_v35, %v929_v37  ;;  %v937_v56 = vmax.f32 %v552_v46, 0.0  ;;  %1755 = vmatprep.mubr.bf16.mxu0 %v10974_v0  ;;  %v556_v57 = vadd.f32 %v555_v51, %v7768_v11  ;;  %v6969_v51 = vld [vmem:[#allocation2 + $0x10] ss:$28 sps:$4 sm:$0xff]  }
 0x14d   :  { %v7940_v55 = vpack.c.bf16 %v938_v43, %v931_v44  ;;  %v939_v39 = vmax.f32 %v655_v47, 0.0  ;;  %1858 = vmatprep.mubr.bf16.mxu1 %v10974_v0  ;;  %v659_v58 = vadd.f32 %v658_v54, %v7763_v10  ;;  %v557_v60 = vpop.f32.mrf.mxu0  ;;  %1912 = vmatpush1.bf16.msra.mxu0 %v6966_v41  ;;  %v6968_v44 = vld [vmem:[#allocation2 + $0x14] ss:$28 sps:$4 sm:$0xff]  }
 0x14e   :  { %11118 = vst [vmem:[#allocation28_spill] sm:$0xff] %v7938_v48  ;;  %v660_v6 = vpop.f32.mrf.mxu1  ;;  %6725 = vmatpush3.bf16.msra.mxu1 %v6967_v42  ;;  %v7946_v13 = vpack.c.bf16 %v937_v56, %v930_v50  ;;  %1913 = vmatprep.subr.bf16.mxu0 %v6968_v44  ;;  %v558_v37 = vadd.f32 %v557_v60, %v7781_v14  ;;  %v943_v46 = vmax.f32 %v556_v57, 0.0  ;;  %v6970_v54 = vld [vmem:[#allocation2 + $0x18] ss:$28 sps:$4 sm:$0xff]  }
 0x14f   :  { %11119 = vst [vmem:[#allocation29_spill] sm:$0xff] %v7940_v55  ;;  %v7948_v17 = vpack.c.bf16 %v939_v39, %v932_v25  ;;  %v661_v18 = vadd.f32 %v660_v6, %v7560_v62  ;;  %v559_v26 = vpop.f32.mrf.mxu0  ;;  %6726 = vmatprep.subr.bf16.mxu1 %v10971_v36  ;;  %v945_v25 = vmax.f32 %v659_v58, 0.0 }
 0x150   :  { %v662_v29 = vpop.f32.mrf.mxu1  ;;  %v560_v35 = vadd.f32 %v559_v26, %v7768_v11  ;;  %v944_v58 = vmax.f32 %v558_v37, 0.0 }
 0x151   :  { %11120 = vst [vmem:[#allocation30_spill] sm:$0xff] %v7948_v17  ;;  %v663_v43 = vadd.f32 %v662_v29, %v7763_v10  ;;  %v946_v47 = vmax.f32 %v661_v18, 0.0  ;;  %v561_v49 = vpop.f32.mrf.mxu0  ;;  %1914 = vmatpush1.bf16.msra.mxu0 %v6969_v51 }
 0x152   :  { %v664_v50 = vpop.f32.mrf.mxu1  ;;  %6727 = vmatpush3.bf16.msra.mxu1 %v6970_v54  ;;  %v950_v56 = vmax.f32 %v560_v35, 0.0  ;;  %v562_v60 = vadd.f32 %v561_v49, %v7781_v14  ;;  %2454 = vmatprep.subr.bf16.mxu0 %v7951_v4 }
 0x153   :  { %v952_v39 = vmax.f32 %v663_v43, 0.0  ;;  %v665_v6 = vadd.f32 %v664_v50, %v7560_v62  ;;  %2698 = vmatprep.subr.bf16.mxu1 %v6850_v34  ;;  %v701_v41 = vpop.f32.mrf.mxu0  ;;  %6312 = vmatmul.mubr.msk.bf16.gmra.mxu0 %vm417_vm1, %v7957_v30 }
 0x154   :  { %v804_v42 = vpop.f32.mrf.mxu1  ;;  %6320 = vmatmul.mubr.msk.bf16.gmra.mxu1 %vm417_vm1, %v7957_v30  ;;  %v7969_v57 = vpack.c.bf16 %v950_v56, %v943_v46  ;;  %v951_v44 = vmax.f32 %v562_v60, 0.0  ;;  %1765 = vmatprep.mubr.bf16.mxu0 %v10974_v0  ;;  %v702_v49 = vadd.f32 %v701_v41, %v7631_v5 }
 0x155   :  { %v7971_v18 = vpack.c.bf16 %v952_v39, %v945_v25  ;;  %v953_v26 = vmax.f32 %v665_v6, 0.0  ;;  %1868 = vmatprep.mubr.bf16.mxu1 %v10974_v0  ;;  %v805_v34 = vadd.f32 %v804_v42, %v7652_v33  ;;  %v703_v37 = vpop.f32.mrf.mxu0  ;;  %v7984_v25 = vld [vmem:[%s10962_s0 + $0x90] sm:$0xff]  }
 0x156   :  { %11121 = vst [vmem:[#allocation31_spill] sm:$0xff] %v7969_v57  ;;  %v6650_v29 = vpop.f32.mrf.mxu1  ;;  %v7976_v35 = vpack.c.bf16 %v951_v44, %v944_v58  ;;  %v704_v54 = vadd.f32 %v703_v37, %v7639_v27 }
 0x157   :  { %11122 = vst [vmem:[#allocation32_spill] sm:$0xff] %v7971_v18  ;;  %v7978_v43 = vpack.c.bf16 %v953_v26, %v946_v47  ;;  %v705_v46 = vpop.f32.mrf.mxu0  ;;  %v865_v51 = vmax.f32 %v805_v34, 0.0  ;;  %v863_v47 = vmax.f32 %v702_v49, 0.0  ;;  %v8103_v18 = vld [vmem:[#allocation6 + $0x100] ss:$8 sps:$4 sm:$0xff]  }
 0x158   :  { %11123 = vst [vmem:[#allocation33_spill] sm:$0xff] %v7976_v35  ;;  %v807_v50 = vpop.f32.mrf.mxu1  ;;  %v706_v56 = vadd.f32 %v705_v46, %v7631_v5  ;;  %v864_v34 = vmax.f32 %v704_v54, 0.0 }
 0x159   :  { %11124 = vst [vmem:[#allocation34_spill] sm:$0xff] %v7978_v43  ;;  %v808_v39 = vadd.f32 %v807_v50, %v7652_v33  ;;  %v707_v60 = vpop.f32.mrf.mxu0 }
 0x15a   :  { %v6651_v6 = vpop.f32.mrf.mxu1  ;;  %v870_v58 = vmax.f32 %v706_v56, 0.0  ;;  %v708_v41 = vadd.f32 %v707_v60, %v7639_v27 }
 0x15b   :  { %v872_v42 = vmax.f32 %v808_v39, 0.0  ;;  %v711_v44 = vpop.f32.mrf.mxu0  ;;  %6313 = vmatmul.mubr.msk.bf16.gmra.mxu0 %vm417_vm1, %v7984_v25 }
 0x15c   :  { %v812_v26 = vpop.f32.mrf.mxu1  ;;  %6321 = vmatmul.mubr.msk.bf16.gmra.mxu1 %vm417_vm1, %v7984_v25  ;;  %v7994_v37 = vpack.c.bf16 %v870_v58, %v863_v47  ;;  %v871_v46 = vmax.f32 %v708_v41, 0.0  ;;  %1775 = vmatprep.mubr.bf16.mxu0 %v10974_v0  ;;  %v712_v60 = vadd.f32 %v711_v44, %v7631_v5 }
 0x15d   :  { %v7996_v29 = vpack.c.bf16 %v872_v42, %v865_v51  ;;  %1878 = vmatprep.mubr.bf16.mxu1 %v10974_v0  ;;  %v813_v49 = vadd.f32 %v812_v26, %v7652_v33  ;;  %v713_v50 = vpop.f32.mrf.mxu0  ;;  %v8007_v51 = vld [vmem:[%s10962_s0 + $0x98] sm:$0xff]  }
 0x15e   :  { %11125 = vst [vmem:[#allocation35_spill] sm:$0xff] %v7994_v37  ;;  %v6654_v56 = vpop.f32.mrf.mxu1  ;;  %v8001_v39 = vpack.c.bf16 %v871_v46, %v864_v34  ;;  %v714_v47 = vadd.f32 %v713_v50, %v7639_v27  ;;  %v877_v34 = vmax.f32 %v712_v60, 0.0 }
 0x15f   :  { %11126 = vst [vmem:[#allocation36_spill] sm:$0xff] %v7996_v29  ;;  %v715_v6 = vpop.f32.mrf.mxu0  ;;  %v879_v54 = vmax.f32 %v813_v49, 0.0 }
 0x160   :  { %11127 = vst [vmem:[#allocation37_spill] sm:$0xff] %v8001_v39  ;;  %v815_v9 = vpop.f32.mrf.mxu1  ;;  %v716_v58 = vadd.f32 %v715_v6, %v7631_v5  ;;  %v878_v49 = vmax.f32 %v714_v47, 0.0 }
 0x161   :  { %v816_v42 = vadd.f32 %v815_v9, %v7652_v33  ;;  %v717_v41 = vpop.f32.mrf.mxu0 }
 0x162   :  { %v6655_v26 = vpop.f32.mrf.mxu1  ;;  %v884_v46 = vmax.f32 %v716_v58, 0.0  ;;  %v718_v44 = vadd.f32 %v717_v41, %v7639_v27 }
 0x163   :  { %v886_v56 = vmax.f32 %v816_v42, 0.0  ;;  %v721_v8 = vpop.f32.mrf.mxu0  ;;  %6314 = vmatmul.mubr.msk.bf16.gmra.mxu0 %vm417_vm1, %v8007_v51 }
 0x164   :  { %v820_v36 = vpop.f32.mrf.mxu1  ;;  %6322 = vmatmul.mubr.msk.bf16.gmra.mxu1 %vm417_vm1, %v8007_v51  ;;  %v8017_v50 = vpack.c.bf16 %v884_v46, %v877_v34  ;;  %v885_v9 = vmax.f32 %v718_v44, 0.0  ;;  %1785 = vmatprep.mubr.bf16.mxu0 %v10974_v0  ;;  %v722_v26 = vadd.f32 %v721_v8, %v7631_v5 }
 0x165   :  { %v8019_v6 = vpack.c.bf16 %v886_v56, %v879_v54  ;;  %1888 = vmatprep.mubr.bf16.mxu1 %v10974_v0  ;;  %v821_v60 = vadd.f32 %v820_v36, %v7652_v33  ;;  %v723_v58 = vpop.f32.mrf.mxu0  ;;  %v8030_v54 = vld [vmem:[%s10962_s0 + $0xa0] sm:$0xff]  }
 0x166   :  { %11128 = vst [vmem:[#allocation38_spill] sm:$0xff] %v8017_v50  ;;  %v6658_v42 = vpop.f32.mrf.mxu1  ;;  %v8024_v41 = vpack.c.bf16 %v885_v9, %v878_v49  ;;  %v724_v34 = vadd.f32 %v723_v58, %v7639_v27  ;;  %v891_v49 = vmax.f32 %v722_v26, 0.0  ;;  %v11134_v26 = vmov 0.0  }
 0x167   :  { %11129 = vst [vmem:[#allocation39_spill] sm:$0xff] %v8019_v6  ;;  %v725_v29 = vpop.f32.mrf.mxu0  ;;  %v893_v47 = vmax.f32 %v821_v60, 0.0 }
 0x168   :  { %11130 = vst [vmem:[#allocation40_spill] sm:$0xff] %v8024_v41  ;;  %v823_v39 = vpop.f32.mrf.mxu1  ;;  %v726_v46 = vadd.f32 %v725_v29, %v7631_v5  ;;  %v892_v60 = vmax.f32 %v724_v34, 0.0 }
 0x169   :  { %v824_v36 = vadd.f32 %v823_v39, %v7652_v33  ;;  %v727_v56 = vpop.f32.mrf.mxu0 }
 0x16a   :  { %v6659_v44 = vpop.f32.mrf.mxu1  ;;  %v898_v9 = vmax.f32 %v726_v46, 0.0  ;;  %v728_v8 = vadd.f32 %v727_v56, %v7639_v27 }
 0x16b   :  { %v900_v42 = vmax.f32 %v824_v36, 0.0  ;;  %v731_v0 = vpop.f32.mrf.mxu0  ;;  %6315 = vmatmul.mubr.msk.bf16.gmra.mxu0 %vm417_vm1, %v8030_v54  ;;  %v11133_v44 = vmov 0  }
 0x16c   :  { %v828_v6 = vpop.f32.mrf.mxu1  ;;  %6323 = vmatmul.mubr.msk.bf16.gmra.mxu1 %vm417_vm1, %v8030_v54  ;;  %v8040_v58 = vpack.c.bf16 %v898_v9, %v891_v49  ;;  %v899_v39 = vmax.f32 %v728_v8, 0.0  ;;  %1931 = vmatprep.mubr.bf16.mxu0 %v11133_v44  ;;  %v732_v50 = vadd.f32 %v731_v0, %v7631_v5 }
 0x16d   :  { %v8042_v29 = vpack.c.bf16 %v900_v42, %v893_v47  ;;  %6728 = vmatprep.mubr.msk.bf16.mxu1 %vm7259_vm2, %v11134_v26  ;;  %v829_v46 = vadd.f32 %v828_v6, %v7652_v33  ;;  %v733_v36 = vpop.f32.mrf.mxu0  ;;  %v6853_v6 = vld [vmem:[#allocation6 + $0x70] ss:$8 sps:$4 sm:$0xff]  }
 0x16e   :  { %11131 = vst [vmem:[#allocation41_spill] sm:$0xff] %v8040_v58  ;;  %v6662_v56 = vpop.f32.mrf.mxu1  ;;  %v8048_v41 = vpack.c.bf16 %v899_v39, %v892_v60  ;;  %v734_v47 = vadd.f32 %v733_v36, %v7639_v27  ;;  %v8054_v58 = vld [vmem:[#allocation6 + $0x130] ss:$8 sps:$4 sm:$0xff]   ;;  %v905_v60 = vmax.f32 %v732_v50, 0.0 }
 0x16f   :  { %11132 = vst [vmem:[#allocation42_spill] sm:$0xff] %v8042_v29  ;;  %v735_v37 = vpop.f32.mrf.mxu0  ;;  %v907_v49 = vmax.f32 %v829_v46, 0.0 }
 0x170   :  { %11135 = vst [vmem:[#allocation43_spill] sm:$0xff] %v8048_v41  ;;  %v831_v34 = vpop.f32.mrf.mxu1  ;;  %v736_v9 = vadd.f32 %v735_v37, %v7631_v5  ;;  %v6856_v41 = vld [vmem:[#allocation6 + $0x64] ss:$8 sps:$4 sm:$0xff]   ;;  %v906_v37 = vmax.f32 %v734_v47, 0.0 }
 0x171   :  { %v832_v42 = vadd.f32 %v831_v34, %v7652_v33  ;;  %v737_v8 = vpop.f32.mrf.mxu0 }
 0x172   :  { %v6663_v29 = vpop.f32.mrf.mxu1  ;;  %v912_v39 = vmax.f32 %v736_v9, 0.0  ;;  %v738_v0 = vadd.f32 %v737_v8, %v7639_v27  ;;  %v8072_v8 = vld [vmem:[#allocation6 + $0x120] ss:$8 sps:$4 sm:$0xff]  }
 0x173   :  { %v914_v56 = vmax.f32 %v832_v42, 0.0  ;;  %v741_v46 = vpop.f32.mrf.mxu0  ;;  %6325 = vmatmul.mubr.msk.bf16.vlgmr.msra.gmra.mxu0 %vm417_vm1, %v7862_v28 }
 0x174   :  { %v836_v43 = vpop.f32.mrf.mxu1  ;;  %6729 = vmatmul.mubr.msk.bf16.vlgmr.msra.gmra.mxu1 %vm417_vm1, %v7862_v28  ;;  %v8063_v29 = vpack.c.bf16 %v912_v39, %v905_v60  ;;  %v913_v34 = vmax.f32 %v738_v0, 0.0  ;;  %1941 = vmatprep.mubr.bf16.mxu0 %v11133_v44  ;;  %v6859_v28 = vld [vmem:[#allocation6 + $0x60] ss:$8 sps:$4 sm:$0xff]   ;;  %v8078_v60 = vld [vmem:[#allocation6 + $0x114] ss:$8 sps:$4 sm:$0xff]  }
 0x175   :  { %v8065_v36 = vpack.c.bf16 %v914_v56, %v907_v49  ;;  %6732 = vmatprep.mubr.msk.bf16.mxu1 %vm7259_vm2, %v11134_v26  ;;  %v837_v50 = vadd.f32 %v836_v43, %v7652_v33  ;;  %v743_v9 = vpop.f32.mrf.mxu0  ;;  %2455 = vmatpush1.bf16.msra.mxu0 %v8054_v58  ;;  %v742_v49 = vadd.f32 %v741_v46, %v7631_v5  ;;  %v6862_v39 = vld [vmem:[#allocation6 + $0x54] ss:$8 sps:$4 sm:$0xff]   ;;  %v8084_v46 = vld [vmem:[#allocation6 + $0x110] ss:$8 sps:$4 sm:$0xff]  }
 0x176   :  { %11136 = vst [vmem:[#allocation44_spill] sm:$0xff] %v8063_v29  ;;  %v6666_v42 = vpop.f32.mrf.mxu1  ;;  %2699 = vmatpush1.bf16.msra.mxu1 %v6853_v6  ;;  %v8074_v47 = vpack.c.bf16 %v913_v34, %v906_v37  ;;  %2456 = vmatprep.subr.bf16.mxu0 %v8056_v59  ;;  %v8086_v34 = vld [vmem:[#allocation6 + $0x104] ss:$8 sps:$4 sm:$0xff]  }
 0x177   :  { %11137 = vst [vmem:[#allocation45_spill] sm:$0xff] %v8065_v36  ;;  %2700 = vmatprep.subr.bf16.mxu1 %v6856_v41  ;;  %v745_v56 = vpop.f32.mrf.mxu0  ;;  %v921_v0 = vmax.f32 %v837_v50, 0.0  ;;  %v744_v42 = vadd.f32 %v743_v9, %v7639_v27  ;;  %v6865_v41 = vld [vmem:[#allocation6 + $0x50] ss:$8 sps:$4 sm:$0xff]   ;;  %v6868_v9 = vld [vmem:[#allocation6 + $0x44] ss:$8 sps:$4 sm:$0xff]  }
 0x178   :  { %11138 = vst [vmem:[#allocation46_spill] sm:$0xff] %v8074_v47  ;;  %v839_v43 = vpop.f32.mrf.mxu1  ;;  %v746_v6 = vadd.f32 %v745_v56, %v7631_v5  ;;  %v919_v47 = vmax.f32 %v742_v49, 0.0 }
 0x179   :  { %v840_v36 = vadd.f32 %v839_v43, %v7652_v33  ;;  %v747_v29 = vpop.f32.mrf.mxu0  ;;  %2457 = vmatpush1.bf16.msra.mxu0 %v8072_v8 }
 0x17a   :  { %v6667_v37 = vpop.f32.mrf.mxu1  ;;  %2701 = vmatpush1.bf16.msra.mxu1 %v6859_v28  ;;  %v926_v17 = vmax.f32 %v746_v6, 0.0  ;;  %v748_v50 = vadd.f32 %v747_v29, %v7639_v27  ;;  %2458 = vmatprep.subr.bf16.mxu0 %v8078_v60  ;;  %v920_v28 = vmax.f32 %v744_v42, 0.0 }
 0x17b   :  { %v928_v32 = vmax.f32 %v840_v36, 0.0  ;;  %2702 = vmatprep.subr.bf16.mxu1 %v6862_v39  ;;  %v751_v56 = vpop.f32.mrf.mxu0  ;;  %6326 = vmatmul.mubr.msk.bf16.gmra.mxu0 %vm417_vm1, %v7892_v22 }
 0x17c   :  { %v844_v43 = vpop.f32.mrf.mxu1  ;;  %6733 = vmatmul.mubr.msk.bf16.gmra.mxu1 %vm417_vm1, %v7892_v22  ;;  %v8094_v37 = vpack.c.bf16 %v926_v17, %v919_v47  ;;  %v927_v36 = vmax.f32 %v748_v50, 0.0  ;;  %1951 = vmatprep.mubr.bf16.mxu0 %v11133_v44  ;;  %v6871_v22 = vld [vmem:[#allocation6 + $0x40] ss:$8 sps:$4 sm:$0xff]   ;;  %v8109_v47 = vld [vmem:[#allocation6 + $0xf4] ss:$8 sps:$4 sm:$0xff]  }
 0x17d   :  { %v8096_v49 = vpack.c.bf16 %v928_v32, %v921_v0  ;;  %6736 = vmatprep.mubr.msk.bf16.mxu1 %vm7259_vm2, %v11134_v26  ;;  %v845_v29 = vadd.f32 %v844_v43, %v7652_v33  ;;  %v753_v39 = vpop.f32.mrf.mxu0  ;;  %2459 = vmatpush1.bf16.msra.mxu0 %v8084_v46  ;;  %v752_v32 = vadd.f32 %v751_v56, %v7631_v5  ;;  %v6874_v0 = vld [vmem:[#allocation6 + $0x34] ss:$8 sps:$4 sm:$0xff]   ;;  %v8115_v56 = vld [vmem:[#allocation6 + $0xf0] ss:$8 sps:$4 sm:$0xff]  }
 0x17e   :  { %11139 = vst [vmem:[#allocation47_spill] sm:$0xff] %v8094_v37  ;;  %v6670_v6 = vpop.f32.mrf.mxu1  ;;  %2703 = vmatpush1.bf16.msra.mxu1 %v6865_v41  ;;  %v8105_v17 = vpack.c.bf16 %v927_v36, %v920_v28  ;;  %2460 = vmatprep.subr.bf16.mxu0 %v8086_v34  ;;  %v8117_v36 = vld [vmem:[#allocation6 + $0xe4] ss:$8 sps:$4 sm:$0xff]  }
 0x17f   :  { %11140 = vst [vmem:[#allocation48_spill] sm:$0xff] %v8096_v49  ;;  %2704 = vmatprep.subr.bf16.mxu1 %v6868_v9  ;;  %v755_v42 = vpop.f32.mrf.mxu0  ;;  %v935_v43 = vmax.f32 %v845_v29, 0.0  ;;  %v754_v6 = vadd.f32 %v753_v39, %v7639_v27  ;;  %v6877_v9 = vld [vmem:[#allocation6 + $0x30] ss:$8 sps:$4 sm:$0xff]   ;;  %v6880_v39 = vld [vmem:[#allocation6 + $0x24] ss:$8 sps:$4 sm:$0xff]  }
 0x180   :  { %11141 = vst [vmem:[#allocation49_spill] sm:$0xff] %v8105_v17  ;;  %v847_v50 = vpop.f32.mrf.mxu1  ;;  %v756_v41 = vadd.f32 %v755_v42, %v7631_v5  ;;  %v933_v17 = vmax.f32 %v752_v32, 0.0 }
 0x181   :  { %v848_v49 = vadd.f32 %v847_v50, %v7652_v33  ;;  %v757_v37 = vpop.f32.mrf.mxu0  ;;  %2461 = vmatpush1.bf16.msra.mxu0 %v8103_v18 }
 0x182   :  { %v6671_v28 = vpop.f32.mrf.mxu1  ;;  %2705 = vmatpush1.bf16.msra.mxu1 %v6871_v22  ;;  %v940_v16 = vmax.f32 %v756_v41, 0.0  ;;  %v758_v29 = vadd.f32 %v757_v37, %v7639_v27  ;;  %2462 = vmatprep.subr.bf16.mxu0 %v8109_v47  ;;  %v934_v22 = vmax.f32 %v754_v6, 0.0 }
 0x183   :  { %v942_v55 = vmax.f32 %v848_v49, 0.0  ;;  %2706 = vmatprep.subr.bf16.mxu1 %v6874_v0  ;;  %v761_v42 = vpop.f32.mrf.mxu0  ;;  %6327 = vmatmul.mubr.msk.bf16.gmra.mxu0 %vm417_vm1, %v7925_v19 }
 0x184   :  { %v852_v50 = vpop.f32.mrf.mxu1  ;;  %6737 = vmatmul.mubr.msk.bf16.gmra.mxu1 %vm417_vm1, %v7925_v19  ;;  %v8125_v28 = vpack.c.bf16 %v940_v16, %v933_v17  ;;  %v941_v49 = vmax.f32 %v758_v29, 0.0  ;;  %1961 = vmatprep.mubr.bf16.mxu0 %v11133_v44  ;;  %v6883_v19 = vld [vmem:[#allocation6 + $0x20] ss:$8 sps:$4 sm:$0xff]   ;;  %v8140_v17 = vld [vmem:[#allocation6 + $0xd4] ss:$8 sps:$4 sm:$0xff]  }
 0x185   :  { %v8127_v32 = vpack.c.bf16 %v942_v55, %v935_v43  ;;  %6740 = vmatprep.mubr.msk.bf16.mxu1 %vm7259_vm2, %v11134_v26  ;;  %v853_v37 = vadd.f32 %v852_v50, %v7652_v33  ;;  %v763_v0 = vpop.f32.mrf.mxu0  ;;  %2463 = vmatpush1.bf16.msra.mxu0 %v8115_v56  ;;  %v762_v55 = vadd.f32 %v761_v42, %v7631_v5  ;;  %v6886_v43 = vld [vmem:[#allocation6 + $0x14] ss:$8 sps:$4 sm:$0xff]   ;;  %v8146_v42 = vld [vmem:[#allocation6 + $0xd0] ss:$8 sps:$4 sm:$0xff]  }
 0x186   :  { %11142 = vst [vmem:[#allocation50_spill] sm:$0xff] %v8125_v28  ;;  %v6674_v41 = vpop.f32.mrf.mxu1  ;;  %2707 = vmatpush1.bf16.msra.mxu1 %v6877_v9  ;;  %v8136_v16 = vpack.c.bf16 %v941_v49, %v934_v22  ;;  %2464 = vmatprep.subr.bf16.mxu0 %v8117_v36  ;;  %v8148_v49 = vld [vmem:[#allocation6 + $0xc4] ss:$8 sps:$4 sm:$0xff]  }
 0x187   :  { %11143 = vst [vmem:[#allocation51_spill] sm:$0xff] %v8127_v32  ;;  %2708 = vmatprep.subr.bf16.mxu1 %v6880_v39  ;;  %v765_v6 = vpop.f32.mrf.mxu0  ;;  %v949_v50 = vmax.f32 %v853_v37, 0.0  ;;  %v764_v41 = vadd.f32 %v763_v0, %v7639_v27  ;;  %v6889_v39 = vld [vmem:[#allocation6 + $0x10] ss:$8 sps:$4 sm:$0xff]   ;;  %v6892_v0 = vld [vmem:[#allocation6 + $0x4] ss:$8 sps:$4 sm:$0xff]  }
 0x188   :  { %11144 = vst [vmem:[#allocation52_spill] sm:$0xff] %v8136_v16  ;;  %v855_v29 = vpop.f32.mrf.mxu1  ;;  %v766_v9 = vadd.f32 %v765_v6, %v7631_v5  ;;  %v947_v16 = vmax.f32 %v762_v55, 0.0 }
 0x189   :  { %v856_v32 = vadd.f32 %v855_v29, %v7652_v33  ;;  %v767_v28 = vpop.f32.mrf.mxu0  ;;  %2465 = vmatpush1.bf16.msra.mxu0 %v8134_v21 }
 0x18a   :  { %v6675_v22 = vpop.f32.mrf.mxu1  ;;  %2709 = vmatpush1.bf16.msra.mxu1 %v6883_v19  ;;  %v954_v40 = vmax.f32 %v766_v9, 0.0  ;;  %v768_v37 = vadd.f32 %v767_v28, %v7639_v27  ;;  %2466 = vmatprep.subr.bf16.mxu0 %v8140_v17  ;;  %v948_v19 = vmax.f32 %v764_v41, 0.0  ;;  %v6898_v41 = vld [vmem:[#allocation6 + $0xb4] ss:$8 sps:$4 sm:$0xff]  }
 0x18b   :  { %v956_v3 = vmax.f32 %v856_v32, 0.0  ;;  %2710 = vmatprep.subr.bf16.mxu1 %v6886_v43  ;;  %v8152_v6 = vpop.f32.mrf.mxu0  ;;  %6328 = vmatmul.mubr.msk.bf16.gmra.mxu0 %vm417_vm1, %v7957_v30 }
 0x18c   :  { %v1214_v29 = vpop.f32.mrf.mxu1  ;;  %6741 = vmatmul.mubr.msk.bf16.gmra.mxu1 %vm417_vm1, %v7957_v30  ;;  %v8158_v22 = vpack.c.bf16 %v954_v40, %v947_v16  ;;  %v955_v32 = vmax.f32 %v768_v37, 0.0  ;;  %1971 = vmatprep.mubr.bf16.mxu0 %v11133_v44  ;;  %v8169_v30 = vld [vmem:[#allocation6 + $0xc0] ss:$8 sps:$4 sm:$0xff]  }
 0x18d   :  { %v8160_v55 = vpack.c.bf16 %v956_v3, %v949_v50  ;;  %6744 = vmatprep.mubr.msk.bf16.mxu1 %vm7259_vm2, %v11134_v26  ;;  %v1215_v28 = vadd.f32 %v1214_v29, %v7763_v10  ;;  %v8166_v43 = vpop.f32.mrf.mxu0  ;;  %2467 = vmatpush1.bf16.msra.mxu0 %v8146_v42  ;;  %v6895_v40 = vld [vmem:[#allocation6] ss:$8 sps:$4 sm:$0xff]   ;;  %v8175_v50 = vld [vmem:[#allocation6 + $0x174] ss:$8 sps:$4 sm:$0xff]  }
 0x18e   :  { %11145 = vst [vmem:[#allocation53_spill] sm:$0xff] %v8158_v22  ;;  %v1216_v9 = vpop.f32.mrf.mxu1  ;;  %2711 = vmatpush1.bf16.msra.mxu1 %v6889_v39  ;;  %v8171_v16 = vpack.c.bf16 %v955_v32, %v948_v19  ;;  %2468 = vmatprep.subr.bf16.mxu0 %v8148_v49  ;;  %v8181_v19 = vld [vmem:[#allocation6 + $0x170] ss:$8 sps:$4 sm:$0xff]  }
 0x18f   :  { %11146 = vst [vmem:[#allocation54_spill] sm:$0xff] %v8160_v55  ;;  %v1217_v3 = vadd.f32 %v1216_v9, %v7560_v62  ;;  %2712 = vmatprep.subr.bf16.mxu1 %v6892_v0  ;;  %v8177_v37 = vpop.f32.mrf.mxu0  ;;  %v1477_v55 = vmax.f32 %v1215_v28, 0.0  ;;  %11148 = vst [vmem:[#allocation56_spill] sm:$0xff] %v8181_v19  ;;  %v6901_v32 = vld [vmem:[#allocation6 + $0xb0] ss:$8 sps:$4 sm:$0xff]  }
 0x190   :  { %11147 = vst [vmem:[#allocation55_spill] sm:$0xff] %v8171_v16  ;;  %v1218_v29 = vpop.f32.mrf.mxu1 }
 0x191   :  { %v1219_v22 = vadd.f32 %v1218_v29, %v7763_v10  ;;  %v1117_v39 = vpop.f32.mrf.mxu0  ;;  %2469 = vmatpush1.bf16.msra.mxu0 %v8169_v30  ;;  %v1478_v9 = vmax.f32 %v1217_v3, 0.0 }
 0x192   :  { %v1220_v2 = vpop.f32.mrf.mxu1  ;;  %2713 = vmatpush1.bf16.msra.mxu1 %v6895_v40  ;;  %2478 = vmatprep.subr.bf16.mxu0 %v8175_v50  ;;  %v6904_v40 = vld [vmem:[#allocation6 + $0xa4] ss:$8 sps:$4 sm:$0xff]  }
 0x193   :  { %v1484_v16 = vmax.f32 %v1219_v22, 0.0  ;;  %v1221_v0 = vadd.f32 %v1220_v2, %v7560_v62  ;;  %2722 = vmatprep.subr.bf16.mxu1 %v6898_v41  ;;  %v8187_v28 = vpop.f32.mrf.mxu0  ;;  %6329 = vmatmul.mubr.msk.bf16.gmra.mxu0 %vm417_vm1, %v7984_v25 }
 0x194   :  { %v1224_v29 = vpop.f32.mrf.mxu1  ;;  %6745 = vmatmul.mubr.msk.bf16.gmra.mxu1 %vm417_vm1, %v7984_v25  ;;  %1981 = vmatprep.mubr.bf16.mxu0 %v11133_v44  ;;  %v6907_v25 = vld [vmem:[#allocation6 + $0xa0] ss:$8 sps:$4 sm:$0xff]  }
 0x195   :  { %v8193_v12 = vpack.c.bf16 %v1484_v16, %v1477_v55  ;;  %v1485_v22 = vmax.f32 %v1221_v0, 0.0  ;;  %6748 = vmatprep.mubr.msk.bf16.mxu1 %vm7259_vm2, %v11134_v26  ;;  %v1225_v2 = vadd.f32 %v1224_v29, %v7763_v10  ;;  %v8199_v3 = vpop.f32.mrf.mxu0  ;;  %2479 = vmatpush2.bf16.msra.mxu0 %v8181_v19  ;;  %v8208_v16 = vld [vmem:[#allocation6 + $0x154] ss:$8 sps:$4 sm:$0xff]  }
 0x196   :  { %v1226_v41 = vpop.f32.mrf.mxu1  ;;  %2723 = vmatpush2.bf16.msra.mxu1 %v6901_v32  ;;  %2480 = vmatprep.subr.bf16.mxu0 %v8185_v63  ;;  %11153 = vst [vmem:[#allocation61_spill] sm:$0xff] %v8208_v16  ;;  %v6910_v0 = vld [vmem:[#allocation6 + $0x94] ss:$8 sps:$4 sm:$0xff]  }
 0x197   :  { %11150 = vst [vmem:[#allocation58_spill] sm:$0xff] %v8193_v12  ;;  %v8204_v53 = vpack.c.bf16 %v1485_v22, %v1478_v9  ;;  %v1227_v55 = vadd.f32 %v1226_v41, %v7560_v62  ;;  %v8210_v12 = vpop.f32.mrf.mxu0  ;;  %2724 = vmatprep.subr.bf16.mxu1 %v6904_v40  ;;  %v1491_v57 = vmax.f32 %v1225_v2, 0.0  ;;  %v8214_v9 = vld [vmem:[#allocation6 + $0x150] ss:$8 sps:$4 sm:$0xff]   ;;  %v1118_v41 = vadd.f32 %v1117_v39, %v7781_v14  ;;  %v8219_v40 = vld [vmem:[#allocation6 + $0x144] ss:$8 sps:$4 sm:$0xff]  }
 0x198   :  { %v1228_v29 = vpop.f32.mrf.mxu1  ;;  %11154 = vst [vmem:[#allocation62_spill] sm:$0xff] %v8214_v9  ;;  %v6913_v22 = vld [vmem:[#allocation6 + $0x90] ss:$8 sps:$4 sm:$0xff]   ;;  %11155 = vst [vmem:[#allocation63_spill] sm:$0xff] %v8219_v40 }
 0x199   :  { %11152 = vst [vmem:[#allocation60_spill] sm:$0xff] %v8204_v53  ;;  %v1229_v35 = vadd.f32 %v1228_v29, %v7763_v10  ;;  %v1127_v32 = vpop.f32.mrf.mxu0  ;;  %2481 = vmatpush2.bf16.msra.mxu0 %v8202_v24  ;;  %v1492_v53 = vmax.f32 %v1227_v55, 0.0  ;;  %v6919_v24 = vld [vmem:[#allocation6 + $0x80] ss:$8 sps:$4 sm:$0xff]  }
 0x19a   :  { %v1230_v48 = vpop.f32.mrf.mxu1  ;;  %2725 = vmatpush2.bf16.msra.mxu1 %v6907_v25  ;;  %2482 = vmatprep.subr.bf16.mxu0 %v8208_v16  ;;  %v6916_v25 = vld [vmem:[#allocation6 + $0x84] ss:$8 sps:$4 sm:$0xff]  }
 0x19b   :  { %v1498_v63 = vmax.f32 %v1229_v35, 0.0  ;;  %v1231_v19 = vadd.f32 %v1230_v48, %v7560_v62  ;;  %2726 = vmatprep.subr.bf16.mxu1 %v6910_v0  ;;  %v8221_v2 = vpop.f32.mrf.mxu0  ;;  %6330 = vmatmul.mubr.msk.bf16.gmra.mxu0 %vm417_vm1, %v8007_v51  ;;  %v1114_v35 = vadd.f32 %v8166_v43, %v7781_v14  ;;  %v1483_v43 = vmax.f32 %v1118_v41, 0.0 }
 0x19c   :  { %v1234_v29 = vpop.f32.mrf.mxu1  ;;  %6749 = vmatmul.mubr.msk.bf16.gmra.mxu1 %vm417_vm1, %v8007_v51  ;;  %1991 = vmatprep.mubr.bf16.mxu0 %v11133_v44  ;;  %v8238_v51 = vld [vmem:[#allocation6 + $0x140] ss:$8 sps:$4 sm:$0xff]  }
 0x19d   :  { %v8229_v39 = vpack.c.bf16 %v1498_v63, %v1491_v57  ;;  %v1499_v48 = vmax.f32 %v1231_v19, 0.0  ;;  %6752 = vmatprep.mubr.msk.bf16.mxu1 %vm7259_vm2, %v11134_v26  ;;  %v1235_v55 = vadd.f32 %v1234_v29, %v7763_v10  ;;  %v8235_v0 = vpop.f32.mrf.mxu0  ;;  %2483 = vmatpush2.bf16.msra.mxu0 %v8214_v9  ;;  %v8244_v19 = vld [vmem:[#allocation6 + $0x1f4] ss:$8 sps:$4 sm:$0xff]   ;;  %v1476_v44 = vmax.f32 %v1114_v35, 0.0 }
 0x19e   :  { %v1236_v16 = vpop.f32.mrf.mxu1  ;;  %2727 = vmatpush2.bf16.msra.mxu1 %v6913_v22  ;;  %2484 = vmatprep.subr.bf16.mxu0 %v8219_v40  ;;  %v1116_v9 = vadd.f32 %v8177_v37, %v7768_v11  ;;  %v1112_v37 = vadd.f32 %v8152_v6, %v7768_v11 }
 0x19f   :  { %11156 = vst [vmem:[#allocation64_spill] sm:$0xff] %v8229_v39  ;;  %v8240_v63 = vpack.c.bf16 %v1499_v48, %v1492_v53  ;;  %v1237_v57 = vadd.f32 %v1236_v16, %v7560_v62  ;;  %v8246_v26 = vpop.f32.mrf.mxu0  ;;  %2728 = vmatprep.subr.bf16.mxu1 %v6916_v25  ;;  %v1505_v39 = vmax.f32 %v1235_v55, 0.0  ;;  %v1128_v53 = vadd.f32 %v1127_v32, %v7781_v14 }
 0x1a0   :  { %v1238_v29 = vpop.f32.mrf.mxu1  ;;  %v8253_v16 = vpack.c.bf16 %v1483_v43, %v1476_v44  ;;  %v1124_v32 = vadd.f32 %v8199_v3, %v7781_v14  ;;  %v1482_v44 = vmax.f32 %v1116_v9, 0.0  ;;  %v1126_v9 = vadd.f32 %v8210_v12, %v7768_v11  ;;  %v8296_v12 = vld [vmem:[#allocation6 + $0x1e4] ss:$8 sps:$4 sm:$0xff]  }
 0x1a1   :  { %11157 = vst [vmem:[#allocation65_spill] sm:$0xff] %v8240_v63  ;;  %v1239_v22 = vadd.f32 %v1238_v29, %v7763_v10  ;;  %v1137_v41 = vpop.f32.mrf.mxu0  ;;  %2485 = vmatpush2.bf16.msra.mxu0 %v8238_v51  ;;  %v1506_v63 = vmax.f32 %v1237_v57, 0.0  ;;  %v1497_v6 = vmax.f32 %v1128_v53, 0.0 }
 0x1a2   :  { %v1240_v48 = vpop.f32.mrf.mxu1  ;;  %2729 = vmatpush2.bf16.msra.mxu1 %v6919_v24  ;;  %11158 = vst [vmem:[#allocation66_spill] sm:$0xff] %v8253_v16  ;;  %2942 = vmatprep.subr.bf16.mxu0 %v8244_v19 }
 0x1a3   :  { %v1512_v40 = vmax.f32 %v1239_v22, 0.0  ;;  %v1241_v25 = vadd.f32 %v1240_v48, %v7560_v62  ;;  %3175 = vmatprep.subr.bf16.mxu1 %v7951_v4  ;;  %v8262_v35 = vpop.f32.mrf.mxu0  ;;  %6331 = vmatmul.mubr.msk.bf16.gmra.mxu0 %vm417_vm1, %v8030_v54 }
 0x1a4   :  { %v1244_v55 = vpop.f32.mrf.mxu1  ;;  %6753 = vmatmul.mubr.msk.bf16.gmra.mxu1 %vm417_vm1, %v8030_v54  ;;  %6363 = vmatprep.mubr.msk.bf16.mxu0 %vm2432_vm3, %v8253_v16 }
 0x1a5   :  { %v8268_v24 = vpack.c.bf16 %v1512_v40, %v1505_v39  ;;  %v1513_v4 = vmax.f32 %v1241_v25, 0.0  ;;  %6394 = vmatprep.mubr.msk.bf16.mxu1 %vm2432_vm3, %v7808_v61  ;;  %v1245_v3 = vadd.f32 %v1244_v55, %v7763_v10  ;;  %v8275_v43 = vpop.f32.mrf.mxu0  ;;  %v1475_v40 = vmax.f32 %v1112_v37, 0.0 }
 0x1a6   :  { %v1246_v57 = vpop.f32.mrf.mxu1  ;;  %v1490_v39 = vmax.f32 %v1124_v32, 0.0 }
 0x1a7   :  { %11159 = vst [vmem:[#allocation67_spill] sm:$0xff] %v8268_v24  ;;  %v8277_v29 = vpack.c.bf16 %v1513_v4, %v1506_v63  ;;  %v1247_v54 = vadd.f32 %v1246_v57, %v7560_v62  ;;  %v8280_v22 = vpop.f32.mrf.mxu0  ;;  %v1519_v25 = vmax.f32 %v1245_v3, 0.0  ;;  %v1573_v61 = vpack.c.bf16 %v1482_v44, %v1475_v40  ;;  %v8287_v63 = vld [vmem:[#allocation6 + $0x1f0] ss:$8 sps:$4 sm:$0xff]  }
 0x1a8   :  { %v1248_v48 = vpop.f32.mrf.mxu1  ;;  %v8285_v53 = vpack.c.bf16 %v1497_v6, %v1490_v39  ;;  %v1138_v4 = vadd.f32 %v1137_v41, %v7781_v14  ;;  %v1122_v3 = vadd.f32 %v8187_v28, %v7768_v11  ;;  %v1134_v6 = vadd.f32 %v8235_v0, %v7781_v14  ;;  %v8311_v0 = vld [vmem:[#allocation6 + $0x1e0] ss:$8 sps:$4 sm:$0xff]  }
 0x1a9   :  { %11160 = vst [vmem:[#allocation68_spill] sm:$0xff] %v8277_v29  ;;  %v1249_v24 = vadd.f32 %v1248_v48, %v7763_v10  ;;  %v1147_v55 = vpop.f32.mrf.mxu0  ;;  %v1520_v37 = vmax.f32 %v1247_v54, 0.0  ;;  %v1496_v28 = vmax.f32 %v1126_v9, 0.0 }
 0x1aa   :  { %v1250_v16 = vpop.f32.mrf.mxu1  ;;  %v1489_v9 = vmax.f32 %v1122_v3, 0.0  ;;  %v8328_v3 = vld [vmem:[#allocation6 + $0x1d0] ss:$8 sps:$4 sm:$0xff]  }
 0x1ab   :  { %v1526_v32 = vmax.f32 %v1249_v24, 0.0  ;;  %v1251_v57 = vadd.f32 %v1250_v16, %v7560_v62  ;;  %v8293_v48 = vpop.f32.mrf.mxu0  ;;  %2487 = vmatmul.mubr.bf16.vlgmr.msra.gmra.mxu0 %v1573_v61  ;;  %v1511_v24 = vmax.f32 %v1138_v4, 0.0  ;;  %v1136_v4 = vadd.f32 %v8246_v26, %v7768_v11 }
 0x1ac   :  { %v1254_v44 = vpop.f32.mrf.mxu1  ;;  %2731 = vmatmul.mubr.bf16.vlgmr.msra.gmra.mxu1 %v7799_v52  ;;  %6364 = vmatprep.mubr.msk.bf16.mxu0 %vm2432_vm3, %v8285_v53  ;;  %v1132_v26 = vadd.f32 %v8221_v2, %v7768_v11 }
 0x1ad   :  { %v8300_v40 = vpack.c.bf16 %v1526_v32, %v1519_v25  ;;  %v1527_v41 = vmax.f32 %v1251_v57, 0.0  ;;  %6395 = vmatprep.mubr.msk.bf16.mxu1 %vm2432_vm3, %v7831_v45  ;;  %v1255_v16 = vadd.f32 %v1254_v44, %v7763_v10  ;;  %v8307_v61 = vpop.f32.mrf.mxu0  ;;  %3176 = vmatpush1.bf16.msra.mxu1 %v8054_v58  ;;  %v8317_v25 = vld [vmem:[#allocation6 + $0x1d4] ss:$8 sps:$4 sm:$0xff]   ;;  %v1504_v58 = vmax.f32 %v1134_v6, 0.0 }
 0x1ae   :  { %v1256_v52 = vpop.f32.mrf.mxu1  ;;  %2943 = vmatpush1.bf16.msra.mxu0 %v8287_v63  ;;  %3177 = vmatprep.subr.bf16.mxu1 %v8056_v59  ;;  %v1580_v45 = vpack.c.bf16 %v1496_v28, %v1489_v9 }
 0x1af   :  { %v8313_v54 = vpack.c.bf16 %v1527_v41, %v1520_v37  ;;  %v1257_v39 = vadd.f32 %v1256_v52, %v7560_v62  ;;  %v8319_v32 = vpop.f32.mrf.mxu0  ;;  %2944 = vmatprep.subr.bf16.mxu0 %v8296_v12  ;;  %v1533_v44 = vmax.f32 %v1255_v16, 0.0  ;;  %v1148_v37 = vadd.f32 %v1147_v55, %v7781_v14 }
 0x1b0   :  { %v1258_v57 = vpop.f32.mrf.mxu1  ;;  %v8330_v52 = vpack.c.bf16 %v1511_v24, %v1504_v58  ;;  %v8342_v24 = vld [vmem:[#allocation6 + $0x1c4] ss:$8 sps:$4 sm:$0xff]  }
 0x1b1   :  { %11161 = vst [vmem:[#allocation69_spill] sm:$0xff] %v8313_v54  ;;  %v1259_v29 = vadd.f32 %v1258_v57, %v7763_v10  ;;  %v1157_v41 = vpop.f32.mrf.mxu0  ;;  %3178 = vmatpush1.bf16.msra.mxu1 %v8072_v8  ;;  %v1534_v6 = vmax.f32 %v1257_v39, 0.0  ;;  %v1144_v8 = vadd.f32 %v8275_v43, %v7781_v14  ;;  %v1525_v2 = vmax.f32 %v1148_v37, 0.0 }
 0x1b2   :  { %v1260_v59 = vpop.f32.mrf.mxu1  ;;  %2945 = vmatpush1.bf16.msra.mxu0 %v8311_v0  ;;  %3179 = vmatprep.subr.bf16.mxu1 %v8078_v60  ;;  %v1510_v60 = vmax.f32 %v1136_v4, 0.0  ;;  %v1503_v4 = vmax.f32 %v1132_v26, 0.0  ;;  %v8373_v26 = vld [vmem:[#allocation6 + $0x1b0] ss:$8 sps:$4 sm:$0xff]  }
 0x1b3   :  { %v1540_v16 = vmax.f32 %v1259_v29, 0.0  ;;  %v1261_v57 = vadd.f32 %v1260_v59, %v7560_v62  ;;  %2946 = vmatprep.subr.bf16.mxu0 %v8317_v25  ;;  %v8339_v55 = vpop.f32.mrf.mxu0  ;;  %2497 = vmatmul.mubr.bf16.gmra.mxu0 %v1580_v45  ;;  %v8361_v59 = vld [vmem:[#allocation6 + $0x1b4] ss:$8 sps:$4 sm:$0xff]   ;;  %v1518_v37 = vmax.f32 %v1144_v8, 0.0  ;;  %v1158_v8 = vadd.f32 %v1157_v41, %v7781_v14 }
 0x1b4   :  { %v1264_v28 = vpop.f32.mrf.mxu1  ;;  %2741 = vmatmul.mubr.bf16.gmra.mxu1 %v7822_v23  ;;  %6365 = vmatprep.mubr.msk.bf16.mxu0 %vm2432_vm3, %v8330_v52  ;;  %v8355_v23 = vld [vmem:[#allocation6 + $0x1c0] ss:$8 sps:$4 sm:$0xff]   ;;  %v1587_v54 = vpack.c.bf16 %v1510_v60, %v1503_v4  ;;  %v1154_v41 = vadd.f32 %v8307_v61, %v7781_v14 }
 0x1b5   :  { %v8344_v29 = vpack.c.bf16 %v1540_v16, %v1533_v44  ;;  %v1541_v39 = vmax.f32 %v1261_v57, 0.0  ;;  %6396 = vmatprep.mubr.msk.bf16.mxu1 %vm2432_vm3, %v7853_v20  ;;  %v1265_v43 = vadd.f32 %v1264_v28, %v7763_v10  ;;  %v8351_v9 = vpop.f32.mrf.mxu0  ;;  %3180 = vmatpush1.bf16.msra.mxu1 %v8084_v46  ;;  %v8399_v61 = vld [vmem:[#allocation6 + $0x1a0] ss:$8 sps:$4 sm:$0xff]  }
 0x1b6   :  { %v1266_v45 = vpop.f32.mrf.mxu1  ;;  %2947 = vmatpush1.bf16.msra.mxu0 %v8328_v3  ;;  %3181 = vmatprep.subr.bf16.mxu1 %v8086_v34 }
 0x1b7   :  { %v8357_v58 = vpack.c.bf16 %v1541_v39, %v1534_v6  ;;  %v1267_v44 = vadd.f32 %v1266_v45, %v7560_v62  ;;  %v8363_v16 = vpop.f32.mrf.mxu0  ;;  %2948 = vmatprep.subr.bf16.mxu0 %v8342_v24  ;;  %v1547_v46 = vmax.f32 %v1265_v43, 0.0  ;;  %v1146_v6 = vadd.f32 %v8280_v22, %v7768_v11 }
 0x1b8   :  { %v1268_v57 = vpop.f32.mrf.mxu1  ;;  %v8369_v39 = vpack.c.bf16 %v1525_v2, %v1518_v37  ;;  %v1142_v22 = vadd.f32 %v8262_v35, %v7768_v11  ;;  %v8384_v2 = vld [vmem:[#allocation6 + $0x1a4] ss:$8 sps:$4 sm:$0xff]   ;;  %v1539_v37 = vmax.f32 %v1158_v8, 0.0 }
 0x1b9   :  { %11162 = vst [vmem:[#allocation70_spill] sm:$0xff] %v8357_v58  ;;  %v1269_v28 = vadd.f32 %v1268_v57, %v7763_v10  ;;  %v1167_v45 = vpop.f32.mrf.mxu0  ;;  %3182 = vmatpush1.bf16.msra.mxu1 %v8103_v18  ;;  %v1548_v58 = vmax.f32 %v1267_v44, 0.0 }
 0x1ba   :  { %v1270_v34 = vpop.f32.mrf.mxu1  ;;  %2949 = vmatpush1.bf16.msra.mxu0 %v8355_v23  ;;  %3183 = vmatprep.subr.bf16.mxu1 %v8109_v47  ;;  %v1524_v47 = vmax.f32 %v1146_v6, 0.0  ;;  %v1517_v6 = vmax.f32 %v1142_v22, 0.0 }
 0x1bb   :  { %v1554_v43 = vmax.f32 %v1269_v28, 0.0  ;;  %v1271_v57 = vadd.f32 %v1270_v34, %v7560_v62  ;;  %2950 = vmatprep.subr.bf16.mxu0 %v8361_v59  ;;  %v8381_v60 = vpop.f32.mrf.mxu0  ;;  %2507 = vmatmul.mubr.bf16.gmra.mxu0 %v1587_v54  ;;  %v8405_v34 = vld [vmem:[#allocation6 + $0x194] ss:$8 sps:$4 sm:$0xff]  }
 0x1bc   :  { %v1274_v18 = vpop.f32.mrf.mxu1  ;;  %2751 = vmatmul.mubr.bf16.gmra.mxu1 %v7845_v7  ;;  %6366 = vmatprep.mubr.msk.bf16.mxu0 %vm2432_vm3, %v8369_v39  ;;  %v1594_v8 = vpack.c.bf16 %v1524_v47, %v1517_v6 }
 0x1bd   :  { %v8388_v44 = vpack.c.bf16 %v1554_v43, %v1547_v46  ;;  %v1555_v4 = vmax.f32 %v1271_v57, 0.0  ;;  %6397 = vmatprep.mubr.msk.bf16.mxu1 %vm2432_vm3, %v7882_v15  ;;  %v1275_v35 = vadd.f32 %v1274_v18, %v7763_v10  ;;  %v8395_v54 = vpop.f32.mrf.mxu0  ;;  %3184 = vmatpush1.bf16.msra.mxu1 %v8115_v56  ;;  %v1156_v43 = vadd.f32 %v8319_v32, %v7768_v11  ;;  %v8418_v32 = vld [vmem:[#allocation6 + $0x190] ss:$8 sps:$4 sm:$0xff]  }
 0x1be   :  { %v1276_v7 = vpop.f32.mrf.mxu1  ;;  %2951 = vmatpush1.bf16.msra.mxu0 %v8373_v26  ;;  %3185 = vmatprep.subr.bf16.mxu1 %v8117_v36  ;;  %v1532_v18 = vmax.f32 %v1154_v41, 0.0  ;;  %v1168_v36 = vadd.f32 %v1167_v45, %v7781_v14 }
 0x1bf   :  { %v8401_v46 = vpack.c.bf16 %v1555_v4, %v1548_v58  ;;  %v1277_v28 = vadd.f32 %v1276_v7, %v7560_v62  ;;  %v8409_v57 = vpop.f32.mrf.mxu0  ;;  %2952 = vmatprep.subr.bf16.mxu0 %v8384_v2  ;;  %v1561_v15 = vmax.f32 %v1275_v35, 0.0  ;;  %v1152_v4 = vadd.f32 %v8293_v48, %v7768_v11  ;;  %v8425_v48 = vld [vmem:[#allocation6 + $0x184] ss:$8 sps:$4 sm:$0xff]  }
 0x1c0   :  { %v1278_v56 = vpop.f32.mrf.mxu1  ;;  %v1538_v45 = vmax.f32 %v1156_v43, 0.0 }
 0x1c1   :  { %11163 = vst [vmem:[#allocation71_spill] sm:$0xff] %v8401_v46  ;;  %v1279_v58 = vadd.f32 %v1278_v56, %v7763_v10  ;;  %v1177_v7 = vpop.f32.mrf.mxu0  ;;  %3186 = vmatpush1.bf16.msra.mxu1 %v8134_v21  ;;  %v8420_v46 = vpack.c.bf16 %v1539_v37, %v1532_v18  ;;  %v1562_v41 = vmax.f32 %v1277_v28, 0.0  ;;  %v1164_v21 = vadd.f32 %v8351_v9, %v7781_v14 }
 0x1c2   :  { %v1280_v22 = vpop.f32.mrf.mxu1  ;;  %2953 = vmatpush1.bf16.msra.mxu0 %v8399_v61  ;;  %3187 = vmatprep.subr.bf16.mxu1 %v8140_v17  ;;  %v1531_v17 = vmax.f32 %v1152_v4, 0.0  ;;  %v1553_v18 = vmax.f32 %v1168_v36, 0.0  ;;  %v8446_v4 = vld [vmem:[#allocation6 + $0x234] ss:$8 sps:$4 sm:$0xff]  }
 0x1c3   :  { %v1568_v35 = vmax.f32 %v1279_v58, 0.0  ;;  %v1281_v56 = vadd.f32 %v1280_v22, %v7560_v62  ;;  %2954 = vmatprep.subr.bf16.mxu0 %v8405_v34  ;;  %v1317_v47 = vpop.f32.mrf.mxu0  ;;  %2517 = vmatmul.mubr.bf16.gmra.mxu0 %v1594_v8  ;;  %v1546_v22 = vmax.f32 %v1164_v21, 0.0 }
 0x1c4   :  { %v1420_v6 = vpop.f32.mrf.mxu1  ;;  %2761 = vmatmul.mubr.bf16.gmra.mxu1 %v7872_v1  ;;  %6367 = vmatprep.mubr.msk.bf16.mxu0 %vm2432_vm3, %v8420_v46  ;;  %v8439_v1 = vld [vmem:[#allocation6 + $0x180] ss:$8 sps:$4 sm:$0xff]   ;;  %v1318_v8 = vadd.f32 %v1317_v47, %v7631_v5  ;;  %v1601_v36 = vpack.c.bf16 %v1538_v45, %v1531_v17  ;;  %v1166_v47 = vadd.f32 %v8363_v16, %v7768_v11  ;;  %v8458_v45 = vld [vmem:[#allocation6 + $0x230] ss:$8 sps:$4 sm:$0xff]   ;;  %v8463_v16 = vld [vmem:[#allocation6 + $0x224] ss:$8 sps:$4 sm:$0xff]  }
 0x1c5   :  { %v8430_v37 = vpack.c.bf16 %v1568_v35, %v1561_v15  ;;  %v1569_v28 = vmax.f32 %v1281_v56, 0.0  ;;  %6398 = vmatprep.mubr.msk.bf16.mxu1 %vm2432_vm3, %v7916_v31  ;;  %v1421_v43 = vadd.f32 %v1420_v6, %v7652_v33  ;;  %v1319_v58 = vpop.f32.mrf.mxu0  ;;  %3188 = vmatpush1.bf16.msra.mxu1 %v8146_v42 }
 0x1c6   :  { %v6690_v9 = vpop.f32.mrf.mxu1  ;;  %2955 = vmatpush1.bf16.msra.mxu0 %v8418_v32  ;;  %3189 = vmatprep.subr.bf16.mxu1 %v8148_v49  ;;  %v1320_v42 = vadd.f32 %v1319_v58, %v7639_v27  ;;  %v1178_v49 = vadd.f32 %v1177_v7, %v7781_v14  ;;  %v1479_v21 = vmax.f32 %v1318_v8, 0.0 }
 0x1c7   :  { %v8441_v15 = vpack.c.bf16 %v1569_v28, %v1562_v41  ;;  %2956 = vmatprep.subr.bf16.mxu0 %v8425_v48  ;;  %v1321_v35 = vpop.f32.mrf.mxu0  ;;  %v1481_v6 = vmax.f32 %v1421_v43, 0.0  ;;  %v8453_v28 = vpack.c.bf16 %v1553_v18, %v1546_v22 }
 0x1c8   :  { %v1423_v56 = vpop.f32.mrf.mxu1  ;;  %v1322_v9 = vadd.f32 %v1321_v35, %v7631_v5  ;;  %v1480_v8 = vmax.f32 %v1320_v42, 0.0  ;;  %v1567_v35 = vmax.f32 %v1178_v49, 0.0 }
 0x1c9   :  { %11164 = vst [vmem:[#allocation72_spill] sm:$0xff] %v8441_v15  ;;  %v1424_v41 = vadd.f32 %v1423_v56, %v7652_v33  ;;  %v1323_v15 = vpop.f32.mrf.mxu0  ;;  %3190 = vmatpush1.bf16.msra.mxu1 %v8169_v30  ;;  %v1174_v30 = vadd.f32 %v8395_v54, %v7781_v14 }
 0x1ca   :  { %v6691_v31 = vpop.f32.mrf.mxu1  ;;  %2957 = vmatpush1.bf16.msra.mxu0 %v8439_v1  ;;  %v1486_v17 = vmax.f32 %v1322_v9, 0.0  ;;  %v1324_v58 = vadd.f32 %v1323_v15, %v7639_v27  ;;  %3199 = vmatprep.subr.bf16.mxu1 %v8175_v50  ;;  %v11167_v9 = vld [vmem:[#allocation56_spill] sm:$0xff] }
 0x1cb   :  { %v1488_v43 = vmax.f32 %v1424_v41, 0.0  ;;  %2966 = vmatprep.subr.bf16.mxu0 %v8446_v4  ;;  %v1162_v31 = vadd.f32 %v8339_v55, %v7768_v11  ;;  %v1327_v7 = vpop.f32.mrf.mxu0  ;;  %2527 = vmatmul.mubr.bf16.gmra.mxu0 %v1601_v36  ;;  %v1552_v55 = vmax.f32 %v1166_v47, 0.0  ;;  %v11169_v41 = vld [vmem:[#allocation57_spill] sm:$0xff] }
 0x1cc   :  { %v1428_v18 = vpop.f32.mrf.mxu1  ;;  %2771 = vmatmul.mubr.bf16.gmra.mxu1 %v7907_v38  ;;  %v8470_v22 = vpack.c.bf16 %v1486_v17, %v1479_v21  ;;  %v1487_v50 = vmax.f32 %v1324_v58, 0.0  ;;  %6368 = vmatprep.mubr.msk.bf16.mxu0 %vm2432_vm3, %v8453_v28  ;;  %v8481_v38 = vld [vmem:[#allocation6 + $0x220] ss:$8 sps:$4 sm:$0xff]   ;;  %v1328_v42 = vadd.f32 %v1327_v7, %v7631_v5  ;;  %v8488_v47 = vld [vmem:[#allocation6 + $0x214] ss:$8 sps:$4 sm:$0xff]   ;;  %v1560_v21 = vmax.f32 %v1174_v30, 0.0 }
 0x1cd   :  { %v8472_v15 = vpack.c.bf16 %v1488_v43, %v1481_v6  ;;  %6399 = vmatprep.mubr.msk.bf16.mxu1 %vm2432_vm3, %v7946_v13  ;;  %v1429_v54 = vadd.f32 %v1428_v18, %v7652_v33  ;;  %v1329_v56 = vpop.f32.mrf.mxu0  ;;  %3200 = vmatpush2.bf16.msra.mxu1 %v11167_v9  ;;  %v1545_v49 = vmax.f32 %v1162_v31, 0.0  ;;  %v1176_v7 = vadd.f32 %v8409_v57, %v7768_v11  ;;  %v8499_v31 = vld [vmem:[#allocation6 + $0x210] ss:$8 sps:$4 sm:$0xff]   ;;  %v8504_v57 = vld [vmem:[#allocation6 + $0x204] ss:$8 sps:$4 sm:$0xff]  }
 0x1ce   :  { %11165 = vst [vmem:[#allocation73_spill] sm:$0xff] %v8470_v22  ;;  %v6694_v36 = vpop.f32.mrf.mxu1  ;;  %2967 = vmatpush2.bf16.msra.mxu0 %v8458_v45  ;;  %v8483_v6 = vpack.c.bf16 %v1487_v50, %v1480_v8  ;;  %3201 = vmatprep.subr.bf16.mxu1 %v11169_v41  ;;  %v1330_v18 = vadd.f32 %v1329_v56, %v7639_v27  ;;  %v1493_v30 = vmax.f32 %v1328_v42, 0.0 }
 0x1cf   :  { %11166 = vst [vmem:[#allocation74_spill] sm:$0xff] %v8472_v15  ;;  %2968 = vmatprep.subr.bf16.mxu0 %v8463_v16  ;;  %v1331_v17 = vpop.f32.mrf.mxu0  ;;  %v1495_v58 = vmax.f32 %v1429_v54, 0.0  ;;  %v1608_v50 = vpack.c.bf16 %v1552_v55, %v1545_v49  ;;  %v8495_v9 = vpack.c.bf16 %v1567_v35, %v1560_v21 }
 0x1d0   :  { %11168 = vst [vmem:[#allocation56_spill] sm:$0xff] %v8483_v6  ;;  %v1431_v43 = vpop.f32.mrf.mxu1  ;;  %v1332_v36 = vadd.f32 %v1331_v17, %v7631_v5  ;;  %v11170_v6 = vld [vmem:[#allocation59_spill] sm:$0xff]  ;;  %v1494_v49 = vmax.f32 %v1330_v18, 0.0 }
 0x1d1   :  { %v1432_v8 = vadd.f32 %v1431_v43, %v7652_v33  ;;  %v1333_v41 = vpop.f32.mrf.mxu0  ;;  %3202 = vmatpush2.bf16.msra.mxu1 %v11170_v6  ;;  %v11171_v43 = vld [vmem:[#allocation61_spill] sm:$0xff]  ;;  %v11172_v6 = vld [vmem:[#allocation28_spill] sm:$0xff] }
 0x1d2   :  { %v6695_v15 = vpop.f32.mrf.mxu1  ;;  %2969 = vmatpush2.bf16.msra.mxu0 %v8481_v38  ;;  %v1500_v54 = vmax.f32 %v1332_v36, 0.0  ;;  %v1334_v17 = vadd.f32 %v1333_v41, %v7639_v27  ;;  %3203 = vmatprep.subr.bf16.mxu1 %v11171_v43  ;;  %v1566_v41 = vmax.f32 %v1176_v7, 0.0  ;;  %v8520_v18 = vld [vmem:[#allocation6 + $0x200] ss:$8 sps:$4 sm:$0xff]  }
 0x1d3   :  { %v1502_v56 = vmax.f32 %v1432_v8, 0.0  ;;  %2970 = vmatprep.subr.bf16.mxu0 %v8488_v47  ;;  %v1172_v15 = vadd.f32 %v8381_v60, %v7768_v11  ;;  %v1337_v55 = vpop.f32.mrf.mxu0  ;;  %2537 = vmatmul.mubr.bf16.gmra.mxu0 %v1608_v50  ;;  %v11175_v8 = vld [vmem:[#allocation33_spill] sm:$0xff]  ;;  %v11176_v50 = vld [vmem:[#allocation62_spill] sm:$0xff] }
 0x1d4   :  { %v1436_v35 = vpop.f32.mrf.mxu1  ;;  %2781 = vmatmul.mubr.bf16.gmra.mxu1 %v11172_v6  ;;  %v8509_v42 = vpack.c.bf16 %v1500_v54, %v1493_v30  ;;  %v1501_v36 = vmax.f32 %v1334_v17, 0.0  ;;  %6369 = vmatprep.mubr.msk.bf16.mxu0 %vm2432_vm3, %v8495_v9  ;;  %v1338_v30 = vadd.f32 %v1337_v55, %v7631_v5  ;;  %v11178_v54 = vld [vmem:[#allocation63_spill] sm:$0xff] }
 0x1d5   :  { %v8511_v21 = vpack.c.bf16 %v1502_v56, %v1495_v58  ;;  %6400 = vmatprep.mubr.msk.bf16.mxu1 %vm2432_vm3, %v11175_v8  ;;  %v1437_v60 = vadd.f32 %v1436_v35, %v7652_v33  ;;  %v1339_v43 = vpop.f32.mrf.mxu0  ;;  %3204 = vmatpush2.bf16.msra.mxu1 %v11176_v50  ;;  %v1559_v56 = vmax.f32 %v1172_v15, 0.0 }
 0x1d6   :  { %11173 = vst [vmem:[#allocation57_spill] sm:$0xff] %v8509_v42  ;;  %v6698_v22 = vpop.f32.mrf.mxu1  ;;  %2971 = vmatpush2.bf16.msra.mxu0 %v8499_v31  ;;  %v8522_v58 = vpack.c.bf16 %v1501_v36, %v1494_v49  ;;  %3205 = vmatprep.subr.bf16.mxu1 %v11178_v54  ;;  %v1507_v55 = vmax.f32 %v1338_v30, 0.0 }
 0x1d7   :  { %11174 = vst [vmem:[#allocation59_spill] sm:$0xff] %v8511_v21  ;;  %2972 = vmatprep.subr.bf16.mxu0 %v8504_v57  ;;  %v1341_v7 = vpop.f32.mrf.mxu0  ;;  %v1509_v35 = vmax.f32 %v1437_v60, 0.0  ;;  %v1340_v22 = vadd.f32 %v1339_v43, %v7639_v27  ;;  %v1615_v21 = vpack.c.bf16 %v1566_v41, %v1559_v56  ;;  %v8534_v60 = vld [vmem:[#allocation6 + $0x74] ss:$8 sps:$4 sm:$0xff]   ;;  %v11179_v41 = vld [vmem:[#allocation31_spill] sm:$0xff] }
 0x1d8   :  { %11177 = vst [vmem:[#allocation61_spill] sm:$0xff] %v8522_v58  ;;  %v1439_v17 = vpop.f32.mrf.mxu1  ;;  %v1342_v6 = vadd.f32 %v1341_v7, %v7631_v5 }
 0x1d9   :  { %v1440_v50 = vadd.f32 %v1439_v17, %v7652_v33  ;;  %v1343_v42 = vpop.f32.mrf.mxu0  ;;  %3206 = vmatpush2.bf16.msra.mxu1 %v8238_v51  ;;  %v1508_v56 = vmax.f32 %v1340_v22, 0.0 }
 0x1da   :  { %v6699_v49 = vpop.f32.mrf.mxu1  ;;  %2973 = vmatpush2.bf16.msra.mxu0 %v8520_v18  ;;  %v1514_v36 = vmax.f32 %v1342_v6, 0.0  ;;  %v1344_v15 = vadd.f32 %v1343_v42, %v7639_v27  ;;  %3423 = vmatprep.subr.bf16.mxu1 %v8244_v19  ;;  %v11182_v6 = vld [vmem:[#allocation58_spill] sm:$0xff] }
 0x1db   :  { %v1516_v54 = vmax.f32 %v1440_v50, 0.0  ;;  %3299 = vmatprep.subr.bf16.mxu0 %v8534_v60  ;;  %v1347_v43 = vpop.f32.mrf.mxu0  ;;  %2547 = vmatmul.mubr.bf16.gmra.mxu0 %v1615_v21 }
 0x1dc   :  { %v1444_v7 = vpop.f32.mrf.mxu1  ;;  %2791 = vmatmul.mubr.bf16.gmra.mxu1 %v11179_v41  ;;  %v8538_v51 = vpack.c.bf16 %v1514_v36, %v1507_v55  ;;  %v1515_v30 = vmax.f32 %v1344_v15, 0.0  ;;  %v1348_v58 = vadd.f32 %v1347_v43, %v7631_v5 }
 0x1dd   :  { %v8540_v17 = vpack.c.bf16 %v1516_v54, %v1509_v35  ;;  %6432 = vmatprep.mubr.msk.bf16.mxu1 %vm2432_vm3, %v11182_v6  ;;  %v1445_v19 = vadd.f32 %v1444_v7, %v7652_v33  ;;  %v1349_v42 = vpop.f32.mrf.mxu0 }
 0x1de   :  { %11180 = vst [vmem:[#allocation28_spill] sm:$0xff] %v8538_v51  ;;  %v6702_v50 = vpop.f32.mrf.mxu1  ;;  %v8545_v49 = vpack.c.bf16 %v1515_v30, %v1508_v56  ;;  %v1350_v22 = vadd.f32 %v1349_v42, %v7639_v27  ;;  %v1521_v15 = vmax.f32 %v1348_v58, 0.0 }
 0x1df   :  { %11181 = vst [vmem:[#allocation62_spill] sm:$0xff] %v8540_v17  ;;  %v1351_v21 = vpop.f32.mrf.mxu0  ;;  %v1523_v41 = vmax.f32 %v1445_v19, 0.0 }
 0x1e0   :  { %11183 = vst [vmem:[#allocation63_spill] sm:$0xff] %v8545_v49  ;;  %v1447_v8 = vpop.f32.mrf.mxu1  ;;  %v1352_v35 = vadd.f32 %v1351_v21, %v7631_v5  ;;  %v11184_v49 = vld [vmem:[#allocation66_spill] sm:$0xff]  ;;  %v1522_v43 = vmax.f32 %v1350_v22, 0.0  ;;  %v11187_v21 = vld [vmem:[#allocation64_spill] sm:$0xff] }
 0x1e1   :  { %v1448_v55 = vadd.f32 %v1447_v8, %v7652_v33  ;;  %v1353_v36 = vpop.f32.mrf.mxu0 }
 0x1e2   :  { %v6703_v54 = vpop.f32.mrf.mxu1  ;;  %v1528_v17 = vmax.f32 %v1352_v35, 0.0  ;;  %v1354_v50 = vadd.f32 %v1353_v36, %v7639_v27 }
 0x1e3   :  { %v1530_v7 = vmax.f32 %v1448_v55, 0.0  ;;  %v1357_v56 = vpop.f32.mrf.mxu0 }
 0x1e4   :  { %v1452_v30 = vpop.f32.mrf.mxu1  ;;  %3208 = vmatmul.mubr.bf16.vlgmr.msra.gmra.mxu1 %v11184_v49  ;;  %v8553_v51 = vpack.c.bf16 %v1528_v17, %v1521_v15  ;;  %v1529_v42 = vmax.f32 %v1354_v50, 0.0  ;;  %v1358_v49 = vadd.f32 %v1357_v56, %v7631_v5 }
 0x1e5   :  { %v8555_v19 = vpack.c.bf16 %v1530_v7, %v1523_v41  ;;  %6433 = vmatprep.mubr.msk.bf16.mxu1 %vm2432_vm3, %v11187_v21  ;;  %3424 = vmatpush1.bf16.msra.mxu1 %v8287_v63  ;;  %v1453_v8 = vadd.f32 %v1452_v30, %v7652_v33  ;;  %v1359_v58 = vpop.f32.mrf.mxu0 }
 0x1e6   :  { %11185 = vst [vmem:[#allocation31_spill] sm:$0xff] %v8553_v51  ;;  %v6706_v35 = vpop.f32.mrf.mxu1  ;;  %3425 = vmatprep.subr.bf16.mxu1 %v8296_v12  ;;  %v8562_v55 = vpack.c.bf16 %v1529_v42, %v1522_v43  ;;  %v1360_v36 = vadd.f32 %v1359_v58, %v7639_v27  ;;  %v1535_v12 = vmax.f32 %v1358_v49, 0.0 }
 0x1e7   :  { %11186 = vst [vmem:[#allocation58_spill] sm:$0xff] %v8555_v19  ;;  %v1361_v17 = vpop.f32.mrf.mxu0  ;;  %v1537_v41 = vmax.f32 %v1453_v8, 0.0  ;;  %v8768_v19 = vld [vmem:[#allocation6] ss:$8 sps:$4 sm:$0xff]  }
 0x1e8   :  { %11188 = vst [vmem:[#allocation66_spill] sm:$0xff] %v8562_v55  ;;  %v1455_v22 = vpop.f32.mrf.mxu1  ;;  %v1362_v54 = vadd.f32 %v1361_v17, %v7631_v5  ;;  %v1536_v8 = vmax.f32 %v1360_v36, 0.0  ;;  %v8811_v55 = vld [vmem:[#allocation6 + $0x94] ss:$8 sps:$4 sm:$0xff]  }
 0x1e9   :  { %v1456_v15 = vadd.f32 %v1455_v22, %v7652_v33  ;;  %3426 = vmatpush1.bf16.msra.mxu1 %v8311_v0  ;;  %v1363_v63 = vpop.f32.mrf.mxu0  ;;  %v11191_v0 = vld [vmem:[#allocation67_spill] sm:$0xff] }
 0x1ea   :  { %v6707_v7 = vpop.f32.mrf.mxu1  ;;  %3427 = vmatprep.subr.bf16.mxu1 %v8317_v25  ;;  %v1542_v50 = vmax.f32 %v1362_v54, 0.0  ;;  %v1364_v56 = vadd.f32 %v1363_v63, %v7639_v27 }
 0x1eb   :  { %v1544_v30 = vmax.f32 %v1456_v15, 0.0  ;;  %v1367_v43 = vpop.f32.mrf.mxu0 }
 0x1ec   :  { %v1460_v42 = vpop.f32.mrf.mxu1  ;;  %3218 = vmatmul.mubr.bf16.gmra.mxu1 %v8285_v53  ;;  %v8572_v58 = vpack.c.bf16 %v1542_v50, %v1535_v12  ;;  %v1543_v17 = vmax.f32 %v1364_v56, 0.0  ;;  %v1368_v53 = vadd.f32 %v1367_v43, %v7631_v5 }
 0x1ed   :  { %v8574_v35 = vpack.c.bf16 %v1544_v30, %v1537_v41  ;;  %6434 = vmatprep.mubr.msk.bf16.mxu1 %vm2432_vm3, %v11191_v0  ;;  %3428 = vmatpush1.bf16.msra.mxu1 %v8328_v3  ;;  %v1461_v25 = vadd.f32 %v1460_v42, %v7652_v33  ;;  %v1369_v49 = vpop.f32.mrf.mxu0 }
 0x1ee   :  { %11189 = vst [vmem:[#allocation64_spill] sm:$0xff] %v8572_v58  ;;  %v6710_v22 = vpop.f32.mrf.mxu1  ;;  %3429 = vmatprep.subr.bf16.mxu1 %v8342_v24  ;;  %v8581_v54 = vpack.c.bf16 %v1543_v17, %v1536_v8  ;;  %v1370_v63 = vadd.f32 %v1369_v49, %v7639_v27  ;;  %v1549_v24 = vmax.f32 %v1368_v53, 0.0 }
 0x1ef   :  { %11190 = vst [vmem:[#allocation75_spill] sm:$0xff] %v8574_v35  ;;  %v1371_v36 = vpop.f32.mrf.mxu0  ;;  %v1551_v41 = vmax.f32 %v1461_v25, 0.0 }
 0x1f0   :  { %11192 = vst [vmem:[#allocation67_spill] sm:$0xff] %v8581_v54  ;;  %v1463_v15 = vpop.f32.mrf.mxu1  ;;  %v1372_v7 = vadd.f32 %v1371_v36, %v7631_v5  ;;  %v1550_v17 = vmax.f32 %v1370_v63, 0.0 }
 0x1f1   :  { %v1464_v12 = vadd.f32 %v1463_v15, %v7652_v33  ;;  %3430 = vmatpush1.bf16.msra.mxu1 %v8355_v23  ;;  %v1373_v3 = vpop.f32.mrf.mxu0 }
 0x1f2   :  { %v6711_v50 = vpop.f32.mrf.mxu1  ;;  %3431 = vmatprep.subr.bf16.mxu1 %v8361_v59  ;;  %v1556_v30 = vmax.f32 %v1372_v7, 0.0  ;;  %v1374_v43 = vadd.f32 %v1373_v3, %v7639_v27 }
 0x1f3   :  { %v1558_v56 = vmax.f32 %v1464_v12, 0.0  ;;  %v1377_v42 = vpop.f32.mrf.mxu0 }
 0x1f4   :  { %v1468_v8 = vpop.f32.mrf.mxu1  ;;  %3228 = vmatmul.mubr.bf16.gmra.mxu1 %v8330_v52  ;;  %v8591_v25 = vpack.c.bf16 %v1556_v30, %v1549_v24  ;;  %v1557_v22 = vmax.f32 %v1374_v43, 0.0  ;;  %v1378_v52 = vadd.f32 %v1377_v42, %v7631_v5 }
 0x1f5   :  { %v8593_v49 = vpack.c.bf16 %v1558_v56, %v1551_v41  ;;  %6435 = vmatprep.mubr.msk.bf16.mxu1 %vm2432_vm3, %v8300_v40  ;;  %3432 = vmatpush1.bf16.msra.mxu1 %v8373_v26  ;;  %v1469_v23 = vadd.f32 %v1468_v8, %v7652_v33  ;;  %v1379_v59 = vpop.f32.mrf.mxu0 }
 0x1f6   :  { %11193 = vst [vmem:[#allocation76_spill] sm:$0xff] %v8591_v25  ;;  %v6714_v53 = vpop.f32.mrf.mxu1  ;;  %3433 = vmatprep.subr.bf16.mxu1 %v8384_v2  ;;  %v8600_v36 = vpack.c.bf16 %v1557_v22, %v1550_v17  ;;  %v1380_v7 = vadd.f32 %v1379_v59, %v7639_v27  ;;  %v1563_v2 = vmax.f32 %v1378_v52, 0.0 }
 0x1f7   :  { %11194 = vst [vmem:[#allocation77_spill] sm:$0xff] %v8593_v49  ;;  %v1381_v15 = vpop.f32.mrf.mxu0  ;;  %v1565_v41 = vmax.f32 %v1469_v23, 0.0 }
 0x1f8   :  { %11195 = vst [vmem:[#allocation78_spill] sm:$0xff] %v8600_v36  ;;  %v1471_v63 = vpop.f32.mrf.mxu1  ;;  %v1382_v12 = vadd.f32 %v1381_v15, %v7631_v5  ;;  %v1564_v8 = vmax.f32 %v1380_v7, 0.0  ;;  %v8775_v36 = vld [vmem:[#allocation6 + $0xb4] ss:$8 sps:$4 sm:$0xff]  }
 0x1f9   :  { %v1472_v3 = vadd.f32 %v1471_v63, %v7652_v33  ;;  %3434 = vmatpush1.bf16.msra.mxu1 %v8399_v61  ;;  %v1383_v26 = vpop.f32.mrf.mxu0 }
 0x1fa   :  { %v6715_v50 = vpop.f32.mrf.mxu1  ;;  %3435 = vmatprep.subr.bf16.mxu1 %v8405_v34  ;;  %v1570_v24 = vmax.f32 %v1382_v12, 0.0  ;;  %v1384_v56 = vadd.f32 %v1383_v26, %v7639_v27 }
 0x1fb   :  { %v1572_v30 = vmax.f32 %v1472_v3, 0.0  ;;  %v1727_v43 = vpop.f32.mrf.mxu0 }
 0x1fc   :  { %v1830_v42 = vpop.f32.mrf.mxu1  ;;  %3238 = vmatmul.mubr.bf16.gmra.mxu1 %v8369_v39  ;;  %v8610_v17 = vpack.c.bf16 %v1570_v24, %v1563_v2  ;;  %v1571_v23 = vmax.f32 %v1384_v56, 0.0 }
 0x1fd   :  { %v8612_v22 = vpack.c.bf16 %v1572_v30, %v1565_v41  ;;  %6436 = vmatprep.mubr.msk.bf16.mxu1 %vm2432_vm3, %v8344_v29  ;;  %3436 = vmatpush1.bf16.msra.mxu1 %v8418_v32  ;;  %v1729_v61 = vpop.f32.mrf.mxu0  ;;  %v1728_v41 = vadd.f32 %v1727_v43, %v7768_v11 }
 0x1fe   :  { %11196 = vst [vmem:[#allocation79_spill] sm:$0xff] %v8610_v17  ;;  %v1832_v34 = vpop.f32.mrf.mxu1  ;;  %3437 = vmatprep.subr.bf16.mxu1 %v8425_v48  ;;  %v8618_v59 = vpack.c.bf16 %v1571_v23, %v1564_v8  ;;  %v1730_v15 = vadd.f32 %v1729_v61, %v7781_v14 }
 0x1ff   :  { %11197 = vst [vmem:[#allocation80_spill] sm:$0xff] %v8612_v22  ;;  %v1833_v53 = vadd.f32 %v1832_v34, %v7560_v62  ;;  %v1731_v39 = vpop.f32.mrf.mxu0 }
 0x200   :  { %11198 = vst [vmem:[#allocation81_spill] sm:$0xff] %v8618_v59  ;;  %v1834_v52 = vpop.f32.mrf.mxu1  ;;  %v1732_v63 = vadd.f32 %v1731_v39, %v7768_v11  ;;  %v2092_v24 = vmax.f32 %v1730_v15, 0.0  ;;  %v8738_v59 = vld [vmem:[#allocation6 + $0x14] ss:$8 sps:$4 sm:$0xff]  }
 0x201   :  { %3438 = vmatpush1.bf16.msra.mxu1 %v8439_v1  ;;  %v1733_v7 = vpop.f32.mrf.mxu0  ;;  %v2094_v12 = vmax.f32 %v1833_v53, 0.0  ;;  %v2091_v1 = vmax.f32 %v1728_v41, 0.0  ;;  %v1835_v53 = vadd.f32 %v1834_v52, %v7763_v10 }
 0x202   :  { %v1836_v32 = vpop.f32.mrf.mxu1  ;;  %3447 = vmatprep.subr.bf16.mxu1 %v8446_v4  ;;  %v1734_v48 = vadd.f32 %v1733_v7, %v7781_v14  ;;  %v2098_v26 = vmax.f32 %v1732_v63, 0.0 }
 0x203   :  { %v1837_v3 = vadd.f32 %v1836_v32, %v7560_v62  ;;  %v1737_v50 = vpop.f32.mrf.mxu0 }
 0x204   :  { %v1840_v2 = vpop.f32.mrf.mxu1  ;;  %3248 = vmatmul.mubr.bf16.gmra.mxu1 %v8420_v46  ;;  %v2099_v30 = vmax.f32 %v1734_v48, 0.0  ;;  %v1831_v46 = vadd.f32 %v1830_v42, %v7763_v10  ;;  %v2189_v34 = vpack.c.bf16 %v2098_v26, %v2091_v1 }
 0x205   :  { %v2101_v56 = vmax.f32 %v1837_v3, 0.0  ;;  %6437 = vmatprep.mubr.msk.bf16.mxu1 %vm2432_vm3, %v8388_v44  ;;  %3448 = vmatpush2.bf16.msra.mxu1 %v8458_v45  ;;  %v1739_v4 = vpop.f32.mrf.mxu0  ;;  %v2100_v3 = vmax.f32 %v1835_v53, 0.0 }
 0x206   :  { %v1842_v43 = vpop.f32.mrf.mxu1  ;;  %3449 = vmatprep.subr.bf16.mxu1 %v8463_v16  ;;  %v8633_v8 = vpack.c.bf16 %v2099_v30, %v2092_v24  ;;  %v1740_v45 = vadd.f32 %v1739_v4, %v7781_v14  ;;  %v1738_v16 = vadd.f32 %v1737_v50, %v7768_v11  ;;  %v2093_v48 = vmax.f32 %v1831_v46, 0.0  ;;  %v8653_v50 = vld [vmem:[#allocation6 + $0x64] ss:$8 sps:$4 sm:$0xff]  }
 0x207   :  { %v8635_v23 = vpack.c.bf16 %v2101_v56, %v2094_v12  ;;  %v1843_v61 = vadd.f32 %v1842_v43, %v7560_v62  ;;  %v1741_v39 = vpop.f32.mrf.mxu0  ;;  %v8649_v12 = vld [vmem:[#allocation6 + $0x70] ss:$8 sps:$4 sm:$0xff]  }
 0x208   :  { %v1844_v15 = vpop.f32.mrf.mxu1  ;;  %v1742_v63 = vadd.f32 %v1741_v39, %v7768_v11  ;;  %6425 = vmatprep.mubr.msk.bf16.mxu0 %vm2432_vm3, %v8633_v8  ;;  %v2105_v1 = vmax.f32 %v1738_v16, 0.0  ;;  %v8668_v53 = vpack.c.bf16 %v2100_v3, %v2093_v48  ;;  %v1841_v39 = vadd.f32 %v1840_v2, %v7763_v10  ;;  %v8671_v16 = vld [vmem:[#allocation6 + $0x54] ss:$8 sps:$4 sm:$0xff]   ;;  %v8684_v3 = vld [vmem:[#allocation6 + $0x50] ss:$8 sps:$4 sm:$0xff]  }
 0x209   :  { %3450 = vmatpush2.bf16.msra.mxu1 %v8481_v38  ;;  %v1743_v41 = vpop.f32.mrf.mxu0  ;;  %2975 = vmatmul.mubr.bf16.vlgmr.msra.gmra.mxu0 %v2189_v34  ;;  %v2108_v42 = vmax.f32 %v1843_v61, 0.0  ;;  %v8665_v34 = vld [vmem:[#allocation6 + $0x60] ss:$8 sps:$4 sm:$0xff]  }
 0x20a   :  { %v1846_v7 = vpop.f32.mrf.mxu1  ;;  %3451 = vmatprep.subr.bf16.mxu1 %v8488_v47  ;;  %v1744_v52 = vadd.f32 %v1743_v41, %v7781_v14  ;;  %3300 = vmatpush1.bf16.msra.mxu0 %v8649_v12  ;;  %v2112_v26 = vmax.f32 %v1742_v63, 0.0  ;;  %v2106_v47 = vmax.f32 %v1740_v45, 0.0 }
 0x20b   :  { %v1847_v32 = vadd.f32 %v1846_v7, %v7560_v62  ;;  %v1747_v38 = vpop.f32.mrf.mxu0  ;;  %3301 = vmatprep.subr.bf16.mxu0 %v8653_v50 }
 0x20c   :  { %v1850_v24 = vpop.f32.mrf.mxu1  ;;  %3258 = vmatmul.mubr.bf16.gmra.mxu1 %v8453_v28  ;;  %v2113_v30 = vmax.f32 %v1744_v52, 0.0  ;;  %v1748_v2 = vadd.f32 %v1747_v38, %v7768_v11  ;;  %v8688_v38 = vld [vmem:[#allocation6 + $0x44] ss:$8 sps:$4 sm:$0xff]  }
 0x20d   :  { %v2115_v56 = vmax.f32 %v1847_v32, 0.0  ;;  %6438 = vmatprep.mubr.msk.bf16.mxu1 %vm2432_vm3, %v8430_v37  ;;  %3452 = vmatpush2.bf16.msra.mxu1 %v8499_v31  ;;  %v1749_v4 = vpop.f32.mrf.mxu0  ;;  %v2196_v31 = vpack.c.bf16 %v2112_v26, %v2105_v1  ;;  %v2107_v26 = vmax.f32 %v1841_v39, 0.0 }
 0x20e   :  { %v1852_v43 = vpop.f32.mrf.mxu1  ;;  %3453 = vmatprep.subr.bf16.mxu1 %v8504_v57  ;;  %v8660_v61 = vpack.c.bf16 %v2113_v30, %v2106_v47  ;;  %3302 = vmatpush1.bf16.msra.mxu0 %v8665_v34  ;;  %v1845_v57 = vadd.f32 %v1844_v15, %v7763_v10  ;;  %v1750_v41 = vadd.f32 %v1749_v4, %v7781_v14 }
 0x20f   :  { %v8662_v28 = vpack.c.bf16 %v2115_v56, %v2108_v42  ;;  %v1853_v46 = vadd.f32 %v1852_v43, %v7560_v62  ;;  %v1751_v45 = vpop.f32.mrf.mxu0  ;;  %3303 = vmatprep.subr.bf16.mxu0 %v8671_v16  ;;  %v2119_v43 = vmax.f32 %v1748_v2, 0.0 }
 0x210   :  { %v1854_v63 = vpop.f32.mrf.mxu1  ;;  %v1752_v7 = vadd.f32 %v1751_v45, %v7768_v11  ;;  %6426 = vmatprep.mubr.msk.bf16.mxu0 %vm2432_vm3, %v8660_v61  ;;  %v2120_v56 = vmax.f32 %v1750_v41, 0.0 }
 0x211   :  { %3454 = vmatpush2.bf16.msra.mxu1 %v8520_v18  ;;  %v1753_v42 = vpop.f32.mrf.mxu0  ;;  %2985 = vmatmul.mubr.bf16.gmra.mxu0 %v2196_v31  ;;  %v2122_v32 = vmax.f32 %v1853_v46, 0.0 }
 0x212   :  { %v1856_v52 = vpop.f32.mrf.mxu1  ;;  %3769 = vmatprep.subr.bf16.mxu1 %v8534_v60  ;;  %v1754_v48 = vadd.f32 %v1753_v42, %v7781_v14  ;;  %3304 = vmatpush1.bf16.msra.mxu0 %v8684_v3  ;;  %v2126_v47 = vmax.f32 %v1752_v7, 0.0  ;;  %v2114_v60 = vmax.f32 %v1845_v57, 0.0  ;;  %v8698_v7 = vld [vmem:[#allocation6 + $0x40] ss:$8 sps:$4 sm:$0xff]   ;;  %v1851_v57 = vadd.f32 %v1850_v24, %v7763_v10 }
 0x213   :  { %v1857_v15 = vadd.f32 %v1856_v52, %v7560_v62  ;;  %v1757_v30 = vpop.f32.mrf.mxu0  ;;  %3305 = vmatprep.subr.bf16.mxu0 %v8688_v38 }
 0x214   :  { %v1860_v18 = vpop.f32.mrf.mxu1  ;;  %3268 = vmatmul.mubr.bf16.gmra.mxu1 %v8495_v9  ;;  %v2127_v1 = vmax.f32 %v1754_v48, 0.0  ;;  %v2203_v41 = vpack.c.bf16 %v2126_v47, %v2119_v43  ;;  %v8702_v48 = vld [vmem:[#allocation6 + $0x34] ss:$8 sps:$4 sm:$0xff]   ;;  %v8705_v2 = vpack.c.bf16 %v2114_v60, %v2107_v26  ;;  %v1758_v24 = vadd.f32 %v1757_v30, %v7768_v11  ;;  %v8715_v60 = vld [vmem:[#allocation6 + $0x30] ss:$8 sps:$4 sm:$0xff]  }
 0x215   :  { %v2129_v4 = vmax.f32 %v1857_v15, 0.0  ;;  %6446 = vmatprep.mubr.msk.bf16.mxu1 %vm2432_vm3, %v8668_v53  ;;  %v1759_v46 = vpop.f32.mrf.mxu0  ;;  %v8721_v30 = vld [vmem:[#allocation6 + $0x24] ss:$8 sps:$4 sm:$0xff]  }
 0x216   :  { %v1862_v31 = vpop.f32.mrf.mxu1  ;;  %v8693_v39 = vpack.c.bf16 %v2127_v1, %v2120_v56  ;;  %3306 = vmatpush1.bf16.msra.mxu0 %v8698_v7  ;;  %v1760_v15 = vadd.f32 %v1759_v46, %v7781_v14 }
 0x217   :  { %v8695_v45 = vpack.c.bf16 %v2129_v4, %v2122_v32  ;;  %v1863_v9 = vadd.f32 %v1862_v31, %v7560_v62  ;;  %v1761_v42 = vpop.f32.mrf.mxu0  ;;  %3307 = vmatprep.subr.bf16.mxu0 %v8702_v48  ;;  %v1855_v32 = vadd.f32 %v1854_v63, %v7763_v10  ;;  %v2121_v63 = vmax.f32 %v1851_v57, 0.0 }
 0x218   :  { %v1864_v52 = vpop.f32.mrf.mxu1  ;;  %v1762_v56 = vadd.f32 %v1761_v42, %v7768_v11  ;;  %6427 = vmatprep.mubr.msk.bf16.mxu0 %vm2432_vm3, %v8693_v39  ;;  %v2133_v57 = vmax.f32 %v1758_v24, 0.0 }
 0x219   :  { %v1763_v47 = vpop.f32.mrf.mxu0  ;;  %2995 = vmatmul.mubr.bf16.gmra.mxu0 %v2203_v41  ;;  %v2136_v4 = vmax.f32 %v1863_v9, 0.0  ;;  %v2128_v9 = vmax.f32 %v1855_v32, 0.0  ;;  %v2134_v41 = vmax.f32 %v1760_v15, 0.0  ;;  %v8733_v32 = vld [vmem:[#allocation6 + $0x20] ss:$8 sps:$4 sm:$0xff]   ;;  %v1861_v15 = vadd.f32 %v1860_v18, %v7763_v10 }
 0x21a   :  { %v1866_v1 = vpop.f32.mrf.mxu1  ;;  %v1764_v43 = vadd.f32 %v1763_v47, %v7781_v14  ;;  %3308 = vmatpush1.bf16.msra.mxu0 %v8715_v60  ;;  %v2140_v46 = vmax.f32 %v1762_v56, 0.0 }
 0x21b   :  { %v1867_v26 = vadd.f32 %v1866_v1, %v7560_v62  ;;  %v1767_v31 = vpop.f32.mrf.mxu0  ;;  %3309 = vmatprep.subr.bf16.mxu0 %v8721_v30 }
 0x21c   :  { %v8718_v42 = vpop.f32.mrf.mxu1  ;;  %3456 = vmatmul.mubr.bf16.vlgmr.msra.gmra.mxu1 %v8633_v8  ;;  %v2141_v47 = vmax.f32 %v1764_v43, 0.0  ;;  %v2210_v43 = vpack.c.bf16 %v2140_v46, %v2133_v57  ;;  %v1768_v18 = vadd.f32 %v1767_v31, %v7768_v11  ;;  %v2135_v57 = vmax.f32 %v1861_v15, 0.0  ;;  %v8756_v31 = vld [vmem:[#allocation6 + $0x4] ss:$8 sps:$4 sm:$0xff]  }
 0x21d   :  { %v2143_v22 = vmax.f32 %v1867_v26, 0.0  ;;  %6447 = vmatprep.mubr.msk.bf16.mxu1 %vm2432_vm3, %v8705_v2  ;;  %3770 = vmatpush1.bf16.msra.mxu1 %v8649_v12  ;;  %v1769_v56 = vpop.f32.mrf.mxu0  ;;  %v1865_v12 = vadd.f32 %v1864_v52, %v7763_v10 }
 0x21e   :  { %v1872_v1 = vpop.f32.mrf.mxu1  ;;  %3771 = vmatprep.subr.bf16.mxu1 %v8653_v50  ;;  %v8728_v49 = vpack.c.bf16 %v2141_v47, %v2134_v41  ;;  %3310 = vmatpush1.bf16.msra.mxu0 %v8733_v32  ;;  %v8741_v50 = vpack.c.bf16 %v2128_v9, %v2121_v63  ;;  %v8752_v47 = vld [vmem:[#allocation6 + $0x10] ss:$8 sps:$4 sm:$0xff]  }
 0x21f   :  { %v8730_v8 = vpack.c.bf16 %v2143_v22, %v2136_v4  ;;  %v1873_v35 = vadd.f32 %v1872_v1, %v7560_v62  ;;  %v1771_v24 = vpop.f32.mrf.mxu0  ;;  %3311 = vmatprep.subr.bf16.mxu0 %v8738_v59  ;;  %v1770_v22 = vadd.f32 %v1769_v56, %v7781_v14  ;;  %v2142_v56 = vmax.f32 %v1865_v12, 0.0 }
 0x220   :  { %v1874_v26 = vpop.f32.mrf.mxu1  ;;  %v1772_v4 = vadd.f32 %v1771_v24, %v7768_v11  ;;  %6428 = vmatprep.mubr.msk.bf16.mxu0 %vm2432_vm3, %v8728_v49 }
 0x221   :  { %3772 = vmatpush1.bf16.msra.mxu1 %v8665_v34  ;;  %v1773_v52 = vpop.f32.mrf.mxu0  ;;  %3005 = vmatmul.mubr.bf16.gmra.mxu0 %v2210_v43  ;;  %v2150_v41 = vmax.f32 %v1873_v35, 0.0  ;;  %v2148_v35 = vmax.f32 %v1770_v22, 0.0  ;;  %v8771_v22 = vpack.c.bf16 %v2142_v56, %v2135_v57 }
 0x222   :  { %v1876_v46 = vpop.f32.mrf.mxu1  ;;  %3773 = vmatprep.subr.bf16.mxu1 %v8671_v16  ;;  %v1774_v63 = vadd.f32 %v1773_v52, %v7781_v14  ;;  %3312 = vmatpush1.bf16.msra.mxu0 %v8752_v47  ;;  %v2154_v1 = vmax.f32 %v1772_v4, 0.0  ;;  %v2147_v52 = vmax.f32 %v1768_v18, 0.0 }
 0x223   :  { %v1877_v9 = vadd.f32 %v1876_v46, %v7560_v62  ;;  %v1777_v34 = vpop.f32.mrf.mxu0  ;;  %3313 = vmatprep.subr.bf16.mxu0 %v8756_v31 }
 0x224   :  { %v1880_v24 = vpop.f32.mrf.mxu1  ;;  %3466 = vmatmul.mubr.bf16.gmra.mxu1 %v8660_v61  ;;  %v2155_v16 = vmax.f32 %v1774_v63, 0.0  ;;  %v2217_v18 = vpack.c.bf16 %v2154_v1, %v2147_v52 }
 0x225   :  { %v2157_v43 = vmax.f32 %v1877_v9, 0.0  ;;  %6448 = vmatprep.mubr.msk.bf16.mxu1 %vm2432_vm3, %v8741_v50  ;;  %3774 = vmatpush1.bf16.msra.mxu1 %v8684_v3  ;;  %v1779_v15 = vpop.f32.mrf.mxu0  ;;  %v1871_v3 = vadd.f32 %v8718_v42, %v7763_v10  ;;  %v1778_v42 = vadd.f32 %v1777_v34, %v7768_v11  ;;  %v8794_v34 = vld [vmem:[#allocation6 + $0xa4] ss:$8 sps:$4 sm:$0xff]  }
 0x226   :  { %v1882_v12 = vpop.f32.mrf.mxu1  ;;  %3775 = vmatprep.subr.bf16.mxu1 %v8688_v38  ;;  %v8763_v4 = vpack.c.bf16 %v2155_v16, %v2148_v35  ;;  %3314 = vmatpush1.bf16.msra.mxu0 %v8768_v19  ;;  %v1875_v38 = vadd.f32 %v1874_v26, %v7763_v10 }
 0x227   :  { %v8765_v61 = vpack.c.bf16 %v2157_v43, %v2150_v41  ;;  %v1883_v46 = vadd.f32 %v1882_v12, %v7560_v62  ;;  %v1781_v63 = vpop.f32.mrf.mxu0  ;;  %3323 = vmatprep.subr.bf16.mxu0 %v8775_v36  ;;  %v1780_v41 = vadd.f32 %v1779_v15, %v7781_v14  ;;  %v8788_v43 = vld [vmem:[#allocation6 + $0xb0] ss:$8 sps:$4 sm:$0xff]   ;;  %v2149_v52 = vmax.f32 %v1871_v3, 0.0 }
 0x228   :  { %v1884_v9 = vpop.f32.mrf.mxu1  ;;  %v1782_v35 = vadd.f32 %v1781_v63, %v7768_v11  ;;  %6429 = vmatprep.mubr.msk.bf16.mxu0 %vm2432_vm3, %v8763_v4  ;;  %v2161_v3 = vmax.f32 %v1778_v42, 0.0 }
 0x229   :  { %3776 = vmatpush1.bf16.msra.mxu1 %v8698_v7  ;;  %v1783_v57 = vpop.f32.mrf.mxu0  ;;  %3015 = vmatmul.mubr.bf16.gmra.mxu0 %v2217_v18  ;;  %v2164_v1 = vmax.f32 %v1883_v46, 0.0  ;;  %v2162_v46 = vmax.f32 %v1780_v41, 0.0  ;;  %v1881_v41 = vadd.f32 %v1880_v24, %v7763_v10 }
 0x22a   :  { %v1886_v56 = vpop.f32.mrf.mxu1  ;;  %3777 = vmatprep.subr.bf16.mxu1 %v8702_v48  ;;  %v1784_v16 = vadd.f32 %v1783_v57, %v7781_v14  ;;  %3324 = vmatpush2.bf16.msra.mxu0 %v8788_v43  ;;  %v2168_v15 = vmax.f32 %v1782_v35, 0.0  ;;  %v2156_v48 = vmax.f32 %v1875_v38, 0.0  ;;  %v8806_v38 = vld [vmem:[#allocation6 + $0xa0] ss:$8 sps:$4 sm:$0xff]  }
 0x22b   :  { %v1887_v26 = vadd.f32 %v1886_v56, %v7560_v62  ;;  %v1787_v12 = vpop.f32.mrf.mxu0  ;;  %3325 = vmatprep.subr.bf16.mxu0 %v8794_v34 }
 0x22c   :  { %v8791_v7 = vpop.f32.mrf.mxu1  ;;  %3476 = vmatmul.mubr.bf16.gmra.mxu1 %v8693_v39  ;;  %v2169_v18 = vmax.f32 %v1784_v16, 0.0  ;;  %v2224_v16 = vpack.c.bf16 %v2168_v15, %v2161_v3  ;;  %v1788_v24 = vadd.f32 %v1787_v12, %v7768_v11  ;;  %v2163_v3 = vmax.f32 %v1881_v41, 0.0 }
 0x22d   :  { %v2171_v63 = vmax.f32 %v1887_v26, 0.0  ;;  %6449 = vmatprep.mubr.msk.bf16.mxu1 %vm2432_vm3, %v8771_v22  ;;  %3778 = vmatpush1.bf16.msra.mxu1 %v8715_v60  ;;  %v1789_v35 = vpop.f32.mrf.mxu0  ;;  %v1885_v60 = vadd.f32 %v1884_v9, %v7763_v10 }
 0x22e   :  { %v1892_v57 = vpop.f32.mrf.mxu1  ;;  %3779 = vmatprep.subr.bf16.mxu1 %v8721_v30  ;;  %v8801_v56 = vpack.c.bf16 %v2169_v18, %v2162_v46  ;;  %3326 = vmatpush2.bf16.msra.mxu0 %v8806_v38  ;;  %v8814_v30 = vpack.c.bf16 %v2156_v48, %v2149_v52 }
 0x22f   :  { %v8803_v39 = vpack.c.bf16 %v2171_v63, %v2164_v1  ;;  %v1893_v54 = vadd.f32 %v1892_v57, %v7560_v62  ;;  %v1791_v42 = vpop.f32.mrf.mxu0  ;;  %3327 = vmatprep.subr.bf16.mxu0 %v8811_v55  ;;  %v1790_v1 = vadd.f32 %v1789_v35, %v7781_v14  ;;  %v8825_v63 = vld [vmem:[#allocation6 + $0x90] ss:$8 sps:$4 sm:$0xff]   ;;  %v2170_v35 = vmax.f32 %v1885_v60, 0.0 }
 0x230   :  { %v1894_v26 = vpop.f32.mrf.mxu1  ;;  %v1792_v46 = vadd.f32 %v1791_v42, %v7768_v11  ;;  %6430 = vmatprep.mubr.msk.bf16.mxu0 %vm2432_vm3, %v8801_v56  ;;  %v8829_v11 = vld [vmem:[#allocation6 + $0x84] ss:$8 sps:$4 sm:$0xff]  }
 0x231   :  { %3780 = vmatpush1.bf16.msra.mxu1 %v8733_v32  ;;  %v1793_v9 = vpop.f32.mrf.mxu0  ;;  %3025 = vmatmul.mubr.bf16.gmra.mxu0 %v2224_v16  ;;  %v2178_v18 = vmax.f32 %v1893_v54, 0.0  ;;  %v2176_v54 = vmax.f32 %v1790_v1, 0.0 }
 0x232   :  { %v1896_v15 = vpop.f32.mrf.mxu1  ;;  %3781 = vmatprep.subr.bf16.mxu1 %v8738_v59  ;;  %v1794_v52 = vadd.f32 %v1793_v9, %v7781_v14  ;;  %3328 = vmatpush2.bf16.msra.mxu0 %v8825_v63  ;;  %v2182_v57 = vmax.f32 %v1792_v46, 0.0  ;;  %v8843_v9 = vld [vmem:[#allocation6 + $0x80] ss:$8 sps:$4 sm:$0xff]  }
 0x233   :  { %v1897_v48 = vadd.f32 %v1896_v15, %v7560_v62  ;;  %v1933_v32 = vpop.f32.mrf.mxu0  ;;  %3329 = vmatprep.subr.bf16.mxu0 %v8829_v11  ;;  %v2175_v62 = vmax.f32 %v1788_v24, 0.0  ;;  %v1891_v24 = vadd.f32 %v8791_v7, %v7763_v10 }
 0x234   :  { %v2036_v42 = vpop.f32.mrf.mxu1  ;;  %3486 = vmatmul.mubr.bf16.gmra.mxu1 %v8728_v49  ;;  %v2183_v59 = vmax.f32 %v1794_v52, 0.0  ;;  %v1934_v12 = vadd.f32 %v1933_v32, %v7631_v5  ;;  %v1895_v52 = vadd.f32 %v1894_v26, %v7763_v10  ;;  %v8851_v32 = vld [vmem:[#allocation6 + $0x134] ss:$8 sps:$4 sm:$0xff]  }
 0x235   :  { %v2185_v14 = vmax.f32 %v1897_v48, 0.0  ;;  %6450 = vmatprep.mubr.msk.bf16.mxu1 %vm2432_vm3, %v8814_v30  ;;  %3782 = vmatpush1.bf16.msra.mxu1 %v8752_v47  ;;  %v2037_v41 = vadd.f32 %v2036_v42, %v7652_v33  ;;  %v1935_v16 = vpop.f32.mrf.mxu0  ;;  %v8846_v47 = vpack.c.bf16 %v2170_v35, %v2163_v3  ;;  %v2231_v15 = vpack.c.bf16 %v2182_v57, %v2175_v62 }
 0x236   :  { %v6730_v60 = vpop.f32.mrf.mxu1  ;;  %3783 = vmatprep.subr.bf16.mxu1 %v8756_v31  ;;  %v8838_v49 = vpack.c.bf16 %v2183_v59, %v2176_v54  ;;  %v1936_v1 = vadd.f32 %v1935_v16, %v7639_v27  ;;  %3330 = vmatpush2.bf16.msra.mxu0 %v8843_v9  ;;  %v2177_v62 = vmax.f32 %v1891_v24, 0.0 }
 0x237   :  { %v8840_v46 = vpack.c.bf16 %v2185_v14, %v2178_v18  ;;  %v1937_v48 = vpop.f32.mrf.mxu0  ;;  %3645 = vmatprep.subr.bf16.mxu0 %v8851_v32  ;;  %v2095_v18 = vmax.f32 %v1934_v12, 0.0  ;;  %v2097_v42 = vmax.f32 %v2037_v41, 0.0  ;;  %v11199_v14 = vld [vmem:[#allocation14_spill] sm:$0xff]  ;;  %v2184_v12 = vmax.f32 %v1895_v52, 0.0 }
 0x238   :  { %v2039_v31 = vpop.f32.mrf.mxu1  ;;  %v1938_v54 = vadd.f32 %v1937_v48, %v7631_v5  ;;  %6431 = vmatprep.mubr.msk.bf16.mxu0 %vm2432_vm3, %v8838_v49  ;;  %v2096_v10 = vmax.f32 %v1936_v1, 0.0 }
 0x239   :  { %v2040_v59 = vadd.f32 %v2039_v31, %v7652_v33  ;;  %3784 = vmatpush1.bf16.msra.mxu1 %v8768_v19  ;;  %v1939_v7 = vpop.f32.mrf.mxu0  ;;  %3035 = vmatmul.mubr.bf16.gmra.mxu0 %v2231_v15  ;;  %v8877_v31 = vpack.c.bf16 %v2184_v12, %v2177_v62  ;;  %v11204_v12 = vld [vmem:[#allocation17_spill] sm:$0xff] }
 0x23a   :  { %v6731_v3 = vpop.f32.mrf.mxu1  ;;  %3793 = vmatprep.subr.bf16.mxu1 %v8775_v36  ;;  %v2102_v26 = vmax.f32 %v1938_v54, 0.0  ;;  %v1940_v57 = vadd.f32 %v1939_v7, %v7639_v27  ;;  %6439 = vmatprep.mubr.msk.bf16.mxu0 %vm2432_vm3, %v11199_v14 }
 0x23b   :  { %v2104_v35 = vmax.f32 %v2040_v59, 0.0  ;;  %v1943_v41 = vpop.f32.mrf.mxu0 }
 0x23c   :  { %v2044_v16 = vpop.f32.mrf.mxu1  ;;  %3496 = vmatmul.mubr.bf16.gmra.mxu1 %v8763_v4  ;;  %v8864_v19 = vpack.c.bf16 %v2102_v26, %v2095_v18  ;;  %v2103_v15 = vmax.f32 %v1940_v57, 0.0  ;;  %v1944_v36 = vadd.f32 %v1943_v41, %v7631_v5  ;;  %v8887_v41 = vld [vmem:[#allocation6 + $0x130] ss:$8 sps:$4 sm:$0xff]  }
 0x23d   :  { %v8866_v60 = vpack.c.bf16 %v2104_v35, %v2097_v42  ;;  %6451 = vmatprep.mubr.msk.bf16.mxu1 %vm2432_vm3, %v8846_v47  ;;  %3794 = vmatpush2.bf16.msra.mxu1 %v8788_v43  ;;  %v2045_v1 = vadd.f32 %v2044_v16, %v7652_v33  ;;  %v1945_v24 = vpop.f32.mrf.mxu0  ;;  %v11203_v35 = vld [vmem:[#allocation15_spill] sm:$0xff] }
 0x23e   :  { %11200 = vst [vmem:[#allocation14_spill] sm:$0xff] %v8864_v19  ;;  %v6734_v52 = vpop.f32.mrf.mxu1  ;;  %3795 = vmatprep.subr.bf16.mxu1 %v8794_v34  ;;  %v8874_v48 = vpack.c.bf16 %v2103_v15, %v2096_v10  ;;  %v1946_v4 = vadd.f32 %v1945_v24, %v7639_v27  ;;  %v2109_v54 = vmax.f32 %v1944_v36, 0.0  ;;  %v8891_v15 = vld [vmem:[#allocation6 + $0x124] ss:$8 sps:$4 sm:$0xff]  }
 0x23f   :  { %11201 = vst [vmem:[#allocation82_spill] sm:$0xff] %v8866_v60  ;;  %v1947_v18 = vpop.f32.mrf.mxu0  ;;  %v2111_v59 = vmax.f32 %v2045_v1, 0.0  ;;  %v11214_v60 = vld [vmem:[#allocation22_spill] sm:$0xff] }
 0x240   :  { %11202 = vst [vmem:[#allocation83_spill] sm:$0xff] %v8874_v48  ;;  %v2047_v42 = vpop.f32.mrf.mxu1  ;;  %v1948_v7 = vadd.f32 %v1947_v18, %v7631_v5  ;;  %v2110_v34 = vmax.f32 %v1946_v4, 0.0 }
 0x241   :  { %v2048_v43 = vadd.f32 %v2047_v42, %v7652_v33  ;;  %3796 = vmatpush2.bf16.msra.mxu1 %v8806_v38  ;;  %v1949_v3 = vpop.f32.mrf.mxu0  ;;  %3332 = vmatmul.mubr.bf16.vlgmr.msra.gmra.mxu0 %v11203_v35 }
 0x242   :  { %v6735_v26 = vpop.f32.mrf.mxu1  ;;  %3797 = vmatprep.subr.bf16.mxu1 %v8811_v55  ;;  %v2116_v10 = vmax.f32 %v1948_v7, 0.0  ;;  %v1950_v62 = vadd.f32 %v1949_v3, %v7639_v27  ;;  %6440 = vmatprep.mubr.msk.bf16.mxu0 %vm2432_vm3, %v11204_v12 }
 0x243   :  { %v2118_v57 = vmax.f32 %v2048_v43, 0.0  ;;  %3646 = vmatpush1.bf16.msra.mxu0 %v8887_v41  ;;  %v1953_v16 = vpop.f32.mrf.mxu0  ;;  %v8910_v43 = vld [vmem:[#allocation6 + $0x114] ss:$8 sps:$4 sm:$0xff]  }
 0x244   :  { %v2052_v38 = vpop.f32.mrf.mxu1  ;;  %3506 = vmatmul.mubr.bf16.gmra.mxu1 %v8801_v56  ;;  %3647 = vmatprep.subr.bf16.mxu0 %v8891_v15  ;;  %v8894_v55 = vpack.c.bf16 %v2116_v10, %v2109_v54  ;;  %v2117_v1 = vmax.f32 %v1950_v62, 0.0  ;;  %v1954_v24 = vadd.f32 %v1953_v16, %v7631_v5  ;;  %v8907_v54 = vld [vmem:[#allocation6 + $0x120] ss:$8 sps:$4 sm:$0xff]  }
 0x245   :  { %v8896_v36 = vpack.c.bf16 %v2118_v57, %v2111_v59  ;;  %6452 = vmatprep.mubr.msk.bf16.mxu1 %vm2432_vm3, %v8877_v31  ;;  %3798 = vmatpush2.bf16.msra.mxu1 %v8825_v63  ;;  %v2053_v52 = vadd.f32 %v2052_v38, %v7652_v33  ;;  %v1955_v4 = vpop.f32.mrf.mxu0  ;;  %v11208_v10 = vld [vmem:[#allocation18_spill] sm:$0xff] }
 0x246   :  { %11205 = vst [vmem:[#allocation15_spill] sm:$0xff] %v8894_v55  ;;  %v6738_v56 = vpop.f32.mrf.mxu1  ;;  %3799 = vmatprep.subr.bf16.mxu1 %v8829_v11  ;;  %v8904_v18 = vpack.c.bf16 %v2117_v1, %v2110_v34  ;;  %v1956_v42 = vadd.f32 %v1955_v4, %v7639_v27  ;;  %v2123_v63 = vmax.f32 %v1954_v24, 0.0  ;;  %v11209_v1 = vld [vmem:[#allocation20_spill] sm:$0xff] }
 0x247   :  { %11206 = vst [vmem:[#allocation17_spill] sm:$0xff] %v8896_v36  ;;  %3648 = vmatpush1.bf16.msra.mxu0 %v8907_v54  ;;  %v1957_v59 = vpop.f32.mrf.mxu0  ;;  %v2125_v3 = vmax.f32 %v2053_v52, 0.0  ;;  %v8921_v24 = vld [vmem:[#allocation6 + $0x110] ss:$8 sps:$4 sm:$0xff]   ;;  %v8925_v4 = vld [vmem:[#allocation6 + $0x104] ss:$8 sps:$4 sm:$0xff]  }
 0x248   :  { %11207 = vst [vmem:[#allocation84_spill] sm:$0xff] %v8904_v18  ;;  %v2055_v7 = vpop.f32.mrf.mxu1  ;;  %3649 = vmatprep.subr.bf16.mxu0 %v8910_v43  ;;  %v1958_v26 = vadd.f32 %v1957_v59, %v7631_v5  ;;  %v2124_v57 = vmax.f32 %v1956_v42, 0.0 }
 0x249   :  { %v2056_v11 = vadd.f32 %v2055_v7, %v7652_v33  ;;  %3800 = vmatpush2.bf16.msra.mxu1 %v8843_v9  ;;  %v1959_v35 = vpop.f32.mrf.mxu0  ;;  %3342 = vmatmul.mubr.bf16.gmra.mxu0 %v11208_v10  ;;  %v11212_v7 = vld [vmem:[#allocation16_spill] sm:$0xff] }
 0x24a   :  { %v6739_v34 = vpop.f32.mrf.mxu1  ;;  %4115 = vmatprep.subr.bf16.mxu1 %v8851_v32  ;;  %v2130_v62 = vmax.f32 %v1958_v26, 0.0  ;;  %v1960_v38 = vadd.f32 %v1959_v35, %v7639_v27  ;;  %6441 = vmatprep.mubr.msk.bf16.mxu0 %vm2432_vm3, %v11209_v1  ;;  %v8939_v10 = vld [vmem:[#allocation6 + $0x100] ss:$8 sps:$4 sm:$0xff]  }
 0x24b   :  { %v2132_v16 = vmax.f32 %v2056_v11, 0.0  ;;  %3650 = vmatpush1.bf16.msra.mxu0 %v8921_v24  ;;  %v1963_v52 = vpop.f32.mrf.mxu0 }
 0x24c   :  { %v2060_v9 = vpop.f32.mrf.mxu1  ;;  %3516 = vmatmul.mubr.bf16.gmra.mxu1 %v8838_v49  ;;  %3651 = vmatprep.subr.bf16.mxu0 %v8925_v4  ;;  %v8928_v32 = vpack.c.bf16 %v2130_v62, %v2123_v63  ;;  %v2131_v42 = vmax.f32 %v1960_v38, 0.0  ;;  %v1964_v59 = vadd.f32 %v1963_v52, %v7631_v5  ;;  %v8942_v62 = vld [vmem:[#allocation6 + $0xf4] ss:$8 sps:$4 sm:$0xff]  }
 0x24d   :  { %v8930_v56 = vpack.c.bf16 %v2132_v16, %v2125_v3  ;;  %6460 = vmatprep.mubr.msk.bf16.mxu1 %vm2432_vm3, %v11212_v7  ;;  %v2061_v26 = vadd.f32 %v2060_v9, %v7652_v33  ;;  %v1965_v11 = vpop.f32.mrf.mxu0  ;;  %v11226_v7 = vld [vmem:[#allocation29_spill] sm:$0xff] }
 0x24e   :  { %11210 = vst [vmem:[#allocation18_spill] sm:$0xff] %v8928_v32  ;;  %v6742_v35 = vpop.f32.mrf.mxu1  ;;  %v8936_v34 = vpack.c.bf16 %v2131_v42, %v2124_v57  ;;  %v1966_v49 = vadd.f32 %v1965_v11, %v7639_v27  ;;  %v2137_v16 = vmax.f32 %v1964_v59, 0.0 }
 0x24f   :  { %11211 = vst [vmem:[#allocation20_spill] sm:$0xff] %v8930_v56  ;;  %3652 = vmatpush1.bf16.msra.mxu0 %v8939_v10  ;;  %v1967_v63 = vpop.f32.mrf.mxu0  ;;  %v2139_v38 = vmax.f32 %v2061_v26, 0.0 }
 0x250   :  { %11213 = vst [vmem:[#allocation85_spill] sm:$0xff] %v8936_v34  ;;  %v2063_v3 = vpop.f32.mrf.mxu1  ;;  %3653 = vmatprep.subr.bf16.mxu0 %v8942_v62  ;;  %v1968_v52 = vadd.f32 %v1967_v63, %v7631_v5  ;;  %v2138_v11 = vmax.f32 %v1966_v49, 0.0  ;;  %v8951_v34 = vld [vmem:[#allocation6 + $0xf0] ss:$8 sps:$4 sm:$0xff]   ;;  %v8955_v63 = vld [vmem:[#allocation6 + $0xe4] ss:$8 sps:$4 sm:$0xff]  }
 0x251   :  { %v2064_v9 = vadd.f32 %v2063_v3, %v7652_v33  ;;  %v1969_v57 = vpop.f32.mrf.mxu0  ;;  %3352 = vmatmul.mubr.bf16.gmra.mxu0 %v7853_v20 }
 0x252   :  { %v6743_v42 = vpop.f32.mrf.mxu1  ;;  %v2144_v35 = vmax.f32 %v1968_v52, 0.0  ;;  %v1970_v36 = vadd.f32 %v1969_v57, %v7639_v27  ;;  %6442 = vmatprep.mubr.msk.bf16.mxu0 %vm2432_vm3, %v11214_v60 }
 0x253   :  { %v2146_v56 = vmax.f32 %v2064_v9, 0.0  ;;  %3654 = vmatpush1.bf16.msra.mxu0 %v8951_v34  ;;  %v1973_v59 = vpop.f32.mrf.mxu0  ;;  %v11217_v9 = vld [vmem:[#allocation19_spill] sm:$0xff] }
 0x254   :  { %v2068_v26 = vpop.f32.mrf.mxu1  ;;  %3802 = vmatmul.mubr.bf16.vlgmr.msra.gmra.mxu1 %v11199_v14  ;;  %3655 = vmatprep.subr.bf16.mxu0 %v8955_v63  ;;  %v8958_v20 = vpack.c.bf16 %v2144_v35, %v2137_v16  ;;  %v2145_v3 = vmax.f32 %v1970_v36, 0.0  ;;  %v1974_v52 = vadd.f32 %v1973_v59, %v7631_v5  ;;  %v8974_v35 = vld [vmem:[#allocation6 + $0xd4] ss:$8 sps:$4 sm:$0xff]  }
 0x255   :  { %v8960_v49 = vpack.c.bf16 %v2146_v56, %v2139_v38  ;;  %6461 = vmatprep.mubr.msk.bf16.mxu1 %vm2432_vm3, %v11217_v9  ;;  %4116 = vmatpush1.bf16.msra.mxu1 %v8887_v41  ;;  %v2069_v57 = vadd.f32 %v2068_v26, %v7652_v33  ;;  %v1975_v42 = vpop.f32.mrf.mxu0  ;;  %v8971_v56 = vld [vmem:[#allocation6 + $0xe0] ss:$8 sps:$4 sm:$0xff]   ;;  %v11220_v9 = vld [vmem:[#allocation25_spill] sm:$0xff] }
 0x256   :  { %11215 = vst [vmem:[#allocation22_spill] sm:$0xff] %v8958_v20  ;;  %v6746_v14 = vpop.f32.mrf.mxu1  ;;  %4117 = vmatprep.subr.bf16.mxu1 %v8891_v15  ;;  %v8968_v18 = vpack.c.bf16 %v2145_v3, %v2138_v11  ;;  %v1976_v16 = vadd.f32 %v1975_v42, %v7639_v27  ;;  %v2151_v41 = vmax.f32 %v1974_v52, 0.0  ;;  %v11219_v42 = vld [vmem:[#allocation23_spill] sm:$0xff]  ;;  %v8985_v52 = vld [vmem:[#allocation6 + $0xd0] ss:$8 sps:$4 sm:$0xff]  }
 0x257   :  { %11216 = vst [vmem:[#allocation86_spill] sm:$0xff] %v8960_v49  ;;  %3656 = vmatpush1.bf16.msra.mxu0 %v8971_v56  ;;  %v1977_v36 = vpop.f32.mrf.mxu0  ;;  %v2153_v59 = vmax.f32 %v2069_v57, 0.0 }
 0x258   :  { %11218 = vst [vmem:[#allocation87_spill] sm:$0xff] %v8968_v18  ;;  %v2071_v38 = vpop.f32.mrf.mxu1  ;;  %3657 = vmatprep.subr.bf16.mxu0 %v8974_v35  ;;  %v1978_v26 = vadd.f32 %v1977_v36, %v7631_v5  ;;  %v2152_v14 = vmax.f32 %v1976_v16, 0.0  ;;  %v8989_v36 = vld [vmem:[#allocation6 + $0xc4] ss:$8 sps:$4 sm:$0xff]  }
 0x259   :  { %v2072_v15 = vadd.f32 %v2071_v38, %v7652_v33  ;;  %4118 = vmatpush1.bf16.msra.mxu1 %v8907_v54  ;;  %v1979_v11 = vpop.f32.mrf.mxu0  ;;  %3362 = vmatmul.mubr.bf16.gmra.mxu0 %v11219_v42 }
 0x25a   :  { %v6747_v3 = vpop.f32.mrf.mxu1  ;;  %4119 = vmatprep.subr.bf16.mxu1 %v8910_v43  ;;  %v2158_v49 = vmax.f32 %v1978_v26, 0.0  ;;  %v1980_v48 = vadd.f32 %v1979_v11, %v7639_v27  ;;  %6443 = vmatprep.mubr.msk.bf16.mxu0 %vm2432_vm3, %v11220_v9 }
 0x25b   :  { %v2160_v18 = vmax.f32 %v2072_v15, 0.0  ;;  %3658 = vmatpush1.bf16.msra.mxu0 %v8985_v52  ;;  %v1983_v57 = vpop.f32.mrf.mxu0  ;;  %v11223_v15 = vld [vmem:[#allocation21_spill] sm:$0xff] }
 0x25c   :  { %v2076_v54 = vpop.f32.mrf.mxu1  ;;  %3812 = vmatmul.mubr.bf16.gmra.mxu1 %v11204_v12  ;;  %3659 = vmatprep.subr.bf16.mxu0 %v8989_v36  ;;  %v8992_v43 = vpack.c.bf16 %v2158_v49, %v2151_v41  ;;  %v2159_v38 = vmax.f32 %v1980_v48, 0.0  ;;  %v1984_v26 = vadd.f32 %v1983_v57, %v7631_v5 }
 0x25d   :  { %v8994_v16 = vpack.c.bf16 %v2160_v18, %v2153_v59  ;;  %6462 = vmatprep.mubr.msk.bf16.mxu1 %vm2432_vm3, %v11223_v15  ;;  %4120 = vmatpush1.bf16.msra.mxu1 %v8921_v24  ;;  %v2077_v11 = vadd.f32 %v2076_v54, %v7652_v33  ;;  %v1985_v3 = vpop.f32.mrf.mxu0  ;;  %v9005_v18 = vld [vmem:[#allocation6 + $0xc0] ss:$8 sps:$4 sm:$0xff]   ;;  %v9008_v59 = vld [vmem:[#allocation6 + $0x174] ss:$8 sps:$4 sm:$0xff]  }
 0x25e   :  { %11221 = vst [vmem:[#allocation23_spill] sm:$0xff] %v8992_v43  ;;  %v6750_v12 = vpop.f32.mrf.mxu1  ;;  %4121 = vmatprep.subr.bf16.mxu1 %v8925_v4  ;;  %v9002_v42 = vpack.c.bf16 %v2159_v38, %v2152_v14  ;;  %v1986_v49 = vadd.f32 %v1985_v3, %v7639_v27  ;;  %v2165_v24 = vmax.f32 %v1984_v26, 0.0  ;;  %v11225_v3 = vld [vmem:[#allocation26_spill] sm:$0xff] }
 0x25f   :  { %11222 = vst [vmem:[#allocation25_spill] sm:$0xff] %v8994_v16  ;;  %3660 = vmatpush1.bf16.msra.mxu0 %v9005_v18  ;;  %v1987_v48 = vpop.f32.mrf.mxu0  ;;  %v2167_v57 = vmax.f32 %v2077_v11, 0.0  ;;  %v9019_v26 = vld [vmem:[#allocation6 + $0x170] ss:$8 sps:$4 sm:$0xff]  }
 0x260   :  { %11224 = vst [vmem:[#allocation88_spill] sm:$0xff] %v9002_v42  ;;  %v2079_v41 = vpop.f32.mrf.mxu1  ;;  %3669 = vmatprep.subr.bf16.mxu0 %v9008_v59  ;;  %v1988_v54 = vadd.f32 %v1987_v48, %v7631_v5  ;;  %v2166_v12 = vmax.f32 %v1986_v49, 0.0  ;;  %v9023_v48 = vld [vmem:[#allocation6 + $0x164] ss:$8 sps:$4 sm:$0xff]  }
 0x261   :  { %v2080_v4 = vadd.f32 %v2079_v41, %v7652_v33  ;;  %4122 = vmatpush1.bf16.msra.mxu1 %v8939_v10  ;;  %v1989_v14 = vpop.f32.mrf.mxu0  ;;  %3372 = vmatmul.mubr.bf16.gmra.mxu0 %v11225_v3 }
 0x262   :  { %v6751_v38 = vpop.f32.mrf.mxu1  ;;  %4123 = vmatprep.subr.bf16.mxu1 %v8942_v62  ;;  %v2172_v16 = vmax.f32 %v1988_v54, 0.0  ;;  %v1990_v15 = vadd.f32 %v1989_v14, %v7639_v27  ;;  %6444 = vmatprep.mubr.msk.bf16.mxu0 %vm2432_vm3, %v11226_v7 }
 0x263   :  { %v2174_v42 = vmax.f32 %v2080_v4, 0.0  ;;  %3670 = vmatpush2.bf16.msra.mxu0 %v9019_v26  ;;  %v1993_v11 = vpop.f32.mrf.mxu0  ;;  %v11229_v4 = vld [vmem:[#allocation24_spill] sm:$0xff] }
 0x264   :  { %v2084_v10 = vpop.f32.mrf.mxu1  ;;  %3822 = vmatmul.mubr.bf16.gmra.mxu1 %v11209_v1  ;;  %3671 = vmatprep.subr.bf16.mxu0 %v9023_v48  ;;  %v9026_v62 = vpack.c.bf16 %v2172_v16, %v2165_v24  ;;  %v2173_v41 = vmax.f32 %v1990_v15, 0.0  ;;  %v1994_v54 = vadd.f32 %v1993_v11, %v7631_v5 }
 0x265   :  { %v9028_v49 = vpack.c.bf16 %v2174_v42, %v2167_v57  ;;  %6463 = vmatprep.mubr.msk.bf16.mxu1 %vm2432_vm3, %v11229_v4  ;;  %4124 = vmatpush1.bf16.msra.mxu1 %v8951_v34  ;;  %v2085_v14 = vadd.f32 %v2084_v10, %v7652_v33  ;;  %v1995_v38 = vpop.f32.mrf.mxu0  ;;  %v9039_v42 = vld [vmem:[#allocation6 + $0x160] ss:$8 sps:$4 sm:$0xff]   ;;  %v9042_v57 = vld [vmem:[#allocation6 + $0x154] ss:$8 sps:$4 sm:$0xff]  }
 0x266   :  { %11227 = vst [vmem:[#allocation26_spill] sm:$0xff] %v9026_v62  ;;  %v6754_v1 = vpop.f32.mrf.mxu1  ;;  %4125 = vmatprep.subr.bf16.mxu1 %v8955_v63  ;;  %v9036_v3 = vpack.c.bf16 %v2173_v41, %v2166_v12  ;;  %v1996_v16 = vadd.f32 %v1995_v38, %v7639_v27  ;;  %v2179_v34 = vmax.f32 %v1994_v54, 0.0  ;;  %v11231_v4 = vld [vmem:[#allocation32_spill] sm:$0xff] }
 0x267   :  { %11228 = vst [vmem:[#allocation29_spill] sm:$0xff] %v9028_v49  ;;  %3672 = vmatpush2.bf16.msra.mxu0 %v9039_v42  ;;  %v1997_v15 = vpop.f32.mrf.mxu0  ;;  %v2181_v11 = vmax.f32 %v2085_v14, 0.0  ;;  %v7016_v54 = vld [vmem:[#allocation6 + $0x150] ss:$8 sps:$4 sm:$0xff]   ;;  %v7029_v62 = vld [vmem:[#allocation6 + $0x1a4] ss:$8 sps:$4 sm:$0xff]  }
 0x268   :  { %11230 = vst [vmem:[#allocation89_spill] sm:$0xff] %v9036_v3  ;;  %v2087_v24 = vpop.f32.mrf.mxu1  ;;  %3673 = vmatprep.subr.bf16.mxu0 %v9042_v57  ;;  %v1998_v10 = vadd.f32 %v1997_v15, %v7631_v5  ;;  %v2180_v38 = vmax.f32 %v1996_v16, 0.0  ;;  %v11234_v15 = vld [vmem:[#allocation27_spill] sm:$0xff] }
 0x269   :  { %v2088_v63 = vadd.f32 %v2087_v24, %v7652_v33  ;;  %4126 = vmatpush1.bf16.msra.mxu1 %v8971_v56  ;;  %v1999_v12 = vpop.f32.mrf.mxu0  ;;  %3382 = vmatmul.mubr.bf16.gmra.mxu0 %v7946_v13  ;;  %v7017_v56 = vld [vmem:[#allocation6 + $0x144] ss:$8 sps:$4 sm:$0xff]  }
 0x26a   :  { %v6755_v41 = vpop.f32.mrf.mxu1  ;;  %4127 = vmatprep.subr.bf16.mxu1 %v8974_v35  ;;  %v2186_v1 = vmax.f32 %v1998_v10, 0.0  ;;  %v2000_v3 = vadd.f32 %v1999_v12, %v7639_v27  ;;  %6445 = vmatprep.mubr.msk.bf16.mxu0 %vm2432_vm3, %v11231_v4 }
 0x26b   :  { %v2188_v49 = vmax.f32 %v2088_v63, 0.0  ;;  %3674 = vmatpush2.bf16.msra.mxu0 %v7016_v54  ;;  %v2488_v5 = vpop.f32.mrf.mxu0  ;;  %v11236_v41 = vld [vmem:[#allocation33_spill] sm:$0xff] }
 0x26c   :  { %v2732_v33 = vpop.f32.mrf.mxu1  ;;  %3832 = vmatmul.mubr.bf16.gmra.mxu1 %v11214_v60  ;;  %3675 = vmatprep.subr.bf16.mxu0 %v7017_v56  ;;  %v9054_v14 = vpack.c.bf16 %v2186_v1, %v2179_v34  ;;  %v2187_v35 = vmax.f32 %v2000_v3, 0.0  ;;  %v7018_v34 = vld [vmem:[#allocation6 + $0x140] ss:$8 sps:$4 sm:$0xff]   ;;  %v7019_v3 = vld [vmem:[#allocation6 + $0x1f4] ss:$8 sps:$4 sm:$0xff]  }
 0x26d   :  { %v9056_v13 = vpack.c.bf16 %v2188_v49, %v2181_v11  ;;  %v9058_v16 = vadd.f32 %v2732_v33, %v2488_v5  ;;  %6464 = vmatprep.mubr.msk.bf16.mxu1 %vm2432_vm3, %v11234_v15  ;;  %4128 = vmatpush1.bf16.msra.mxu1 %v8985_v52  ;;  %v2490_v27 = vpop.f32.mrf.mxu0 }
 0x26e   :  { %11232 = vst [vmem:[#allocation32_spill] sm:$0xff] %v9054_v14  ;;  %v2734_v24 = vpop.f32.mrf.mxu1  ;;  %4129 = vmatprep.subr.bf16.mxu1 %v8989_v36  ;;  %v9064_v10 = vpack.c.bf16 %v2187_v35, %v2180_v38  ;;  %v11237_v38 = vld [vmem:[#allocation60_spill] sm:$0xff]  ;;  %v11238_v35 = vld [vmem:[#allocation30_spill] sm:$0xff] }
 0x26f   :  { %11233 = vst [vmem:[#allocation90_spill] sm:$0xff] %v9056_v13  ;;  %v9066_v60 = vadd.f32 %v2734_v24, %v2490_v27  ;;  %3676 = vmatpush2.bf16.msra.mxu0 %v7018_v34  ;;  %v2492_v49 = vpop.f32.mrf.mxu0  ;;  %v11241_v13 = vld [vmem:[#allocation68_spill] sm:$0xff] }
 0x270   :  { %11235 = vst [vmem:[#allocation91_spill] sm:$0xff] %v9064_v10  ;;  %v2736_v11 = vpop.f32.mrf.mxu1  ;;  %3893 = vmatprep.subr.bf16.mxu0 %v7019_v3  ;;  %v7025_v10 = vld [vmem:[#allocation6 + $0x1c4] ss:$8 sps:$4 sm:$0xff]  }
 0x271   :  { %v9068_v63 = vadd.f32 %v2736_v11, %v2492_v49  ;;  %4130 = vmatpush1.bf16.msra.mxu1 %v9005_v18  ;;  %v2494_v12 = vpop.f32.mrf.mxu0  ;;  %3392 = vmatmul.mubr.bf16.gmra.mxu0 %v11236_v41 }
 0x272   :  { %v2738_v52 = vpop.f32.mrf.mxu1  ;;  %4139 = vmatprep.subr.bf16.mxu1 %v9008_v59  ;;  %6453 = vmatprep.mubr.msk.bf16.mxu0 %vm2432_vm3, %v11237_v38 }
 0x273   :  { %v9073_v36 = vadd.f32 %v2738_v52, %v2494_v12  ;;  %v2498_v1 = vpop.f32.mrf.mxu0 }
 0x274   :  { %v2742_v5 = vpop.f32.mrf.mxu1  ;;  %3842 = vmatmul.mubr.bf16.gmra.mxu1 %v11220_v9 }
 0x275   :  { %v9078_v33 = vadd.f32 %v2742_v5, %v2498_v1  ;;  %6465 = vmatprep.mubr.msk.bf16.mxu1 %vm2432_vm3, %v11238_v35  ;;  %4140 = vmatpush2.bf16.msra.mxu1 %v9019_v26  ;;  %v2500_v18 = vpop.f32.mrf.mxu0  ;;  %v11239_v26 = vld [vmem:[#allocation65_spill] sm:$0xff]  ;;  %v7021_v5 = vld [vmem:[#allocation6 + $0x1e4] ss:$8 sps:$4 sm:$0xff]  }
 0x276   :  { %v2744_v27 = vpop.f32.mrf.mxu1  ;;  %4141 = vmatprep.subr.bf16.mxu1 %v9023_v48  ;;  %v7020_v48 = vld [vmem:[#allocation6 + $0x1f0] ss:$8 sps:$4 sm:$0xff]   ;;  %v7027_v35 = vld [vmem:[#allocation6 + $0x1b4] ss:$8 sps:$4 sm:$0xff]  }
 0x277   :  { %v9084_v59 = vadd.f32 %v2744_v27, %v2500_v18  ;;  %v2502_v24 = vpop.f32.mrf.mxu0  ;;  %v11240_v18 = vld [vmem:[#allocation34_spill] sm:$0xff] }
 0x278   :  { %v2746_v49 = vpop.f32.mrf.mxu1 }
 0x279   :  { %v9086_v11 = vadd.f32 %v2746_v49, %v2502_v24  ;;  %4142 = vmatpush2.bf16.msra.mxu1 %v9039_v42  ;;  %v2504_v9 = vpop.f32.mrf.mxu0  ;;  %3678 = vmatmul.mubr.bf16.vlgmr.msra.gmra.mxu0 %v11182_v6  ;;  %v7022_v24 = vld [vmem:[#allocation6 + $0x1e0] ss:$8 sps:$4 sm:$0xff]  }
 0x27a   :  { %v2748_v12 = vpop.f32.mrf.mxu1  ;;  %4143 = vmatprep.subr.bf16.mxu1 %v9042_v57  ;;  %6454 = vmatprep.mubr.msk.bf16.mxu0 %vm2432_vm3, %v11239_v26 }
 0x27b   :  { %v9091_v52 = vadd.f32 %v2748_v12, %v2504_v9  ;;  %3894 = vmatpush1.bf16.msra.mxu0 %v7020_v48  ;;  %v2508_v41 = vpop.f32.mrf.mxu0  ;;  %v7023_v12 = vld [vmem:[#allocation6 + $0x1d4] ss:$8 sps:$4 sm:$0xff]  }
 0x27c   :  { %v2752_v1 = vpop.f32.mrf.mxu1  ;;  %3852 = vmatmul.mubr.bf16.gmra.mxu1 %v11226_v7  ;;  %3895 = vmatprep.subr.bf16.mxu0 %v7021_v5 }
 0x27d   :  { %v9096_v42 = vadd.f32 %v2752_v1, %v2508_v41  ;;  %6466 = vmatprep.mubr.msk.bf16.mxu1 %vm2432_vm3, %v11240_v18  ;;  %4144 = vmatpush2.bf16.msra.mxu1 %v7016_v54  ;;  %v2510_v6 = vpop.f32.mrf.mxu0 }
 0x27e   :  { %v2754_v57 = vpop.f32.mrf.mxu1  ;;  %4145 = vmatprep.subr.bf16.mxu1 %v7017_v56  ;;  %v7024_v56 = vld [vmem:[#allocation6 + $0x1d0] ss:$8 sps:$4 sm:$0xff]  }
 0x27f   :  { %v9100_v27 = vadd.f32 %v2754_v57, %v2510_v6  ;;  %3896 = vmatpush1.bf16.msra.mxu0 %v7022_v24  ;;  %v2512_v49 = vpop.f32.mrf.mxu0 }
 0x280   :  { %v2756_v9 = vpop.f32.mrf.mxu1  ;;  %3897 = vmatprep.subr.bf16.mxu0 %v7023_v12 }
 0x281   :  { %v9102_v7 = vadd.f32 %v2756_v9, %v2512_v49  ;;  %4146 = vmatpush2.bf16.msra.mxu1 %v7018_v34  ;;  %v2514_v41 = vpop.f32.mrf.mxu0  ;;  %3688 = vmatmul.mubr.bf16.gmra.mxu0 %v11187_v21  ;;  %v11243_v34 = vld [vmem:[#allocation73_spill] sm:$0xff] }
 0x282   :  { %v2758_v1 = vpop.f32.mrf.mxu1  ;;  %4363 = vmatprep.subr.bf16.mxu1 %v7019_v3  ;;  %6455 = vmatprep.mubr.msk.bf16.mxu0 %vm2432_vm3, %v11241_v13 }
 0x283   :  { %v9105_v54 = vadd.f32 %v2758_v1, %v2514_v41  ;;  %3898 = vmatpush1.bf16.msra.mxu0 %v7024_v56  ;;  %v2518_v6 = vpop.f32.mrf.mxu0  ;;  %v7026_v41 = vld [vmem:[#allocation6 + $0x1c0] ss:$8 sps:$4 sm:$0xff]  }
 0x284   :  { %v2762_v57 = vpop.f32.mrf.mxu1  ;;  %3862 = vmatmul.mubr.bf16.gmra.mxu1 %v11231_v4  ;;  %3899 = vmatprep.subr.bf16.mxu0 %v7025_v10 }
 0x285   :  { %v9110_v49 = vadd.f32 %v2762_v57, %v2518_v6  ;;  %6474 = vmatprep.mubr.msk.bf16.mxu1 %vm2432_vm3, %v11243_v34  ;;  %v2520_v21 = vpop.f32.mrf.mxu0  ;;  %v11247_v57 = vld [vmem:[#allocation69_spill] sm:$0xff] }
 0x286   :  { %v2764_v3 = vpop.f32.mrf.mxu1  ;;  %v9123_v34 = vld [vmem:[#allocation6 + $0x1b0] ss:$8 sps:$4 sm:$0xff]  }
 0x287   :  { %11242 = vst [vmem:[#allocation33_spill] sm:$0xff] %v9110_v49  ;;  %v9114_v9 = vadd.f32 %v2764_v3, %v2520_v21  ;;  %3900 = vmatpush1.bf16.msra.mxu0 %v7026_v41  ;;  %v2522_v1 = vpop.f32.mrf.mxu0 }
 0x288   :  { %v2766_v18 = vpop.f32.mrf.mxu1  ;;  %3901 = vmatprep.subr.bf16.mxu0 %v7027_v35 }
 0x289   :  { %11244 = vst [vmem:[#allocation60_spill] sm:$0xff] %v9114_v9  ;;  %v9116_v15 = vadd.f32 %v2766_v18, %v2522_v1  ;;  %v2524_v4 = vpop.f32.mrf.mxu0  ;;  %3698 = vmatmul.mubr.bf16.gmra.mxu0 %v11191_v0  ;;  %v11248_v1 = vld [vmem:[#allocation57_spill] sm:$0xff] }
 0x28a   :  { %v2768_v14 = vpop.f32.mrf.mxu1  ;;  %6456 = vmatprep.mubr.msk.bf16.mxu0 %vm2432_vm3, %v11247_v57 }
 0x28b   :  { %11245 = vst [vmem:[#allocation65_spill] sm:$0xff] %v9116_v15  ;;  %v9119_v6 = vadd.f32 %v2768_v14, %v2524_v4  ;;  %3902 = vmatpush1.bf16.msra.mxu0 %v9123_v34  ;;  %v2528_v21 = vpop.f32.mrf.mxu0 }
 0x28c   :  { %v2772_v3 = vpop.f32.mrf.mxu1  ;;  %4148 = vmatmul.mubr.bf16.vlgmr.msra.gmra.mxu1 %v11237_v38  ;;  %3903 = vmatprep.subr.bf16.mxu0 %v7029_v62  ;;  %v7031_v38 = vld [vmem:[#allocation6 + $0x194] ss:$8 sps:$4 sm:$0xff]  }
 0x28d   :  { %11246 = vst [vmem:[#allocation68_spill] sm:$0xff] %v9119_v6  ;;  %v9127_v18 = vadd.f32 %v2772_v3, %v2528_v21  ;;  %6475 = vmatprep.mubr.msk.bf16.mxu1 %vm2432_vm3, %v11248_v1  ;;  %4364 = vmatpush1.bf16.msra.mxu1 %v7020_v48  ;;  %v2530_v0 = vpop.f32.mrf.mxu0  ;;  %v9133_v6 = vld [vmem:[#allocation6 + $0x1a0] ss:$8 sps:$4 sm:$0xff]  }
 0x28e   :  { %v2774_v14 = vpop.f32.mrf.mxu1  ;;  %4365 = vmatprep.subr.bf16.mxu1 %v7021_v5  ;;  %v11252_v5 = vld [vmem:[#allocation70_spill] sm:$0xff] }
 0x28f   :  { %v9131_v4 = vadd.f32 %v2774_v14, %v2530_v0  ;;  %3904 = vmatpush1.bf16.msra.mxu0 %v9133_v6  ;;  %v2532_v15 = vpop.f32.mrf.mxu0  ;;  %v9143_v0 = vld [vmem:[#allocation6 + $0x190] ss:$8 sps:$4 sm:$0xff]  }
 0x290   :  { %v2776_v9 = vpop.f32.mrf.mxu1  ;;  %3905 = vmatprep.subr.bf16.mxu0 %v7031_v38 }
 0x291   :  { %11249 = vst [vmem:[#allocation69_spill] sm:$0xff] %v9131_v4  ;;  %v9136_v49 = vadd.f32 %v2776_v9, %v2532_v15  ;;  %4366 = vmatpush1.bf16.msra.mxu1 %v7022_v24  ;;  %v2534_v21 = vpop.f32.mrf.mxu0  ;;  %3708 = vmatmul.mubr.bf16.gmra.mxu0 %v8300_v40  ;;  %v7033_v15 = vld [vmem:[#allocation6 + $0x184] ss:$8 sps:$4 sm:$0xff]   ;;  %v7035_v4 = vld [vmem:[#allocation6 + $0x234] ss:$8 sps:$4 sm:$0xff]  }
 0x292   :  { %v2778_v3 = vpop.f32.mrf.mxu1  ;;  %4367 = vmatprep.subr.bf16.mxu1 %v7023_v12  ;;  %6457 = vmatprep.mubr.msk.bf16.mxu0 %vm2432_vm3, %v11252_v5  ;;  %v11253_v9 = vld [vmem:[#allocation28_spill] sm:$0xff] }
 0x293   :  { %11250 = vst [vmem:[#allocation92_spill] sm:$0xff] %v9136_v49  ;;  %v9139_v48 = vadd.f32 %v2778_v3, %v2534_v21  ;;  %3906 = vmatpush1.bf16.msra.mxu0 %v9143_v0  ;;  %v2538_v14 = vpop.f32.mrf.mxu0  ;;  %v7034_v3 = vld [vmem:[#allocation6 + $0x180] ss:$8 sps:$4 sm:$0xff]  }
 0x294   :  { %v2782_v1 = vpop.f32.mrf.mxu1  ;;  %4158 = vmatmul.mubr.bf16.gmra.mxu1 %v11239_v26  ;;  %3907 = vmatprep.subr.bf16.mxu0 %v7033_v15 }
 0x295   :  { %11251 = vst [vmem:[#allocation93_spill] sm:$0xff] %v9139_v48  ;;  %v9147_v24 = vadd.f32 %v2782_v1, %v2538_v14  ;;  %6476 = vmatprep.mubr.msk.bf16.mxu1 %vm2432_vm3, %v11253_v9  ;;  %4368 = vmatpush1.bf16.msra.mxu1 %v7024_v56  ;;  %v2540_v40 = vpop.f32.mrf.mxu0  ;;  %v11256_v9 = vld [vmem:[#allocation71_spill] sm:$0xff] }
 0x296   :  { %v2784_v12 = vpop.f32.mrf.mxu1  ;;  %4369 = vmatprep.subr.bf16.mxu1 %v7025_v10  ;;  %v7036_v10 = vld [vmem:[#allocation6 + $0x230] ss:$8 sps:$4 sm:$0xff]  }
 0x297   :  { %v9151_v21 = vadd.f32 %v2784_v12, %v2540_v40  ;;  %3908 = vmatpush1.bf16.msra.mxu0 %v7034_v3  ;;  %v2542_v48 = vpop.f32.mrf.mxu0 }
 0x298   :  { %v2786_v49 = vpop.f32.mrf.mxu1  ;;  %3917 = vmatprep.subr.bf16.mxu0 %v7035_v4 }
 0x299   :  { %11254 = vst [vmem:[#allocation70_spill] sm:$0xff] %v9151_v21  ;;  %v9153_v26 = vadd.f32 %v2786_v49, %v2542_v48  ;;  %4370 = vmatpush1.bf16.msra.mxu1 %v7026_v41  ;;  %v2544_v1 = vpop.f32.mrf.mxu0  ;;  %3718 = vmatmul.mubr.bf16.gmra.mxu0 %v8344_v29  ;;  %v7037_v21 = vld [vmem:[#allocation6 + $0x224] ss:$8 sps:$4 sm:$0xff]   ;;  %v7038_v48 = vld [vmem:[#allocation6 + $0x220] ss:$8 sps:$4 sm:$0xff]  }
 0x29a   :  { %v2788_v14 = vpop.f32.mrf.mxu1  ;;  %4371 = vmatprep.subr.bf16.mxu1 %v7027_v35  ;;  %6458 = vmatprep.mubr.msk.bf16.mxu0 %vm2432_vm3, %v11256_v9 }
 0x29b   :  { %v9156_v56 = vadd.f32 %v2788_v14, %v2544_v1  ;;  %3918 = vmatpush2.bf16.msra.mxu0 %v7036_v10  ;;  %v2548_v40 = vpop.f32.mrf.mxu0 }
 0x29c   :  { %v2792_v12 = vpop.f32.mrf.mxu1  ;;  %4168 = vmatmul.mubr.bf16.gmra.mxu1 %v11241_v13  ;;  %3919 = vmatprep.subr.bf16.mxu0 %v7037_v21 }
 0x29d   :  { %11255 = vst [vmem:[#allocation94_spill] sm:$0xff] %v9156_v56  ;;  %v9161_v49 = vadd.f32 %v2792_v12, %v2548_v40  ;;  %6477 = vmatprep.mubr.msk.bf16.mxu1 %vm2432_vm3, %v8553_v51  ;;  %4372 = vmatpush1.bf16.msra.mxu1 %v9123_v34  ;;  %v2550_v29 = vpop.f32.mrf.mxu0  ;;  %v7039_v56 = vld [vmem:[#allocation6 + $0x214] ss:$8 sps:$4 sm:$0xff]   ;;  %v9246_v51 = vld [vmem:[#allocation6 + $0x20] ss:$8 sps:$4 sm:$0xff]  }
 0x29e   :  { %v2794_v35 = vpop.f32.mrf.mxu1  ;;  %4373 = vmatprep.subr.bf16.mxu1 %v7029_v62  ;;  %v11257_v62 = vld [vmem:[#allocation72_spill] sm:$0xff] }
 0x29f   :  { %v9166_v41 = vadd.f32 %v2794_v35, %v2550_v29  ;;  %3920 = vmatpush2.bf16.msra.mxu0 %v7038_v48  ;;  %v2552_v1 = vpop.f32.mrf.mxu0  ;;  %v7040_v29 = vld [vmem:[#allocation6 + $0x210] ss:$8 sps:$4 sm:$0xff]  }
 0x2a0   :  { %v2796_v14 = vpop.f32.mrf.mxu1  ;;  %3921 = vmatprep.subr.bf16.mxu0 %v7039_v56 }
 0x2a1   :  { %v9168_v13 = vadd.f32 %v2796_v14, %v2552_v1  ;;  %4374 = vmatpush1.bf16.msra.mxu1 %v9133_v6  ;;  %v2554_v40 = vpop.f32.mrf.mxu0  ;;  %3728 = vmatmul.mubr.bf16.gmra.mxu0 %v8388_v44  ;;  %v7041_v1 = vld [vmem:[#allocation6 + $0x204] ss:$8 sps:$4 sm:$0xff]   ;;  %v7042_v6 = vld [vmem:[#allocation6 + $0x200] ss:$8 sps:$4 sm:$0xff]   ;;  %v7043_v14 = vld [vmem:[#allocation6 + $0x74] ss:$8 sps:$4 sm:$0xff]  }
 0x2a2   :  { %v2798_v12 = vpop.f32.mrf.mxu1  ;;  %4375 = vmatprep.subr.bf16.mxu1 %v7031_v38  ;;  %6459 = vmatprep.mubr.msk.bf16.mxu0 %vm2432_vm3, %v11257_v62 }
 0x2a3   :  { %v9172_v34 = vadd.f32 %v2798_v12, %v2554_v40  ;;  %3922 = vmatpush2.bf16.msra.mxu0 %v7040_v29 }
 0x2a4   :  { %v9176_v35 = vpop.f32.mrf.mxu1  ;;  %4178 = vmatmul.mubr.bf16.gmra.mxu1 %v11247_v57  ;;  %3923 = vmatprep.subr.bf16.mxu0 %v7041_v1 }
 0x2a5   :  { %6478 = vmatprep.mubr.msk.bf16.mxu1 %vm2432_vm3, %v8572_v58  ;;  %4376 = vmatpush1.bf16.msra.mxu1 %v9143_v0 }
 0x2a6   :  { %v9182_v44 = vpop.f32.mrf.mxu1  ;;  %4377 = vmatprep.subr.bf16.mxu1 %v7033_v15 }
 0x2a7   :  { %3924 = vmatpush2.bf16.msra.mxu0 %v7042_v6 }
 0x2a8   :  { %v9184_v38 = vpop.f32.mrf.mxu1  ;;  %4239 = vmatprep.subr.bf16.mxu0 %v7043_v14 }
 0x2a9   :  { %4378 = vmatpush1.bf16.msra.mxu1 %v7034_v3  ;;  %3738 = vmatmul.mubr.bf16.gmra.mxu0 %v8430_v37  ;;  %v7044_v37 = vld [vmem:[#allocation6 + $0x70] ss:$8 sps:$4 sm:$0xff]  }
 0x2aa   :  { %v9186_v40 = vpop.f32.mrf.mxu1  ;;  %4387 = vmatprep.subr.bf16.mxu1 %v7035_v4  ;;  %6467 = vmatprep.mubr.msk.bf16.mxu0 %vm2432_vm3, %v8635_v23 }
 0x2ac   :  { %v9191_v57 = vpop.f32.mrf.mxu1  ;;  %4188 = vmatmul.mubr.bf16.gmra.mxu1 %v11252_v5  ;;  %v7045_v5 = vld [vmem:[#allocation6 + $0x64] ss:$8 sps:$4 sm:$0xff]  }
 0x2ad   :  { %6479 = vmatprep.mubr.msk.bf16.mxu1 %vm2432_vm3, %v8591_v25  ;;  %4388 = vmatpush2.bf16.msra.mxu1 %v7036_v10  ;;  %v7047_v10 = vld [vmem:[#allocation6 + $0x54] ss:$8 sps:$4 sm:$0xff]   ;;  %v9239_v25 = vld [vmem:[#allocation6 + $0x24] ss:$8 sps:$4 sm:$0xff]  }
 0x2ae   :  { %v9196_v0 = vpop.f32.mrf.mxu1  ;;  %4389 = vmatprep.subr.bf16.mxu1 %v7037_v21 }
 0x2b0   :  { %v9198_v15 = vpop.f32.mrf.mxu1 }
 0x2b1   :  { %4390 = vmatpush2.bf16.msra.mxu1 %v7038_v48  ;;  %3926 = vmatmul.mubr.bf16.vlgmr.msra.gmra.mxu0 %v8668_v53  ;;  %v7046_v53 = vld [vmem:[#allocation6 + $0x60] ss:$8 sps:$4 sm:$0xff]  }
 0x2b2   :  { %v9200_v3 = vpop.f32.mrf.mxu1  ;;  %4391 = vmatprep.subr.bf16.mxu1 %v7039_v56  ;;  %6468 = vmatprep.mubr.msk.bf16.mxu0 %vm2432_vm3, %v8662_v28 }
 0x2b3   :  { %4240 = vmatpush1.bf16.msra.mxu0 %v7044_v37 }
 0x2b4   :  { %v9205_v4 = vpop.f32.mrf.mxu1  ;;  %4198 = vmatmul.mubr.bf16.gmra.mxu1 %v11256_v9  ;;  %4241 = vmatprep.subr.bf16.mxu0 %v7045_v5  ;;  %v7048_v9 = vld [vmem:[#allocation6 + $0x50] ss:$8 sps:$4 sm:$0xff]  }
 0x2b5   :  { %6480 = vmatprep.mubr.msk.bf16.mxu1 %vm2432_vm3, %v8610_v17  ;;  %4392 = vmatpush2.bf16.msra.mxu1 %v7040_v29  ;;  %v7049_v29 = vld [vmem:[#allocation6 + $0x44] ss:$8 sps:$4 sm:$0xff]  }
 0x2b6   :  { %v9210_v21 = vpop.f32.mrf.mxu1  ;;  %4393 = vmatprep.subr.bf16.mxu1 %v7041_v1 }
 0x2b7   :  { %4242 = vmatpush1.bf16.msra.mxu0 %v7046_v53 }
 0x2b8   :  { %v9212_v56 = vpop.f32.mrf.mxu1  ;;  %4243 = vmatprep.subr.bf16.mxu0 %v7047_v10 }
 0x2b9   :  { %4394 = vmatpush2.bf16.msra.mxu1 %v7042_v6  ;;  %3936 = vmatmul.mubr.bf16.gmra.mxu0 %v8705_v2  ;;  %v7050_v6 = vld [vmem:[#allocation6 + $0x40] ss:$8 sps:$4 sm:$0xff]  }
 0x2ba   :  { %v9214_v48 = vpop.f32.mrf.mxu1  ;;  %4709 = vmatprep.subr.bf16.mxu1 %v7043_v14  ;;  %6469 = vmatprep.mubr.msk.bf16.mxu0 %vm2432_vm3, %v8695_v45  ;;  %v7051_v14 = vld [vmem:[#allocation6 + $0x34] ss:$8 sps:$4 sm:$0xff]  }
 0x2bb   :  { %4244 = vmatpush1.bf16.msra.mxu0 %v7048_v9 }
 0x2bc   :  { %v9219_v12 = vpop.f32.mrf.mxu1  ;;  %4208 = vmatmul.mubr.bf16.gmra.mxu1 %v11257_v62  ;;  %4245 = vmatprep.subr.bf16.mxu0 %v7049_v29  ;;  %v9233_v62 = vld [vmem:[#allocation6 + $0x30] ss:$8 sps:$4 sm:$0xff]  }
 0x2bd   :  { %11258 = vst [vmem:[#allocation71_spill] sm:$0xff] %v9219_v12  ;;  %6488 = vmatprep.mubr.msk.bf16.mxu1 %vm2432_vm3, %v8864_v19  ;;  %v9268_v12 = vld [vmem:[#allocation6 + $0x10] ss:$8 sps:$4 sm:$0xff]  }
 0x2be   :  { %v9224_v1 = vpop.f32.mrf.mxu1 }
 0x2bf   :  { %11259 = vst [vmem:[#allocation72_spill] sm:$0xff] %v9224_v1  ;;  %4246 = vmatpush1.bf16.msra.mxu0 %v7050_v6 }
 0x2c0   :  { %v9226_v2 = vpop.f32.mrf.mxu1  ;;  %4247 = vmatprep.subr.bf16.mxu0 %v7051_v14 }
 0x2c1   :  { %11260 = vst [vmem:[#allocation95_spill] sm:$0xff] %v9226_v2  ;;  %3946 = vmatmul.mubr.bf16.gmra.mxu0 %v8741_v50  ;;  %v89_v50 = vld [vmem:[#allocation7] sm:$0x3] }
 0x2c2   :  { %v9228_v17 = vpop.f32.mrf.mxu1  ;;  %6470 = vmatprep.mubr.msk.bf16.mxu0 %vm2432_vm3, %v8730_v8 }
 0x2c3   :  { %11261 = vst [vmem:[#allocation96_spill] sm:$0xff] %v9228_v17  ;;  %4248 = vmatpush1.bf16.msra.mxu0 %v9233_v62 }
 0x2c4   :  { %v9236_v19 = vpop.f32.mrf.mxu1  ;;  %4396 = vmatmul.mubr.bf16.vlgmr.msra.gmra.mxu1 %v8635_v23  ;;  %4249 = vmatprep.subr.bf16.mxu0 %v9239_v25  ;;  %v11265_v23 = vld [vmem:[#allocation13_spill] sm:$0xff] }
 0x2c5   :  { %11262 = vst [vmem:[#allocation97_spill] sm:$0xff] %v9236_v19  ;;  %6489 = vmatprep.mubr.msk.bf16.mxu1 %vm2432_vm3, %v8894_v55  ;;  %4710 = vmatpush1.bf16.msra.mxu1 %v7044_v37  ;;  %v9251_v19 = vld [vmem:[#allocation6 + $0x14] ss:$8 sps:$4 sm:$0xff]   ;;  %v11266_v2 = vsub.s32 0, %v11265_v23 }
 0x2c6   :  { %v9244_v58 = vpop.f32.mrf.mxu1  ;;  %4711 = vmatprep.subr.bf16.mxu1 %v7045_v5  ;;  %v11267_v5 = vsub.s32 1, %v11265_v23 }
 0x2c7   :  { %11263 = vst [vmem:[#allocation98_spill] sm:$0xff] %v9244_v58  ;;  %4250 = vmatpush1.bf16.msra.mxu0 %v9246_v51  ;;  %v9256_v1 = vrot.slane %v89_v50, %v11266_v2 }
 0x2c8   :  { %v9249_v17 = vpop.f32.mrf.mxu1  ;;  %4251 = vmatprep.subr.bf16.mxu0 %v9251_v19  ;;  %v9263_v58 = vrot.slane %v89_v50, %v11267_v5  ;;  %v9285_v5 = vld [vmem:[#allocation6] ss:$8 sps:$4 sm:$0xff]  }
 0x2c9   :  { %11264 = vst [vmem:[#allocation99_spill] sm:$0xff] %v9249_v17  ;;  %4712 = vmatpush1.bf16.msra.mxu1 %v7046_v53  ;;  %v2976_v37 = vpop.f32.mrf.mxu0  ;;  %3956 = vmatmul.mubr.bf16.gmra.mxu0 %v8771_v22  ;;  %v9274_v22 = vld [vmem:[#allocation6 + $0x4] ss:$8 sps:$4 sm:$0xff]  }
 0x2ca   :  { %v9258_v55 = vpop.f32.mrf.mxu1  ;;  %4713 = vmatprep.subr.bf16.mxu1 %v7047_v10  ;;  %v3045_v17 = vadd.f32 %v2976_v37, %v9058_v16  ;;  %6471 = vmatprep.mubr.msk.bf16.mxu0 %vm2432_vm3, %v8765_v61 }
 0x2cb   :  { %4252 = vmatpush1.bf16.msra.mxu0 %v9268_v12  ;;  %v2978_v53 = vpop.f32.mrf.mxu0 }
 0x2cc   :  { %v9271_v2 = vpop.f32.mrf.mxu1  ;;  %4406 = vmatmul.mubr.bf16.gmra.mxu1 %v8662_v28  ;;  %4253 = vmatprep.subr.bf16.mxu0 %v9274_v22  ;;  %v3084_v10 = vadd.f32 %v9256_v1, %v3045_v17  ;;  %v3046_v16 = vadd.f32 %v2978_v53, %v9066_v60  ;;  %v9290_v60 = vld [vmem:[#allocation6 + $0xb4] ss:$8 sps:$4 sm:$0xff]  }
 0x2cd   :  { %11268 = vst [vmem:[#allocation13_spill] sm:$0xff] %v9271_v2  ;;  %6490 = vmatprep.mubr.msk.bf16.mxu1 %vm2432_vm3, %v8928_v32  ;;  %4714 = vmatpush1.bf16.msra.mxu1 %v7048_v9  ;;  %v2980_v50 = vpop.f32.mrf.mxu0 }
 0x2ce   :  { %v9281_v23 = vpop.f32.mrf.mxu1  ;;  %4715 = vmatprep.subr.bf16.mxu1 %v7049_v29  ;;  %v3085_v37 = vadd.f32 %v9263_v58, %v3046_v16  ;;  %v3047_v28 = vadd.f32 %v2980_v50, %v9068_v63  ;;  %v3112_v9 = vmax.f32 %v3084_v10, 0.0  ;;  %v9302_v10 = vld [vmem:[#allocation6 + $0xb0] ss:$8 sps:$4 sm:$0xff]  }
 0x2cf   :  { %11269 = vst [vmem:[#allocation100_spill] sm:$0xff] %v9281_v23  ;;  %4254 = vmatpush1.bf16.msra.mxu0 %v9285_v5  ;;  %v2982_v2 = vpop.f32.mrf.mxu0 }
 0x2d0   :  { %v9288_v17 = vpop.f32.mrf.mxu1  ;;  %4263 = vmatprep.subr.bf16.mxu0 %v9290_v60  ;;  %v3113_v53 = vmax.f32 %v3085_v37, 0.0  ;;  %v3086_v32 = vadd.f32 %v9256_v1, %v3047_v28  ;;  %v3048_v29 = vadd.f32 %v2982_v2, %v9073_v36  ;;  %v9308_v2 = vld [vmem:[#allocation6 + $0xa4] ss:$8 sps:$4 sm:$0xff]  }
 0x2d1   :  { %11270 = vst [vmem:[#allocation101_spill] sm:$0xff] %v9288_v17  ;;  %4716 = vmatpush1.bf16.msra.mxu1 %v7050_v6  ;;  %v2986_v16 = vpop.f32.mrf.mxu0  ;;  %3966 = vmatmul.mubr.bf16.gmra.mxu0 %v8814_v30 }
 0x2d2   :  { %v9295_v63 = vpop.f32.mrf.mxu1  ;;  %4717 = vmatprep.subr.bf16.mxu1 %v7051_v14  ;;  %v3140_v50 = vmax.f32 %v3112_v9, %v3113_v53  ;;  %v3087_v17 = vadd.f32 %v9263_v58, %v3048_v29  ;;  %v3049_v23 = vadd.f32 %v2986_v16, %v9078_v33  ;;  %6472 = vmatprep.mubr.msk.bf16.mxu0 %vm2432_vm3, %v8803_v39  ;;  %v3114_v30 = vmax.f32 %v3086_v32, 0.0  ;;  %v9326_v16 = vld [vmem:[#allocation6 + $0x94] ss:$8 sps:$4 sm:$0xff]  }
 0x2d3   :  { %11271 = vst [vmem:[#allocation102_spill] sm:$0xff] %v9295_v63  ;;  %4264 = vmatpush2.bf16.msra.mxu0 %v9302_v10  ;;  %v2988_v36 = vpop.f32.mrf.mxu0  ;;  %v11303_v63 = vld [vmem:[#allocation47_spill] sm:$0xff] }
 0x2d4   :  { %v9305_v6 = vpop.f32.mrf.mxu1  ;;  %4416 = vmatmul.mubr.bf16.gmra.mxu1 %v8695_v45  ;;  %4265 = vmatprep.subr.bf16.mxu0 %v9308_v2  ;;  %v3115_v14 = vmax.f32 %v3087_v17, 0.0  ;;  %v3088_v33 = vadd.f32 %v9256_v1, %v3049_v23  ;;  %v3050_v37 = vadd.f32 %v2988_v36, %v9084_v59  ;;  %v9321_v17 = vld [vmem:[#allocation6 + $0xa0] ss:$8 sps:$4 sm:$0xff]  }
 0x2d5   :  { %11272 = vst [vmem:[#allocation103_spill] sm:$0xff] %v9305_v6  ;;  %6491 = vmatprep.mubr.msk.bf16.mxu1 %vm2432_vm3, %v8958_v20  ;;  %4718 = vmatpush1.bf16.msra.mxu1 %v9233_v62  ;;  %v2990_v28 = vpop.f32.mrf.mxu0  ;;  %v9467_v20 = vld [vmem:[#allocation6 + $0x100] ss:$8 sps:$4 sm:$0xff]  }
 0x2d6   :  { %v9316_v9 = vpop.f32.mrf.mxu1  ;;  %4719 = vmatprep.subr.bf16.mxu1 %v9239_v25  ;;  %v3141_v45 = vmax.f32 %v3114_v30, %v3115_v14  ;;  %v3089_v53 = vadd.f32 %v9263_v58, %v3050_v37  ;;  %v3051_v32 = vadd.f32 %v2990_v28, %v9086_v11  ;;  %v3116_v59 = vmax.f32 %v3088_v33, 0.0  ;;  %v11299_v6 = vld [vmem:[#allocation44_spill] sm:$0xff] }
 0x2d7   :  { %11273 = vst [vmem:[#allocation104_spill] sm:$0xff] %v9316_v9  ;;  %4266 = vmatpush2.bf16.msra.mxu0 %v9321_v17  ;;  %v2992_v23 = vpop.f32.mrf.mxu0 }
 0x2d8   :  { %v9324_v29 = vpop.f32.mrf.mxu1  ;;  %4267 = vmatprep.subr.bf16.mxu0 %v9326_v16  ;;  %v3117_v62 = vmax.f32 %v3089_v53, 0.0  ;;  %v3090_v25 = vadd.f32 %v9256_v1, %v3051_v32  ;;  %v3052_v36 = vadd.f32 %v2992_v23, %v9091_v52  ;;  %v9332_v11 = vpack.c.bf16 %v3141_v45, %v3140_v50  ;;  %v9342_v52 = vld [vmem:[#allocation6 + $0x90] ss:$8 sps:$4 sm:$0xff]  }
 0x2d9   :  { %11274 = vst [vmem:[#allocation105_spill] sm:$0xff] %v9324_v29  ;;  %4720 = vmatpush1.bf16.msra.mxu1 %v9246_v51  ;;  %v2996_v30 = vpop.f32.mrf.mxu0  ;;  %3976 = vmatmul.mubr.bf16.gmra.mxu0 %v8846_v47  ;;  %v9348_v47 = vld [vmem:[#allocation6 + $0x84] ss:$8 sps:$4 sm:$0xff]  }
 0x2da   :  { %11275 = vst [vmem:[#allocation106_spill] sm:$0xff] %v9332_v11  ;;  %v9334_v14 = vpop.f32.mrf.mxu1  ;;  %4721 = vmatprep.subr.bf16.mxu1 %v9251_v19  ;;  %v3142_v33 = vmax.f32 %v3116_v59, %v3117_v62  ;;  %v3091_v37 = vadd.f32 %v9263_v58, %v3052_v36  ;;  %v3053_v28 = vadd.f32 %v2996_v30, %v9096_v42  ;;  %v3118_v19 = vmax.f32 %v3090_v25, 0.0  ;;  %v9361_v25 = vld [vmem:[#allocation6 + $0x80] ss:$8 sps:$4 sm:$0xff]  }
 0x2db   :  { %11276 = vst [vmem:[#allocation107_spill] sm:$0xff] %v9334_v14  ;;  %6473 = vmatprep.mubr.msk.bf16.mxu0 %vm2432_vm3, %v8840_v46  ;;  %4268 = vmatpush2.bf16.msra.mxu0 %v9342_v52  ;;  %v2998_v51 = vpop.f32.mrf.mxu0  ;;  %v11283_v11 = vld [vmem:[#allocation68_spill] sm:$0xff]  ;;  %v11298_v14 = vld [vmem:[#allocation21_spill] sm:$0xff] }
 0x2dc   :  { %v9345_v50 = vpop.f32.mrf.mxu1  ;;  %4426 = vmatmul.mubr.bf16.gmra.mxu1 %v8730_v8  ;;  %4269 = vmatprep.subr.bf16.mxu0 %v9348_v47  ;;  %v3119_v45 = vmax.f32 %v3091_v37, 0.0  ;;  %v3092_v42 = vadd.f32 %v9256_v1, %v3053_v28  ;;  %v3054_v53 = vadd.f32 %v2998_v51, %v9100_v27  ;;  %v9366_v37 = vld [vmem:[#allocation6 + $0x134] ss:$8 sps:$4 sm:$0xff]  }
 0x2dd   :  { %6492 = vmatprep.mubr.msk.bf16.mxu1 %vm2432_vm3, %v8992_v43  ;;  %4722 = vmatpush1.bf16.msra.mxu1 %v9268_v12  ;;  %v3000_v32 = vpop.f32.mrf.mxu0  ;;  %v11293_v43 = vld [vmem:[#allocation41_spill] sm:$0xff] }
 0x2de   :  { %v9356_v59 = vpop.f32.mrf.mxu1  ;;  %4723 = vmatprep.subr.bf16.mxu1 %v9274_v22  ;;  %v3143_v8 = vmax.f32 %v3118_v19, %v3119_v45  ;;  %v3093_v23 = vadd.f32 %v9263_v58, %v3054_v53  ;;  %v3055_v62 = vadd.f32 %v3000_v32, %v9102_v7  ;;  %v3120_v27 = vmax.f32 %v3092_v42, 0.0  ;;  %v11278_v53 = vld [vmem:[#allocation33_spill] sm:$0xff] }
 0x2df   :  { %4270 = vmatpush2.bf16.msra.mxu0 %v9361_v25  ;;  %v3002_v36 = vpop.f32.mrf.mxu0 }
 0x2e0   :  { %v9364_v30 = vpop.f32.mrf.mxu1  ;;  %4585 = vmatprep.subr.bf16.mxu0 %v9366_v37  ;;  %v3121_v12 = vmax.f32 %v3093_v23, 0.0  ;;  %v3094_v22 = vadd.f32 %v9256_v1, %v3055_v62  ;;  %v3056_v28 = vadd.f32 %v3002_v36, %v9105_v54  ;;  %v9372_v7 = vpack.c.bf16 %v3143_v8, %v3142_v33  ;;  %v11279_v23 = vld [vmem:[#allocation35_spill] sm:$0xff] }
 0x2e1   :  { %4724 = vmatpush1.bf16.msra.mxu1 %v9285_v5  ;;  %v3006_v51 = vpop.f32.mrf.mxu0  ;;  %3986 = vmatmul.mubr.bf16.gmra.mxu0 %v8877_v31  ;;  %v11280_v31 = vld [vmem:[#allocation60_spill] sm:$0xff] }
 0x2e2   :  { %11277 = vst [vmem:[#allocation108_spill] sm:$0xff] %v9372_v7  ;;  %v9374_v19 = vpop.f32.mrf.mxu1  ;;  %4733 = vmatprep.subr.bf16.mxu1 %v9290_v60  ;;  %v3144_v45 = vmax.f32 %v3120_v27, %v3121_v12  ;;  %v3095_v42 = vadd.f32 %v9263_v58, %v3056_v28  ;;  %v3057_v32 = vadd.f32 %v3006_v51, %v11278_v53  ;;  %v3122_v5 = vmax.f32 %v3094_v22, 0.0  ;;  %v11281_v60 = vld [vmem:[#allocation26_spill] sm:$0xff] }
 0x2e3   :  { %6481 = vmatprep.mubr.msk.bf16.mxu0 %vm2432_vm3, %v11279_v23  ;;  %v3008_v54 = vpop.f32.mrf.mxu0 }
 0x2e4   :  { %v9382_v62 = vpop.f32.mrf.mxu1  ;;  %4436 = vmatmul.mubr.bf16.gmra.mxu1 %v8765_v61  ;;  %v3123_v33 = vmax.f32 %v3095_v42, 0.0  ;;  %v3096_v8 = vadd.f32 %v9256_v1, %v3057_v32  ;;  %v3058_v36 = vadd.f32 %v3008_v54, %v11280_v31  ;;  %v11282_v61 = vld [vmem:[#allocation65_spill] sm:$0xff] }
 0x2e5   :  { %6493 = vmatprep.mubr.msk.bf16.mxu1 %vm2432_vm3, %v11281_v60  ;;  %4734 = vmatpush2.bf16.msra.mxu1 %v9302_v10  ;;  %v3010_v27 = vpop.f32.mrf.mxu0 }
 0x2e6   :  { %v9390_v12 = vpop.f32.mrf.mxu1  ;;  %4735 = vmatprep.subr.bf16.mxu1 %v9308_v2  ;;  %v3145_v28 = vmax.f32 %v3122_v5, %v3123_v33  ;;  %v3097_v51 = vadd.f32 %v9263_v58, %v3058_v36  ;;  %v3059_v22 = vadd.f32 %v3010_v27, %v11282_v61  ;;  %v3124_v42 = vmax.f32 %v3096_v8, 0.0  ;;  %v11285_v5 = vld [vmem:[#allocation16_spill] sm:$0xff]  ;;  %v11286_v27 = vld [vmem:[#allocation38_spill] sm:$0xff] }
 0x2e7   :  { %v3012_v53 = vpop.f32.mrf.mxu0  ;;  %v11288_v61 = vld [vmem:[#allocation32_spill] sm:$0xff] }
 0x2e8   :  { %v9395_v32 = vpop.f32.mrf.mxu1  ;;  %v3125_v54 = vmax.f32 %v3097_v51, 0.0  ;;  %v3098_v31 = vadd.f32 %v9256_v1, %v3059_v22  ;;  %v3060_v7 = vadd.f32 %v3012_v53, %v11283_v11  ;;  %v9400_v10 = vpack.c.bf16 %v3145_v28, %v3144_v45  ;;  %v9410_v11 = vld [vmem:[#allocation6 + $0x130] ss:$8 sps:$4 sm:$0xff]   ;;  %v9416_v28 = vld [vmem:[#allocation6 + $0x124] ss:$8 sps:$4 sm:$0xff]  }
 0x2e9   :  { %4736 = vmatpush2.bf16.msra.mxu1 %v9321_v17  ;;  %v3016_v60 = vpop.f32.mrf.mxu0  ;;  %4272 = vmatmul.mubr.bf16.vlgmr.msra.gmra.mxu0 %v11285_v5  ;;  %v9429_v5 = vld [vmem:[#allocation6 + $0x120] ss:$8 sps:$4 sm:$0xff]  }
 0x2ea   :  { %11284 = vst [vmem:[#allocation33_spill] sm:$0xff] %v9400_v10  ;;  %v9402_v2 = vpop.f32.mrf.mxu1  ;;  %4737 = vmatprep.subr.bf16.mxu1 %v9326_v16  ;;  %v3146_v33 = vmax.f32 %v3124_v42, %v3125_v54  ;;  %v3099_v8 = vadd.f32 %v9263_v58, %v3060_v7  ;;  %v3061_v36 = vadd.f32 %v3016_v60, %v9127_v18  ;;  %v3126_v16 = vmax.f32 %v3098_v31, 0.0  ;;  %v11287_v60 = vld [vmem:[#allocation69_spill] sm:$0xff]  ;;  %v11289_v54 = vld [vmem:[#allocation92_spill] sm:$0xff] }
 0x2eb   :  { %6482 = vmatprep.mubr.msk.bf16.mxu0 %vm2432_vm3, %v11286_v27  ;;  %4586 = vmatpush1.bf16.msra.mxu0 %v9410_v11  ;;  %v3018_v17 = vpop.f32.mrf.mxu0 }
 0x2ec   :  { %v9413_v45 = vpop.f32.mrf.mxu1  ;;  %4446 = vmatmul.mubr.bf16.gmra.mxu1 %v8803_v39  ;;  %4587 = vmatprep.subr.bf16.mxu0 %v9416_v28  ;;  %v3127_v7 = vmax.f32 %v3099_v8, 0.0  ;;  %v3100_v18 = vadd.f32 %v9256_v1, %v3061_v36  ;;  %v3062_v51 = vadd.f32 %v3018_v17, %v11287_v60  ;;  %v9434_v60 = vld [vmem:[#allocation6 + $0x114] ss:$8 sps:$4 sm:$0xff]  }
 0x2ed   :  { %6494 = vmatprep.mubr.msk.bf16.mxu1 %vm2432_vm3, %v11288_v61  ;;  %4738 = vmatpush2.bf16.msra.mxu1 %v9342_v52  ;;  %v3020_v22 = vpop.f32.mrf.mxu0 }
 0x2ee   :  { %v9424_v42 = vpop.f32.mrf.mxu1  ;;  %4739 = vmatprep.subr.bf16.mxu1 %v9348_v47  ;;  %v3147_v39 = vmax.f32 %v3126_v16, %v3127_v7  ;;  %v3101_v53 = vadd.f32 %v9263_v58, %v3062_v51  ;;  %v3063_v31 = vadd.f32 %v3020_v22, %v11289_v54  ;;  %v3128_v8 = vmax.f32 %v3100_v18, 0.0  ;;  %v11290_v16 = vld [vmem:[#allocation93_spill] sm:$0xff]  ;;  %v11292_v18 = vld [vmem:[#allocation19_spill] sm:$0xff] }
 0x2ef   :  { %4588 = vmatpush1.bf16.msra.mxu0 %v9429_v5  ;;  %v3022_v36 = vpop.f32.mrf.mxu0 }
 0x2f0   :  { %v9432_v17 = vpop.f32.mrf.mxu1  ;;  %4589 = vmatprep.subr.bf16.mxu0 %v9434_v60  ;;  %v3129_v52 = vmax.f32 %v3101_v53, 0.0  ;;  %v3102_v47 = vadd.f32 %v9256_v1, %v3063_v31  ;;  %v3064_v7 = vadd.f32 %v3022_v36, %v11290_v16  ;;  %v9440_v51 = vpack.c.bf16 %v3147_v39, %v3146_v33  ;;  %v9450_v31 = vld [vmem:[#allocation6 + $0x110] ss:$8 sps:$4 sm:$0xff]   ;;  %v9456_v39 = vld [vmem:[#allocation6 + $0x104] ss:$8 sps:$4 sm:$0xff]  }
 0x2f1   :  { %4740 = vmatpush2.bf16.msra.mxu1 %v9361_v25  ;;  %v3026_v22 = vpop.f32.mrf.mxu0  ;;  %4282 = vmatmul.mubr.bf16.gmra.mxu0 %v11292_v18  ;;  %v11294_v36 = vld [vmem:[#allocation70_spill] sm:$0xff]  ;;  %v11295_v16 = vld [vmem:[#allocation37_spill] sm:$0xff] }
 0x2f2   :  { %11291 = vst [vmem:[#allocation35_spill] sm:$0xff] %v9440_v51  ;;  %v9442_v54 = vpop.f32.mrf.mxu1  ;;  %5055 = vmatprep.subr.bf16.mxu1 %v9366_v37  ;;  %v3148_v10 = vmax.f32 %v3128_v8, %v3129_v52  ;;  %v3103_v61 = vadd.f32 %v9263_v58, %v3064_v7  ;;  %v3065_v53 = vadd.f32 %v3026_v22, %v9147_v24  ;;  %v3130_v37 = vmax.f32 %v3102_v47, 0.0 }
 0x2f3   :  { %6483 = vmatprep.mubr.msk.bf16.mxu0 %vm2432_vm3, %v11293_v43  ;;  %4590 = vmatpush1.bf16.msra.mxu0 %v9450_v31  ;;  %v3028_v25 = vpop.f32.mrf.mxu0 }
 0x2f4   :  { %v9453_v33 = vpop.f32.mrf.mxu1  ;;  %4456 = vmatmul.mubr.bf16.gmra.mxu1 %v8840_v46  ;;  %4591 = vmatprep.subr.bf16.mxu0 %v9456_v39  ;;  %v3131_v8 = vmax.f32 %v3103_v61, 0.0  ;;  %v3104_v24 = vadd.f32 %v9256_v1, %v3065_v53  ;;  %v3066_v52 = vadd.f32 %v3028_v25, %v11294_v36  ;;  %v9472_v25 = vld [vmem:[#allocation6 + $0xf4] ss:$8 sps:$4 sm:$0xff]  }
 0x2f5   :  { %6502 = vmatprep.mubr.msk.bf16.mxu1 %vm2432_vm3, %v11295_v16  ;;  %v3030_v7 = vpop.f32.mrf.mxu0 }
 0x2f6   :  { %v9463_v22 = vpop.f32.mrf.mxu1  ;;  %v3149_v18 = vmax.f32 %v3130_v37, %v3131_v8  ;;  %v3105_v51 = vadd.f32 %v9263_v58, %v3066_v52  ;;  %v3067_v46 = vadd.f32 %v3030_v7, %v9153_v26  ;;  %v3132_v61 = vmax.f32 %v3104_v24, 0.0  ;;  %v11296_v37 = vld [vmem:[#allocation94_spill] sm:$0xff] }
 0x2f7   :  { %4592 = vmatpush1.bf16.msra.mxu0 %v9467_v20  ;;  %v3032_v47 = vpop.f32.mrf.mxu0 }
 0x2f8   :  { %v9470_v53 = vpop.f32.mrf.mxu1  ;;  %4593 = vmatprep.subr.bf16.mxu0 %v9472_v25  ;;  %v3133_v36 = vmax.f32 %v3105_v51, 0.0  ;;  %v3106_v16 = vadd.f32 %v9256_v1, %v3067_v46  ;;  %v3068_v8 = vadd.f32 %v3032_v47, %v11296_v37  ;;  %v9477_v52 = vpack.c.bf16 %v3149_v18, %v3148_v10  ;;  %v9486_v51 = vld [vmem:[#allocation6 + $0xf0] ss:$8 sps:$4 sm:$0xff]   ;;  %v9492_v18 = vld [vmem:[#allocation6 + $0xe4] ss:$8 sps:$4 sm:$0xff]  }
 0x2f9   :  { %v3036_v26 = vpop.f32.mrf.mxu0  ;;  %4292 = vmatmul.mubr.bf16.gmra.mxu0 %v11298_v14 }
 0x2fa   :  { %11297 = vst [vmem:[#allocation60_spill] sm:$0xff] %v9477_v52  ;;  %v9479_v7 = vpop.f32.mrf.mxu1  ;;  %v3150_v24 = vmax.f32 %v3132_v61, %v3133_v36  ;;  %v3107_v29 = vadd.f32 %v9263_v58, %v3068_v8  ;;  %v3069_v9 = vadd.f32 %v3036_v26, %v9161_v49  ;;  %6484 = vmatprep.mubr.msk.bf16.mxu0 %vm2432_vm3, %v11299_v6  ;;  %v3134_v14 = vmax.f32 %v3106_v16, 0.0  ;;  %v11300_v36 = vld [vmem:[#allocation40_spill] sm:$0xff]  ;;  %v9510_v52 = vld [vmem:[#allocation6 + $0xd4] ss:$8 sps:$4 sm:$0xff]  }
 0x2fb   :  { %4594 = vmatpush1.bf16.msra.mxu0 %v9486_v51  ;;  %v3038_v46 = vpop.f32.mrf.mxu0 }
 0x2fc   :  { %v9489_v10 = vpop.f32.mrf.mxu1  ;;  %4742 = vmatmul.mubr.bf16.vlgmr.msra.gmra.mxu1 %v11279_v23  ;;  %4595 = vmatprep.subr.bf16.mxu0 %v9492_v18  ;;  %v3135_v61 = vmax.f32 %v3107_v29, 0.0  ;;  %v3108_v49 = vadd.f32 %v9256_v1, %v3069_v9  ;;  %v3070_v47 = vadd.f32 %v3038_v46, %v9166_v41  ;;  %v9505_v29 = vld [vmem:[#allocation6 + $0xe0] ss:$8 sps:$4 sm:$0xff]  }
 0x2fd   :  { %6503 = vmatprep.mubr.msk.bf16.mxu1 %vm2432_vm3, %v11300_v36  ;;  %5056 = vmatpush1.bf16.msra.mxu1 %v9410_v11  ;;  %v3040_v37 = vpop.f32.mrf.mxu0 }
 0x2fe   :  { %v9500_v8 = vpop.f32.mrf.mxu1  ;;  %5057 = vmatprep.subr.bf16.mxu1 %v9416_v28  ;;  %v3151_v23 = vmax.f32 %v3134_v14, %v3135_v61  ;;  %v3109_v26 = vadd.f32 %v9263_v58, %v3070_v47  ;;  %v3071_v16 = vadd.f32 %v3040_v37, %v9168_v13  ;;  %v3136_v41 = vmax.f32 %v3108_v49, 0.0  ;;  %v11302_v49 = vld [vmem:[#allocation24_spill] sm:$0xff] }
 0x2ff   :  { %4596 = vmatpush1.bf16.msra.mxu0 %v9505_v29  ;;  %v3042_v9 = vpop.f32.mrf.mxu0 }
 0x300   :  { %v9508_v46 = vpop.f32.mrf.mxu1  ;;  %4597 = vmatprep.subr.bf16.mxu0 %v9510_v52  ;;  %v3137_v11 = vmax.f32 %v3109_v26, 0.0  ;;  %v3110_v28 = vadd.f32 %v9256_v1, %v3071_v16  ;;  %v3072_v14 = vadd.f32 %v3042_v9, %v9172_v34  ;;  %v9516_v13 = vpack.c.bf16 %v3151_v23, %v3150_v24  ;;  %v9526_v34 = vld [vmem:[#allocation6 + $0xd0] ss:$8 sps:$4 sm:$0xff]   ;;  %v9532_v23 = vld [vmem:[#allocation6 + $0xc4] ss:$8 sps:$4 sm:$0xff]  }
 0x301   :  { %5058 = vmatpush1.bf16.msra.mxu1 %v9429_v5  ;;  %v3333_v61 = vpop.f32.mrf.mxu0  ;;  %4302 = vmatmul.mubr.bf16.gmra.mxu0 %v11302_v49  ;;  %v11304_v9 = vld [vmem:[#allocation43_spill] sm:$0xff] }
 0x302   :  { %11301 = vst [vmem:[#allocation65_spill] sm:$0xff] %v9516_v13  ;;  %v9518_v47 = vpop.f32.mrf.mxu1  ;;  %5059 = vmatprep.subr.bf16.mxu1 %v9434_v60  ;;  %v3152_v37 = vmax.f32 %v3136_v41, %v3137_v11  ;;  %v3111_v36 = vadd.f32 %v9263_v58, %v3072_v14  ;;  %v3334_v26 = vadd.f32 %v3333_v61, %v9176_v35  ;;  %v3138_v60 = vmax.f32 %v3110_v28, 0.0 }
 0x303   :  { %6485 = vmatprep.mubr.msk.bf16.mxu0 %vm2432_vm3, %v11303_v63  ;;  %4598 = vmatpush1.bf16.msra.mxu0 %v9526_v34  ;;  %v3335_v5 = vpop.f32.mrf.mxu0 }
 0x304   :  { %v9529_v24 = vpop.f32.mrf.mxu1  ;;  %4752 = vmatmul.mubr.bf16.gmra.mxu1 %v11286_v27  ;;  %4599 = vmatprep.subr.bf16.mxu0 %v9532_v23  ;;  %v3139_v16 = vmax.f32 %v3111_v36, 0.0  ;;  %v3526_v35 = vadd.f32 %v9345_v50, %v3334_v26  ;;  %v3336_v41 = vadd.f32 %v3335_v5, %v9182_v44  ;;  %v9545_v36 = vld [vmem:[#allocation6 + $0xc0] ss:$8 sps:$4 sm:$0xff]  }
 0x305   :  { %6504 = vmatprep.mubr.msk.bf16.mxu1 %vm2432_vm3, %v11304_v9  ;;  %5060 = vmatpush1.bf16.msra.mxu1 %v9450_v31  ;;  %v3337_v11 = vpop.f32.mrf.mxu0  ;;  %v9551_v31 = vld [vmem:[#allocation6 + $0x174] ss:$8 sps:$4 sm:$0xff]  }
 0x306   :  { %v9540_v14 = vpop.f32.mrf.mxu1  ;;  %5061 = vmatprep.subr.bf16.mxu1 %v9456_v39  ;;  %v3153_v27 = vmax.f32 %v3138_v60, %v3139_v16  ;;  %v3527_v61 = vadd.f32 %v9356_v59, %v3336_v41  ;;  %v3338_v28 = vadd.f32 %v3337_v11, %v9184_v38  ;;  %v3554_v44 = vadd.f32 %v3526_v35, %v9256_v1  ;;  %v11305_v60 = vld [vmem:[#allocation27_spill] sm:$0xff] }
 0x307   :  { %4600 = vmatpush1.bf16.msra.mxu0 %v9545_v36  ;;  %v3339_v50 = vpop.f32.mrf.mxu0 }
 0x308   :  { %v9549_v49 = vpop.f32.mrf.mxu1  ;;  %4609 = vmatprep.subr.bf16.mxu0 %v9551_v31  ;;  %v3555_v39 = vadd.f32 %v3527_v61, %v9263_v58  ;;  %v3528_v26 = vadd.f32 %v9364_v30, %v3338_v28  ;;  %v3340_v59 = vadd.f32 %v3339_v50, %v9186_v40  ;;  %v9562_v16 = vpack.c.bf16 %v3153_v27, %v3152_v37  ;;  %v11307_v61 = vld [vmem:[#allocation50_spill] sm:$0xff] }
 0x309   :  { %5062 = vmatpush1.bf16.msra.mxu1 %v9467_v20  ;;  %v3343_v38 = vpop.f32.mrf.mxu0  ;;  %4312 = vmatmul.mubr.bf16.gmra.mxu0 %v11305_v60  ;;  %v9568_v40 = vld [vmem:[#allocation6 + $0x170] ss:$8 sps:$4 sm:$0xff]   ;;  %v3582_v20 = vmax.f32 %v3554_v44, 0.0  ;;  %v9589_v60 = vld [vmem:[#allocation6 + $0x160] ss:$8 sps:$4 sm:$0xff]  }
 0x30a   :  { %v9558_v5 = vpop.f32.mrf.mxu1  ;;  %5063 = vmatprep.subr.bf16.mxu1 %v9472_v25  ;;  %11306 = vst [vmem:[#allocation68_spill] sm:$0xff] %v9562_v16  ;;  %v3583_v35 = vmax.f32 %v3555_v39, 0.0  ;;  %v3529_v41 = vadd.f32 %v9374_v19, %v3340_v59  ;;  %v3344_v11 = vadd.f32 %v3343_v38, %v9191_v57  ;;  %6486 = vmatprep.mubr.msk.bf16.mxu0 %vm2432_vm3, %v11307_v61  ;;  %v9575_v25 = vld [vmem:[#allocation6 + $0x164] ss:$8 sps:$4 sm:$0xff]   ;;  %v11308_v27 = vld [vmem:[#allocation46_spill] sm:$0xff] }
 0x30b   :  { %4610 = vmatpush2.bf16.msra.mxu0 %v9568_v40  ;;  %v3556_v30 = vadd.f32 %v3528_v26, %v9256_v1  ;;  %v3345_v28 = vpop.f32.mrf.mxu0 }
 0x30c   :  { %v9572_v50 = vpop.f32.mrf.mxu1  ;;  %4762 = vmatmul.mubr.bf16.gmra.mxu1 %v11293_v43  ;;  %4611 = vmatprep.subr.bf16.mxu0 %v9575_v25  ;;  %v3557_v57 = vadd.f32 %v3529_v41, %v9263_v58  ;;  %v3530_v19 = vadd.f32 %v9382_v62, %v3344_v11  ;;  %v3346_v37 = vadd.f32 %v3345_v28, %v9196_v0  ;;  %v9595_v11 = vld [vmem:[#allocation6 + $0x154] ss:$8 sps:$4 sm:$0xff]  }
 0x30d   :  { %6505 = vmatprep.mubr.msk.bf16.mxu1 %vm2432_vm3, %v11308_v27  ;;  %5064 = vmatpush1.bf16.msra.mxu1 %v9486_v51  ;;  %v3347_v44 = vpop.f32.mrf.mxu0  ;;  %v3610_v43 = vmax.f32 %v3582_v20, %v3583_v35  ;;  %v3584_v0 = vmax.f32 %v3556_v30, 0.0  ;;  %v11309_v30 = vld [vmem:[#allocation30_spill] sm:$0xff] }
 0x30e   :  { %v9584_v39 = vpop.f32.mrf.mxu1  ;;  %5065 = vmatprep.subr.bf16.mxu1 %v9492_v18  ;;  %v3585_v26 = vmax.f32 %v3557_v57, 0.0  ;;  %v3531_v59 = vadd.f32 %v9390_v12, %v3346_v37  ;;  %v3348_v38 = vadd.f32 %v3347_v44, %v9198_v15  ;;  %v3558_v62 = vadd.f32 %v3530_v19, %v9256_v1  ;;  %v11310_v44 = vld [vmem:[#allocation53_spill] sm:$0xff] }
 0x30f   :  { %4612 = vmatpush2.bf16.msra.mxu0 %v9589_v60  ;;  %v3349_v41 = vpop.f32.mrf.mxu0 }
 0x310   :  { %v9593_v51 = vpop.f32.mrf.mxu1  ;;  %4613 = vmatprep.subr.bf16.mxu0 %v9595_v11  ;;  %v3559_v18 = vadd.f32 %v3531_v59, %v9263_v58  ;;  %v3532_v12 = vadd.f32 %v9395_v32, %v3348_v38  ;;  %v3350_v15 = vadd.f32 %v3349_v41, %v9200_v3  ;;  %v3611_v28 = vmax.f32 %v3584_v0, %v3585_v26  ;;  %v9610_v32 = vld [vmem:[#allocation6 + $0x150] ss:$8 sps:$4 sm:$0xff]  }
 0x311   :  { %5066 = vmatpush1.bf16.msra.mxu1 %v9505_v29  ;;  %v3353_v35 = vpop.f32.mrf.mxu0  ;;  %4322 = vmatmul.mubr.bf16.gmra.mxu0 %v11309_v30  ;;  %v3586_v3 = vmax.f32 %v3558_v62, 0.0  ;;  %v11312_v62 = vld [vmem:[#allocation49_spill] sm:$0xff] }
 0x312   :  { %v9602_v20 = vpop.f32.mrf.mxu1  ;;  %5067 = vmatprep.subr.bf16.mxu1 %v9510_v52  ;;  %v3587_v57 = vmax.f32 %v3559_v18, 0.0  ;;  %v3533_v19 = vadd.f32 %v9402_v2, %v3350_v15  ;;  %v3354_v37 = vadd.f32 %v3353_v35, %v9205_v4  ;;  %6487 = vmatprep.mubr.msk.bf16.mxu0 %vm2432_vm3, %v11310_v44  ;;  %v3560_v29 = vadd.f32 %v3532_v12, %v9256_v1  ;;  %v9617_v52 = vld [vmem:[#allocation6 + $0x144] ss:$8 sps:$4 sm:$0xff]   ;;  %v9633_v35 = vld [vmem:[#allocation6 + $0x140] ss:$8 sps:$4 sm:$0xff]  }
 0x313   :  { %4614 = vmatpush2.bf16.msra.mxu0 %v9610_v32  ;;  %v3355_v59 = vpop.f32.mrf.mxu0  ;;  %v9620_v4 = vpack.c.bf16 %v3611_v28, %v3610_v43  ;;  %v9639_v28 = vld [vmem:[#allocation6 + $0x1f4] ss:$8 sps:$4 sm:$0xff]  }
 0x314   :  { %v9614_v38 = vpop.f32.mrf.mxu1  ;;  %4772 = vmatmul.mubr.bf16.gmra.mxu1 %v11299_v6  ;;  %4615 = vmatprep.subr.bf16.mxu0 %v9617_v52  ;;  %v3561_v2 = vadd.f32 %v3533_v19, %v9263_v58  ;;  %v3534_v26 = vadd.f32 %v9413_v45, %v3354_v37  ;;  %v3356_v0 = vadd.f32 %v3355_v59, %v9210_v21  ;;  %v3588_v21 = vmax.f32 %v3560_v29, 0.0  ;;  %v11313_v37 = vld [vmem:[#allocation34_spill] sm:$0xff] }
 0x315   :  { %11311 = vst [vmem:[#allocation16_spill] sm:$0xff] %v9620_v4  ;;  %6506 = vmatprep.mubr.msk.bf16.mxu1 %vm2432_vm3, %v11312_v62  ;;  %5068 = vmatpush1.bf16.msra.mxu1 %v9526_v34  ;;  %v3357_v41 = vpop.f32.mrf.mxu0  ;;  %v3612_v6 = vmax.f32 %v3586_v3, %v3587_v57 }
 0x316   :  { %v9628_v18 = vpop.f32.mrf.mxu1  ;;  %5069 = vmatprep.subr.bf16.mxu1 %v9532_v23  ;;  %v3589_v12 = vmax.f32 %v3561_v2, 0.0  ;;  %v3535_v43 = vadd.f32 %v9424_v42, %v3356_v0  ;;  %v3358_v15 = vadd.f32 %v3357_v41, %v9212_v56  ;;  %v3562_v45 = vadd.f32 %v3534_v26, %v9256_v1  ;;  %v11314_v2 = vld [vmem:[#allocation71_spill] sm:$0xff]  ;;  %v11315_v0 = vld [vmem:[#allocation56_spill] sm:$0xff] }
 0x317   :  { %4616 = vmatpush2.bf16.msra.mxu0 %v9633_v35  ;;  %v3359_v30 = vpop.f32.mrf.mxu0 }
 0x318   :  { %v9637_v34 = vpop.f32.mrf.mxu1  ;;  %4833 = vmatprep.subr.bf16.mxu0 %v9639_v28  ;;  %v3563_v23 = vadd.f32 %v3535_v43, %v9263_v58  ;;  %v3536_v42 = vadd.f32 %v9432_v17, %v3358_v15  ;;  %v3360_v56 = vadd.f32 %v3359_v30, %v9214_v48  ;;  %v3613_v3 = vmax.f32 %v3588_v21, %v3589_v12  ;;  %v11318_v21 = vld [vmem:[#allocation52_spill] sm:$0xff] }
 0x319   :  { %5070 = vmatpush1.bf16.msra.mxu1 %v9545_v36  ;;  %v3363_v57 = vpop.f32.mrf.mxu0  ;;  %4332 = vmatmul.mubr.bf16.gmra.mxu0 %v11313_v37  ;;  %v3590_v17 = vmax.f32 %v3562_v45, 0.0 }
 0x31a   :  { %v9646_v19 = vpop.f32.mrf.mxu1  ;;  %5079 = vmatprep.subr.bf16.mxu1 %v9551_v31  ;;  %v3591_v29 = vmax.f32 %v3563_v23, 0.0  ;;  %v3537_v59 = vadd.f32 %v9442_v54, %v3360_v56  ;;  %v3364_v26 = vadd.f32 %v3363_v57, %v11314_v2  ;;  %6495 = vmatprep.mubr.msk.bf16.mxu0 %vm2432_vm3, %v11315_v0  ;;  %v3564_v48 = vadd.f32 %v3536_v42, %v9256_v1  ;;  %v11317_v54 = vld [vmem:[#allocation72_spill] sm:$0xff]  ;;  %v11319_v42 = vld [vmem:[#allocation95_spill] sm:$0xff] }
 0x31b   :  { %v3365_v36 = vpop.f32.mrf.mxu0  ;;  %v9658_v43 = vpack.c.bf16 %v3613_v3, %v3612_v6  ;;  %v11320_v2 = vld [vmem:[#allocation96_spill] sm:$0xff] }
 0x31c   :  { %v9655_v41 = vpop.f32.mrf.mxu1  ;;  %4782 = vmatmul.mubr.bf16.gmra.mxu1 %v11303_v63  ;;  %v3565_v31 = vadd.f32 %v3537_v59, %v9263_v58  ;;  %v3538_v12 = vadd.f32 %v9453_v33, %v3364_v26  ;;  %v3366_v15 = vadd.f32 %v3365_v36, %v11317_v54  ;;  %v3614_v23 = vmax.f32 %v3590_v17, %v3591_v29  ;;  %v11323_v54 = vld [vmem:[#allocation61_spill] sm:$0xff] }
 0x31d   :  { %11316 = vst [vmem:[#allocation38_spill] sm:$0xff] %v9658_v43  ;;  %6507 = vmatprep.mubr.msk.bf16.mxu1 %vm2432_vm3, %v11318_v21  ;;  %5080 = vmatpush2.bf16.msra.mxu1 %v9568_v40  ;;  %v3367_v45 = vpop.f32.mrf.mxu0  ;;  %v3592_v57 = vmax.f32 %v3564_v48, 0.0  ;;  %v9770_v21 = vld [vmem:[#allocation6 + $0x1b0] ss:$8 sps:$4 sm:$0xff]  }
 0x31e   :  { %v9666_v30 = vpop.f32.mrf.mxu1  ;;  %5081 = vmatprep.subr.bf16.mxu1 %v9575_v25  ;;  %v3593_v63 = vmax.f32 %v3565_v31, 0.0  ;;  %v3539_v6 = vadd.f32 %v9463_v22, %v3366_v15  ;;  %v3368_v56 = vadd.f32 %v3367_v45, %v11319_v42  ;;  %v3566_v33 = vadd.f32 %v3538_v12, %v9256_v1  ;;  %v11321_v22 = vld [vmem:[#allocation73_spill] sm:$0xff] }
 0x31f   :  { %v3369_v37 = vpop.f32.mrf.mxu0  ;;  %v11322_v31 = vld [vmem:[#allocation97_spill] sm:$0xff] }
 0x320   :  { %v9672_v3 = vpop.f32.mrf.mxu1  ;;  %v3567_v59 = vadd.f32 %v3539_v6, %v9263_v58  ;;  %v3540_v40 = vadd.f32 %v9470_v53, %v3368_v56  ;;  %v3370_v26 = vadd.f32 %v3369_v37, %v11320_v2  ;;  %v3615_v17 = vmax.f32 %v3592_v57, %v3593_v63  ;;  %v9686_v53 = vld [vmem:[#allocation6 + $0x1f0] ss:$8 sps:$4 sm:$0xff]   ;;  %v11327_v2 = vld [vmem:[#allocation99_spill] sm:$0xff] }
 0x321   :  { %5082 = vmatpush2.bf16.msra.mxu1 %v9589_v60  ;;  %v3373_v25 = vpop.f32.mrf.mxu0  ;;  %4618 = vmatmul.mubr.bf16.vlgmr.msra.gmra.mxu0 %v11321_v22  ;;  %v3594_v60 = vmax.f32 %v3566_v33, 0.0  ;;  %v11325_v56 = vld [vmem:[#allocation98_spill] sm:$0xff]  ;;  %v11326_v33 = vld [vmem:[#allocation55_spill] sm:$0xff] }
 0x322   :  { %v9678_v29 = vpop.f32.mrf.mxu1  ;;  %5083 = vmatprep.subr.bf16.mxu1 %v9595_v11  ;;  %v3595_v48 = vmax.f32 %v3567_v59, 0.0  ;;  %v3541_v36 = vadd.f32 %v9479_v7, %v3370_v26  ;;  %v3374_v12 = vadd.f32 %v3373_v25, %v11322_v31  ;;  %6496 = vmatprep.mubr.msk.bf16.mxu0 %vm2432_vm3, %v11323_v54  ;;  %v3568_v15 = vadd.f32 %v3540_v40, %v9256_v1  ;;  %v9693_v11 = vld [vmem:[#allocation6 + $0x1e4] ss:$8 sps:$4 sm:$0xff]   ;;  %v9709_v25 = vld [vmem:[#allocation6 + $0x1e0] ss:$8 sps:$4 sm:$0xff]  }
 0x323   :  { %4834 = vmatpush1.bf16.msra.mxu0 %v9686_v53  ;;  %v3375_v45 = vpop.f32.mrf.mxu0  ;;  %v9696_v7 = vpack.c.bf16 %v3615_v17, %v3614_v23 }
 0x324   :  { %v9690_v6 = vpop.f32.mrf.mxu1  ;;  %4792 = vmatmul.mubr.bf16.gmra.mxu1 %v11307_v61  ;;  %4835 = vmatprep.subr.bf16.mxu0 %v9693_v11  ;;  %v3569_v63 = vadd.f32 %v3541_v36, %v9263_v58  ;;  %v3542_v42 = vadd.f32 %v9489_v10, %v3374_v12  ;;  %v3376_v57 = vadd.f32 %v3375_v45, %v11325_v56  ;;  %v3596_v10 = vmax.f32 %v3568_v15, 0.0  ;;  %v9715_v36 = vld [vmem:[#allocation6 + $0x1d4] ss:$8 sps:$4 sm:$0xff]  }
 0x325   :  { %11324 = vst [vmem:[#allocation69_spill] sm:$0xff] %v9696_v7  ;;  %6508 = vmatprep.mubr.msk.bf16.mxu1 %vm2432_vm3, %v11326_v33  ;;  %5084 = vmatpush2.bf16.msra.mxu1 %v9610_v32  ;;  %v3377_v37 = vpop.f32.mrf.mxu0  ;;  %v3616_v61 = vmax.f32 %v3594_v60, %v3595_v48  ;;  %v11328_v60 = vld [vmem:[#allocation57_spill] sm:$0xff]  ;;  %v11338_v33 = vld [vmem:[#allocation66_spill] sm:$0xff] }
 0x326   :  { %v9704_v59 = vpop.f32.mrf.mxu1  ;;  %5085 = vmatprep.subr.bf16.mxu1 %v9617_v52  ;;  %v3597_v40 = vmax.f32 %v3569_v63, 0.0  ;;  %v3543_v23 = vadd.f32 %v9500_v8, %v3376_v57  ;;  %v3378_v26 = vadd.f32 %v3377_v37, %v11327_v2  ;;  %v3570_v22 = vadd.f32 %v3542_v42, %v9256_v1  ;;  %v11329_v42 = vld [vmem:[#allocation13_spill] sm:$0xff]  ;;  %v11330_v57 = vld [vmem:[#allocation63_spill] sm:$0xff] }
 0x327   :  { %4836 = vmatpush1.bf16.msra.mxu0 %v9709_v25  ;;  %v3379_v17 = vpop.f32.mrf.mxu0 }
 0x328   :  { %v9713_v32 = vpop.f32.mrf.mxu1  ;;  %4837 = vmatprep.subr.bf16.mxu0 %v9715_v36  ;;  %v3571_v52 = vadd.f32 %v3543_v23, %v9263_v58  ;;  %v3544_v8 = vadd.f32 %v9508_v46, %v3378_v26  ;;  %v3380_v48 = vadd.f32 %v3379_v17, %v9258_v55  ;;  %v3617_v15 = vmax.f32 %v3596_v10, %v3597_v40  ;;  %v9730_v46 = vld [vmem:[#allocation6 + $0x1d0] ss:$8 sps:$4 sm:$0xff]  }
 0x329   :  { %5086 = vmatpush2.bf16.msra.mxu1 %v9633_v35  ;;  %v3383_v31 = vpop.f32.mrf.mxu0  ;;  %4628 = vmatmul.mubr.bf16.gmra.mxu0 %v11328_v60  ;;  %v3598_v55 = vmax.f32 %v3570_v22, 0.0  ;;  %v11332_v26 = vld [vmem:[#allocation100_spill] sm:$0xff]  ;;  %v11333_v22 = vld [vmem:[#allocation74_spill] sm:$0xff] }
 0x32a   :  { %v9722_v12 = vpop.f32.mrf.mxu1  ;;  %5303 = vmatprep.subr.bf16.mxu1 %v9639_v28  ;;  %v3599_v45 = vmax.f32 %v3571_v52, 0.0  ;;  %v3545_v63 = vadd.f32 %v9518_v47, %v3380_v48  ;;  %v3384_v56 = vadd.f32 %v3383_v31, %v11329_v42  ;;  %6497 = vmatprep.mubr.msk.bf16.mxu0 %vm2432_vm3, %v11330_v57  ;;  %v3572_v35 = vadd.f32 %v3544_v8, %v9256_v1  ;;  %v9737_v28 = vld [vmem:[#allocation6 + $0x1c4] ss:$8 sps:$4 sm:$0xff]   ;;  %v11334_v31 = vld [vmem:[#allocation101_spill] sm:$0xff] }
 0x32b   :  { %4838 = vmatpush1.bf16.msra.mxu0 %v9730_v46  ;;  %v3385_v37 = vpop.f32.mrf.mxu0  ;;  %v9740_v47 = vpack.c.bf16 %v3617_v15, %v3616_v61  ;;  %v9751_v61 = vld [vmem:[#allocation6 + $0x1c0] ss:$8 sps:$4 sm:$0xff]  }
 0x32c   :  { %v9734_v23 = vpop.f32.mrf.mxu1  ;;  %4802 = vmatmul.mubr.bf16.gmra.mxu1 %v11310_v44  ;;  %4839 = vmatprep.subr.bf16.mxu0 %v9737_v28  ;;  %v3573_v40 = vadd.f32 %v3545_v63, %v9263_v58  ;;  %v3546_v2 = vadd.f32 %v9529_v24, %v3384_v56  ;;  %v3386_v10 = vadd.f32 %v3385_v37, %v11332_v26  ;;  %v3600_v15 = vmax.f32 %v3572_v35, 0.0  ;;  %v9757_v56 = vld [vmem:[#allocation6 + $0x1b4] ss:$8 sps:$4 sm:$0xff]  }
 0x32d   :  { %11331 = vst [vmem:[#allocation92_spill] sm:$0xff] %v9740_v47  ;;  %6516 = vmatprep.mubr.msk.bf16.mxu1 %vm2432_vm3, %v11333_v22  ;;  %v3387_v17 = vpop.f32.mrf.mxu0  ;;  %v3618_v8 = vmax.f32 %v3598_v55, %v3599_v45  ;;  %v11335_v55 = vld [vmem:[#allocation102_spill] sm:$0xff] }
 0x32e   :  { %v9747_v52 = vpop.f32.mrf.mxu1  ;;  %v3601_v44 = vmax.f32 %v3573_v40, 0.0  ;;  %v3547_v48 = vadd.f32 %v9540_v14, %v3386_v10  ;;  %v3388_v60 = vadd.f32 %v3387_v17, %v11334_v31  ;;  %v3574_v24 = vadd.f32 %v3546_v2, %v9256_v1  ;;  %v11336_v10 = vld [vmem:[#allocation28_spill] sm:$0xff]  ;;  %v11337_v17 = vld [vmem:[#allocation103_spill] sm:$0xff] }
 0x32f   :  { %4840 = vmatpush1.bf16.msra.mxu0 %v9751_v61  ;;  %v3389_v63 = vpop.f32.mrf.mxu0 }
 0x330   :  { %v9755_v42 = vpop.f32.mrf.mxu1  ;;  %4841 = vmatprep.subr.bf16.mxu0 %v9757_v56  ;;  %v3575_v45 = vadd.f32 %v3547_v48, %v9263_v58  ;;  %v3548_v14 = vadd.f32 %v9549_v49, %v3388_v60  ;;  %v3390_v37 = vadd.f32 %v3389_v63, %v11335_v55  ;;  %v3619_v35 = vmax.f32 %v3600_v15, %v3601_v44  ;;  %v9777_v44 = vld [vmem:[#allocation6 + $0x1a4] ss:$8 sps:$4 sm:$0xff]  }
 0x331   :  { %v3393_v40 = vpop.f32.mrf.mxu0  ;;  %4638 = vmatmul.mubr.bf16.gmra.mxu0 %v11336_v10  ;;  %v3602_v49 = vmax.f32 %v3574_v24, 0.0  ;;  %v11340_v55 = vld [vmem:[#allocation104_spill] sm:$0xff]  ;;  %v11341_v24 = vld [vmem:[#allocation59_spill] sm:$0xff] }
 0x332   :  { %v9763_v26 = vpop.f32.mrf.mxu1  ;;  %v3603_v2 = vmax.f32 %v3575_v45, 0.0  ;;  %v3549_v22 = vadd.f32 %v9558_v5, %v3390_v37  ;;  %v3394_v31 = vadd.f32 %v3393_v40, %v11337_v17  ;;  %6498 = vmatprep.mubr.msk.bf16.mxu0 %vm2432_vm3, %v11338_v33  ;;  %v3576_v48 = vadd.f32 %v3548_v14, %v9256_v1  ;;  %v9794_v17 = vld [vmem:[#allocation6 + $0x1a0] ss:$8 sps:$4 sm:$0xff]  }
 0x333   :  { %4842 = vmatpush1.bf16.msra.mxu0 %v9770_v21  ;;  %v3395_v60 = vpop.f32.mrf.mxu0  ;;  %v9780_v5 = vpack.c.bf16 %v3619_v35, %v3618_v8 }
 0x334   :  { %v9774_v63 = vpop.f32.mrf.mxu1  ;;  %5088 = vmatmul.mubr.bf16.vlgmr.msra.gmra.mxu1 %v11315_v0  ;;  %4843 = vmatprep.subr.bf16.mxu0 %v9777_v44  ;;  %v3577_v15 = vadd.f32 %v3549_v22, %v9263_v58  ;;  %v3550_v45 = vadd.f32 %v9572_v50, %v3394_v31  ;;  %v3396_v37 = vadd.f32 %v3395_v60, %v11340_v55  ;;  %v11342_v22 = vld [vmem:[#allocation105_spill] sm:$0xff]  ;;  %v3604_v31 = vmax.f32 %v3576_v48, 0.0  ;;  %v11344_v48 = vld [vmem:[#allocation31_spill] sm:$0xff] }
 0x335   :  { %11339 = vst [vmem:[#allocation93_spill] sm:$0xff] %v9780_v5  ;;  %6517 = vmatprep.mubr.msk.bf16.mxu1 %vm2432_vm3, %v11341_v24  ;;  %5304 = vmatpush1.bf16.msra.mxu1 %v9686_v53  ;;  %v3397_v14 = vpop.f32.mrf.mxu0  ;;  %v3620_v0 = vmax.f32 %v3602_v49, %v3603_v2  ;;  %v9799_v55 = vld [vmem:[#allocation6 + $0x194] ss:$8 sps:$4 sm:$0xff]   ;;  %v11343_v49 = vld [vmem:[#allocation107_spill] sm:$0xff] }
 0x336   :  { %v9788_v40 = vpop.f32.mrf.mxu1  ;;  %5305 = vmatprep.subr.bf16.mxu1 %v9693_v11  ;;  %v3605_v10 = vmax.f32 %v3577_v15, 0.0  ;;  %v3578_v8 = vadd.f32 %v3550_v45, %v9256_v1  ;;  %v3551_v35 = vadd.f32 %v9584_v39, %v3396_v37  ;;  %v3398_v50 = vadd.f32 %v3397_v14, %v11342_v22 }
 0x337   :  { %4844 = vmatpush1.bf16.msra.mxu0 %v9794_v17  ;;  %v3399_v60 = vpop.f32.mrf.mxu0 }
 0x338   :  { %v9797_v53 = vpop.f32.mrf.mxu1  ;;  %4845 = vmatprep.subr.bf16.mxu0 %v9799_v55  ;;  %v3579_v11 = vadd.f32 %v3551_v35, %v9263_v58  ;;  %v3552_v2 = vadd.f32 %v9593_v51, %v3398_v50  ;;  %v3400_v39 = vadd.f32 %v3399_v60, %v11343_v49  ;;  %v3606_v15 = vmax.f32 %v3578_v8, 0.0  ;;  %v11345_v50 = vld [vmem:[#allocation67_spill] sm:$0xff] }
 0x339   :  { %5306 = vmatpush1.bf16.msra.mxu1 %v9709_v25  ;;  %v3679_v45 = vpop.f32.mrf.mxu0  ;;  %4648 = vmatmul.mubr.bf16.gmra.mxu0 %v11344_v48  ;;  %v3621_v24 = vmax.f32 %v3604_v31, %v3605_v10  ;;  %v9817_v25 = vld [vmem:[#allocation6 + $0x190] ss:$8 sps:$4 sm:$0xff]  }
 0x33a   :  { %v9806_v37 = vpop.f32.mrf.mxu1  ;;  %5307 = vmatprep.subr.bf16.mxu1 %v9715_v36  ;;  %v3607_v14 = vmax.f32 %v3579_v11, 0.0  ;;  %v3580_v22 = vadd.f32 %v3552_v2, %v9256_v1  ;;  %v3553_v35 = vadd.f32 %v9602_v20, %v3400_v39  ;;  %v9813_v51 = vadd.f32 %v9614_v38, %v3679_v45  ;;  %6499 = vmatprep.mubr.msk.bf16.mxu0 %vm2432_vm3, %v11345_v50  ;;  %v9823_v36 = vld [vmem:[#allocation6 + $0x184] ss:$8 sps:$4 sm:$0xff]   ;;  %v11347_v31 = vld [vmem:[#allocation62_spill] sm:$0xff] }
 0x33b   :  { %4846 = vmatpush1.bf16.msra.mxu0 %v9817_v25  ;;  %v3681_v8 = vpop.f32.mrf.mxu0  ;;  %v9826_v20 = vpack.c.bf16 %v3621_v24, %v3620_v0  ;;  %v9841_v45 = vld [vmem:[#allocation6 + $0x180] ss:$8 sps:$4 sm:$0xff]   ;;  %v9846_v24 = vld [vmem:[#allocation6 + $0x234] ss:$8 sps:$4 sm:$0xff]  }
 0x33c   :  { %v9820_v60 = vpop.f32.mrf.mxu1  ;;  %5098 = vmatmul.mubr.bf16.gmra.mxu1 %v11323_v54  ;;  %4847 = vmatprep.subr.bf16.mxu0 %v9823_v36  ;;  %v3581_v38 = vadd.f32 %v3553_v35, %v9263_v58  ;;  %v9830_v10 = vadd.f32 %v9628_v18, %v3681_v8  ;;  %v3622_v11 = vmax.f32 %v3606_v15, %v3607_v14  ;;  %v3608_v54 = vmax.f32 %v3580_v22, 0.0  ;;  %v11348_v14 = vld [vmem:[#allocation64_spill] sm:$0xff]  ;;  %v11349_v35 = vld [vmem:[#allocation78_spill] sm:$0xff] }
 0x33d   :  { %11346 = vst [vmem:[#allocation19_spill] sm:$0xff] %v9826_v20  ;;  %6518 = vmatprep.mubr.msk.bf16.mxu1 %vm2432_vm3, %v11347_v31  ;;  %5308 = vmatpush1.bf16.msra.mxu1 %v9730_v46  ;;  %v3683_v2 = vpop.f32.mrf.mxu0  ;;  %v7108_v8 = vld [vmem:[#allocation6 + $0x230] ss:$8 sps:$4 sm:$0xff]   ;;  %v7109_v31 = vld [vmem:[#allocation6 + $0x224] ss:$8 sps:$4 sm:$0xff]  }
 0x33e   :  { %v9835_v49 = vpop.f32.mrf.mxu1  ;;  %5309 = vmatprep.subr.bf16.mxu1 %v9737_v28  ;;  %v3609_v39 = vmax.f32 %v3581_v38, 0.0  ;;  %v9839_v0 = vadd.f32 %v9637_v34, %v3683_v2 }
 0x33f   :  { %4848 = vmatpush1.bf16.msra.mxu0 %v9841_v45  ;;  %v3685_v18 = vpop.f32.mrf.mxu0 }
 0x340   :  { %v9844_v48 = vpop.f32.mrf.mxu1  ;;  %4857 = vmatprep.subr.bf16.mxu0 %v9846_v24  ;;  %v9850_v46 = vadd.f32 %v9646_v19, %v3685_v18  ;;  %v3623_v28 = vmax.f32 %v3608_v54, %v3609_v39  ;;  %v7110_v39 = vld [vmem:[#allocation6 + $0x220] ss:$8 sps:$4 sm:$0xff]  }
 0x341   :  { %5310 = vmatpush1.bf16.msra.mxu1 %v9751_v61  ;;  %v3689_v15 = vpop.f32.mrf.mxu0  ;;  %4658 = vmatmul.mubr.bf16.gmra.mxu0 %v11348_v14  ;;  %v11352_v14 = vld [vmem:[#allocation76_spill] sm:$0xff] }
 0x342   :  { %v9853_v34 = vpop.f32.mrf.mxu1  ;;  %5311 = vmatprep.subr.bf16.mxu1 %v9757_v56  ;;  %v9858_v22 = vadd.f32 %v9655_v41, %v3689_v15  ;;  %6500 = vmatprep.mubr.msk.bf16.mxu0 %vm2432_vm3, %v11349_v35  ;;  %v9862_v19 = vpack.c.bf16 %v3623_v28, %v3622_v11  ;;  %v11351_v56 = vld [vmem:[#allocation58_spill] sm:$0xff] }
 0x343   :  { %4858 = vmatpush2.bf16.msra.mxu0 %v7108_v8  ;;  %v3691_v38 = vpop.f32.mrf.mxu0 }
 0x344   :  { %11350 = vst [vmem:[#allocation41_spill] sm:$0xff] %v9862_v19  ;;  %v9864_v61 = vpop.f32.mrf.mxu1  ;;  %5108 = vmatmul.mubr.bf16.gmra.mxu1 %v11330_v57  ;;  %4859 = vmatprep.subr.bf16.mxu0 %v7109_v31  ;;  %v9868_v2 = vadd.f32 %v9666_v30, %v3691_v38  ;;  %v7111_v30 = vld [vmem:[#allocation6 + $0x214] ss:$8 sps:$4 sm:$0xff]   ;;  %v7112_v38 = vld [vmem:[#allocation6 + $0x210] ss:$8 sps:$4 sm:$0xff]  }
 0x345   :  { %6519 = vmatprep.mubr.msk.bf16.mxu1 %vm2432_vm3, %v11351_v56  ;;  %5312 = vmatpush1.bf16.msra.mxu1 %v9770_v21  ;;  %v3693_v41 = vpop.f32.mrf.mxu0 }
 0x346   :  { %v9873_v54 = vpop.f32.mrf.mxu1  ;;  %5313 = vmatprep.subr.bf16.mxu1 %v9777_v44  ;;  %v9877_v11 = vadd.f32 %v9672_v3, %v3693_v41  ;;  %v11353_v44 = vld [vmem:[#allocation81_spill] sm:$0xff] }
 0x347   :  { %4860 = vmatpush2.bf16.msra.mxu0 %v7110_v39  ;;  %v3695_v57 = vpop.f32.mrf.mxu0 }
 0x348   :  { %v9879_v18 = vpop.f32.mrf.mxu1  ;;  %4861 = vmatprep.subr.bf16.mxu0 %v7111_v30  ;;  %v9882_v28 = vadd.f32 %v9678_v29, %v3695_v57  ;;  %v11354_v57 = vld [vmem:[#allocation75_spill] sm:$0xff] }
 0x349   :  { %5314 = vmatpush1.bf16.msra.mxu1 %v9794_v17  ;;  %v3699_v21 = vpop.f32.mrf.mxu0  ;;  %4668 = vmatmul.mubr.bf16.gmra.mxu0 %v11352_v14  ;;  %v7113_v17 = vld [vmem:[#allocation6 + $0x204] ss:$8 sps:$4 sm:$0xff]   ;;  %v7114_v14 = vld [vmem:[#allocation6 + $0x200] ss:$8 sps:$4 sm:$0xff]  }
 0x34a   :  { %v9885_v15 = vpop.f32.mrf.mxu1  ;;  %5315 = vmatprep.subr.bf16.mxu1 %v9799_v55  ;;  %v9890_v3 = vadd.f32 %v9690_v6, %v3699_v21  ;;  %6501 = vmatprep.mubr.msk.bf16.mxu0 %vm2432_vm3, %v11353_v44 }
 0x34b   :  { %4862 = vmatpush2.bf16.msra.mxu0 %v7112_v38  ;;  %v3701_v56 = vpop.f32.mrf.mxu0 }
 0x34c   :  { %v9894_v29 = vpop.f32.mrf.mxu1  ;;  %5118 = vmatmul.mubr.bf16.gmra.mxu1 %v11338_v33  ;;  %4863 = vmatprep.subr.bf16.mxu0 %v7113_v17  ;;  %v9898_v41 = vadd.f32 %v9704_v59, %v3701_v56  ;;  %v7115_v59 = vld [vmem:[#allocation6 + $0x74] ss:$8 sps:$4 sm:$0xff]  }
 0x34d   :  { %6520 = vmatprep.mubr.msk.bf16.mxu1 %vm2432_vm3, %v11354_v57  ;;  %5316 = vmatpush1.bf16.msra.mxu1 %v9817_v25  ;;  %v3703_v6 = vpop.f32.mrf.mxu0 }
 0x34e   :  { %v9903_v55 = vpop.f32.mrf.mxu1  ;;  %5317 = vmatprep.subr.bf16.mxu1 %v9823_v36  ;;  %v9907_v21 = vadd.f32 %v9713_v32, %v3703_v6  ;;  %v11357_v36 = vld [vmem:[#allocation83_spill] sm:$0xff] }
 0x34f   :  { %11355 = vst [vmem:[#allocation70_spill] sm:$0xff] %v9903_v55  ;;  %4864 = vmatpush2.bf16.msra.mxu0 %v7114_v14  ;;  %v3705_v33 = vpop.f32.mrf.mxu0  ;;  %v11356_v55 = vld [vmem:[#allocation79_spill] sm:$0xff] }
 0x350   :  { %v9909_v62 = vpop.f32.mrf.mxu1  ;;  %5179 = vmatprep.subr.bf16.mxu0 %v7115_v59  ;;  %v9912_v56 = vadd.f32 %v9722_v12, %v3705_v33 }
 0x351   :  { %5318 = vmatpush1.bf16.msra.mxu1 %v9841_v45  ;;  %v3709_v25 = vpop.f32.mrf.mxu0  ;;  %4678 = vmatmul.mubr.bf16.gmra.mxu0 %v11356_v55  ;;  %v11359_v45 = vld [vmem:[#allocation77_spill] sm:$0xff] }
 0x352   :  { %v9915_v57 = vpop.f32.mrf.mxu1  ;;  %5327 = vmatprep.subr.bf16.mxu1 %v9846_v24  ;;  %v9920_v32 = vadd.f32 %v9734_v23, %v3709_v25  ;;  %6509 = vmatprep.mubr.msk.bf16.mxu0 %vm2432_vm3, %v11357_v36 }
 0x353   :  { %v3711_v6 = vpop.f32.mrf.mxu0 }
 0x354   :  { %v9924_v59 = vpop.f32.mrf.mxu1  ;;  %5128 = vmatmul.mubr.bf16.gmra.mxu1 %v11345_v50  ;;  %v9928_v12 = vadd.f32 %v9747_v52, %v3711_v6  ;;  %v11362_v6 = vld [vmem:[#allocation14_spill] sm:$0xff] }
 0x355   :  { %11358 = vst [vmem:[#allocation94_spill] sm:$0xff] %v9924_v59  ;;  %6521 = vmatprep.mubr.msk.bf16.mxu1 %vm2432_vm3, %v11359_v45  ;;  %5328 = vmatpush2.bf16.msra.mxu1 %v7108_v8  ;;  %v3713_v55 = vpop.f32.mrf.mxu0 }
 0x356   :  { %v9932_v24 = vpop.f32.mrf.mxu1  ;;  %5329 = vmatprep.subr.bf16.mxu1 %v7109_v31  ;;  %v9935_v23 = vadd.f32 %v9755_v42, %v3713_v55  ;;  %v7116_v31 = vld [vmem:[#allocation6 + $0x70] ss:$8 sps:$4 sm:$0xff]  }
 0x357   :  { %11360 = vst [vmem:[#allocation21_spill] sm:$0xff] %v9932_v24  ;;  %v3715_v33 = vpop.f32.mrf.mxu0  ;;  %v11363_v42 = vld [vmem:[#allocation84_spill] sm:$0xff] }
 0x358   :  { %v9937_v25 = vpop.f32.mrf.mxu1  ;;  %v9940_v59 = vadd.f32 %v9763_v26, %v3715_v33  ;;  %v7117_v26 = vld [vmem:[#allocation6 + $0x64] ss:$8 sps:$4 sm:$0xff]  }
 0x359   :  { %11361 = vst [vmem:[#allocation44_spill] sm:$0xff] %v9937_v25  ;;  %5330 = vmatpush2.bf16.msra.mxu1 %v7110_v39  ;;  %v3719_v52 = vpop.f32.mrf.mxu0  ;;  %4866 = vmatmul.mubr.bf16.vlgmr.msra.gmra.mxu0 %v11362_v6  ;;  %v11365_v33 = vld [vmem:[#allocation80_spill] sm:$0xff] }
 0x35a   :  { %v9942_v50 = vpop.f32.mrf.mxu1  ;;  %5331 = vmatprep.subr.bf16.mxu1 %v7111_v30  ;;  %v9946_v8 = vadd.f32 %v9774_v63, %v3719_v52  ;;  %5180 = vmatpush1.bf16.msra.mxu0 %v7116_v31  ;;  %v7118_v6 = vld [vmem:[#allocation6 + $0x60] ss:$8 sps:$4 sm:$0xff]   ;;  %v7128_v25 = vld [vmem:[#allocation6 + $0x10] ss:$8 sps:$4 sm:$0xff]  }
 0x35b   :  { %6510 = vmatprep.mubr.msk.bf16.mxu0 %vm2432_vm3, %v11363_v42  ;;  %v3721_v45 = vpop.f32.mrf.mxu0  ;;  %5181 = vmatprep.subr.bf16.mxu0 %v7117_v26  ;;  %v7119_v26 = vld [vmem:[#allocation6 + $0x54] ss:$8 sps:$4 sm:$0xff]  }
 0x35c   :  { %v9950_v55 = vpop.f32.mrf.mxu1  ;;  %5138 = vmatmul.mubr.bf16.gmra.mxu1 %v11349_v35  ;;  %v9954_v39 = vadd.f32 %v9788_v40, %v3721_v45 }
 0x35d   :  { %11364 = vst [vmem:[#allocation24_spill] sm:$0xff] %v9950_v55  ;;  %6522 = vmatprep.mubr.msk.bf16.mxu1 %vm2432_vm3, %v11365_v33  ;;  %5332 = vmatpush2.bf16.msra.mxu1 %v7112_v38  ;;  %v3723_v63 = vpop.f32.mrf.mxu0  ;;  %v11367_v33 = vld [vmem:[#allocation15_spill] sm:$0xff] }
 0x35e   :  { %v9958_v30 = vpop.f32.mrf.mxu1  ;;  %5333 = vmatprep.subr.bf16.mxu1 %v7113_v17  ;;  %v9961_v52 = vadd.f32 %v9797_v53, %v3723_v63  ;;  %5182 = vmatpush1.bf16.msra.mxu0 %v7118_v6  ;;  %v7120_v53 = vld [vmem:[#allocation6 + $0x50] ss:$8 sps:$4 sm:$0xff]  }
 0x35f   :  { %v3725_v31 = vpop.f32.mrf.mxu0  ;;  %5183 = vmatprep.subr.bf16.mxu0 %v7119_v26  ;;  %v11368_v63 = vld [vmem:[#allocation85_spill] sm:$0xff] }
 0x360   :  { %v9963_v35 = vpop.f32.mrf.mxu1  ;;  %v9966_v40 = vadd.f32 %v9806_v37, %v3725_v31  ;;  %v7121_v37 = vld [vmem:[#allocation6 + $0x44] ss:$8 sps:$4 sm:$0xff]   ;;  %v11370_v31 = vld [vmem:[#allocation82_spill] sm:$0xff] }
 0x361   :  { %11366 = vst [vmem:[#allocation47_spill] sm:$0xff] %v9963_v35  ;;  %5334 = vmatpush2.bf16.msra.mxu1 %v7114_v14  ;;  %v3729_v45 = vpop.f32.mrf.mxu0  ;;  %4876 = vmatmul.mubr.bf16.gmra.mxu0 %v11367_v33  ;;  %v7122_v33 = vld [vmem:[#allocation6 + $0x40] ss:$8 sps:$4 sm:$0xff]  }
 0x362   :  { %v9968_v38 = vpop.f32.mrf.mxu1  ;;  %v9972_v17 = vadd.f32 %v9820_v60, %v3729_v45  ;;  %5184 = vmatpush1.bf16.msra.mxu0 %v7120_v53  ;;  %6511 = vmatprep.mubr.msk.bf16.mxu0 %vm2432_vm3, %v11368_v63 }
 0x363   :  { %v3731_v6 = vpop.f32.mrf.mxu0  ;;  %5185 = vmatprep.subr.bf16.mxu0 %v7121_v37 }
 0x364   :  { %v9976_v35 = vpop.f32.mrf.mxu1  ;;  %5148 = vmatmul.mubr.bf16.gmra.mxu1 %v11353_v44  ;;  %v9980_v14 = vadd.f32 %v9835_v49, %v3731_v6  ;;  %v7123_v44 = vld [vmem:[#allocation6 + $0x34] ss:$8 sps:$4 sm:$0xff]  }
 0x365   :  { %11369 = vst [vmem:[#allocation43_spill] sm:$0xff] %v9976_v35  ;;  %6530 = vmatprep.mubr.msk.bf16.mxu1 %vm2432_vm3, %v11370_v31  ;;  %v3733_v60 = vpop.f32.mrf.mxu0  ;;  %v11374_v31 = vld [vmem:[#allocation18_spill] sm:$0xff] }
 0x366   :  { %v9984_v26 = vpop.f32.mrf.mxu1  ;;  %v9987_v45 = vadd.f32 %v9844_v48, %v3733_v60  ;;  %5186 = vmatpush1.bf16.msra.mxu0 %v7122_v33  ;;  %v7124_v48 = vld [vmem:[#allocation6 + $0x30] ss:$8 sps:$4 sm:$0xff]   ;;  %v11375_v60 = vld [vmem:[#allocation87_spill] sm:$0xff] }
 0x367   :  { %11371 = vst [vmem:[#allocation27_spill] sm:$0xff] %v9984_v26  ;;  %v3735_v53 = vpop.f32.mrf.mxu0  ;;  %5187 = vmatprep.subr.bf16.mxu0 %v7123_v44  ;;  %v11377_v44 = vld [vmem:[#allocation17_spill] sm:$0xff] }
 0x368   :  { %v9989_v35 = vpop.f32.mrf.mxu1  ;;  %v9992_v37 = vadd.f32 %v9853_v34, %v3735_v53  ;;  %v7125_v34 = vld [vmem:[#allocation6 + $0x24] ss:$8 sps:$4 sm:$0xff]  }
 0x369   :  { %11372 = vst [vmem:[#allocation50_spill] sm:$0xff] %v9989_v35  ;;  %v3739_v49 = vpop.f32.mrf.mxu0  ;;  %4886 = vmatmul.mubr.bf16.gmra.mxu0 %v11374_v31 }
 0x36a   :  { %v9994_v6 = vpop.f32.mrf.mxu1  ;;  %v9998_v55 = vadd.f32 %v9864_v61, %v3739_v49  ;;  %5188 = vmatpush1.bf16.msra.mxu0 %v7124_v48  ;;  %6512 = vmatprep.mubr.msk.bf16.mxu0 %vm2432_vm3, %v11375_v60  ;;  %v7126_v48 = vld [vmem:[#allocation6 + $0x20] ss:$8 sps:$4 sm:$0xff]  }
 0x36b   :  { %11373 = vst [vmem:[#allocation46_spill] sm:$0xff] %v9994_v6  ;;  %v3741_v33 = vpop.f32.mrf.mxu0  ;;  %5189 = vmatprep.subr.bf16.mxu0 %v7125_v34 }
 0x36c   :  { %v10002_v35 = vpop.f32.mrf.mxu1  ;;  %5336 = vmatmul.mubr.bf16.vlgmr.msra.gmra.mxu1 %v11357_v36  ;;  %v10006_v53 = vadd.f32 %v9873_v54, %v3741_v33  ;;  %v7127_v36 = vld [vmem:[#allocation6 + $0x14] ss:$8 sps:$4 sm:$0xff]  }
 0x36d   :  { %11376 = vst [vmem:[#allocation30_spill] sm:$0xff] %v10002_v35  ;;  %6531 = vmatprep.mubr.msk.bf16.mxu1 %vm2432_vm3, %v11377_v44  ;;  %v3743_v61 = vpop.f32.mrf.mxu0  ;;  %v11381_v44 = vld [vmem:[#allocation22_spill] sm:$0xff] }
 0x36e   :  { %v10010_v49 = vpop.f32.mrf.mxu1  ;;  %v10013_v31 = vadd.f32 %v9879_v18, %v3743_v61  ;;  %5190 = vmatpush1.bf16.msra.mxu0 %v7126_v48  ;;  %v11382_v18 = vld [vmem:[#allocation88_spill] sm:$0xff] }
 0x36f   :  { %11378 = vst [vmem:[#allocation53_spill] sm:$0xff] %v10010_v49  ;;  %v3745_v6 = vpop.f32.mrf.mxu0  ;;  %5191 = vmatprep.subr.bf16.mxu0 %v7127_v36  ;;  %v7129_v36 = vld [vmem:[#allocation6 + $0x4] ss:$8 sps:$4 sm:$0xff]  }
 0x370   :  { %v10015_v35 = vpop.f32.mrf.mxu1  ;;  %v10018_v34 = vadd.f32 %v9885_v15, %v3745_v6 }
 0x371   :  { %11379 = vst [vmem:[#allocation34_spill] sm:$0xff] %v10015_v35  ;;  %v3927_v54 = vpop.f32.mrf.mxu0  ;;  %4896 = vmatmul.mubr.bf16.gmra.mxu0 %v11381_v44  ;;  %v11384_v35 = vld [vmem:[#allocation20_spill] sm:$0xff] }
 0x372   :  { %v10020_v33 = vpop.f32.mrf.mxu1  ;;  %v3996_v49 = vadd.f32 %v3927_v54, %v9813_v51  ;;  %5192 = vmatpush1.bf16.msra.mxu0 %v7128_v25  ;;  %6513 = vmatprep.mubr.msk.bf16.mxu0 %vm2432_vm3, %v11382_v18 }
 0x373   :  { %11380 = vst [vmem:[#allocation71_spill] sm:$0xff] %v10020_v33  ;;  %v3929_v61 = vpop.f32.mrf.mxu0  ;;  %5193 = vmatprep.subr.bf16.mxu0 %v7129_v36  ;;  %v7130_v33 = vld [vmem:[#allocation6] ss:$8 sps:$4 sm:$0xff]   ;;  %v7131_v36 = vld [vmem:[#allocation6 + $0xb4] ss:$8 sps:$4 sm:$0xff]  }
 0x374   :  { %v10026_v48 = vpop.f32.mrf.mxu1  ;;  %5346 = vmatmul.mubr.bf16.gmra.mxu1 %v11363_v42  ;;  %v4024_v15 = vadd.f32 %v3996_v49, %v9256_v1  ;;  %v3997_v6 = vadd.f32 %v3929_v61, %v9830_v10 }
 0x375   :  { %11383 = vst [vmem:[#allocation56_spill] sm:$0xff] %v10026_v48  ;;  %6532 = vmatprep.mubr.msk.bf16.mxu1 %vm2432_vm3, %v11384_v35  ;;  %v3931_v51 = vpop.f32.mrf.mxu0 }
 0x376   :  { %v10033_v54 = vpop.f32.mrf.mxu1  ;;  %v4025_v25 = vadd.f32 %v3997_v6, %v9263_v58  ;;  %v3998_v44 = vadd.f32 %v3931_v51, %v9839_v0  ;;  %5194 = vmatpush1.bf16.msra.mxu0 %v7130_v33  ;;  %v4052_v49 = vmax.f32 %v4024_v15, 0.0  ;;  %v7132_v51 = vld [vmem:[#allocation6 + $0xb0] ss:$8 sps:$4 sm:$0xff]  }
 0x377   :  { %11385 = vst [vmem:[#allocation72_spill] sm:$0xff] %v10033_v54  ;;  %v3933_v48 = vpop.f32.mrf.mxu0  ;;  %5203 = vmatprep.subr.bf16.mxu0 %v7131_v36  ;;  %v11387_v54 = vld [vmem:[#allocation23_spill] sm:$0xff]  ;;  %v11390_v36 = vld [vmem:[#allocation86_spill] sm:$0xff] }
 0x378   :  { %v10037_v42 = vpop.f32.mrf.mxu1  ;;  %v4053_v26 = vmax.f32 %v4025_v25, 0.0  ;;  %v4026_v10 = vadd.f32 %v3998_v44, %v9256_v1  ;;  %v3999_v35 = vadd.f32 %v3933_v48, %v9850_v46  ;;  %v7133_v46 = vld [vmem:[#allocation6 + $0xa4] ss:$8 sps:$4 sm:$0xff]  }
 0x379   :  { %11386 = vst [vmem:[#allocation95_spill] sm:$0xff] %v10037_v42  ;;  %v3937_v61 = vpop.f32.mrf.mxu0  ;;  %4906 = vmatmul.mubr.bf16.gmra.mxu0 %v11387_v54  ;;  %v11388_v42 = vld [vmem:[#allocation89_spill] sm:$0xff] }
 0x37a   :  { %v10041_v24 = vpop.f32.mrf.mxu1  ;;  %v4080_v6 = vmax.f32 %v4052_v49, %v4053_v26  ;;  %v4027_v0 = vadd.f32 %v3999_v35, %v9263_v58  ;;  %v4000_v33 = vadd.f32 %v3937_v61, %v9858_v22  ;;  %5204 = vmatpush2.bf16.msra.mxu0 %v7132_v51  ;;  %6514 = vmatprep.mubr.msk.bf16.mxu0 %vm2432_vm3, %v11388_v42  ;;  %v4054_v48 = vmax.f32 %v4026_v10, 0.0 }
 0x37b   :  { %v3939_v15 = vpop.f32.mrf.mxu0  ;;  %5205 = vmatprep.subr.bf16.mxu0 %v7133_v46 }
 0x37c   :  { %v10048_v25 = vpop.f32.mrf.mxu1  ;;  %5356 = vmatmul.mubr.bf16.gmra.mxu1 %v11368_v63  ;;  %v4055_v44 = vmax.f32 %v4027_v0, 0.0  ;;  %v4028_v26 = vadd.f32 %v4000_v33, %v9256_v1  ;;  %v4001_v54 = vadd.f32 %v3939_v15, %v9868_v2  ;;  %v7134_v63 = vld [vmem:[#allocation6 + $0xa0] ss:$8 sps:$4 sm:$0xff]   ;;  %v7135_v33 = vld [vmem:[#allocation6 + $0x94] ss:$8 sps:$4 sm:$0xff]  }
 0x37d   :  { %11389 = vst [vmem:[#allocation96_spill] sm:$0xff] %v10048_v25  ;;  %6533 = vmatprep.mubr.msk.bf16.mxu1 %vm2432_vm3, %v11390_v36  ;;  %v3941_v22 = vpop.f32.mrf.mxu0 }
 0x37e   :  { %v10055_v49 = vpop.f32.mrf.mxu1  ;;  %v4081_v35 = vmax.f32 %v4054_v48, %v4055_v44  ;;  %v4029_v61 = vadd.f32 %v4001_v54, %v9263_v58  ;;  %v4002_v51 = vadd.f32 %v3941_v22, %v9877_v11  ;;  %5206 = vmatpush2.bf16.msra.mxu0 %v7134_v63  ;;  %v4056_v46 = vmax.f32 %v4028_v26, 0.0  ;;  %v11392_v54 = vld [vmem:[#allocation26_spill] sm:$0xff] }
 0x37f   :  { %v3943_v10 = vpop.f32.mrf.mxu0  ;;  %5207 = vmatprep.subr.bf16.mxu0 %v7135_v33  ;;  %v7136_v63 = vld [vmem:[#allocation6 + $0x90] ss:$8 sps:$4 sm:$0xff]   ;;  %v11393_v33 = vld [vmem:[#allocation91_spill] sm:$0xff] }
 0x380   :  { %v10059_v0 = vpop.f32.mrf.mxu1  ;;  %v4057_v2 = vmax.f32 %v4029_v61, 0.0  ;;  %v4030_v15 = vadd.f32 %v4002_v51, %v9256_v1  ;;  %v4003_v36 = vadd.f32 %v3943_v10, %v9882_v28  ;;  %v10063_v25 = vpack.c.bf16 %v4081_v35, %v4080_v6  ;;  %v7137_v28 = vld [vmem:[#allocation6 + $0x84] ss:$8 sps:$4 sm:$0xff]  }
 0x381   :  { %v3947_v48 = vpop.f32.mrf.mxu0  ;;  %4916 = vmatmul.mubr.bf16.gmra.mxu0 %v11392_v54 }
 0x382   :  { %11391 = vst [vmem:[#allocation73_spill] sm:$0xff] %v10063_v25  ;;  %v10065_v44 = vpop.f32.mrf.mxu1  ;;  %v4082_v11 = vmax.f32 %v4056_v46, %v4057_v2  ;;  %v4031_v26 = vadd.f32 %v4003_v36, %v9263_v58  ;;  %v4004_v22 = vadd.f32 %v3947_v48, %v9890_v3  ;;  %5208 = vmatpush2.bf16.msra.mxu0 %v7136_v63  ;;  %v4058_v6 = vmax.f32 %v4030_v15, 0.0  ;;  %v11394_v2 = vld [vmem:[#allocation25_spill] sm:$0xff] }
 0x383   :  { %6515 = vmatprep.mubr.msk.bf16.mxu0 %vm2432_vm3, %v11393_v33  ;;  %v3949_v61 = vpop.f32.mrf.mxu0  ;;  %5209 = vmatprep.subr.bf16.mxu0 %v7137_v28  ;;  %v11402_v25 = vld [vmem:[#allocation37_spill] sm:$0xff] }
 0x384   :  { %v10072_v51 = vpop.f32.mrf.mxu1  ;;  %5366 = vmatmul.mubr.bf16.gmra.mxu1 %v11375_v60  ;;  %v4059_v35 = vmax.f32 %v4031_v26, 0.0  ;;  %v4032_v46 = vadd.f32 %v4004_v22, %v9256_v1  ;;  %v4005_v10 = vadd.f32 %v3949_v61, %v9898_v41  ;;  %v7138_v60 = vld [vmem:[#allocation6 + $0x80] ss:$8 sps:$4 sm:$0xff]  }
 0x385   :  { %6534 = vmatprep.mubr.msk.bf16.mxu1 %vm2432_vm3, %v11394_v2  ;;  %v3951_v3 = vpop.f32.mrf.mxu0 }
 0x386   :  { %v10079_v36 = vpop.f32.mrf.mxu1  ;;  %v4083_v48 = vmax.f32 %v4058_v6, %v4059_v35  ;;  %v4033_v54 = vadd.f32 %v4005_v10, %v9263_v58  ;;  %v4006_v63 = vadd.f32 %v3951_v3, %v9907_v21  ;;  %5210 = vmatpush2.bf16.msra.mxu0 %v7138_v60  ;;  %v4060_v28 = vmax.f32 %v4032_v46, 0.0  ;;  %v11396_v10 = vld [vmem:[#allocation32_spill] sm:$0xff] }
 0x387   :  { %5579 = vmatprep.subr.bf16.mxu0 %v9862_v19  ;;  %v3953_v15 = vpop.f32.mrf.mxu0  ;;  %v11397_v60 = vld [vmem:[#allocation36_spill] sm:$0xff] }
 0x388   :  { %v10084_v26 = vpop.f32.mrf.mxu1  ;;  %v4061_v41 = vmax.f32 %v4033_v54, 0.0  ;;  %v4034_v22 = vadd.f32 %v4006_v63, %v9256_v1  ;;  %v4007_v61 = vadd.f32 %v3953_v15, %v9912_v56  ;;  %v10088_v2 = vpack.c.bf16 %v4083_v48, %v4082_v11  ;;  %v11398_v15 = vld [vmem:[#allocation29_spill] sm:$0xff] }
 0x389   :  { %v3957_v6 = vpop.f32.mrf.mxu0  ;;  %4926 = vmatmul.mubr.bf16.gmra.mxu0 %v11396_v10 }
 0x38a   :  { %11395 = vst [vmem:[#allocation97_spill] sm:$0xff] %v10088_v2  ;;  %v10090_v35 = vpop.f32.mrf.mxu1  ;;  %v4084_v21 = vmax.f32 %v4060_v28, %v4061_v41  ;;  %v4035_v46 = vadd.f32 %v4007_v61, %v9263_v58  ;;  %v4008_v3 = vadd.f32 %v3957_v6, %v9920_v32  ;;  %6523 = vmatprep.mubr.msk.bf16.mxu0 %vm2432_vm3, %v11397_v60  ;;  %v4062_v56 = vmax.f32 %v4034_v22, 0.0 }
 0x38b   :  { %v3959_v54 = vpop.f32.mrf.mxu0 }
 0x38c   :  { %v10097_v19 = vpop.f32.mrf.mxu1  ;;  %5376 = vmatmul.mubr.bf16.gmra.mxu1 %v11382_v18  ;;  %v4063_v11 = vmax.f32 %v4035_v46, 0.0  ;;  %v4036_v48 = vadd.f32 %v4008_v3, %v9256_v1  ;;  %v4009_v63 = vadd.f32 %v3959_v54, %v9928_v12 }
 0x38d   :  { %6535 = vmatprep.mubr.msk.bf16.mxu1 %vm2432_vm3, %v11398_v15  ;;  %v3961_v28 = vpop.f32.mrf.mxu0 }
 0x38e   :  { %v10104_v41 = vpop.f32.mrf.mxu1  ;;  %v4085_v32 = vmax.f32 %v4062_v56, %v4063_v11  ;;  %v4037_v61 = vadd.f32 %v4009_v63, %v9263_v58  ;;  %v4010_v6 = vadd.f32 %v3961_v28, %v9935_v23  ;;  %v4064_v10 = vmax.f32 %v4036_v48, 0.0  ;;  %v11403_v48 = vld [vmem:[#allocation39_spill] sm:$0xff] }
 0x38f   :  { %11399 = vst [vmem:[#allocation61_spill] sm:$0xff] %v10104_v41  ;;  %v3963_v60 = vpop.f32.mrf.mxu0  ;;  %v11442_v41 = vld [vmem:[#allocation27_spill] sm:$0xff] }
 0x390   :  { %v10108_v18 = vpop.f32.mrf.mxu1  ;;  %v4065_v22 = vmax.f32 %v4037_v61, 0.0  ;;  %v4038_v46 = vadd.f32 %v4010_v6, %v9256_v1  ;;  %v4011_v12 = vadd.f32 %v3963_v60, %v9940_v59  ;;  %v10112_v3 = vpack.c.bf16 %v4085_v32, %v4084_v21  ;;  %v11405_v61 = vld [vmem:[#allocation90_spill] sm:$0xff] }
 0x391   :  { %11400 = vst [vmem:[#allocation98_spill] sm:$0xff] %v10108_v18  ;;  %v3967_v54 = vpop.f32.mrf.mxu0  ;;  %5212 = vmatmul.mubr.bf16.vlgmr.msra.gmra.mxu0 %v11402_v25  ;;  %v11441_v18 = vld [vmem:[#allocation21_spill] sm:$0xff] }
 0x392   :  { %11401 = vst [vmem:[#allocation99_spill] sm:$0xff] %v10112_v3  ;;  %v10114_v15 = vpop.f32.mrf.mxu1  ;;  %v4086_v56 = vmax.f32 %v4064_v10, %v4065_v22  ;;  %v4039_v11 = vadd.f32 %v4011_v12, %v9263_v58  ;;  %v4012_v23 = vadd.f32 %v3967_v54, %v9946_v8  ;;  %5580 = vmatpush1.bf16.msra.mxu0 %v9562_v16  ;;  %v4066_v63 = vmax.f32 %v4038_v46, 0.0 }
 0x393   :  { %6524 = vmatprep.mubr.msk.bf16.mxu0 %vm2432_vm3, %v11403_v48  ;;  %5581 = vmatprep.subr.bf16.mxu0 %v9826_v20  ;;  %v3969_v59 = vpop.f32.mrf.mxu0 }
 0x394   :  { %v10123_v21 = vpop.f32.mrf.mxu1  ;;  %5386 = vmatmul.mubr.bf16.gmra.mxu1 %v11388_v42  ;;  %v4067_v28 = vmax.f32 %v4039_v11, 0.0  ;;  %v4040_v25 = vadd.f32 %v4012_v23, %v9256_v1  ;;  %v4013_v32 = vadd.f32 %v3969_v59, %v9954_v39 }
 0x395   :  { %11404 = vst [vmem:[#allocation57_spill] sm:$0xff] %v10123_v21  ;;  %6536 = vmatprep.mubr.msk.bf16.mxu1 %vm2432_vm3, %v11405_v61  ;;  %v3971_v8 = vpop.f32.mrf.mxu0  ;;  %v11409_v61 = vld [vmem:[#allocation42_spill] sm:$0xff] }
 0x396   :  { %v10130_v6 = vpop.f32.mrf.mxu1  ;;  %v4087_v10 = vmax.f32 %v4066_v63, %v4067_v28  ;;  %v4041_v60 = vadd.f32 %v4013_v32, %v9263_v58  ;;  %v4014_v22 = vadd.f32 %v3971_v8, %v9961_v52  ;;  %5582 = vmatpush1.bf16.msra.mxu0 %v9516_v13  ;;  %v4068_v42 = vmax.f32 %v4040_v25, 0.0  ;;  %v11407_v63 = vld [vmem:[#allocation40_spill] sm:$0xff] }
 0x397   :  { %5583 = vmatprep.subr.bf16.mxu0 %v9780_v5  ;;  %v3973_v46 = vpop.f32.mrf.mxu0  ;;  %v11408_v32 = vld [vmem:[#allocation60_spill] sm:$0xff]  ;;  %v10259_v5 = vld [vmem:[#allocation9] sm:$0xff]  }
 0x398   :  { %v10136_v12 = vpop.f32.mrf.mxu1  ;;  %v4069_v39 = vmax.f32 %v4041_v60, 0.0  ;;  %v4042_v54 = vadd.f32 %v4014_v22, %v9256_v1  ;;  %v4015_v11 = vadd.f32 %v3973_v46, %v9966_v40  ;;  %v10140_v23 = vpack.c.bf16 %v4087_v10, %v4086_v56  ;;  %11432 = vst [vmem:[#allocation104_spill] sm:$0xff] %v10259_v5 }
 0x399   :  { %v3977_v48 = vpop.f32.mrf.mxu0  ;;  %5222 = vmatmul.mubr.bf16.gmra.mxu0 %v11407_v63  ;;  %v11411_v63 = vld [vmem:[#allocation35_spill] sm:$0xff] }
 0x39a   :  { %11406 = vst [vmem:[#allocation13_spill] sm:$0xff] %v10140_v23  ;;  %v10142_v59 = vpop.f32.mrf.mxu1  ;;  %v4088_v52 = vmax.f32 %v4068_v42, %v4069_v39  ;;  %v4043_v28 = vadd.f32 %v4015_v11, %v9263_v58  ;;  %v4016_v25 = vadd.f32 %v3977_v48, %v9972_v17  ;;  %5584 = vmatpush1.bf16.msra.mxu0 %v11408_v32  ;;  %v4070_v8 = vmax.f32 %v4042_v54, 0.0  ;;  %v11429_v32 = vld [vmem:[#allocation55_spill] sm:$0xff] }
 0x39b   :  { %6525 = vmatprep.mubr.msk.bf16.mxu0 %vm2432_vm3, %v11409_v61  ;;  %5585 = vmatprep.subr.bf16.mxu0 %v9740_v47  ;;  %v3979_v40 = vpop.f32.mrf.mxu0  ;;  %v11410_v42 = vmov 0  }
 0x39c   :  { %v10151_v56 = vpop.f32.mrf.mxu1  ;;  %5396 = vmatmul.mubr.bf16.gmra.mxu1 %v11393_v33  ;;  %v4071_v10 = vmax.f32 %v4043_v28, 0.0  ;;  %v4044_v60 = vadd.f32 %v4016_v25, %v9256_v1  ;;  %v4017_v22 = vadd.f32 %v3979_v40, %v9980_v14 }
 0x39d   :  { %5672 = vmatprep.mubr.bf16.mxu1 %v11410_v42  ;;  %v3981_v17 = vpop.f32.mrf.mxu0 }
 0x39e   :  { %v10157_v46 = vpop.f32.mrf.mxu1  ;;  %v4089_v39 = vmax.f32 %v4070_v8, %v4071_v10  ;;  %v4045_v11 = vadd.f32 %v4017_v22, %v9263_v58  ;;  %v4018_v48 = vadd.f32 %v3981_v17, %v9987_v45  ;;  %5586 = vmatpush1.bf16.msra.mxu0 %v11411_v63  ;;  %v4072_v61 = vmax.f32 %v4044_v60, 0.0  ;;  %v11413_v17 = vld [vmem:[#allocation33_spill] sm:$0xff] }
 0x39f   :  { %5587 = vmatprep.subr.bf16.mxu0 %v9696_v7  ;;  %v3983_v33 = vpop.f32.mrf.mxu0  ;;  %v11414_v7 = vld [vmem:[#allocation45_spill] sm:$0xff] }
 0x3a0   :  { %v10163_v54 = vpop.f32.mrf.mxu1  ;;  %v4073_v28 = vmax.f32 %v4045_v11, 0.0  ;;  %v4046_v14 = vadd.f32 %v4018_v48, %v9256_v1  ;;  %v4019_v25 = vadd.f32 %v3983_v33, %v9992_v37  ;;  %v10167_v40 = vpack.c.bf16 %v4089_v39, %v4088_v52 }
 0x3a1   :  { %v3987_v8 = vpop.f32.mrf.mxu0  ;;  %5232 = vmatmul.mubr.bf16.gmra.mxu0 %v11304_v9 }
 0x3a2   :  { %11412 = vst [vmem:[#allocation63_spill] sm:$0xff] %v10167_v40  ;;  %v10169_v10 = vpop.f32.mrf.mxu1  ;;  %v4090_v45 = vmax.f32 %v4072_v61, %v4073_v28  ;;  %v4047_v60 = vadd.f32 %v4019_v25, %v9263_v58  ;;  %v4020_v22 = vadd.f32 %v3987_v8, %v9998_v55  ;;  %5588 = vmatpush1.bf16.msra.mxu0 %v11413_v17  ;;  %v4074_v39 = vmax.f32 %v4046_v14, 0.0  ;;  %v11426_v17 = vld [vmem:[#allocation54_spill] sm:$0xff] }
 0x3a3   :  { %6526 = vmatprep.mubr.msk.bf16.mxu0 %vm2432_vm3, %v11414_v7  ;;  %5589 = vmatprep.subr.bf16.mxu0 %v9658_v43  ;;  %v3989_v37 = vpop.f32.mrf.mxu0  ;;  %v11415_v7 = vld [vmem:[#allocation108_spill] sm:$0xff] }
 0x3a4   :  { %v10178_v52 = vpop.f32.mrf.mxu1  ;;  %v4075_v11 = vmax.f32 %v4047_v60, 0.0  ;;  %v4048_v48 = vadd.f32 %v4020_v22, %v9256_v1  ;;  %v4021_v9 = vadd.f32 %v3989_v37, %v10006_v53 }
 0x3a5   :  { %v3991_v61 = vpop.f32.mrf.mxu0 }
 0x3a6   :  { %v10182_v33 = vpop.f32.mrf.mxu1  ;;  %v4091_v55 = vmax.f32 %v4074_v39, %v4075_v11  ;;  %v4049_v28 = vadd.f32 %v4021_v9, %v9263_v58  ;;  %v4022_v25 = vadd.f32 %v3991_v61, %v10013_v31  ;;  %5590 = vmatpush1.bf16.msra.mxu0 %v11415_v7  ;;  %v4076_v8 = vmax.f32 %v4048_v48, 0.0  ;;  %v11417_v61 = vld [vmem:[#allocation106_spill] sm:$0xff] }
 0x3a7   :  { %5591 = vmatprep.subr.bf16.mxu0 %v9620_v4  ;;  %v3993_v43 = vpop.f32.mrf.mxu0  ;;  %v11418_v4 = vld [vmem:[#allocation48_spill] sm:$0xff] }
 0x3a8   :  { %v10188_v14 = vpop.f32.mrf.mxu1  ;;  %v4077_v60 = vmax.f32 %v4049_v28, 0.0  ;;  %v4050_v22 = vadd.f32 %v4022_v25, %v9256_v1  ;;  %v4023_v53 = vadd.f32 %v3993_v43, %v10018_v34  ;;  %v10192_v37 = vpack.c.bf16 %v4091_v55, %v4090_v45  ;;  %v11419_v55 = vld [vmem:[#allocation70_spill] sm:$0xff] }
 0x3a9   :  { %v4273_v39 = vpop.f32.mrf.mxu0  ;;  %5242 = vmatmul.mubr.bf16.gmra.mxu0 %v11308_v27 }
 0x3aa   :  { %11416 = vst [vmem:[#allocation100_spill] sm:$0xff] %v10192_v37  ;;  %v10194_v11 = vpop.f32.mrf.mxu1  ;;  %v4092_v31 = vmax.f32 %v4076_v8, %v4077_v60  ;;  %v4051_v48 = vadd.f32 %v4023_v53, %v9263_v58  ;;  %v4274_v9 = vadd.f32 %v4273_v39, %v9894_v29  ;;  %5592 = vmatpush1.bf16.msra.mxu0 %v11417_v61  ;;  %v4078_v43 = vmax.f32 %v4050_v22, 0.0 }
 0x3ab   :  { %6527 = vmatprep.mubr.msk.bf16.mxu0 %vm2432_vm3, %v11418_v4  ;;  %v4275_v28 = vpop.f32.mrf.mxu0 }
 0x3ac   :  { %v10202_v25 = vpop.f32.mrf.mxu1  ;;  %v4079_v34 = vmax.f32 %v4051_v48, 0.0  ;;  %v4466_v45 = vadd.f32 %v10072_v51, %v4274_v9  ;;  %v4276_v7 = vadd.f32 %v4275_v28, %v11419_v55  ;;  %v11420_v55 = vld [vmem:[#allocation49_spill] sm:$0xff] }
 0x3ad   :  { %v4277_v27 = vpop.f32.mrf.mxu0 }
 0x3ae   :  { %v10206_v8 = vpop.f32.mrf.mxu1  ;;  %v4093_v60 = vmax.f32 %v4078_v43, %v4079_v34  ;;  %v4467_v29 = vadd.f32 %v10079_v36, %v4276_v7  ;;  %v4278_v53 = vadd.f32 %v4277_v27, %v9909_v62  ;;  %v4494_v39 = vadd.f32 %v4466_v45, %v9256_v1  ;;  %v11422_v7 = vld [vmem:[#allocation94_spill] sm:$0xff]  ;;  %v11423_v45 = vld [vmem:[#allocation51_spill] sm:$0xff] }
 0x3af   :  { %v4279_v4 = vpop.f32.mrf.mxu0 }
 0x3b0   :  { %v10211_v61 = vpop.f32.mrf.mxu1  ;;  %v4495_v22 = vadd.f32 %v4467_v29, %v9263_v58  ;;  %v4468_v48 = vadd.f32 %v10084_v26, %v4278_v53  ;;  %v4280_v51 = vadd.f32 %v4279_v4, %v9915_v57  ;;  %v10219_v43 = vpack.c.bf16 %v4093_v60, %v4092_v31 }
 0x3b1   :  { %v4283_v9 = vpop.f32.mrf.mxu0  ;;  %5252 = vmatmul.mubr.bf16.gmra.mxu0 %v11420_v55  ;;  %v4522_v27 = vmax.f32 %v4494_v39, 0.0 }
 0x3b2   :  { %v10216_v28 = vpop.f32.mrf.mxu1  ;;  %11421 = vst [vmem:[#allocation74_spill] sm:$0xff] %v10219_v43  ;;  %v4523_v36 = vmax.f32 %v4495_v22, 0.0  ;;  %v4469_v62 = vadd.f32 %v10090_v35, %v4280_v51  ;;  %v4284_v34 = vadd.f32 %v4283_v9, %v11422_v7  ;;  %6528 = vmatprep.mubr.msk.bf16.mxu0 %vm2432_vm3, %v11423_v45  ;;  %v4496_v26 = vadd.f32 %v4468_v48, %v9256_v1  ;;  %v11425_v48 = vld [vmem:[#allocation52_spill] sm:$0xff] }
 0x3b3   :  { %v4285_v29 = vpop.f32.mrf.mxu0 }
 0x3b4   :  { %v10226_v57 = vpop.f32.mrf.mxu1  ;;  %v4497_v53 = vadd.f32 %v4469_v62, %v9263_v58  ;;  %v10230_v4 = vadd.f32 %v10097_v19, %v4284_v34  ;;  %v4550_v35 = vmax.f32 %v4522_v27, %v4523_v36  ;;  %v4524_v51 = vmax.f32 %v4496_v26, 0.0 }
 0x3b5   :  { %v4287_v31 = vpop.f32.mrf.mxu0 }
 0x3b6   :  { %11424 = vst [vmem:[#allocation101_spill] sm:$0xff] %v10230_v4  ;;  %v10232_v60 = vpop.f32.mrf.mxu1  ;;  %v4525_v22 = vmax.f32 %v4497_v53, 0.0 }
 0x3b7   :  { %v4289_v9 = vpop.f32.mrf.mxu0 }
 0x3b8   :  { %v10234_v55 = vpop.f32.mrf.mxu1  ;;  %v4551_v45 = vmax.f32 %v4524_v51, %v4525_v22 }
 0x3b9   :  { %v4293_v39 = vpop.f32.mrf.mxu0  ;;  %5262 = vmatmul.mubr.bf16.gmra.mxu0 %v11425_v48 }
 0x3ba   :  { %v10236_v7 = vpop.f32.mrf.mxu1  ;;  %6529 = vmatprep.mubr.msk.bf16.mxu0 %vm2432_vm3, %v11426_v17  ;;  %v10243_v34 = vpack.c.bf16 %v4551_v45, %v4550_v35 }
 0x3bb   :  { %v4295_v19 = vpop.f32.mrf.mxu0 }
 0x3bc   :  { %v10241_v62 = vpop.f32.mrf.mxu1  ;;  %11427 = vst [vmem:[#allocation102_spill] sm:$0xff] %v10243_v34 }
 0x3bd   :  { %v4297_v36 = vpop.f32.mrf.mxu0 }
 0x3be   :  { %v10245_v27 = vpop.f32.mrf.mxu1 }
 0x3bf   :  { %v4299_v26 = vpop.f32.mrf.mxu0 }
 0x3c0   :  { %v10247_v53 = vpop.f32.mrf.mxu1 }
 0x3c1   :  { %v4303_v63 = vpop.f32.mrf.mxu0  ;;  %5272 = vmatmul.mubr.bf16.gmra.mxu0 %v11429_v32 }
 0x3c2   :  { %v10249_v47 = vpop.f32.mrf.mxu1  ;;  %5609 = vmatprep.mubr.bf16.mxu0 %v11410_v42 }
 0x3c3   :  { %11428 = vst [vmem:[#allocation28_spill] sm:$0xff] %v10249_v47  ;;  %v4305_v22 = vpop.f32.mrf.mxu0 }
 0x3c4   :  { %v10253_v17 = vpop.f32.mrf.mxu1 }
 0x3c5   :  { %v4307_v51 = vpop.f32.mrf.mxu0 }
 0x3c6   :  { %v10255_v48 = vpop.f32.mrf.mxu1 }
 0x3c7   :  { %11430 = vst [vmem:[#allocation103_spill] sm:$0xff] %v10255_v48  ;;  %v4309_v35 = vpop.f32.mrf.mxu0 }
 0x3c8   :  { %v10257_v45 = vpop.f32.mrf.mxu1 }
 0x3c9   :  { %11431 = vst [vmem:[#allocation66_spill] sm:$0xff] %v10257_v45  ;;  %v4313_v13 = vpop.f32.mrf.mxu0  ;;  %6540 = vmatmul.mubr.msk.bf16.vlgmr.msra.gmra.mxu0 %vm5567_vm4, %v10259_v5 }
 0x3ca   :  { %v10261_v20 = vpop.f32.mrf.mxu1  ;;  %5619 = vmatprep.mubr.bf16.mxu0 %v11410_v42  ;;  %v4296_v42 = vadd.f32 %v4295_v19, %v9958_v30  ;;  %v11445_v19 = vld [vmem:[#allocation95_spill] sm:$0xff] }
 0x3cb   :  { %11433 = vst [vmem:[#allocation59_spill] sm:$0xff] %v10261_v20  ;;  %v4315_v32 = vpop.f32.mrf.mxu0  ;;  %v4290_v20 = vadd.f32 %v4289_v9, %v9942_v50  ;;  %v11444_v9 = vld [vmem:[#allocation72_spill] sm:$0xff] }
 0x3cc   :  { %v10266_v47 = vpop.f32.mrf.mxu1 }
 0x3cd   :  { %11434 = vst [vmem:[#allocation105_spill] sm:$0xff] %v10266_v47  ;;  %v4317_v16 = vpop.f32.mrf.mxu0  ;;  %v4300_v47 = vadd.f32 %v4299_v26, %v9968_v38  ;;  %v10292_v50 = vadd.f32 %v10114_v15, %v4290_v20 }
 0x3ce   :  { %v10268_v34 = vpop.f32.mrf.mxu1 }
 0x3cf   :  { %11435 = vst [vmem:[#allocation107_spill] sm:$0xff] %v10268_v34  ;;  %v4319_v2 = vpop.f32.mrf.mxu0  ;;  %v10310_v15 = vadd.f32 %v10142_v59, %v4300_v47  ;;  %v11454_v47 = vld [vmem:[#allocation34_spill] sm:$0xff] }
 0x3d0   :  { %v10270_v3 = vpop.f32.mrf.mxu1  ;;  %v4318_v59 = vadd.f32 %v4317_v16, %v11454_v47 }
 0x3d1   :  { %11436 = vst [vmem:[#allocation31_spill] sm:$0xff] %v10270_v3  ;;  %v4323_v23 = vpop.f32.mrf.mxu0  ;;  %v10284_v3 = vadd.f32 %v4285_v29, %v11441_v18 }
 0x3d2   :  { %v10272_v40 = vpop.f32.mrf.mxu1 }
 0x3d3   :  { %11437 = vst [vmem:[#allocation67_spill] sm:$0xff] %v10272_v40  ;;  %v4325_v4 = vpop.f32.mrf.mxu0  ;;  %v4306_v40 = vadd.f32 %v4305_v22, %v11442_v41  ;;  %v10302_v41 = vadd.f32 %v10130_v6, %v4296_v42  ;;  %v11451_v22 = vld [vmem:[#allocation56_spill] sm:$0xff] }
 0x3d4   :  { %v10274_v37 = vpop.f32.mrf.mxu1  ;;  %v4326_v30 = vadd.f32 %v4325_v4, %v11444_v9  ;;  %v4324_v9 = vadd.f32 %v4323_v23, %v11451_v22 }
 0x3d5   :  { %11438 = vst [vmem:[#allocation62_spill] sm:$0xff] %v10274_v37  ;;  %v4327_v5 = vpop.f32.mrf.mxu0  ;;  %v11443_v37 = vld [vmem:[#allocation44_spill] sm:$0xff]  ;;  %v10318_v42 = vadd.f32 %v10157_v46, %v4306_v40 }
 0x3d6   :  { %v10277_v45 = vpop.f32.mrf.mxu1  ;;  %v10289_v21 = vadd.f32 %v4287_v31, %v11443_v37  ;;  %v4328_v38 = vadd.f32 %v4327_v5, %v11445_v19  ;;  %v11448_v37 = vld [vmem:[#allocation96_spill] sm:$0xff]  ;;  %v11449_v31 = vld [vmem:[#allocation47_spill] sm:$0xff] }
 0x3d7   :  { %11439 = vst [vmem:[#allocation64_spill] sm:$0xff] %v10277_v45  ;;  %v4329_v43 = vpop.f32.mrf.mxu0  ;;  %v10307_v20 = vadd.f32 %v4297_v36, %v11449_v31  ;;  %v11450_v5 = vld [vmem:[#allocation71_spill] sm:$0xff] }
 0x3d8   :  { %v10281_v34 = vpop.f32.mrf.mxu1  ;;  %v4330_v48 = vadd.f32 %v4329_v43, %v10041_v24  ;;  %v11447_v24 = vld [vmem:[#allocation50_spill] sm:$0xff]  ;;  %v4320_v4 = vadd.f32 %v4319_v2, %v11450_v5  ;;  %v4487_v2 = vadd.f32 %v10206_v8, %v4326_v30  ;;  %v4488_v23 = vadd.f32 %v10211_v61, %v4328_v38 }
 0x3d9   :  { %11440 = vst [vmem:[#allocation78_spill] sm:$0xff] %v10281_v34  ;;  %v4333_v26 = vpop.f32.mrf.mxu0  ;;  %v11446_v34 = vld [vmem:[#allocation24_spill] sm:$0xff]  ;;  %v4308_v43 = vadd.f32 %v4307_v51, %v11447_v24  ;;  %v4486_v8 = vadd.f32 %v10202_v25, %v4324_v9 }
 0x3da   :  { %v10296_v45 = vpop.f32.mrf.mxu1  ;;  %v10299_v18 = vadd.f32 %v4293_v39, %v11446_v34  ;;  %v4334_v29 = vadd.f32 %v4333_v26, %v11448_v37  ;;  %v11452_v34 = vld [vmem:[#allocation43_spill] sm:$0xff]  ;;  %v4489_v51 = vadd.f32 %v10216_v28, %v4330_v48  ;;  %v11453_v26 = vld [vmem:[#allocation53_spill] sm:$0xff]  ;;  %v4485_v16 = vadd.f32 %v10194_v11, %v4320_v4 }
 0x3db   :  { %v4335_v19 = vpop.f32.mrf.mxu0  ;;  %v4304_v6 = vadd.f32 %v4303_v63, %v11452_v34  ;;  %v4316_v24 = vadd.f32 %v4315_v32, %v11453_v26  ;;  %v4480_v63 = vadd.f32 %v10163_v54, %v4308_v43  ;;  %v11456_v32 = vld [vmem:[#allocation30_spill] sm:$0xff]  ;;  %v4516_v11 = vadd.f32 %v4488_v23, %v9256_v1 }
 0x3dc   :  { %v10314_v39 = vpop.f32.mrf.mxu1  ;;  %v4336_v36 = vadd.f32 %v4335_v19, %v10055_v49  ;;  %v4490_v46 = vadd.f32 %v10226_v57, %v4334_v29  ;;  %v11455_v49 = vld [vmem:[#allocation46_spill] sm:$0xff]  ;;  %v4314_v5 = vadd.f32 %v4313_v13, %v11456_v32  ;;  %v4517_v38 = vadd.f32 %v4489_v51, %v9263_v58 }
 0x3dd   :  { %v4337_v37 = vpop.f32.mrf.mxu0  ;;  %v4310_v48 = vadd.f32 %v4309_v35, %v11455_v49  ;;  %v4484_v35 = vadd.f32 %v10188_v14, %v4318_v59  ;;  %v4515_v13 = vadd.f32 %v4487_v2, %v9263_v58  ;;  %v4513_v14 = vadd.f32 %v4485_v16, %v9263_v58 }
 0x3de   :  { %v10326_v31 = vpop.f32.mrf.mxu1  ;;  %v4491_v40 = vadd.f32 %v10232_v60, %v4336_v36  ;;  %v4338_v28 = vadd.f32 %v4337_v37, %v10059_v0  ;;  %v4483_v0 = vadd.f32 %v10182_v33, %v4316_v24  ;;  %v4518_v29 = vadd.f32 %v4490_v46, %v9256_v1 }
 0x3df   :  { %v4339_v61 = vpop.f32.mrf.mxu0  ;;  %v4482_v33 = vadd.f32 %v10178_v52, %v4314_v5  ;;  %v4514_v9 = vadd.f32 %v4486_v8, %v9256_v1  ;;  %v4545_v51 = vmax.f32 %v4517_v38, 0.0  ;;  %v4543_v24 = vmax.f32 %v4515_v13, 0.0 }
 0x3e0   :  { %v10336_v30 = vpop.f32.mrf.mxu1  ;;  %v4519_v54 = vadd.f32 %v4491_v40, %v9263_v58  ;;  %v4492_v57 = vadd.f32 %v10234_v55, %v4338_v28  ;;  %v4340_v60 = vadd.f32 %v4339_v61, %v10065_v44  ;;  %v4481_v44 = vadd.f32 %v10169_v10, %v4310_v48 }
 0x3e1   :  { %v4619_v25 = vpop.f32.mrf.mxu0  ;;  %v4512_v10 = vadd.f32 %v4484_v35, %v9256_v1  ;;  %v4544_v52 = vmax.f32 %v4516_v11, 0.0  ;;  %v4546_v2 = vmax.f32 %v4518_v29, 0.0  ;;  %v4478_v40 = vadd.f32 %v10151_v56, %v4304_v6  ;;  %v11458_v11 = vld [vmem:[#allocation57_spill] sm:$0xff] }
 0x3e2   :  { %v10346_v43 = vpop.f32.mrf.mxu1  ;;  %v4520_v4 = vadd.f32 %v4492_v57, %v9256_v1  ;;  %v4493_v22 = vadd.f32 %v10236_v7, %v4340_v60  ;;  %v10352_v55 = vadd.f32 %v10241_v62, %v4619_v25  ;;  %v4547_v36 = vmax.f32 %v4519_v54, 0.0 }
 0x3e3   :  { %v4621_v19 = vpop.f32.mrf.mxu0  ;;  %v4511_v62 = vadd.f32 %v4483_v0, %v9263_v58  ;;  %v4510_v28 = vadd.f32 %v4482_v33, %v9256_v1  ;;  %v4541_v49 = vmax.f32 %v4513_v14, 0.0  ;;  %v4542_v5 = vmax.f32 %v4514_v9, 0.0 }
 0x3e4   :  { %v10358_v34 = vpop.f32.mrf.mxu1  ;;  %v4521_v26 = vadd.f32 %v4493_v22, %v9263_v58  ;;  %v10362_v7 = vadd.f32 %v10245_v27, %v4621_v19  ;;  %v4548_v23 = vmax.f32 %v4520_v4, 0.0  ;;  %v4509_v27 = vadd.f32 %v4481_v44, %v9263_v58  ;;  %v11459_v22 = vld [vmem:[#allocation103_spill] sm:$0xff] }
 0x3e5   :  { %v4623_v47 = vpop.f32.mrf.mxu0  ;;  %v4562_v16 = vmax.f32 %v4546_v2, %v4547_v36  ;;  %v4561_v61 = vmax.f32 %v4544_v52, %v4545_v51  ;;  %v4476_v38 = vadd.f32 %v10136_v12, %v10307_v20  ;;  %v4508_v56 = vadd.f32 %v4480_v63, %v9256_v1  ;;  %v11464_v52 = vld [vmem:[#allocation66_spill] sm:$0xff] }
 0x3e6   :  { %v10366_v59 = vpop.f32.mrf.mxu1  ;;  %v4549_v37 = vmax.f32 %v4521_v26, 0.0  ;;  %v10369_v46 = vadd.f32 %v10247_v53, %v4623_v47  ;;  %v4507_v53 = vadd.f32 %v10318_v42, %v9263_v58  ;;  %v4539_v6 = vmax.f32 %v4511_v62, 0.0  ;;  %v11463_v62 = vld [vmem:[#allocation74_spill] sm:$0xff] }
 0x3e7   :  { %v10374_v48 = vpop.f32.mrf.mxu0  ;;  %v4540_v60 = vmax.f32 %v4512_v10, 0.0  ;;  %v4560_v13 = vmax.f32 %v4542_v5, %v4543_v24  ;;  %v4474_v25 = vadd.f32 %v11458_v11, %v10299_v18  ;;  %v4505_v12 = vadd.f32 %v10310_v15, %v9263_v58  ;;  %v11461_v18 = vld [vmem:[#allocation61_spill] sm:$0xff]  ;;  %v11462_v15 = vld [vmem:[#allocation98_spill] sm:$0xff] }
 0x3e8   :  { %v10376_v32 = vpop.f32.mrf.mxu1  ;;  %v4563_v8 = vmax.f32 %v4548_v23, %v4549_v37  ;;  %v4506_v20 = vadd.f32 %v4478_v40, %v9256_v1  ;;  %v4537_v42 = vmax.f32 %v4509_v27, 0.0  ;;  %v4538_v4 = vmax.f32 %v4510_v28, 0.0 }
 0x3e9   :  { %v4629_v54 = vpop.f32.mrf.mxu0  ;;  %v4559_v33 = vmax.f32 %v4540_v60, %v4541_v49  ;;  %v4471_v14 = vadd.f32 %v11461_v18, %v10284_v3  ;;  %v4472_v9 = vadd.f32 %v11462_v15, %v10289_v21  ;;  %v4503_v19 = vadd.f32 %v10302_v41, %v9263_v58  ;;  %v11471_v18 = vld [vmem:[#allocation63_spill] sm:$0xff] }
 0x3ea   :  { %v10383_v57 = vpop.f32.mrf.mxu1  ;;  %v10386_v0 = vadd.f32 %v10253_v17, %v4629_v54  ;;  %v10388_v35 = vpack.c.bf16 %v4563_v8, %v4562_v16  ;;  %v10401_v17 = vpack.c.bf16 %v4561_v61, %v4560_v13  ;;  %v4504_v51 = vadd.f32 %v4476_v38, %v9256_v1  ;;  %v11466_v61 = vld [vmem:[#allocation100_spill] sm:$0xff]  ;;  %v11468_v54 = vld [vmem:[#allocation101_spill] sm:$0xff] }
 0x3eb   :  { %v4631_v63 = vpop.f32.mrf.mxu0  ;;  %v4535_v10 = vmax.f32 %v4507_v53, 0.0  ;;  %v4536_v24 = vmax.f32 %v4508_v56, 0.0  ;;  %v4558_v3 = vmax.f32 %v4538_v4, %v4539_v6  ;;  %v4501_v21 = vadd.f32 %v10292_v50, %v9263_v58  ;;  %v11467_v53 = vld [vmem:[#allocation105_spill] sm:$0xff] }
 0x3ec   :  { %11457 = vst [vmem:[#allocation58_spill] sm:$0xff] %v10388_v35  ;;  %v10395_v29 = vpop.f32.mrf.mxu1  ;;  %v10398_v44 = vadd.f32 %v11459_v22, %v4631_v63  ;;  %5642 = vmatprep.subr.bf16.mxu1 %v10388_v35  ;;  %11460 = vst [vmem:[#allocation76_spill] sm:$0xff] %v10401_v17  ;;  %v4502_v41 = vadd.f32 %v4474_v25, %v9256_v1  ;;  %v4533_v37 = vmax.f32 %v4505_v12, 0.0  ;;  %v4534_v40 = vmax.f32 %v4506_v20, 0.0  ;;  %v11469_v20 = vld [vmem:[#allocation107_spill] sm:$0xff] }
 0x3ed   :  { %v4633_v36 = vpop.f32.mrf.mxu0  ;;  %5643 = vmatpush1.bf16.msra.mxu1 %v11463_v62  ;;  %v10424_v27 = vpack.c.bf16 %v4559_v33, %v4558_v3  ;;  %v4557_v28 = vmax.f32 %v4536_v24, %v4537_v42  ;;  %v4499_v49 = vadd.f32 %v4471_v14, %v9263_v58  ;;  %v4500_v5 = vadd.f32 %v4472_v9, %v9256_v1  ;;  %v11472_v9 = vld [vmem:[#allocation31_spill] sm:$0xff] }
 0x3ee   :  { %v10410_v26 = vpop.f32.mrf.mxu1  ;;  %v10414_v47 = vadd.f32 %v11464_v52, %v4633_v36  ;;  %5644 = vmatprep.subr.bf16.mxu1 %v10401_v17  ;;  %v4531_v50 = vmax.f32 %v4503_v19, 0.0  ;;  %v4532_v38 = vmax.f32 %v4504_v51, 0.0  ;;  %v4556_v6 = vmax.f32 %v4534_v40, %v4535_v10  ;;  %v11473_v52 = vld [vmem:[#allocation67_spill] sm:$0xff]  ;;  %v11506_v17 = vld [vmem:[#allocation108_spill] sm:$0xff] }
 0x3ef   :  { %v10420_v2 = vpop.f32.mrf.mxu0  ;;  %11465 = vst [vmem:[#allocation81_spill] sm:$0xff] %v10424_v27  ;;  %v4498_v60 = vadd.f32 %v11468_v54, %v9256_v1  ;;  %v4529_v13 = vmax.f32 %v4501_v21, 0.0  ;;  %v4530_v12 = vmax.f32 %v4502_v41, 0.0  ;;  %v4527_v14 = vmax.f32 %v4499_v49, 0.0  ;;  %v11476_v49 = vld [vmem:[#allocation62_spill] sm:$0xff] }
 0x3f0   :  { %v10422_v23 = vpop.f32.mrf.mxu1  ;;  %v10442_v63 = vpack.c.bf16 %v4557_v28, %v4556_v6  ;;  %v4555_v4 = vmax.f32 %v4532_v38, %v4533_v37  ;;  %v4528_v15 = vmax.f32 %v4500_v5, 0.0  ;;  %v11475_v28 = vld [vmem:[#allocation13_spill] sm:$0xff] }
 0x3f1   :  { %v4639_v16 = vpop.f32.mrf.mxu0  ;;  %5645 = vmatpush1.bf16.msra.mxu1 %v11466_v61  ;;  %v4554_v51 = vmax.f32 %v4530_v12, %v4531_v50  ;;  %v4526_v24 = vmax.f32 %v4498_v60, 0.0  ;;  %v11480_v12 = vld [vmem:[#allocation78_spill] sm:$0xff] }
 0x3f2   :  { %v10428_v8 = vpop.f32.mrf.mxu1  ;;  %v10432_v56 = vadd.f32 %v11467_v53, %v4639_v16  ;;  %5646 = vmatprep.subr.bf16.mxu1 %v10424_v27  ;;  %11470 = vst [vmem:[#allocation75_spill] sm:$0xff] %v10442_v63  ;;  %v4553_v41 = vmax.f32 %v4528_v15, %v4529_v13  ;;  %v11477_v53 = vld [vmem:[#allocation64_spill] sm:$0xff]  ;;  %v11504_v27 = vld [vmem:[#allocation33_spill] sm:$0xff] }
 0x3f3   :  { %v4641_v11 = vpop.f32.mrf.mxu0  ;;  %v10456_v21 = vpack.c.bf16 %v4555_v4, %v4554_v51  ;;  %v4552_v16 = vmax.f32 %v4526_v24, %v4527_v14  ;;  %v10479_v4 = vld [vmem:[#allocation9 + $0x8] sm:$0xff]   ;;  %v11483_v24 = vmov 0  }
 0x3f4   :  { %v10437_v25 = vpop.f32.mrf.mxu1  ;;  %v10440_v42 = vadd.f32 %v11469_v20, %v4641_v11  ;;  %v11479_v11 = vld [vmem:[#allocation99_spill] sm:$0xff]  ;;  %11481 = vst [vmem:[#allocation77_spill] sm:$0xff] %v10479_v4  ;;  %6541 = vmatmul.mubr.msk.bf16.gmra.mxu0 %vm5567_vm4, %v10479_v4 }
 0x3f5   :  { %v4643_v22 = vpop.f32.mrf.mxu0  ;;  %5647 = vmatpush1.bf16.msra.mxu1 %v11471_v18  ;;  %11474 = vst [vmem:[#allocation79_spill] sm:$0xff] %v10456_v21  ;;  %v10470_v54 = vpack.c.bf16 %v4553_v41, %v4552_v16  ;;  %5629 = vmatprep.mubr.bf16.mxu0 %v11483_v24  ;;  %v11484_v41 = vld [vmem:[#allocation102_spill] sm:$0xff]  ;;  %v11501_v18 = vld [vmem:[#allocation35_spill] sm:$0xff] }
 0x3f6   :  { %v10444_v33 = vpop.f32.mrf.mxu1  ;;  %v10448_v19 = vadd.f32 %v11472_v9, %v4643_v22  ;;  %5648 = vmatprep.subr.bf16.mxu1 %v10442_v63 }
 0x3f7   :  { %v4645_v36 = vpop.f32.mrf.mxu0  ;;  %11478 = vst [vmem:[#allocation83_spill] sm:$0xff] %v10470_v54 }
 0x3f8   :  { %v10451_v10 = vpop.f32.mrf.mxu1  ;;  %v10454_v3 = vadd.f32 %v11473_v52, %v4645_v36  ;;  %v11482_v36 = vld [vmem:[#allocation97_spill] sm:$0xff] }
 0x3f9   :  { %v4649_v37 = vpop.f32.mrf.mxu0  ;;  %5649 = vmatpush1.bf16.msra.mxu1 %v11475_v28  ;;  %v11497_v28 = vld [vmem:[#allocation60_spill] sm:$0xff] }
 0x3fa   :  { %v10458_v40 = vpop.f32.mrf.mxu1  ;;  %v10462_v5 = vadd.f32 %v11476_v49, %v4649_v37  ;;  %5650 = vmatprep.subr.bf16.mxu1 %v10456_v21 }
 0x3fb   :  { %v4651_v50 = vpop.f32.mrf.mxu0 }
 0x3fc   :  { %v10465_v38 = vpop.f32.mrf.mxu1  ;;  %v10468_v6 = vadd.f32 %v11477_v53, %v4651_v50  ;;  %v11485_v53 = vld [vmem:[#allocation73_spill] sm:$0xff] }
 0x3fd   :  { %v4653_v60 = vpop.f32.mrf.mxu0  ;;  %5651 = vmatpush1.bf16.msra.mxu1 %v11479_v11  ;;  %v11493_v11 = vld [vmem:[#allocation65_spill] sm:$0xff] }
 0x3fe   :  { %v10472_v13 = vpop.f32.mrf.mxu1  ;;  %v10476_v20 = vadd.f32 %v11480_v12, %v4653_v60  ;;  %5652 = vmatprep.subr.bf16.mxu1 %v10470_v54  ;;  %v11486_v12 = vld [vmem:[#allocation41_spill] sm:$0xff] }
 0x3ff   :  { %v4655_v22 = vpop.f32.mrf.mxu0 }
 0x400   :  { %v10481_v14 = vpop.f32.mrf.mxu1  ;;  %v10484_v15 = vadd.f32 %v10296_v45, %v4655_v22 }
 0x401   :  { %v4659_v9 = vpop.f32.mrf.mxu0  ;;  %5653 = vmatpush1.bf16.msra.mxu1 %v11482_v36 }
 0x402   :  { %v10488_v51 = vpop.f32.mrf.mxu1  ;;  %v10493_v52 = vadd.f32 %v10314_v39, %v4659_v9  ;;  %5654 = vmatprep.subr.bf16.mxu1 %v11484_v41  ;;  %v10508_v39 = vld [vmem:[#allocation9 + $0x10] sm:$0xff]  }
 0x403   :  { %v4661_v37 = vpop.f32.mrf.mxu0  ;;  %11487 = vst [vmem:[#allocation14_spill] sm:$0xff] %v10508_v39  ;;  %6542 = vmatmul.mubr.msk.bf16.gmra.mxu0 %vm5567_vm4, %v10508_v39 }
 0x404   :  { %v10496_v49 = vpop.f32.mrf.mxu1  ;;  %v10499_v45 = vadd.f32 %v10326_v31, %v4661_v37  ;;  %v11488_v31 = vld [vmem:[#allocation104_spill] sm:$0xff]  ;;  %5735 = vmatprep.mubr.bf16.mxu0 %v11483_v24 }
 0x405   :  { %v4663_v16 = vpop.f32.mrf.mxu0  ;;  %5655 = vmatpush1.bf16.msra.mxu1 %v11485_v53 }
 0x406   :  { %v10501_v50 = vpop.f32.mrf.mxu1  ;;  %v10505_v60 = vadd.f32 %v10336_v30, %v4663_v16  ;;  %5799 = vmatprep.subr.bf16.mxu1 %v11486_v12  ;;  %v11489_v30 = vld [vmem:[#allocation68_spill] sm:$0xff]  ;;  %v11490_v12 = vld [vmem:[#allocation19_spill] sm:$0xff] }
 0x407   :  { %v4665_v22 = vpop.f32.mrf.mxu0 }
 0x408   :  { %v10510_v9 = vpop.f32.mrf.mxu1  ;;  %v10513_v41 = vadd.f32 %v10346_v43, %v4665_v22  ;;  %6543 = vmatmul.mubr.msk.bf16.vlgmr.msra.gmra.mxu1 %vm5567_vm4, %v11488_v31 }
 0x409   :  { %v4669_v37 = vpop.f32.mrf.mxu0  ;;  %5800 = vmatpush1.bf16.msra.mxu1 %v11489_v30  ;;  %5682 = vmatprep.mubr.bf16.mxu1 %v11483_v24 }
 0x40a   :  { %v10519_v53 = vpop.f32.mrf.mxu1  ;;  %v10524_v16 = vadd.f32 %v10358_v34, %v4669_v37  ;;  %5801 = vmatprep.subr.bf16.mxu1 %v11490_v12  ;;  %v11494_v34 = vld [vmem:[#allocation93_spill] sm:$0xff] }
 0x40b   :  { %v4671_v43 = vpop.f32.mrf.mxu0 }
 0x40c   :  { %v10528_v22 = vpop.f32.mrf.mxu1  ;;  %v10531_v31 = vadd.f32 %v10366_v59, %v4671_v43 }
 0x40d   :  { %11491 = vst [vmem:[#allocation84_spill] sm:$0xff] %v10528_v22  ;;  %v4673_v36 = vpop.f32.mrf.mxu0  ;;  %5802 = vmatpush1.bf16.msra.mxu1 %v11493_v11  ;;  %v11498_v11 = vld [vmem:[#allocation92_spill] sm:$0xff] }
 0x40e   :  { %v10533_v54 = vpop.f32.mrf.mxu1  ;;  %v10537_v30 = vadd.f32 %v10376_v32, %v4673_v36  ;;  %5803 = vmatprep.subr.bf16.mxu1 %v11494_v34 }
 0x40f   :  { %11492 = vst [vmem:[#allocation80_spill] sm:$0xff] %v10533_v54  ;;  %v4675_v37 = vpop.f32.mrf.mxu0  ;;  %v10620_v54 = vld [vmem:[#allocation9 + $0x20] sm:$0xff]  }
 0x410   :  { %v10540_v12 = vpop.f32.mrf.mxu1  ;;  %v10543_v21 = vadd.f32 %v10383_v57, %v4675_v37  ;;  %6544 = vmatmul.mubr.msk.bf16.gmra.mxu1 %vm5567_vm4, %v10479_v4  ;;  %v11502_v4 = vld [vmem:[#allocation69_spill] sm:$0xff]  ;;  %11514 = vst [vmem:[#allocation20_spill] sm:$0xff] %v10620_v54 }
 0x411   :  { %11495 = vst [vmem:[#allocation15_spill] sm:$0xff] %v10540_v12  ;;  %v4679_v59 = vpop.f32.mrf.mxu0  ;;  %5804 = vmatpush1.bf16.msra.mxu1 %v11497_v28  ;;  %5692 = vmatprep.mubr.bf16.mxu1 %v11483_v24 }
 0x412   :  { %v10547_v43 = vpop.f32.mrf.mxu1  ;;  %v10552_v32 = vadd.f32 %v10395_v29, %v4679_v59  ;;  %5805 = vmatprep.subr.bf16.mxu1 %v11498_v11 }
 0x413   :  { %11496 = vst [vmem:[#allocation85_spill] sm:$0xff] %v10547_v43  ;;  %v4681_v36 = vpop.f32.mrf.mxu0  ;;  %v10595_v43 = vld [vmem:[#allocation9 + $0x18] sm:$0xff]  }
 0x414   :  { %v10555_v34 = vpop.f32.mrf.mxu1  ;;  %v10558_v57 = vadd.f32 %v10410_v26, %v4681_v36  ;;  %11509 = vst [vmem:[#allocation17_spill] sm:$0xff] %v10595_v43 }
 0x415   :  { %11499 = vst [vmem:[#allocation82_spill] sm:$0xff] %v10555_v34  ;;  %v4683_v37 = vpop.f32.mrf.mxu0  ;;  %5806 = vmatpush1.bf16.msra.mxu1 %v11501_v18  ;;  %v11505_v18 = vld [vmem:[#allocation38_spill] sm:$0xff] }
 0x416   :  { %v10560_v63 = vpop.f32.mrf.mxu1  ;;  %v10564_v28 = vadd.f32 %v10422_v23, %v4683_v37  ;;  %5807 = vmatprep.subr.bf16.mxu1 %v11502_v4 }
 0x417   :  { %11500 = vst [vmem:[#allocation18_spill] sm:$0xff] %v10560_v63  ;;  %v4685_v29 = vpop.f32.mrf.mxu0 }
 0x418   :  { %v10567_v59 = vpop.f32.mrf.mxu1  ;;  %v10570_v11 = vadd.f32 %v10428_v8, %v4685_v29  ;;  %6545 = vmatmul.mubr.msk.bf16.gmra.mxu1 %vm5567_vm4, %v10508_v39 }
 0x419   :  { %11503 = vst [vmem:[#allocation87_spill] sm:$0xff] %v10567_v59  ;;  %v4867_v26 = vpop.f32.mrf.mxu0  ;;  %5808 = vmatpush1.bf16.msra.mxu1 %v11504_v27  ;;  %5829 = vmatprep.mubr.bf16.mxu1 %v11483_v24  ;;  %v11507_v27 = vld [vmem:[#allocation28_spill] sm:$0xff] }
 0x41a   :  { %v10574_v36 = vpop.f32.mrf.mxu1  ;;  %v4936_v23 = vadd.f32 %v4867_v26, %v10352_v55  ;;  %5809 = vmatprep.subr.bf16.mxu1 %v11505_v18  ;;  %v4750_v62 = vadd.f32 %v11507_v27, %v10374_v48  ;;  %v11508_v26 = vld [vmem:[#allocation16_spill] sm:$0xff]  ;;  %v11510_v48 = vld [vmem:[#allocation106_spill] sm:$0xff] }
 0x41b   :  { %v4869_v4 = vpop.f32.mrf.mxu0 }
 0x41c   :  { %v10580_v37 = vpop.f32.mrf.mxu1  ;;  %v4964_v8 = vadd.f32 %v4936_v23, %v9256_v1  ;;  %v4937_v29 = vadd.f32 %v4869_v4, %v10362_v7 }
 0x41d   :  { %v4871_v61 = vpop.f32.mrf.mxu0  ;;  %5810 = vmatpush1.bf16.msra.mxu1 %v11506_v17 }
 0x41e   :  { %v10584_v39 = vpop.f32.mrf.mxu1  ;;  %v4965_v35 = vadd.f32 %v4937_v29, %v9263_v58  ;;  %v4938_v55 = vadd.f32 %v4871_v61, %v10369_v46  ;;  %5811 = vmatprep.subr.bf16.mxu1 %v11508_v26  ;;  %v4992_v23 = vmax.f32 %v4964_v8, 0.0 }
 0x41f   :  { %v4873_v18 = vpop.f32.mrf.mxu0 }
 0x420   :  { %v10592_v12 = vpop.f32.mrf.mxu1  ;;  %v4993_v34 = vmax.f32 %v4965_v35, 0.0  ;;  %v4966_v7 = vadd.f32 %v4938_v55, %v9256_v1  ;;  %v4939_v4 = vadd.f32 %v4873_v18, %v4750_v62 }
 0x421   :  { %v4877_v17 = vpop.f32.mrf.mxu0  ;;  %5812 = vmatpush1.bf16.msra.mxu1 %v11510_v48 }
 0x422   :  { %v10597_v59 = vpop.f32.mrf.mxu1  ;;  %v5020_v29 = vmax.f32 %v4992_v23, %v4993_v34  ;;  %v4967_v46 = vadd.f32 %v4939_v4, %v9263_v58  ;;  %v4940_v61 = vadd.f32 %v4877_v17, %v10386_v0  ;;  %v4994_v8 = vmax.f32 %v4966_v7, 0.0  ;;  %v11512_v34 = vld [vmem:[#allocation59_spill] sm:$0xff] }
 0x423   :  { %v4879_v27 = vpop.f32.mrf.mxu0  ;;  %v4760_v0 = vadd.f32 %v11512_v34, %v10420_v2 }
 0x424   :  { %v10602_v26 = vpop.f32.mrf.mxu1  ;;  %v4995_v35 = vmax.f32 %v4967_v46, 0.0  ;;  %v4968_v55 = vadd.f32 %v4940_v61, %v9256_v1  ;;  %v4941_v62 = vadd.f32 %v4879_v27, %v10398_v44  ;;  %6552 = vmatmul.mubr.msk.bf16.vlgmr.msra.gmra.mxu1 %vm5567_vm4, %v10595_v43 }
 0x425   :  { %v4881_v18 = vpop.f32.mrf.mxu0  ;;  %5839 = vmatprep.mubr.bf16.mxu1 %v11483_v24 }
 0x426   :  { %v10608_v63 = vpop.f32.mrf.mxu1  ;;  %v5021_v23 = vmax.f32 %v4994_v8, %v4995_v35  ;;  %v4969_v4 = vadd.f32 %v4941_v62, %v9263_v58  ;;  %v4942_v7 = vadd.f32 %v4881_v18, %v10414_v47  ;;  %v4996_v17 = vmax.f32 %v4968_v55, 0.0 }
 0x427   :  { %11511 = vst [vmem:[#allocation22_spill] sm:$0xff] %v10608_v63  ;;  %v4883_v48 = vpop.f32.mrf.mxu0 }
 0x428   :  { %v10615_v46 = vpop.f32.mrf.mxu1  ;;  %v10617_v44 = vpack.c.bf16 %v5021_v23, %v5020_v29  ;;  %v4997_v61 = vmax.f32 %v4969_v4, 0.0  ;;  %v4970_v27 = vadd.f32 %v4942_v7, %v9256_v1  ;;  %v4943_v43 = vadd.f32 %v4883_v48, %v4760_v0 }
 0x429   :  { %v4887_v63 = vpop.f32.mrf.mxu0 }
 0x42a   :  { %11513 = vst [vmem:[#allocation88_spill] sm:$0xff] %v10617_v44  ;;  %v10622_v22 = vpop.f32.mrf.mxu1  ;;  %v5022_v2 = vmax.f32 %v4996_v17, %v4997_v61  ;;  %v4971_v8 = vadd.f32 %v4943_v43, %v9263_v58  ;;  %v4944_v47 = vadd.f32 %v4887_v63, %v10432_v56  ;;  %v4998_v62 = vmax.f32 %v4970_v27, 0.0 }
 0x42b   :  { %v4889_v35 = vpop.f32.mrf.mxu0 }
 0x42c   :  { %v10626_v55 = vpop.f32.mrf.mxu1  ;;  %v4999_v29 = vmax.f32 %v4971_v8, 0.0  ;;  %v4972_v18 = vadd.f32 %v4944_v47, %v9256_v1  ;;  %v4945_v34 = vadd.f32 %v4889_v35, %v10440_v42  ;;  %6553 = vmatmul.mubr.msk.bf16.gmra.mxu1 %vm5567_vm4, %v10620_v54  ;;  %v10643_v8 = vld [vmem:[#allocation9 + $0x28] sm:$0xff]  }
 0x42d   :  { %v4891_v0 = vpop.f32.mrf.mxu0  ;;  %5849 = vmatprep.mubr.bf16.mxu1 %v11483_v24  ;;  %11516 = vst [vmem:[#allocation89_spill] sm:$0xff] %v10643_v8 }
 0x42e   :  { %v10632_v23 = vpop.f32.mrf.mxu1  ;;  %v5023_v43 = vmax.f32 %v4998_v62, %v4999_v29  ;;  %v4973_v56 = vadd.f32 %v4945_v34, %v9263_v58  ;;  %v4946_v63 = vadd.f32 %v4891_v0, %v10448_v19  ;;  %v5000_v4 = vmax.f32 %v4972_v18, 0.0 }
 0x42f   :  { %v4893_v7 = vpop.f32.mrf.mxu0 }
 0x430   :  { %v10637_v17 = vpop.f32.mrf.mxu1  ;;  %v10639_v48 = vpack.c.bf16 %v5023_v43, %v5022_v2  ;;  %v5001_v42 = vmax.f32 %v4973_v56, 0.0  ;;  %v4974_v61 = vadd.f32 %v4946_v63, %v9256_v1  ;;  %v4947_v27 = vadd.f32 %v4893_v7, %v10454_v3 }
 0x431   :  { %v4897_v47 = vpop.f32.mrf.mxu0 }
 0x432   :  { %11515 = vst [vmem:[#allocation23_spill] sm:$0xff] %v10639_v48  ;;  %v10645_v35 = vpop.f32.mrf.mxu1  ;;  %v5024_v62 = vmax.f32 %v5000_v4, %v5001_v42  ;;  %v4975_v29 = vadd.f32 %v4947_v27, %v9263_v58  ;;  %v4948_v19 = vadd.f32 %v4897_v47, %v10462_v5  ;;  %v5002_v2 = vmax.f32 %v4974_v61, 0.0 }
 0x433   :  { %v4899_v18 = vpop.f32.mrf.mxu0 }
 0x434   :  { %v10649_v34 = vpop.f32.mrf.mxu1  ;;  %v5003_v0 = vmax.f32 %v4975_v29, 0.0  ;;  %v4976_v43 = vadd.f32 %v4948_v19, %v9256_v1  ;;  %v4949_v56 = vadd.f32 %v4899_v18, %v10468_v6  ;;  %6554 = vmatmul.mubr.msk.bf16.gmra.mxu1 %vm5567_vm4, %v10643_v8 }
 0x435   :  { %v4901_v3 = vpop.f32.mrf.mxu0  ;;  %5955 = vmatprep.mubr.bf16.mxu1 %v11483_v24 }
 0x436   :  { %v10655_v63 = vpop.f32.mrf.mxu1  ;;  %v5025_v4 = vmax.f32 %v5002_v2, %v5003_v0  ;;  %v4977_v5 = vadd.f32 %v4949_v56, %v9263_v58  ;;  %v4950_v7 = vadd.f32 %v4901_v3, %v10476_v20  ;;  %v5004_v42 = vmax.f32 %v4976_v43, 0.0 }
 0x437   :  { %v4903_v61 = vpop.f32.mrf.mxu0 }
 0x438   :  { %v10660_v27 = vpop.f32.mrf.mxu1  ;;  %v10662_v47 = vpack.c.bf16 %v5025_v4, %v5024_v62  ;;  %v5005_v6 = vmax.f32 %v4977_v5, 0.0  ;;  %v4978_v29 = vadd.f32 %v4950_v7, %v9256_v1  ;;  %v4951_v19 = vadd.f32 %v4903_v61, %v10484_v15 }
 0x439   :  { %11517 = vst [vmem:[#allocation86_spill] sm:$0xff] %v10660_v27  ;;  %v4907_v18 = vpop.f32.mrf.mxu0 }
 0x43a   :  { %11518 = vst [vmem:[#allocation26_spill] sm:$0xff] %v10662_v47  ;;  %v10666_v8 = vpop.f32.mrf.mxu1  ;;  %v5026_v54 = vmax.f32 %v5004_v42, %v5005_v6  ;;  %v4979_v2 = vadd.f32 %v4951_v19, %v9263_v58  ;;  %v4952_v0 = vadd.f32 %v4907_v18, %v10493_v52  ;;  %v5006_v43 = vmax.f32 %v4978_v29, 0.0 }
 0x43b   :  { %v4909_v20 = vpop.f32.mrf.mxu0 }
 0x43c   :  { %v5007_v56 = vmax.f32 %v4979_v2, 0.0  ;;  %v4980_v3 = vadd.f32 %v4952_v0, %v9256_v1  ;;  %v4953_v62 = vadd.f32 %v4909_v20, %v10499_v45  ;;  %v10672_v4 = vpop.f32.mrf.mxu1 }
 0x43d   :  { %v4911_v5 = vpop.f32.mrf.mxu0 }
 0x43e   :  { %v5027_v7 = vmax.f32 %v5006_v43, %v5007_v56  ;;  %v4981_v15 = vadd.f32 %v4953_v62, %v9263_v58  ;;  %v4954_v61 = vadd.f32 %v4911_v5, %v10505_v60  ;;  %v5008_v42 = vmax.f32 %v4980_v3, 0.0  ;;  %v10680_v2 = vpop.f32.mrf.mxu1 }
 0x43f   :  { %v4913_v6 = vpop.f32.mrf.mxu0 }
 0x440   :  { %v10676_v19 = vpack.c.bf16 %v5027_v7, %v5026_v54  ;;  %v5009_v52 = vmax.f32 %v4981_v15, 0.0  ;;  %v4982_v29 = vadd.f32 %v4954_v61, %v9256_v1  ;;  %v4955_v18 = vadd.f32 %v4913_v6, %v10513_v41  ;;  %v10686_v5 = vpop.f32.mrf.mxu1 }
 0x441   :  { %v4917_v45 = vpop.f32.mrf.mxu0 }
 0x442   :  { %11519 = vst [vmem:[#allocation91_spill] sm:$0xff] %v10676_v19  ;;  %v5028_v0 = vmax.f32 %v5008_v42, %v5009_v52  ;;  %v4983_v20 = vadd.f32 %v4955_v18, %v9263_v58  ;;  %v4956_v43 = vadd.f32 %v4917_v45, %v10524_v16  ;;  %v5010_v62 = vmax.f32 %v4982_v29, 0.0  ;;  %v10694_v45 = vpop.f32.mrf.mxu1 }
 0x443   :  { %v4919_v56 = vpop.f32.mrf.mxu0 }
 0x444   :  { %v5011_v60 = vmax.f32 %v4983_v20, 0.0  ;;  %v4984_v3 = vadd.f32 %v4956_v43, %v9256_v1  ;;  %v4957_v54 = vadd.f32 %v4919_v56, %v10531_v31 }
 0x445   :  { %v4921_v7 = vpop.f32.mrf.mxu0 }
 0x446   :  { %v5029_v15 = vmax.f32 %v5010_v62, %v5011_v60  ;;  %v4985_v41 = vadd.f32 %v4957_v54, %v9263_v58  ;;  %v4958_v61 = vadd.f32 %v4921_v7, %v10537_v30  ;;  %v5012_v42 = vmax.f32 %v4984_v3, 0.0  ;;  %v10700_v54 = vpop.f32.mrf.mxu1 }
 0x447   :  { %v4923_v6 = vpop.f32.mrf.mxu0 }
 0x448   :  { %v10690_v52 = vpack.c.bf16 %v5029_v15, %v5028_v0  ;;  %v5013_v16 = vmax.f32 %v4985_v41, 0.0  ;;  %v4986_v29 = vadd.f32 %v4958_v61, %v9256_v1  ;;  %v4959_v18 = vadd.f32 %v4923_v6, %v10543_v21 }
 0x449   :  { %v4927_v31 = vpop.f32.mrf.mxu0 }
 0x44a   :  { %11520 = vst [vmem:[#allocation25_spill] sm:$0xff] %v10690_v52  ;;  %v5030_v20 = vmax.f32 %v5012_v42, %v5013_v16  ;;  %v4987_v43 = vadd.f32 %v4959_v18, %v9263_v58  ;;  %v4960_v56 = vadd.f32 %v4927_v31, %v10552_v32  ;;  %v5014_v60 = vmax.f32 %v4986_v29, 0.0  ;;  %v10708_v18 = vpop.f32.mrf.mxu1 }
 0x44b   :  { %v4929_v62 = vpop.f32.mrf.mxu0 }
 0x44c   :  { %v5015_v30 = vmax.f32 %v4987_v43, 0.0  ;;  %v4988_v3 = vadd.f32 %v4960_v56, %v9256_v1  ;;  %v4961_v0 = vadd.f32 %v4929_v62, %v10558_v57 }
 0x44d   :  { %v4931_v7 = vpop.f32.mrf.mxu0 }
 0x44e   :  { %v5031_v15 = vmax.f32 %v5014_v60, %v5015_v30  ;;  %v4989_v21 = vadd.f32 %v4961_v0, %v9263_v58  ;;  %v4962_v41 = vadd.f32 %v4931_v7, %v10564_v28  ;;  %v5016_v61 = vmax.f32 %v4988_v3, 0.0  ;;  %v10714_v3 = vpop.f32.mrf.mxu1 }
 0x44f   :  { %v4933_v42 = vpop.f32.mrf.mxu0 }
 0x450   :  { %v10704_v6 = vpack.c.bf16 %v5031_v15, %v5030_v20  ;;  %v5017_v32 = vmax.f32 %v4989_v21, 0.0  ;;  %v4990_v16 = vadd.f32 %v4962_v41, %v9256_v1  ;;  %v4963_v29 = vadd.f32 %v4933_v42, %v10570_v11 }
 0x451   :  { %v5213_v57 = vpop.f32.mrf.mxu0 }
 0x452   :  { %11521 = vst [vmem:[#allocation32_spill] sm:$0xff] %v10704_v6  ;;  %v5032_v31 = vmax.f32 %v5016_v61, %v5017_v32  ;;  %v4991_v43 = vadd.f32 %v4963_v29, %v9263_v58  ;;  %v5214_v56 = vadd.f32 %v5213_v57, %v10437_v25  ;;  %v5018_v60 = vmax.f32 %v4990_v16, 0.0 }
 0x453   :  { %v5215_v62 = vpop.f32.mrf.mxu0 }
 0x454   :  { %v5019_v28 = vmax.f32 %v4991_v43, 0.0  ;;  %v5406_v30 = vadd.f32 %v10626_v55, %v5214_v56  ;;  %v5216_v20 = vadd.f32 %v5215_v62, %v10444_v33  ;;  %v10723_v55 = vpop.f32.mrf.mxu1 }
 0x455   :  { %v5217_v0 = vpop.f32.mrf.mxu0 }
 0x456   :  { %v5033_v7 = vmax.f32 %v5018_v60, %v5019_v28  ;;  %v5434_v11 = vadd.f32 %v5406_v30, %v9256_v1  ;;  %v5407_v15 = vadd.f32 %v10632_v23, %v5216_v20  ;;  %v5218_v21 = vadd.f32 %v5217_v0, %v10451_v10  ;;  %v10732_v62 = vpop.f32.mrf.mxu1 }
 0x457   :  { %v5219_v41 = vpop.f32.mrf.mxu0 }
 0x458   :  { %v10719_v61 = vpack.c.bf16 %v5033_v7, %v5032_v31  ;;  %v5435_v25 = vadd.f32 %v5407_v15, %v9263_v58  ;;  %v5408_v42 = vadd.f32 %v10637_v17, %v5218_v21  ;;  %v5220_v33 = vadd.f32 %v5219_v41, %v10458_v40  ;;  %v10735_v20 = vpop.f32.mrf.mxu1 }
 0x459   :  { %v5223_v32 = vpop.f32.mrf.mxu0  ;;  %v5462_v16 = vmax.f32 %v5434_v11, 0.0 }
 0x45a   :  { %11522 = vst [vmem:[#allocation36_spill] sm:$0xff] %v10719_v61  ;;  %v5463_v29 = vmax.f32 %v5435_v25, 0.0  ;;  %v5224_v57 = vadd.f32 %v5223_v32, %v10465_v38  ;;  %v5436_v23 = vadd.f32 %v5408_v42, %v9256_v1  ;;  %v5409_v10 = vadd.f32 %v10645_v35, %v5220_v33  ;;  %v10739_v35 = vpop.f32.mrf.mxu1 }
 0x45b   :  { %v5225_v43 = vpop.f32.mrf.mxu0 }
 0x45c   :  { %v10730_v31 = vadd.f32 %v10649_v34, %v5224_v57  ;;  %v5490_v56 = vmax.f32 %v5462_v16, %v5463_v29  ;;  %v5437_v17 = vadd.f32 %v5409_v10, %v9263_v58  ;;  %v5464_v40 = vmax.f32 %v5436_v23, 0.0  ;;  %v5383_v21 = vpop.f32.mrf.mxu1 }
 0x45d   :  { %v5227_v60 = vpop.f32.mrf.mxu0  ;;  %v10744_v47 = vadd.f32 %v5225_v43, %v10472_v13 }
 0x45e   :  { %11523 = vst [vmem:[#allocation29_spill] sm:$0xff] %v10730_v31  ;;  %v5465_v28 = vmax.f32 %v5437_v17, 0.0  ;;  %v5387_v42 = vpop.f32.mrf.mxu1  ;;  %v10747_v19 = vadd.f32 %v5227_v60, %v10481_v14 }
 0x45f   :  { %v5229_v30 = vpop.f32.mrf.mxu0 }
 0x460   :  { %v5491_v0 = vmax.f32 %v5464_v40, %v5465_v28  ;;  %v5389_v16 = vpop.f32.mrf.mxu1  ;;  %v10751_v61 = vadd.f32 %v5229_v30, %v10488_v51  ;;  %v11525_v51 = vld [vmem:[#allocation84_spill] sm:$0xff] }
 0x461   :  { %v5233_v38 = vpop.f32.mrf.mxu0 }
 0x462   :  { %v10737_v11 = vpack.c.bf16 %v5491_v0, %v5490_v56  ;;  %v5391_v23 = vpop.f32.mrf.mxu1  ;;  %v10754_v27 = vadd.f32 %v5233_v38, %v10496_v49  ;;  %v11526_v38 = vld [vmem:[#allocation22_spill] sm:$0xff] }
 0x463   :  { %v5235_v7 = vpop.f32.mrf.mxu0 }
 0x464   :  { %11524 = vst [vmem:[#allocation37_spill] sm:$0xff] %v10737_v11  ;;  %v5393_v40 = vpop.f32.mrf.mxu1  ;;  %v5236_v13 = vadd.f32 %v5235_v7, %v10501_v50  ;;  %v11529_v7 = vld [vmem:[#allocation87_spill] sm:$0xff] }
 0x465   :  { %v5237_v34 = vpop.f32.mrf.mxu0 }
 0x466   :  { %v5397_v0 = vpop.f32.mrf.mxu1 }
 0x467   :  { %v5239_v15 = vpop.f32.mrf.mxu0 }
 0x468   :  { %v5240_v11 = vadd.f32 %v5239_v15, %v10519_v53  ;;  %v5399_v52 = vpop.f32.mrf.mxu1 }
 0x469   :  { %v5243_v41 = vpop.f32.mrf.mxu0 }
 0x46a   :  { %v10763_v60 = vadd.f32 %v10694_v45, %v5240_v11  ;;  %v5244_v30 = vadd.f32 %v5243_v41, %v11525_v51  ;;  %v11530_v11 = vld [vmem:[#allocation85_spill] sm:$0xff]  ;;  %v11531_v41 = vld [vmem:[#allocation82_spill] sm:$0xff] }
 0x46b   :  { %v5245_v25 = vpop.f32.mrf.mxu0 }
 0x46d   :  { %v5247_v33 = vpop.f32.mrf.mxu0 }
 0x46f   :  { %v5249_v32 = vpop.f32.mrf.mxu0 }
 0x471   :  { %v5253_v29 = vpop.f32.mrf.mxu0 }
 0x473   :  { %v5255_v57 = vpop.f32.mrf.mxu0 }
 0x475   :  { %v5257_v10 = vpop.f32.mrf.mxu0 }
 0x477   :  { %v5259_v17 = vpop.f32.mrf.mxu0 }
 0x478   :  { %v5260_v14 = vadd.f32 %v5259_v17, %v10574_v36 }
 0x479   :  { %v5263_v28 = vpop.f32.mrf.mxu0 }
 0x47a   :  { %v5264_v43 = vadd.f32 %v5263_v28, %v10580_v37 }
 0x47b   :  { %v5265_v56 = vpop.f32.mrf.mxu0 }
 0x47c   :  { %v5266_v31 = vadd.f32 %v5265_v56, %v10584_v39  ;;  %v5250_v56 = vadd.f32 %v5249_v32, %v11530_v11 }
 0x47d   :  { %v5267_v24 = vpop.f32.mrf.mxu0 }
 0x47e   :  { %v5268_v53 = vadd.f32 %v5267_v24, %v10592_v12  ;;  %v5401_v24 = vpop.f32.mrf.mxu1  ;;  %v11527_v12 = vld [vmem:[#allocation80_spill] sm:$0xff] }
 0x47f   :  { %v5269_v44 = vpop.f32.mrf.mxu0 }
 0x480   :  { %v5270_v48 = vadd.f32 %v5269_v44, %v10597_v59  ;;  %v5238_v44 = vadd.f32 %v5237_v34, %v10510_v9  ;;  %v5258_v9 = vadd.f32 %v5257_v10, %v11529_v7  ;;  %v5427_v34 = vadd.f32 %v5389_v16, %v5266_v31  ;;  %v5403_v16 = vpop.f32.mrf.mxu1 }
 0x481   :  { %v5273_v6 = vpop.f32.mrf.mxu0  ;;  %v5428_v17 = vadd.f32 %v5391_v23, %v5268_v53  ;;  %v11532_v23 = vld [vmem:[#allocation15_spill] sm:$0xff] }
 0x482   :  { %v5274_v59 = vadd.f32 %v5273_v6, %v10602_v26  ;;  %v5429_v49 = vadd.f32 %v5393_v40, %v5270_v48  ;;  %v5246_v26 = vadd.f32 %v5245_v25, %v11527_v12  ;;  %v11528_v6 = vld [vmem:[#allocation18_spill] sm:$0xff]  ;;  %v5254_v48 = vadd.f32 %v5253_v29, %v11531_v41 }
 0x483   :  { %v5275_v39 = vpop.f32.mrf.mxu0  ;;  %v5256_v50 = vadd.f32 %v5255_v57, %v11528_v6  ;;  %v5425_v40 = vadd.f32 %v5383_v21, %v5260_v14  ;;  %v5248_v10 = vadd.f32 %v5247_v33, %v11532_v23  ;;  %v5455_v32 = vadd.f32 %v5427_v34, %v9263_v58 }
 0x484   :  { %v5276_v15 = vadd.f32 %v5275_v39, %v11526_v38  ;;  %v5430_v37 = vadd.f32 %v5397_v0, %v5274_v59  ;;  %v5426_v39 = vadd.f32 %v5387_v42, %v5264_v43  ;;  %v5457_v25 = vadd.f32 %v5429_v49, %v9263_v58 }
 0x485   :  { %v5277_v36 = vpop.f32.mrf.mxu0  ;;  %v5456_v21 = vadd.f32 %v5428_v17, %v9256_v1  ;;  %v5419_v53 = vadd.f32 %v10708_v18, %v5246_v26  ;;  %v5422_v59 = vadd.f32 %v10732_v62, %v5254_v48  ;;  %v5453_v33 = vadd.f32 %v5425_v40, %v9263_v58 }
 0x486   :  { %v5431_v28 = vadd.f32 %v5399_v52, %v5276_v15  ;;  %v5278_v45 = vadd.f32 %v5277_v36, %v10615_v46  ;;  %v5423_v52 = vadd.f32 %v10735_v20, %v5256_v50  ;;  %v5424_v46 = vadd.f32 %v10739_v35, %v5258_v9 }
 0x487   :  { %v5279_v51 = vpop.f32.mrf.mxu0  ;;  %v5458_v42 = vadd.f32 %v5430_v37, %v9256_v1  ;;  %v5454_v20 = vadd.f32 %v5426_v39, %v9256_v1  ;;  %v5485_v35 = vmax.f32 %v5457_v25, 0.0  ;;  %v5420_v49 = vadd.f32 %v10714_v3, %v5248_v10 }
 0x488   :  { %v5459_v57 = vadd.f32 %v5431_v28, %v9263_v58  ;;  %v5432_v38 = vadd.f32 %v5401_v24, %v5278_v45  ;;  %v5280_v31 = vadd.f32 %v5279_v51, %v10622_v22  ;;  %v5421_v22 = vadd.f32 %v10723_v55, %v5250_v56 }
 0x489   :  { %v5451_v15 = vadd.f32 %v5423_v52, %v9263_v58  ;;  %v5452_v24 = vadd.f32 %v5424_v46, %v9256_v1  ;;  %v5483_v12 = vmax.f32 %v5455_v32, 0.0  ;;  %v5484_v18 = vmax.f32 %v5456_v21, 0.0  ;;  %v11535_v46 = vld [vmem:[#allocation32_spill] sm:$0xff] }
 0x48a   :  { %v5460_v29 = vadd.f32 %v5432_v38, %v9256_v1  ;;  %v5433_v0 = vadd.f32 %v5403_v16, %v5280_v31  ;;  %v5487_v14 = vmax.f32 %v5459_v57, 0.0  ;;  %v5486_v26 = vmax.f32 %v5458_v42, 0.0  ;;  %v11533_v57 = vld [vmem:[#allocation86_spill] sm:$0xff] }
 0x48b   :  { %v5418_v62 = vadd.f32 %v10700_v54, %v5244_v30  ;;  %v5449_v50 = vadd.f32 %v5421_v22, %v9263_v58  ;;  %v5450_v7 = vadd.f32 %v5422_v59, %v9256_v1  ;;  %v5481_v9 = vmax.f32 %v5453_v33, 0.0 }
 0x48c   :  { %v5461_v43 = vadd.f32 %v5433_v0, %v9263_v58  ;;  %v5488_v55 = vmax.f32 %v5460_v29, 0.0  ;;  %v5482_v34 = vmax.f32 %v5454_v20, 0.0  ;;  %v5502_v36 = vmax.f32 %v5486_v26, %v5487_v14  ;;  %v11536_v0 = vld [vmem:[#allocation29_spill] sm:$0xff]  ;;  %v11539_v26 = vld [vmem:[#allocation26_spill] sm:$0xff] }
 0x48d   :  { %v5501_v3 = vmax.f32 %v5484_v18, %v5485_v35  ;;  %v5415_v37 = vadd.f32 %v10680_v2, %v5236_v13  ;;  %v5416_v28 = vadd.f32 %v10686_v5, %v5238_v44  ;;  %v5447_v45 = vadd.f32 %v5419_v53, %v9263_v58  ;;  %v11537_v35 = vld [vmem:[#allocation25_spill] sm:$0xff] }
 0x48e   :  { %v5489_v6 = vmax.f32 %v5461_v43, 0.0  ;;  %v5448_v11 = vadd.f32 %v5420_v49, %v9256_v1  ;;  %v5479_v56 = vmax.f32 %v5451_v15, 0.0  ;;  %v5480_v41 = vmax.f32 %v5452_v24, 0.0 }
 0x48f   :  { %v5500_v30 = vmax.f32 %v5482_v34, %v5483_v12  ;;  %v5413_v48 = vadd.f32 %v10666_v8, %v10751_v61  ;;  %v5414_v40 = vadd.f32 %v10672_v4, %v10754_v27  ;;  %v5445_v39 = vadd.f32 %v10763_v60, %v9263_v58  ;;  %v11534_v27 = vld [vmem:[#allocation36_spill] sm:$0xff]  ;;  %v11538_v12 = vld [vmem:[#allocation91_spill] sm:$0xff]  ;;  %v11545_v34 = vld [vmem:[#allocation74_spill] sm:$0xff] }
 0x490   :  { %v5503_v17 = vmax.f32 %v5488_v55, %v5489_v6  ;;  %v5446_v2 = vadd.f32 %v5418_v62, %v9256_v1  ;;  %v5477_v5 = vmax.f32 %v5449_v50, 0.0  ;;  %v5478_v13 = vmax.f32 %v5450_v7, 0.0  ;;  %v11540_v55 = vld [vmem:[#allocation23_spill] sm:$0xff]  ;;  %v11541_v6 = vld [vmem:[#allocation37_spill] sm:$0xff]  ;;  %v11542_v62 = vld [vmem:[#allocation88_spill] sm:$0xff] }
 0x491   :  { %v5539_v44 = vpack.c.bf16 %v5501_v3, %v5500_v30  ;;  %v5499_v51 = vmax.f32 %v5480_v41, %v5481_v9  ;;  %v5411_v25 = vadd.f32 %v10655_v63, %v10744_v47  ;;  %v5412_v8 = vadd.f32 %v11533_v57, %v10747_v19  ;;  %v11543_v50 = vld [vmem:[#allocation58_spill] sm:$0xff]  ;;  %v7139_v7 = vld [vmem:[#allocation9] sm:$0xff]   ;;  %v11544_v9 = vld [vmem:[#allocation17_spill] sm:$0xff] }
 0x492   :  { %v5545_v54 = vpack.c.bf16 %v5503_v17, %v5502_v36  ;;  %v5443_v61 = vadd.f32 %v5415_v37, %v9263_v58  ;;  %v5444_v4 = vadd.f32 %v5416_v28, %v9256_v1  ;;  %v5475_v60 = vmax.f32 %v5447_v45, 0.0  ;;  %v11547_v17 = vld [vmem:[#allocation76_spill] sm:$0xff]  ;;  %v11549_v37 = vld [vmem:[#allocation81_spill] sm:$0xff]  ;;  %v11556_v30 = vld [vmem:[#allocation14_spill] sm:$0xff] }
 0x493   :  { %v5476_v38 = vmax.f32 %v5448_v11, 0.0  ;;  %v5498_v31 = vmax.f32 %v5478_v13, %v5479_v56  ;;  %v5441_v16 = vadd.f32 %v5413_v48, %v9263_v58  ;;  %v5442_v63 = vadd.f32 %v5414_v40, %v9256_v1  ;;  %v11548_v3 = vld [vmem:[#allocation100_spill] sm:$0xff]  ;;  %v11550_v28 = vld [vmem:[#allocation77_spill] sm:$0xff]  ;;  %v11552_v11 = vld [vmem:[#allocation63_spill] sm:$0xff] }
 0x494   :  { %5705 = vmatprep.subr.bf16.mxu0 %v5545_v54  ;;  %5925 = vmatprep.subr.bf16.mxu1 %v5545_v54  ;;  %v5473_v47 = vmax.f32 %v5445_v39, 0.0  ;;  %v5474_v23 = vmax.f32 %v5446_v2, 0.0  ;;  %v5439_v52 = vadd.f32 %v5411_v25, %v9263_v58  ;;  %v5440_v32 = vadd.f32 %v5412_v8, %v9256_v1  ;;  %v11551_v45 = vld [vmem:[#allocation20_spill] sm:$0xff]  ;;  %v11553_v56 = vld [vmem:[#allocation75_spill] sm:$0xff]  ;;  %v11554_v41 = vld [vmem:[#allocation13_spill] sm:$0xff]  ;;  %v5611_v8 = vpop.f32.mrf.mxu0 }
 0x495   :  { %5706 = vmatpush1.bf16.msra.mxu0 %v11534_v27  ;;  %5926 = vmatpush1.bf16.msra.mxu1 %v11534_v27  ;;  %v5533_v19 = vpack.c.bf16 %v5499_v51, %v5498_v31  ;;  %v5497_v10 = vmax.f32 %v5476_v38, %v5477_v5  ;;  %v5471_v21 = vmax.f32 %v5443_v61, 0.0  ;;  %v5472_v42 = vmax.f32 %v5444_v4, 0.0  ;;  %v11555_v54 = vld [vmem:[#allocation79_spill] sm:$0xff]  ;;  %v11557_v48 = vld [vmem:[#allocation89_spill] sm:$0xff]  ;;  %v11561_v5 = vld [vmem:[#allocation102_spill] sm:$0xff] }
 0x496   :  { %5707 = vmatprep.subr.bf16.mxu0 %v5539_v44  ;;  %5927 = vmatprep.subr.bf16.mxu1 %v5539_v44  ;;  %v5496_v29 = vmax.f32 %v5474_v23, %v5475_v60  ;;  %v5438_v53 = vadd.f32 %v11536_v0, %v9256_v1  ;;  %v5469_v22 = vmax.f32 %v5441_v16, 0.0  ;;  %v5470_v59 = vmax.f32 %v5442_v63, 0.0  ;;  %v11558_v40 = vld [vmem:[#allocation99_spill] sm:$0xff]  ;;  %v11560_v2 = vld [vmem:[#allocation97_spill] sm:$0xff]  ;;  %v5613_v4 = vpop.f32.mrf.mxu0 }
 0x497   :  { %v5495_v20 = vmax.f32 %v5472_v42, %v5473_v47  ;;  %v5467_v58 = vmax.f32 %v5439_v52, 0.0  ;;  %v5468_v14 = vmax.f32 %v5440_v32, 0.0  ;;  %v11546_v36 = vmov 0   ;;  %v11559_v39 = vld [vmem:[#allocation83_spill] sm:$0xff]  ;;  %v11562_v44 = vld [vmem:[#allocation73_spill] sm:$0xff] }
 0x498   :  { %v5527_v33 = vpack.c.bf16 %v5497_v10, %v5496_v29  ;;  %v5494_v43 = vmax.f32 %v5470_v59, %v5471_v21  ;;  %v5466_v49 = vmax.f32 %v5438_v53, 0.0  ;;  %v5615_v31 = vpop.f32.mrf.mxu0 }
 0x499   :  { %5708 = vmatpush1.bf16.msra.mxu0 %v11535_v46  ;;  %5928 = vmatpush1.bf16.msra.mxu1 %v11535_v46  ;;  %v5493_v24 = vmax.f32 %v5468_v14, %v5469_v22 }
 0x49a   :  { %5709 = vmatprep.subr.bf16.mxu0 %v5533_v19  ;;  %5929 = vmatprep.subr.bf16.mxu1 %v5533_v19  ;;  %v5521_v15 = vpack.c.bf16 %v5495_v20, %v5494_v43  ;;  %v5492_v1 = vmax.f32 %v5466_v49, %v5467_v58  ;;  %v5617_v47 = vpop.f32.mrf.mxu0 }
 0x49c   :  { %v5515_v18 = vpack.c.bf16 %v5493_v24, %v5492_v1 }
 0x49d   :  { %5710 = vmatpush1.bf16.msra.mxu0 %v11537_v35  ;;  %5930 = vmatpush1.bf16.msra.mxu1 %v11537_v35 }
 0x49e   :  { %5711 = vmatprep.subr.bf16.mxu0 %v5527_v33  ;;  %5931 = vmatprep.subr.bf16.mxu1 %v5527_v33 }
 0x4a1   :  { %5712 = vmatpush1.bf16.msra.mxu0 %v11538_v12  ;;  %5932 = vmatpush1.bf16.msra.mxu1 %v11538_v12 }
 0x4a2   :  { %5713 = vmatprep.subr.bf16.mxu0 %v5521_v15  ;;  %5933 = vmatprep.subr.bf16.mxu1 %v5521_v15 }
 0x4a5   :  { %5714 = vmatpush1.bf16.msra.mxu0 %v11539_v26  ;;  %5934 = vmatpush1.bf16.msra.mxu1 %v11539_v26 }
 0x4a6   :  { %5715 = vmatprep.subr.bf16.mxu0 %v5515_v18  ;;  %5935 = vmatprep.subr.bf16.mxu1 %v5515_v18 }
 0x4a9   :  { %5716 = vmatpush1.bf16.msra.mxu0 %v11540_v55  ;;  %5936 = vmatpush1.bf16.msra.mxu1 %v11540_v55 }
 0x4aa   :  { %5717 = vmatprep.subr.bf16.mxu0 %v11541_v6  ;;  %5937 = vmatprep.subr.bf16.mxu1 %v11541_v6 }
 0x4ad   :  { %5718 = vmatpush1.bf16.msra.mxu0 %v11542_v62  ;;  %5938 = vmatpush1.bf16.msra.mxu1 %v11542_v62 }
 0x4ae   :  { %5862 = vmatprep.subr.bf16.mxu0 %v11543_v50 }
 0x4b0   :  { %6546 = vmatmul.mubr.msk.bf16.vlgmr.msra.gmra.mxu0 %vm5567_vm4, %v7139_v7  ;;  %6558 = vmatmul.mubr.msk.bf16.vlgmr.msra.gmra.mxu1 %vm5567_vm4, %v11544_v9 }
 0x4b1   :  { %5863 = vmatpush1.bf16.msra.mxu0 %v11545_v34  ;;  %5745 = vmatprep.mubr.bf16.mxu0 %v11546_v36 }
 0x4b2   :  { %5864 = vmatprep.subr.bf16.mxu0 %v11547_v17  ;;  %5965 = vmatprep.mubr.bf16.mxu1 %v11546_v36 }
 0x4b4   :  { %v5621_v19 = vpop.f32.mrf.mxu0 }
 0x4b5   :  { %5865 = vmatpush1.bf16.msra.mxu0 %v11548_v3 }
 0x4b6   :  { %5866 = vmatprep.subr.bf16.mxu0 %v11549_v37  ;;  %v5623_v52 = vpop.f32.mrf.mxu0 }
 0x4b8   :  { %6547 = vmatmul.mubr.msk.bf16.gmra.mxu0 %vm5567_vm4, %v11550_v28  ;;  %6559 = vmatmul.mubr.msk.bf16.gmra.mxu1 %vm5567_vm4, %v11551_v45  ;;  %v5625_v32 = vpop.f32.mrf.mxu0 }
 0x4b9   :  { %5867 = vmatpush1.bf16.msra.mxu0 %v11552_v11  ;;  %5755 = vmatprep.mubr.bf16.mxu0 %v11546_v36 }
 0x4ba   :  { %5868 = vmatprep.subr.bf16.mxu0 %v11553_v56  ;;  %5975 = vmatprep.mubr.bf16.mxu1 %v11546_v36  ;;  %v5627_v53 = vpop.f32.mrf.mxu0 }
 0x4bd   :  { %5869 = vmatpush1.bf16.msra.mxu0 %v11554_v41 }
 0x4be   :  { %5870 = vmatprep.subr.bf16.mxu0 %v11555_v54 }
 0x4c0   :  { %6548 = vmatmul.mubr.msk.bf16.gmra.mxu0 %vm5567_vm4, %v11556_v30  ;;  %6560 = vmatmul.mubr.msk.bf16.gmra.mxu1 %vm5567_vm4, %v11557_v48 }
 0x4c1   :  { %5871 = vmatpush1.bf16.msra.mxu0 %v11558_v40  ;;  %5892 = vmatprep.mubr.bf16.mxu0 %v11546_v36 }
 0x4c2   :  { %5872 = vmatprep.subr.bf16.mxu0 %v11559_v39 }
 0x4c3   :  { %v5631_v58 = vpop.f32.mrf.mxu0 }
 0x4c5   :  { %5873 = vmatpush1.bf16.msra.mxu0 %v11560_v2  ;;  %v5633_v12 = vpop.f32.mrf.mxu0 }
 0x4c6   :  { %5874 = vmatprep.subr.bf16.mxu0 %v11561_v5 }
 0x4c7   :  { %v5635_v62 = vpop.f32.mrf.mxu0 }
 0x4c8   :  { %v10863_v13 = vpop.f32.mrf.mxu1 }
 0x4c9   :  { %5875 = vmatpush1.bf16.msra.mxu0 %v11562_v44  ;;  %v5637_v17 = vpop.f32.mrf.mxu0 }
 0x4ca   :  { %v10866_v51 = vpop.f32.mrf.mxu1 }
 0x4cc   :  { %6555 = vmatmul.mubr.msk.bf16.vlgmr.msra.gmra.mxu0 %vm5567_vm4, %v11544_v9  ;;  %v10870_v25 = vpop.f32.mrf.mxu1 }
 0x4cd   :  { %5902 = vmatprep.mubr.bf16.mxu0 %v11546_v36 }
 0x4ce   :  { %v10873_v57 = vpop.f32.mrf.mxu1 }
 0x4d0   :  { %v10875_v61 = vpop.f32.mrf.mxu1 }
 0x4d2   :  { %v10877_v27 = vpop.f32.mrf.mxu1 }
 0x4d4   :  { %6556 = vmatmul.mubr.msk.bf16.gmra.mxu0 %vm5567_vm4, %v11551_v45  ;;  %v10881_v60 = vpop.f32.mrf.mxu1 }
 0x4d5   :  { %5912 = vmatprep.mubr.bf16.mxu0 %v11546_v36 }
 0x4d6   :  { %v10884_v38 = vpop.f32.mrf.mxu1 }
 0x4d8   :  { %v10886_v16 = vpop.f32.mrf.mxu1 }
 0x4da   :  { %v10888_v63 = vpop.f32.mrf.mxu1 }
 0x4dc   :  { %6557 = vmatmul.mubr.msk.bf16.gmra.mxu0 %vm5567_vm4, %v11557_v48  ;;  %v10892_v23 = vpop.f32.mrf.mxu1 }
 0x4de   :  { %v10894_v10 = vpop.f32.mrf.mxu1 }
 0x4e4   :  { %v5831_v46 = vpop.f32.mrf.mxu1 }
 0x4e5   :  { %v5986_v21 = vmax.f32 %v5611_v8, %v5831_v46 }
 0x4e6   :  { %v5833_v42 = vpop.f32.mrf.mxu1 }
 0x4e7   :  { %v5987_v29 = vmax.f32 %v5613_v4, %v5833_v42 }
 0x4e8   :  { %v5835_v0 = vpop.f32.mrf.mxu1 }
 0x4e9   :  { %v6579_v22 = vpack.c.bf16 %v5987_v29, %v5986_v21  ;;  %v5992_v59 = vmax.f32 %v5615_v31, %v5835_v0 }
 0x4ea   :  { %v5837_v33 = vpop.f32.mrf.mxu1 }
 0x4eb   :  { %6130 = vst [vmem:[%s10968_s6] sm:$0xff] %v6579_v22  ;;  %v5993_v20 = vmax.f32 %v5617_v47, %v5837_v33 }
 0x4ec   :  { %v5841_v35 = vpop.f32.mrf.mxu1 }
 0x4ed   :  { %v6582_v14 = vpack.c.bf16 %v5993_v20, %v5992_v59  ;;  %v5998_v43 = vmax.f32 %v5621_v19, %v5841_v35 }
 0x4ee   :  { %v5843_v49 = vpop.f32.mrf.mxu1 }
 0x4ef   :  { %6133 = vst [vmem:[%s10968_s6 + $0x18] sm:$0xff] %v6582_v14  ;;  %v5999_v15 = vmax.f32 %v5623_v52, %v5843_v49 }
 0x4f0   :  { %v5845_v24 = vpop.f32.mrf.mxu1 }
 0x4f1   :  { %v6585_v1 = vpack.c.bf16 %v5999_v15, %v5998_v43  ;;  %v6004_v18 = vmax.f32 %v5625_v32, %v5845_v24 }
 0x4f2   :  { %v5847_v26 = vpop.f32.mrf.mxu1 }
 0x4f3   :  { %6136 = vst [vmem:[%s10968_s6 + $0x30] sm:$0xff] %v6585_v1  ;;  %v6005_v55 = vmax.f32 %v5627_v53, %v5847_v26 }
 0x4f4   :  { %v5851_v6 = vpop.f32.mrf.mxu1 }
 0x4f5   :  { %v6588_v50 = vpack.c.bf16 %v6005_v55, %v6004_v18  ;;  %v6010_v7 = vmax.f32 %v5631_v58, %v5851_v6 }
 0x4f6   :  { %v5853_v9 = vpop.f32.mrf.mxu1 }
 0x4f7   :  { %6139 = vst [vmem:[%s10968_s6 + $0x48] sm:$0xff] %v6588_v50  ;;  %v6011_v34 = vmax.f32 %v5633_v12, %v5853_v9 }
 0x4f8   :  { %v5855_v36 = vpop.f32.mrf.mxu1 }
 0x4f9   :  { %v6591_v3 = vpack.c.bf16 %v6011_v34, %v6010_v7  ;;  %v6016_v37 = vmax.f32 %v5635_v62, %v5855_v36 }
 0x4fa   :  { %v5857_v28 = vpop.f32.mrf.mxu1 }
 0x4fb   :  { %6142 = vst [vmem:[%s10968_s6 + $0x60] sm:$0xff] %v6591_v3  ;;  %v6017_v45 = vmax.f32 %v5637_v17, %v5857_v28 }
 0x4fd   :  { %v6594_v11 = vpack.c.bf16 %v6017_v45, %v6016_v37 }
 0x4ff   :  { %6145 = vst [vmem:[%s10968_s6 + $0x78] sm:$0xff] %v6594_v11 }
 0x570   :  { %v5737_v56 = vpop.f32.mrf.mxu0  ;;  %v5957_v41 = vpop.f32.mrf.mxu1 }
 0x571   :  { %v5990_v54 = vmax.f32 %v5737_v56, %v5957_v41 }
 0x572   :  { %v5739_v30 = vpop.f32.mrf.mxu0  ;;  %v5959_v48 = vpop.f32.mrf.mxu1 }
 0x573   :  { %v5991_v40 = vmax.f32 %v5739_v30, %v5959_v48 }
 0x574   :  { %v5741_v39 = vpop.f32.mrf.mxu0  ;;  %v5961_v2 = vpop.f32.mrf.mxu1 }
 0x575   :  { %v6581_v5 = vpack.c.bf16 %v5991_v40, %v5990_v54  ;;  %v5996_v4 = vmax.f32 %v5741_v39, %v5961_v2 }
 0x576   :  { %v5743_v44 = vpop.f32.mrf.mxu0  ;;  %v5963_v8 = vpop.f32.mrf.mxu1 }
 0x577   :  { %6132 = vst [vmem:[%s10968_s6 + $0x10] sm:$0xff] %v6581_v5  ;;  %v5997_v31 = vmax.f32 %v5743_v44, %v5963_v8 }
 0x578   :  { %v5747_v47 = vpop.f32.mrf.mxu0  ;;  %v5967_v19 = vpop.f32.mrf.mxu1 }
 0x579   :  { %v6584_v52 = vpack.c.bf16 %v5997_v31, %v5996_v4  ;;  %v6002_v46 = vmax.f32 %v5747_v47, %v5967_v19 }
 0x57a   :  { %v5749_v32 = vpop.f32.mrf.mxu0  ;;  %v5969_v21 = vpop.f32.mrf.mxu1 }
 0x57b   :  { %6135 = vst [vmem:[%s10968_s6 + $0x28] sm:$0xff] %v6584_v52  ;;  %v6003_v42 = vmax.f32 %v5749_v32, %v5969_v21 }
 0x57c   :  { %v5751_v29 = vpop.f32.mrf.mxu0  ;;  %v5971_v0 = vpop.f32.mrf.mxu1 }
 0x57d   :  { %v6587_v53 = vpack.c.bf16 %v6003_v42, %v6002_v46  ;;  %v6008_v33 = vmax.f32 %v5751_v29, %v5971_v0 }
 0x57e   :  { %v5753_v22 = vpop.f32.mrf.mxu0  ;;  %v5973_v59 = vpop.f32.mrf.mxu1 }
 0x57f   :  { %6138 = vst [vmem:[%s10968_s6 + $0x40] sm:$0xff] %v6587_v53  ;;  %v6009_v20 = vmax.f32 %v5753_v22, %v5973_v59 }
 0x580   :  { %v5757_v35 = vpop.f32.mrf.mxu0  ;;  %v5977_v58 = vpop.f32.mrf.mxu1 }
 0x581   :  { %v6590_v14 = vpack.c.bf16 %v6009_v20, %v6008_v33  ;;  %v6014_v43 = vmax.f32 %v5757_v35, %v5977_v58 }
 0x582   :  { %v5759_v49 = vpop.f32.mrf.mxu0  ;;  %v5979_v15 = vpop.f32.mrf.mxu1 }
 0x583   :  { %6141 = vst [vmem:[%s10968_s6 + $0x58] sm:$0xff] %v6590_v14  ;;  %v6015_v24 = vmax.f32 %v5759_v49, %v5979_v15 }
 0x584   :  { %v5761_v12 = vpop.f32.mrf.mxu0  ;;  %v5981_v1 = vpop.f32.mrf.mxu1 }
 0x585   :  { %v6593_v18 = vpack.c.bf16 %v6015_v24, %v6014_v43  ;;  %v6020_v6 = vmax.f32 %v5761_v12, %v5981_v1 }
 0x586   :  { %v5763_v26 = vpop.f32.mrf.mxu0  ;;  %v5983_v55 = vpop.f32.mrf.mxu1 }
 0x587   :  { %6144 = vst [vmem:[%s10968_s6 + $0x70] sm:$0xff] %v6593_v18  ;;  %v6021_v62 = vmax.f32 %v5763_v26, %v5983_v55 }
 0x589   :  { %v6596_v50 = vpack.c.bf16 %v6021_v62, %v6020_v6 }
 0x58b   :  { %6147 = vst [vmem:[%s10968_s6 + $0x88] sm:$0xff] %v6596_v50 }
 0x58c   :  { %v5894_v7 = vpop.f32.mrf.mxu0 }
 0x58d   :  { %v5988_v34 = vmax.f32 %v10863_v13, %v5894_v7 }
 0x58e   :  { %v5896_v9 = vpop.f32.mrf.mxu0 }
 0x58f   :  { %v5989_v36 = vmax.f32 %v10866_v51, %v5896_v9 }
 0x590   :  { %v5898_v17 = vpop.f32.mrf.mxu0 }
 0x591   :  { %v6580_v3 = vpack.c.bf16 %v5989_v36, %v5988_v34  ;;  %v5994_v28 = vmax.f32 %v10870_v25, %v5898_v17 }
 0x592   :  { %v5900_v37 = vpop.f32.mrf.mxu0 }
 0x593   :  { %6131 = vst [vmem:[%s10968_s6 + $0x8] sm:$0xff] %v6580_v3  ;;  %v5995_v45 = vmax.f32 %v10873_v57, %v5900_v37 }
 0x594   :  { %v5904_v11 = vpop.f32.mrf.mxu0 }
 0x595   :  { %v6583_v56 = vpack.c.bf16 %v5995_v45, %v5994_v28  ;;  %v6000_v13 = vmax.f32 %v10875_v61, %v5904_v11 }
 0x596   :  { %v5906_v41 = vpop.f32.mrf.mxu0 }
 0x597   :  { %6134 = vst [vmem:[%s10968_s6 + $0x20] sm:$0xff] %v6583_v56  ;;  %v6001_v51 = vmax.f32 %v10877_v27, %v5906_v41 }
 0x598   :  { %v5908_v54 = vpop.f32.mrf.mxu0 }
 0x599   :  { %v6586_v30 = vpack.c.bf16 %v6001_v51, %v6000_v13  ;;  %v6006_v25 = vmax.f32 %v10881_v60, %v5908_v54 }
 0x59a   :  { %v5910_v48 = vpop.f32.mrf.mxu0 }
 0x59b   :  { %6137 = vst [vmem:[%s10968_s6 + $0x38] sm:$0xff] %v6586_v30  ;;  %v6007_v57 = vmax.f32 %v10884_v38, %v5910_v48 }
 0x59c   :  { %v5914_v40 = vpop.f32.mrf.mxu0 }
 0x59d   :  { %v6589_v39 = vpack.c.bf16 %v6007_v57, %v6006_v25  ;;  %v6012_v61 = vmax.f32 %v10886_v16, %v5914_v40 }
 0x59e   :  { %v5916_v2 = vpop.f32.mrf.mxu0 }
 0x59f   :  { %6140 = vst [vmem:[%s10968_s6 + $0x50] sm:$0xff] %v6589_v39  ;;  %v6013_v27 = vmax.f32 %v10888_v63, %v5916_v2 }
 0x5a0   :  { %v5918_v5 = vpop.f32.mrf.mxu0 }
 0x5a1   :  { %v6592_v44 = vpack.c.bf16 %v6013_v27, %v6012_v61  ;;  %v6018_v60 = vmax.f32 %v10892_v23, %v5918_v5 }
 0x5a2   :  { %v5920_v8 = vpop.f32.mrf.mxu0 }
 0x5a3   :  { %6143 = vst [vmem:[%s10968_s6 + $0x68] sm:$0xff] %v6592_v44  ;;  %v6019_v38 = vmax.f32 %v10894_v10, %v5920_v8 }
 0x5a5   :  { %v6595_v4 = vpack.c.bf16 %v6019_v38, %v6018_v60 }
 0x5a7   :  { %6146 = vst [vmem:[%s10968_s6 + $0x80] sm:$0xff] %v6595_v4 }
 0x5a8   :  { %6152 = vsyncpa [#allocation3], 1 }
 0x5a9   :  { %6153 = vsyncpa [#allocation5], 1 }
 0x5aa   :  { %6154 = vsyncpa [#allocation8], 1 }

// kernel: net_forward.3
= control target key start
LH: loop header
LB: loop body
LE: loop exit
PB: predicated region body
PF: predicated region fallthrough
CT: control target
= control target key end

     0   :  { %10 = vsyncpa [#allocation3], 0  ;;  %s9449_s0 = inlined_call_operand.vmem [shape: bf16[16,9216], index: 0, kind: input, shape index: {}]   ;;  %s9450_s1 = inlined_call_operand.hbm [shape: bf16[9216,128], index: 1, kind: input, shape index: {}]   ;;  %s9451_s2 = inlined_call_operand.hbm [shape: f32[1,128], index: 2, kind: input, shape index: {}]   ;;  %s9452_s3 = inlined_call_operand.hbm [shape: bf16[128,128], index: 3, kind: input, shape index: {}]   ;;  %s9453_s4 = inlined_call_operand.hbm [shape: f32[1,128], index: 4, kind: input, shape index: {}]   ;;  %s9454_s5 = inlined_call_operand.vmem [shape: f32[16,128], index: 5, kind: output, shape index: {}]  }
   0x1   :  { %11 = vsyncpa [#allocation5], 0 }
   0x2   :  { %12 = vsyncpa [#allocation8], 0  ;;  %s8904_s18 = smov [#allocation4]   ;;  %s8905_s20 = smov [#allocation2]  }
   0x3   :  { %s33_s19 = sshll.u32 %s8904_s18, 4  ;;  %s20_s21 = sshll.u32 %s8905_s20, 4  ;;  %s34_s19 = int_to_ptr.vmem [resolvable:$true] %s33_s19  ;;  %s21_s21 = int_to_ptr.vmem [resolvable:$true] %s20_s21 }
   0x4   :  { %s8826_s22 = scalar_lea.vmem %s34_s19, 16  ;;  %s8830_s23 = scalar_lea.vmem %s34_s19, 32 }
   0x5   :  { %p8827_p0 = scmp.ne.s32.totalorder %s34_s19, %s8826_s22  ;;  %p8831_p1 = scmp.lt.s32.totalorder %s34_s19, %s34_s19 }
   0x6   :  { %p8832_p2 = scmp.lt.s32.totalorder %s8830_s23, %s8826_s22 }
   0x8   :  { %p8833_p3 = por %p8832_p2, %p8831_p1 }
   0xa   :  { %p8834_p4 = pnand %p8833_p3, %p8827_p0 }
   0xc   :  { %8837 = shalt.err (!%p8834_p4)
}
   0xd   :  { %36 = dma.hbm_to_vmem [thread:$0]  %s9451_s2, 16, %s34_s19, [#allocation5]  }
   0xe   :  { %s8846_s26 = scalar_lea.vmem %s21_s21, 73728  ;;  %p8851_p6 = scmp.lt.s32.totalorder %s21_s21, %s21_s21 }
   0xf   :  { %p8847_p5 = scmp.ne.s32.totalorder %s21_s21, %s8846_s26  ;;  %p8852_p7 = scmp.lt.s32.totalorder %s8846_s26, %s8846_s26 }
  0x11   :  { %p8853_p8 = por %p8852_p7, %p8851_p6 }
  0x13   :  { %p8854_p9 = pnand %p8853_p8, %p8847_p5 }
  0x15   :  { %8857 = shalt.err (!%p8854_p9)
}
  0x16   :  { %s8906_s27 = smov 64   ;;  %s8907_s28 = smov 4  }
  0x17   :  { %26 = dma.hbm_to_vmem [thread:$0]  %s9450_s1, 73728, %s21_s21, [#allocation3], %s8906_s27, %s8906_s27, %s8907_s28  }
  0x18   :  { %s8908_s6 = smov [#allocation6]   ;;  %s8909_s8 = smov [#allocation7]  }
  0x19   :  { %s42_s7 = sshll.u32 %s8908_s6, 4  ;;  %s55_s9 = sshll.u32 %s8909_s8, 4  ;;  %s43_s7 = int_to_ptr.vmem [resolvable:$true] %s42_s7  ;;  %s56_s9 = int_to_ptr.vmem [resolvable:$true] %s55_s9 }
  0x1a   :  { %s8866_s2 = scalar_lea.vmem %s43_s7, 1024  ;;  %p8871_p11 = scmp.lt.s32.totalorder %s43_s7, %s43_s7 }
  0x1b   :  { %p8867_p10 = scmp.ne.s32.totalorder %s43_s7, %s8866_s2  ;;  %p8872_p12 = scmp.lt.s32.totalorder %s8866_s2, %s8866_s2 }
  0x1d   :  { %p8873_p13 = por %p8872_p12, %p8871_p11 }
  0x1f   :  { %p8874_p0 = pnand %p8873_p13, %p8867_p10 }
  0x21   :  { %8877 = shalt.err (!%p8874_p0)
}
  0x22   :  { %48 = dma.hbm_to_vmem [thread:$0]  %s9452_s3, 1024, %s43_s7, [#allocation5], %s8906_s27, %s8906_s27, %s8907_s28  }
  0x23   :  { %s8886_s12 = scalar_lea.vmem %s56_s9, 16  ;;  %s8890_s1 = scalar_lea.vmem %s56_s9, 32 }
  0x24   :  { %p8887_p1 = scmp.ne.s32.totalorder %s56_s9, %s8886_s12  ;;  %p8891_p2 = scmp.lt.s32.totalorder %s56_s9, %s56_s9 }
  0x25   :  { %p8892_p3 = scmp.lt.s32.totalorder %s8890_s1, %s8886_s12 }
  0x27   :  { %p8893_p4 = por %p8892_p3, %p8891_p2 }
  0x29   :  { %p8894_p5 = pnand %p8893_p4, %p8887_p1 }
  0x2b   :  { %8897 = shalt.err (!%p8894_p5)
}
  0x2c   :  { %58 = dma.hbm_to_vmem [thread:$0]  %s9453_s4, 16, %s56_s9, [#allocation8]  }
  0x2d   :  { %8898 = dma.done.wait [#allocation3], 73728  }
  0x2e   :  { %8899 = vsyncadd [#allocation3], 4294893568 }
  0x2f   :  { %8900 = dma.done.wait [#allocation5], 1040  }
  0x30   :  { %8901 = vsyncadd [#allocation5], 4294966256 }
  0x31   :  { %8902 = dma.done.wait [#allocation8], 16  }
  0x32   :  { %8903 = vsyncadd [#allocation8], 4294967280  ;;  %v8226_v0 = vld [vmem:[#allocation2 + $0x78] sm:$0xff]   ;;  %v8230_v4 = vld [vmem:[#allocation2 + $0x70] sm:$0xff]   ;;  %vm8911_vm0 = vmmov 0  }
  0x33   :  { %v8227_v1 = vld [vmem:[#allocation2 + $0xf8] sm:$0xff]   ;;  %7397 = vmatprep.subr.bf16.mxu0 %v8226_v0  ;;  %v8231_v5 = vld [vmem:[#allocation2 + $0xf0] sm:$0xff]   ;;  %v8234_v8 = vld [vmem:[#allocation2 + $0x68] sm:$0xff]  }
  0x34   :  { %v8228_v2 = vld [vmem:[#allocation2 + $0x38] sm:$0xff]   ;;  %7419 = vmatprep.subr.bf16.mxu1 %v8227_v1  ;;  %v8232_v6 = vld [vmem:[#allocation2 + $0x30] sm:$0xff]   ;;  %v8235_v9 = vld [vmem:[#allocation2 + $0xe8] sm:$0xff]  }
  0x35   :  { %v8229_v3 = vld [vmem:[#allocation2 + $0xb8] sm:$0xff]   ;;  %7398 = vmatpush3.bf16.msra.mxu0 %v8228_v2  ;;  %v8233_v7 = vld [vmem:[#allocation2 + $0xb0] sm:$0xff]   ;;  %v8236_v10 = vld [vmem:[#allocation2 + $0x28] sm:$0xff]  }
  0x36   :  { %7420 = vmatpush3.bf16.msra.mxu1 %v8229_v3  ;;  %7399 = vmatprep.subr.bf16.mxu0 %v8230_v4  ;;  %v8237_v11 = vld [vmem:[#allocation2 + $0xa8] sm:$0xff]   ;;  %v8238_v12 = vld [vmem:[#allocation2 + $0x60] sm:$0xff]   ;;  %v8242_v16 = vld [vmem:[#allocation2 + $0x58] sm:$0xff]  }
  0x37   :  { %7421 = vmatprep.subr.bf16.mxu1 %v8231_v5  ;;  %v8239_v13 = vld [vmem:[#allocation2 + $0xe0] sm:$0xff]   ;;  %v8243_v17 = vld [vmem:[#allocation2 + $0xd8] sm:$0xff]   ;;  %v8246_v20 = vld [vmem:[#allocation2 + $0x50] sm:$0xff]  }
  0x38   :  { %v8240_v14 = vld [vmem:[#allocation2 + $0x20] sm:$0xff]   ;;  %v8244_v18 = vld [vmem:[#allocation2 + $0x18] sm:$0xff]   ;;  %v8247_v21 = vld [vmem:[#allocation2 + $0xd0] sm:$0xff]  }
  0x39   :  { %7400 = vmatpush3.bf16.msra.mxu0 %v8232_v6  ;;  %v8241_v15 = vld [vmem:[#allocation2 + $0xa0] sm:$0xff]   ;;  %v8245_v19 = vld [vmem:[#allocation2 + $0x98] sm:$0xff]   ;;  %v8248_v22 = vld [vmem:[#allocation2 + $0x10] sm:$0xff]  }
  0x3a   :  { %7422 = vmatpush3.bf16.msra.mxu1 %v8233_v7  ;;  %7401 = vmatprep.subr.bf16.mxu0 %v8234_v8  ;;  %v8249_v23 = vld [vmem:[#allocation2 + $0x90] sm:$0xff]   ;;  %v8250_v24 = vld [vmem:[#allocation2 + $0x48] sm:$0xff]   ;;  %v8254_v28 = vld [vmem:[#allocation2 + $0x40] sm:$0xff]  }
  0x3b   :  { %7423 = vmatprep.subr.bf16.mxu1 %v8235_v9  ;;  %v8251_v25 = vld [vmem:[#allocation2 + $0xc8] sm:$0xff]   ;;  %v8255_v29 = vld [vmem:[#allocation2 + $0xc0] sm:$0xff]   ;;  %v8258_v40 = vld [vmem:[#allocation2 + $0x178] sm:$0xff]  }
  0x3c   :  { %v8252_v26 = vld [vmem:[#allocation2 + $0x8] sm:$0xff]   ;;  %v8256_v30 = vld [vmem:[#allocation2] sm:$0xff]   ;;  %v8259_v41 = vld [vmem:[#allocation2 + $0x1f8] sm:$0xff]  }
  0x3d   :  { %7402 = vmatpush3.bf16.msra.mxu0 %v8236_v10  ;;  %v8253_v27 = vld [vmem:[#allocation2 + $0x88] sm:$0xff]   ;;  %v8257_v31 = vld [vmem:[#allocation2 + $0x80] sm:$0xff]   ;;  %v8260_v42 = vld [vmem:[#allocation2 + $0x138] sm:$0xff]  }
  0x3e   :  { %7424 = vmatpush3.bf16.msra.mxu1 %v8237_v11  ;;  %7403 = vmatprep.subr.bf16.mxu0 %v8238_v12  ;;  %v72_v32 = vld [vmem:[%s9449_s0] sm:$0xff]  ;;  %v73_v34 = vld [vmem:[%s9449_s0 + $0x8] sm:$0xff]  ;;  %v8261_v43 = vld [vmem:[#allocation2 + $0x1b8] sm:$0xff]  }
  0x3f   :  { %7425 = vmatprep.subr.bf16.mxu1 %v8239_v13  ;;  %v108_v33 = vld [vmem:[%s9449_s0 + $0x120] sm:$0xff]  ;;  %v109_v37 = vld [vmem:[%s9449_s0 + $0x128] sm:$0xff]  ;;  %v8262_v44 = vld [vmem:[#allocation2 + $0x170] sm:$0xff]  }
  0x40   :  { %v6740_v35 = vcombine.low %v72_v32, %v108_v33  ;;  %v6741_v36 = vcombine.high %v72_v32, %v108_v33  ;;  %v6742_v38 = vcombine.low %v73_v34, %v109_v37  ;;  %v6743_v39 = vcombine.high %v73_v34, %v109_v37  ;;  %v8263_v45 = vld [vmem:[#allocation2 + $0x1f0] sm:$0xff]   ;;  %v8266_v48 = vld [vmem:[#allocation2 + $0x168] sm:$0xff]   ;;  %v8270_v52 = vld [vmem:[#allocation2 + $0x160] sm:$0xff]  }
  0x41   :  { %7404 = vmatpush3.bf16.msra.mxu0 %v8240_v14  ;;  %v8264_v46 = vld [vmem:[#allocation2 + $0x130] sm:$0xff]   ;;  %v8267_v49 = vld [vmem:[#allocation2 + $0x1e8] sm:$0xff]   ;;  %v8271_v53 = vld [vmem:[#allocation2 + $0x1e0] sm:$0xff]  }
  0x42   :  { %7426 = vmatpush3.bf16.msra.mxu1 %v8241_v15  ;;  %7405 = vmatprep.subr.bf16.mxu0 %v8242_v16  ;;  %v8265_v47 = vld [vmem:[#allocation2 + $0x1b0] sm:$0xff]   ;;  %v8268_v50 = vld [vmem:[#allocation2 + $0x128] sm:$0xff]   ;;  %v8272_v54 = vld [vmem:[#allocation2 + $0x120] sm:$0xff]  }
  0x43   :  { %7427 = vmatprep.subr.bf16.mxu1 %v8243_v17  ;;  %5151 = vmatprep.mubr.bf16.mxu0 %v6741_v36  ;;  %v8269_v51 = vld [vmem:[#allocation2 + $0x1a8] sm:$0xff]   ;;  %v8273_v55 = vld [vmem:[#allocation2 + $0x1a0] sm:$0xff]   ;;  %v8274_v56 = vld [vmem:[#allocation2 + $0x158] sm:$0xff]  }
  0x44   :  { %5192 = vmatprep.mubr.bf16.mxu1 %v6743_v39  ;;  %v8275_v57 = vld [vmem:[#allocation2 + $0x1d8] sm:$0xff]   ;;  %v8278_v60 = vld [vmem:[#allocation2 + $0x150] sm:$0xff]   ;;  %v8282_v0 = vld [vmem:[#allocation2 + $0x148] sm:$0xff]  }
  0x45   :  { %7406 = vmatpush3.bf16.msra.mxu0 %v8244_v18  ;;  %v8276_v58 = vld [vmem:[#allocation2 + $0x118] sm:$0xff]   ;;  %v8279_v61 = vld [vmem:[#allocation2 + $0x1d0] sm:$0xff]   ;;  %v8283_v1 = vld [vmem:[#allocation2 + $0x1c8] sm:$0xff]  }
  0x46   :  { %7428 = vmatpush3.bf16.msra.mxu1 %v8245_v19  ;;  %7407 = vmatprep.subr.bf16.mxu0 %v8246_v20  ;;  %v8277_v59 = vld [vmem:[#allocation2 + $0x198] sm:$0xff]   ;;  %v8280_v62 = vld [vmem:[#allocation2 + $0x110] sm:$0xff]   ;;  %v8284_v2 = vld [vmem:[#allocation2 + $0x108] sm:$0xff]  }
  0x47   :  { %7429 = vmatprep.subr.bf16.mxu1 %v8247_v21  ;;  %v8281_v63 = vld [vmem:[#allocation2 + $0x190] sm:$0xff]   ;;  %v8285_v3 = vld [vmem:[#allocation2 + $0x188] sm:$0xff]   ;;  %v8286_v4 = vld [vmem:[#allocation2 + $0x140] sm:$0xff]  }
  0x48   :  { %v8287_v5 = vld [vmem:[#allocation2 + $0x1c0] sm:$0xff]   ;;  %v74_v8 = vld [vmem:[%s9449_s0 + $0x10] sm:$0xff]  ;;  %v75_v12 = vld [vmem:[%s9449_s0 + $0x18] sm:$0xff] }
  0x49   :  { %7408 = vmatpush3.bf16.msra.mxu0 %v8248_v22  ;;  %v8288_v6 = vld [vmem:[#allocation2 + $0x100] sm:$0xff]   ;;  %v110_v9 = vld [vmem:[%s9449_s0 + $0x130] sm:$0xff]  ;;  %v111_v13 = vld [vmem:[%s9449_s0 + $0x138] sm:$0xff] }
  0x4a   :  { %7430 = vmatpush3.bf16.msra.mxu1 %v8249_v23  ;;  %7409 = vmatprep.subr.bf16.mxu0 %v8250_v24  ;;  %v8289_v7 = vld [vmem:[#allocation2 + $0x180] sm:$0xff]   ;;  %v6744_v10 = vcombine.low %v74_v8, %v110_v9  ;;  %v6745_v11 = vcombine.high %v74_v8, %v110_v9  ;;  %v6746_v14 = vcombine.low %v75_v12, %v111_v13  ;;  %v8290_v16 = vld [vmem:[#allocation2 + $0x278] sm:$0xff]   ;;  %v8294_v20 = vld [vmem:[#allocation2 + $0x270] sm:$0xff]  }
  0x4b   :  { %7431 = vmatprep.subr.bf16.mxu1 %v8251_v25  ;;  %v6747_v15 = vcombine.high %v75_v12, %v111_v13  ;;  %v8291_v17 = vld [vmem:[#allocation2 + $0x2f8] sm:$0xff]   ;;  %v8295_v21 = vld [vmem:[#allocation2 + $0x2f0] sm:$0xff]   ;;  %v8298_v24 = vld [vmem:[#allocation2 + $0x268] sm:$0xff]  }
  0x4c   :  { %v8292_v18 = vld [vmem:[#allocation2 + $0x238] sm:$0xff]   ;;  %v8296_v22 = vld [vmem:[#allocation2 + $0x230] sm:$0xff]   ;;  %v8299_v25 = vld [vmem:[#allocation2 + $0x2e8] sm:$0xff]  }
  0x4d   :  { %7410 = vmatpush3.bf16.msra.mxu0 %v8252_v26  ;;  %v8293_v19 = vld [vmem:[#allocation2 + $0x2b8] sm:$0xff]   ;;  %v8297_v23 = vld [vmem:[#allocation2 + $0x2b0] sm:$0xff]   ;;  %v8300_v26 = vld [vmem:[#allocation2 + $0x228] sm:$0xff]  }
  0x4e   :  { %7432 = vmatpush3.bf16.msra.mxu1 %v8253_v27  ;;  %7411 = vmatprep.subr.bf16.mxu0 %v8254_v28  ;;  %v8301_v27 = vld [vmem:[#allocation2 + $0x2a8] sm:$0xff]   ;;  %v8302_v28 = vld [vmem:[#allocation2 + $0x260] sm:$0xff]   ;;  %v8306_v32 = vld [vmem:[#allocation2 + $0x258] sm:$0xff]  }
  0x4f   :  { %7433 = vmatprep.subr.bf16.mxu1 %v8255_v29  ;;  %v8303_v29 = vld [vmem:[#allocation2 + $0x2e0] sm:$0xff]   ;;  %v8307_v33 = vld [vmem:[#allocation2 + $0x2d8] sm:$0xff]   ;;  %v8310_v36 = vld [vmem:[#allocation2 + $0x250] sm:$0xff]  }
  0x50   :  { %v8308_v34 = vld [vmem:[#allocation2 + $0x218] sm:$0xff]   ;;  %v8311_v37 = vld [vmem:[#allocation2 + $0x2d0] sm:$0xff]  }
  0x51   :  { %7412 = vmatpush3.bf16.msra.mxu0 %v8256_v30  ;;  %v8304_v30 = vld [vmem:[#allocation2 + $0x220] sm:$0xff]   ;;  %v8313_v39 = vld [vmem:[#allocation2 + $0x290] sm:$0xff]   ;;  %v8338_v8 = vld [vmem:[#allocation2 + $0x358] sm:$0xff]  }
  0x52   :  { %7434 = vmatpush3.bf16.msra.mxu1 %v8257_v31  ;;  %7441 = vmatprep.subr.bf16.mxu0 %v8258_v40  ;;  %v8305_v31 = vld [vmem:[#allocation2 + $0x2a0] sm:$0xff]   ;;  %v8314_v40 = vld [vmem:[#allocation2 + $0x248] sm:$0xff]   ;;  %v8339_v9 = vld [vmem:[#allocation2 + $0x3d8] sm:$0xff]  }
  0x53   :  { %7463 = vmatprep.subr.bf16.mxu1 %v8259_v41  ;;  %v8315_v41 = vld [vmem:[#allocation2 + $0x2c8] sm:$0xff]   ;;  %v8342_v12 = vld [vmem:[#allocation2 + $0x350] sm:$0xff]  }
  0x54   :  { %5152 = vmatmul.mubr.bf16.vlgmr.msra.gmra.mxu0 %v6740_v35  ;;  %v8309_v35 = vld [vmem:[#allocation2 + $0x298] sm:$0xff]   ;;  %v8343_v13 = vld [vmem:[#allocation2 + $0x3d0] sm:$0xff]  }
  0x55   :  { %5193 = vmatmul.mubr.bf16.vlgmr.msra.gmra.mxu1 %v6742_v38  ;;  %7442 = vmatpush3.bf16.msra.mxu0 %v8260_v42  ;;  %v8312_v38 = vld [vmem:[#allocation2 + $0x210] sm:$0xff]   ;;  %v8316_v42 = vld [vmem:[#allocation2 + $0x208] sm:$0xff]  }
  0x56   :  { %7464 = vmatpush3.bf16.msra.mxu1 %v8261_v43  ;;  %7443 = vmatprep.subr.bf16.mxu0 %v8262_v44  ;;  %v8317_v43 = vld [vmem:[#allocation2 + $0x288] sm:$0xff]   ;;  %v8318_v44 = vld [vmem:[#allocation2 + $0x240] sm:$0xff]  }
  0x57   :  { %7465 = vmatprep.subr.bf16.mxu1 %v8263_v45  ;;  %5233 = vmatprep.mubr.bf16.mxu0 %v6745_v11  ;;  %v8319_v45 = vld [vmem:[#allocation2 + $0x2c0] sm:$0xff]   ;;  %v8341_v11 = vld [vmem:[#allocation2 + $0x398] sm:$0xff]  }
  0x58   :  { %5274 = vmatprep.mubr.bf16.mxu1 %v6747_v15  ;;  %v8345_v15 = vld [vmem:[#allocation2 + $0x390] sm:$0xff]  }
  0x59   :  { %7444 = vmatpush3.bf16.msra.mxu0 %v8264_v46  ;;  %v8320_v46 = vld [vmem:[#allocation2 + $0x200] sm:$0xff]  }
  0x5a   :  { %7466 = vmatpush3.bf16.msra.mxu1 %v8265_v47  ;;  %7445 = vmatprep.subr.bf16.mxu0 %v8266_v48  ;;  %v8321_v47 = vld [vmem:[#allocation2 + $0x280] sm:$0xff]  }
  0x5b   :  { %7467 = vmatprep.subr.bf16.mxu1 %v8267_v49  ;;  %v76_v48 = vld [vmem:[%s9449_s0 + $0x20] sm:$0xff] }
  0x5c   :  { %v112_v49 = vld [vmem:[%s9449_s0 + $0x140] sm:$0xff] }
  0x5d   :  { %7446 = vmatpush3.bf16.msra.mxu0 %v8268_v50  ;;  %v77_v50 = vld [vmem:[%s9449_s0 + $0x28] sm:$0xff] }
  0x5e   :  { %7468 = vmatpush3.bf16.msra.mxu1 %v8269_v51  ;;  %7447 = vmatprep.subr.bf16.mxu0 %v8270_v52  ;;  %v113_v51 = vld [vmem:[%s9449_s0 + $0x148] sm:$0xff]  ;;  %v6748_v52 = vcombine.low %v76_v48, %v112_v49 }
  0x5f   :  { %7469 = vmatprep.subr.bf16.mxu1 %v8271_v53  ;;  %v6749_v53 = vcombine.high %v76_v48, %v112_v49  ;;  %v8370_v48 = vld [vmem:[#allocation2 + $0x458] sm:$0xff]  }
  0x60   :  { %v8371_v49 = vld [vmem:[#allocation2 + $0x4d8] sm:$0xff]  }
  0x61   :  { %7448 = vmatpush3.bf16.msra.mxu0 %v8272_v54  ;;  %v6750_v54 = vcombine.low %v77_v50, %v113_v51 }
  0x62   :  { %7470 = vmatpush3.bf16.msra.mxu1 %v8273_v55  ;;  %7449 = vmatprep.subr.bf16.mxu0 %v8274_v56  ;;  %v6751_v55 = vcombine.high %v77_v50, %v113_v51  ;;  %v8322_v56 = vld [vmem:[#allocation2 + $0x378] sm:$0xff]  }
  0x63   :  { %7471 = vmatprep.subr.bf16.mxu1 %v8275_v57  ;;  %v8323_v57 = vld [vmem:[#allocation2 + $0x3f8] sm:$0xff]  }
  0x64   :  { %v8372_v50 = vld [vmem:[#allocation2 + $0x418] sm:$0xff]  }
  0x65   :  { %7450 = vmatpush3.bf16.msra.mxu0 %v8276_v58  ;;  %v8324_v58 = vld [vmem:[#allocation2 + $0x338] sm:$0xff]  }
  0x66   :  { %7472 = vmatpush3.bf16.msra.mxu1 %v8277_v59  ;;  %7451 = vmatprep.subr.bf16.mxu0 %v8278_v60  ;;  %v8325_v59 = vld [vmem:[#allocation2 + $0x3b8] sm:$0xff]   ;;  %v8326_v60 = vld [vmem:[#allocation2 + $0x370] sm:$0xff]  }
  0x67   :  { %7473 = vmatprep.subr.bf16.mxu1 %v8279_v61  ;;  %v8327_v61 = vld [vmem:[#allocation2 + $0x3f0] sm:$0xff]   ;;  %v8373_v51 = vld [vmem:[#allocation2 + $0x498] sm:$0xff]  }
  0x69   :  { %7452 = vmatpush3.bf16.msra.mxu0 %v8280_v62  ;;  %v8328_v62 = vld [vmem:[#allocation2 + $0x330] sm:$0xff]  }
  0x6a   :  { %7474 = vmatpush3.bf16.msra.mxu1 %v8281_v63  ;;  %7453 = vmatprep.subr.bf16.mxu0 %v8282_v0  ;;  %v8329_v63 = vld [vmem:[#allocation2 + $0x3b0] sm:$0xff]   ;;  %v8330_v0 = vld [vmem:[#allocation2 + $0x368] sm:$0xff]  }
  0x6b   :  { %7475 = vmatprep.subr.bf16.mxu1 %v8283_v1  ;;  %v8331_v1 = vld [vmem:[#allocation2 + $0x3e8] sm:$0xff]  }
  0x6d   :  { %7454 = vmatpush3.bf16.msra.mxu0 %v8284_v2  ;;  %v8332_v2 = vld [vmem:[#allocation2 + $0x328] sm:$0xff]  }
  0x6e   :  { %7476 = vmatpush3.bf16.msra.mxu1 %v8285_v3  ;;  %7455 = vmatprep.subr.bf16.mxu0 %v8286_v4  ;;  %v8333_v3 = vld [vmem:[#allocation2 + $0x3a8] sm:$0xff]   ;;  %v8334_v4 = vld [vmem:[#allocation2 + $0x360] sm:$0xff]  }
  0x6f   :  { %7477 = vmatprep.subr.bf16.mxu1 %v8287_v5  ;;  %v8335_v5 = vld [vmem:[#allocation2 + $0x3e0] sm:$0xff]  }
  0x71   :  { %7456 = vmatpush3.bf16.msra.mxu0 %v8288_v6  ;;  %v8336_v6 = vld [vmem:[#allocation2 + $0x320] sm:$0xff]  }
  0x72   :  { %7478 = vmatpush3.bf16.msra.mxu1 %v8289_v7  ;;  %7485 = vmatprep.subr.bf16.mxu0 %v8290_v16  ;;  %v8337_v7 = vld [vmem:[#allocation2 + $0x3a0] sm:$0xff]   ;;  %v8346_v16 = vld [vmem:[#allocation2 + $0x348] sm:$0xff]  }
  0x73   :  { %7507 = vmatprep.subr.bf16.mxu1 %v8291_v17  ;;  %v8347_v17 = vld [vmem:[#allocation2 + $0x3c8] sm:$0xff]  }
  0x74   :  { %5234 = vmatmul.mubr.bf16.vlgmr.msra.gmra.mxu0 %v6744_v10  ;;  %v8340_v10 = vld [vmem:[#allocation2 + $0x318] sm:$0xff]  }
  0x75   :  { %5275 = vmatmul.mubr.bf16.vlgmr.msra.gmra.mxu1 %v6746_v14  ;;  %7486 = vmatpush3.bf16.msra.mxu0 %v8292_v18  ;;  %v8344_v14 = vld [vmem:[#allocation2 + $0x310] sm:$0xff]   ;;  %v8348_v18 = vld [vmem:[#allocation2 + $0x308] sm:$0xff]  }
  0x76   :  { %7508 = vmatpush3.bf16.msra.mxu1 %v8293_v19  ;;  %7487 = vmatprep.subr.bf16.mxu0 %v8294_v20  ;;  %v8349_v19 = vld [vmem:[#allocation2 + $0x388] sm:$0xff]   ;;  %v8350_v20 = vld [vmem:[#allocation2 + $0x340] sm:$0xff]  }
  0x77   :  { %7509 = vmatprep.subr.bf16.mxu1 %v8295_v21  ;;  %5315 = vmatprep.mubr.bf16.mxu0 %v6749_v53  ;;  %v8351_v21 = vld [vmem:[#allocation2 + $0x3c0] sm:$0xff]   ;;  %v8375_v53 = vld [vmem:[#allocation2 + $0x4d0] sm:$0xff]  }
  0x78   :  { %5356 = vmatprep.mubr.bf16.mxu1 %v6751_v55  ;;  %v8377_v55 = vld [vmem:[#allocation2 + $0x490] sm:$0xff]  }
  0x79   :  { %7488 = vmatpush3.bf16.msra.mxu0 %v8296_v22  ;;  %v8352_v22 = vld [vmem:[#allocation2 + $0x300] sm:$0xff]  }
  0x7a   :  { %7510 = vmatpush3.bf16.msra.mxu1 %v8297_v23  ;;  %7489 = vmatprep.subr.bf16.mxu0 %v8298_v24  ;;  %v8353_v23 = vld [vmem:[#allocation2 + $0x380] sm:$0xff]   ;;  %v78_v24 = vld [vmem:[%s9449_s0 + $0x30] sm:$0xff] }
  0x7b   :  { %7511 = vmatprep.subr.bf16.mxu1 %v8299_v25  ;;  %v114_v25 = vld [vmem:[%s9449_s0 + $0x150] sm:$0xff] }
  0x7d   :  { %7490 = vmatpush3.bf16.msra.mxu0 %v8300_v26  ;;  %v79_v26 = vld [vmem:[%s9449_s0 + $0x38] sm:$0xff] }
  0x7e   :  { %7512 = vmatpush3.bf16.msra.mxu1 %v8301_v27  ;;  %7491 = vmatprep.subr.bf16.mxu0 %v8302_v28  ;;  %v6752_v27 = vcombine.low %v78_v24, %v114_v25  ;;  %v6753_v28 = vcombine.high %v78_v24, %v114_v25  ;;  %v8402_v24 = vld [vmem:[#allocation2 + $0x558] sm:$0xff]  }
  0x7f   :  { %7513 = vmatprep.subr.bf16.mxu1 %v8303_v29  ;;  %v115_v29 = vld [vmem:[%s9449_s0 + $0x158] sm:$0xff] }
  0x80   :  { %v8403_v25 = vld [vmem:[#allocation2 + $0x5d8] sm:$0xff]  }
  0x81   :  { %7492 = vmatpush3.bf16.msra.mxu0 %v8304_v30  ;;  %v6754_v30 = vcombine.low %v79_v26, %v115_v29 }
  0x82   :  { %7514 = vmatpush3.bf16.msra.mxu1 %v8305_v31  ;;  %7493 = vmatprep.subr.bf16.mxu0 %v8306_v32  ;;  %v6755_v31 = vcombine.high %v79_v26, %v115_v29  ;;  %v8354_v32 = vld [vmem:[#allocation2 + $0x478] sm:$0xff]   ;;  %v8407_v29 = vld [vmem:[#allocation2 + $0x5d0] sm:$0xff]  }
  0x83   :  { %7515 = vmatprep.subr.bf16.mxu1 %v8307_v33  ;;  %v8355_v33 = vld [vmem:[#allocation2 + $0x4f8] sm:$0xff]  }
  0x84   :  { %v8404_v26 = vld [vmem:[#allocation2 + $0x518] sm:$0xff]  }
  0x85   :  { %7494 = vmatpush3.bf16.msra.mxu0 %v8308_v34  ;;  %v8356_v34 = vld [vmem:[#allocation2 + $0x438] sm:$0xff]  }
  0x86   :  { %7516 = vmatpush3.bf16.msra.mxu1 %v8309_v35  ;;  %7495 = vmatprep.subr.bf16.mxu0 %v8310_v36  ;;  %v8357_v35 = vld [vmem:[#allocation2 + $0x4b8] sm:$0xff]   ;;  %v8358_v36 = vld [vmem:[#allocation2 + $0x470] sm:$0xff]  }
  0x87   :  { %7517 = vmatprep.subr.bf16.mxu1 %v8311_v37  ;;  %v8359_v37 = vld [vmem:[#allocation2 + $0x4f0] sm:$0xff]  }
  0x89   :  { %7496 = vmatpush3.bf16.msra.mxu0 %v8312_v38  ;;  %v8360_v38 = vld [vmem:[#allocation2 + $0x430] sm:$0xff]  }
  0x8a   :  { %7518 = vmatpush3.bf16.msra.mxu1 %v8313_v39  ;;  %7497 = vmatprep.subr.bf16.mxu0 %v8314_v40  ;;  %v8361_v39 = vld [vmem:[#allocation2 + $0x4b0] sm:$0xff]   ;;  %v8362_v40 = vld [vmem:[#allocation2 + $0x468] sm:$0xff]  }
  0x8b   :  { %7519 = vmatprep.subr.bf16.mxu1 %v8315_v41  ;;  %v8363_v41 = vld [vmem:[#allocation2 + $0x4e8] sm:$0xff]  }
  0x8d   :  { %7498 = vmatpush3.bf16.msra.mxu0 %v8316_v42  ;;  %v8364_v42 = vld [vmem:[#allocation2 + $0x428] sm:$0xff]  }
  0x8e   :  { %7520 = vmatpush3.bf16.msra.mxu1 %v8317_v43  ;;  %7499 = vmatprep.subr.bf16.mxu0 %v8318_v44  ;;  %v8365_v43 = vld [vmem:[#allocation2 + $0x4a8] sm:$0xff]   ;;  %v8366_v44 = vld [vmem:[#allocation2 + $0x460] sm:$0xff]  }
  0x8f   :  { %7521 = vmatprep.subr.bf16.mxu1 %v8319_v45  ;;  %v8367_v45 = vld [vmem:[#allocation2 + $0x4e0] sm:$0xff]  }
  0x91   :  { %7500 = vmatpush3.bf16.msra.mxu0 %v8320_v46  ;;  %v8368_v46 = vld [vmem:[#allocation2 + $0x420] sm:$0xff]  }
  0x92   :  { %7522 = vmatpush3.bf16.msra.mxu1 %v8321_v47  ;;  %7529 = vmatprep.subr.bf16.mxu0 %v8322_v56  ;;  %v8369_v47 = vld [vmem:[#allocation2 + $0x4a0] sm:$0xff]   ;;  %v8378_v56 = vld [vmem:[#allocation2 + $0x448] sm:$0xff]  }
  0x93   :  { %7551 = vmatprep.subr.bf16.mxu1 %v8323_v57  ;;  %v8379_v57 = vld [vmem:[#allocation2 + $0x4c8] sm:$0xff]  }
  0x94   :  { %5316 = vmatmul.mubr.bf16.vlgmr.msra.gmra.mxu0 %v6748_v52  ;;  %v8374_v52 = vld [vmem:[#allocation2 + $0x450] sm:$0xff]  }
  0x95   :  { %5357 = vmatmul.mubr.bf16.vlgmr.msra.gmra.mxu1 %v6750_v54  ;;  %7530 = vmatpush3.bf16.msra.mxu0 %v8324_v58  ;;  %v8376_v54 = vld [vmem:[#allocation2 + $0x410] sm:$0xff]   ;;  %v8380_v58 = vld [vmem:[#allocation2 + $0x408] sm:$0xff]  }
  0x96   :  { %7552 = vmatpush3.bf16.msra.mxu1 %v8325_v59  ;;  %7531 = vmatprep.subr.bf16.mxu0 %v8326_v60  ;;  %v8381_v59 = vld [vmem:[#allocation2 + $0x488] sm:$0xff]   ;;  %v8382_v60 = vld [vmem:[#allocation2 + $0x440] sm:$0xff]  }
  0x97   :  { %7553 = vmatprep.subr.bf16.mxu1 %v8327_v61  ;;  %5397 = vmatprep.mubr.bf16.mxu0 %v6753_v28  ;;  %v8383_v61 = vld [vmem:[#allocation2 + $0x4c0] sm:$0xff]   ;;  %v8406_v28 = vld [vmem:[#allocation2 + $0x550] sm:$0xff]  }
  0x98   :  { %5438 = vmatprep.mubr.bf16.mxu1 %v6755_v31  ;;  %v8409_v31 = vld [vmem:[#allocation2 + $0x590] sm:$0xff]  }
  0x99   :  { %7532 = vmatpush3.bf16.msra.mxu0 %v8328_v62  ;;  %v8384_v62 = vld [vmem:[#allocation2 + $0x400] sm:$0xff]  }
  0x9a   :  { %7554 = vmatpush3.bf16.msra.mxu1 %v8329_v63  ;;  %7533 = vmatprep.subr.bf16.mxu0 %v8330_v0  ;;  %v8385_v63 = vld [vmem:[#allocation2 + $0x480] sm:$0xff]  }
  0x9b   :  { %7555 = vmatprep.subr.bf16.mxu1 %v8331_v1  ;;  %v80_v0 = vld [vmem:[%s9449_s0 + $0x40] sm:$0xff] }
  0x9c   :  { %v116_v1 = vld [vmem:[%s9449_s0 + $0x160] sm:$0xff] }
  0x9d   :  { %7534 = vmatpush3.bf16.msra.mxu0 %v8332_v2  ;;  %v6756_v2 = vcombine.low %v80_v0, %v116_v1 }
  0x9e   :  { %7556 = vmatpush3.bf16.msra.mxu1 %v8333_v3  ;;  %7535 = vmatprep.subr.bf16.mxu0 %v8334_v4  ;;  %v6757_v3 = vcombine.high %v80_v0, %v116_v1  ;;  %v81_v4 = vld [vmem:[%s9449_s0 + $0x48] sm:$0xff]  ;;  %v8434_v0 = vld [vmem:[#allocation2 + $0x658] sm:$0xff]  }
  0x9f   :  { %7557 = vmatprep.subr.bf16.mxu1 %v8335_v5  ;;  %v117_v5 = vld [vmem:[%s9449_s0 + $0x168] sm:$0xff]  ;;  %v8435_v1 = vld [vmem:[#allocation2 + $0x6d8] sm:$0xff]  }
  0xa1   :  { %7536 = vmatpush3.bf16.msra.mxu0 %v8336_v6  ;;  %v6758_v6 = vcombine.low %v81_v4, %v117_v5 }
  0xa2   :  { %7558 = vmatpush3.bf16.msra.mxu1 %v8337_v7  ;;  %7537 = vmatprep.subr.bf16.mxu0 %v8338_v8  ;;  %v6759_v7 = vcombine.high %v81_v4, %v117_v5  ;;  %v8386_v8 = vld [vmem:[#allocation2 + $0x578] sm:$0xff]   ;;  %v8438_v4 = vld [vmem:[#allocation2 + $0x650] sm:$0xff]  }
  0xa3   :  { %7559 = vmatprep.subr.bf16.mxu1 %v8339_v9  ;;  %v8387_v9 = vld [vmem:[#allocation2 + $0x5f8] sm:$0xff]   ;;  %v8439_v5 = vld [vmem:[#allocation2 + $0x6d0] sm:$0xff]  }
  0xa5   :  { %7538 = vmatpush3.bf16.msra.mxu0 %v8340_v10  ;;  %v8388_v10 = vld [vmem:[#allocation2 + $0x538] sm:$0xff]  }
  0xa6   :  { %7560 = vmatpush3.bf16.msra.mxu1 %v8341_v11  ;;  %7539 = vmatprep.subr.bf16.mxu0 %v8342_v12  ;;  %v8389_v11 = vld [vmem:[#allocation2 + $0x5b8] sm:$0xff]   ;;  %v8390_v12 = vld [vmem:[#allocation2 + $0x570] sm:$0xff]  }
  0xa7   :  { %7561 = vmatprep.subr.bf16.mxu1 %v8343_v13  ;;  %v8391_v13 = vld [vmem:[#allocation2 + $0x5f0] sm:$0xff]  }
  0xa9   :  { %7540 = vmatpush3.bf16.msra.mxu0 %v8344_v14  ;;  %v8392_v14 = vld [vmem:[#allocation2 + $0x530] sm:$0xff]  }
  0xaa   :  { %7562 = vmatpush3.bf16.msra.mxu1 %v8345_v15  ;;  %7541 = vmatprep.subr.bf16.mxu0 %v8346_v16  ;;  %v8393_v15 = vld [vmem:[#allocation2 + $0x5b0] sm:$0xff]   ;;  %v8394_v16 = vld [vmem:[#allocation2 + $0x568] sm:$0xff]  }
  0xab   :  { %7563 = vmatprep.subr.bf16.mxu1 %v8347_v17  ;;  %v8395_v17 = vld [vmem:[#allocation2 + $0x5e8] sm:$0xff]  }
  0xad   :  { %7542 = vmatpush3.bf16.msra.mxu0 %v8348_v18  ;;  %v8396_v18 = vld [vmem:[#allocation2 + $0x528] sm:$0xff]  }
  0xae   :  { %7564 = vmatpush3.bf16.msra.mxu1 %v8349_v19  ;;  %7543 = vmatprep.subr.bf16.mxu0 %v8350_v20  ;;  %v8397_v19 = vld [vmem:[#allocation2 + $0x5a8] sm:$0xff]   ;;  %v8398_v20 = vld [vmem:[#allocation2 + $0x560] sm:$0xff]  }
  0xaf   :  { %7565 = vmatprep.subr.bf16.mxu1 %v8351_v21  ;;  %v8399_v21 = vld [vmem:[#allocation2 + $0x5e0] sm:$0xff]  }
  0xb1   :  { %7544 = vmatpush3.bf16.msra.mxu0 %v8352_v22  ;;  %v8400_v22 = vld [vmem:[#allocation2 + $0x520] sm:$0xff]  }
  0xb2   :  { %7566 = vmatpush3.bf16.msra.mxu1 %v8353_v23  ;;  %7573 = vmatprep.subr.bf16.mxu0 %v8354_v32  ;;  %v8401_v23 = vld [vmem:[#allocation2 + $0x5a0] sm:$0xff]   ;;  %v8410_v32 = vld [vmem:[#allocation2 + $0x548] sm:$0xff]  }
  0xb3   :  { %7595 = vmatprep.subr.bf16.mxu1 %v8355_v33  ;;  %v8411_v33 = vld [vmem:[#allocation2 + $0x5c8] sm:$0xff]  }
  0xb4   :  { %5398 = vmatmul.mubr.bf16.vlgmr.msra.gmra.mxu0 %v6752_v27  ;;  %v8405_v27 = vld [vmem:[#allocation2 + $0x598] sm:$0xff]  }
  0xb5   :  { %5439 = vmatmul.mubr.bf16.vlgmr.msra.gmra.mxu1 %v6754_v30  ;;  %7574 = vmatpush3.bf16.msra.mxu0 %v8356_v34  ;;  %v8408_v30 = vld [vmem:[#allocation2 + $0x510] sm:$0xff]   ;;  %v8412_v34 = vld [vmem:[#allocation2 + $0x508] sm:$0xff]  }
  0xb6   :  { %7596 = vmatpush3.bf16.msra.mxu1 %v8357_v35  ;;  %7575 = vmatprep.subr.bf16.mxu0 %v8358_v36  ;;  %v8413_v35 = vld [vmem:[#allocation2 + $0x588] sm:$0xff]   ;;  %v8414_v36 = vld [vmem:[#allocation2 + $0x540] sm:$0xff]  }
  0xb7   :  { %7597 = vmatprep.subr.bf16.mxu1 %v8359_v37  ;;  %5479 = vmatprep.mubr.bf16.mxu0 %v6757_v3  ;;  %v8415_v37 = vld [vmem:[#allocation2 + $0x5c0] sm:$0xff]   ;;  %v8437_v3 = vld [vmem:[#allocation2 + $0x698] sm:$0xff]  }
  0xb8   :  { %5520 = vmatprep.mubr.bf16.mxu1 %v6759_v7  ;;  %v8441_v7 = vld [vmem:[#allocation2 + $0x690] sm:$0xff]  }
  0xb9   :  { %7576 = vmatpush3.bf16.msra.mxu0 %v8360_v38  ;;  %v8416_v38 = vld [vmem:[#allocation2 + $0x500] sm:$0xff]  }
  0xba   :  { %7598 = vmatpush3.bf16.msra.mxu1 %v8361_v39  ;;  %7577 = vmatprep.subr.bf16.mxu0 %v8362_v40  ;;  %v8417_v39 = vld [vmem:[#allocation2 + $0x580] sm:$0xff]   ;;  %v82_v40 = vld [vmem:[%s9449_s0 + $0x50] sm:$0xff] }
  0xbb   :  { %7599 = vmatprep.subr.bf16.mxu1 %v8363_v41  ;;  %v118_v41 = vld [vmem:[%s9449_s0 + $0x170] sm:$0xff] }
  0xbd   :  { %7578 = vmatpush3.bf16.msra.mxu0 %v8364_v42  ;;  %v83_v42 = vld [vmem:[%s9449_s0 + $0x58] sm:$0xff] }
  0xbe   :  { %7600 = vmatpush3.bf16.msra.mxu1 %v8365_v43  ;;  %7579 = vmatprep.subr.bf16.mxu0 %v8366_v44  ;;  %v119_v43 = vld [vmem:[%s9449_s0 + $0x178] sm:$0xff]  ;;  %v6760_v44 = vcombine.low %v82_v40, %v118_v41 }
  0xbf   :  { %7601 = vmatprep.subr.bf16.mxu1 %v8367_v45  ;;  %v6761_v45 = vcombine.high %v82_v40, %v118_v41  ;;  %v6739_v40 = vld [vmem:[#allocation4] ss:$0 sm:$0xff] }
  0xc1   :  { %7580 = vmatpush3.bf16.msra.mxu0 %v8368_v46  ;;  %v6762_v46 = vcombine.low %v83_v42, %v119_v43 }
  0xc2   :  { %7602 = vmatpush3.bf16.msra.mxu1 %v8369_v47  ;;  %7581 = vmatprep.subr.bf16.mxu0 %v8370_v48  ;;  %v6763_v47 = vcombine.high %v83_v42, %v119_v43  ;;  %v8418_v48 = vld [vmem:[#allocation2 + $0x678] sm:$0xff]   ;;  %v8454_v42 = vld [vmem:[#allocation2 + $0x770] sm:$0xff]  }
  0xc3   :  { %7603 = vmatprep.subr.bf16.mxu1 %v8371_v49  ;;  %v8419_v49 = vld [vmem:[#allocation2 + $0x6f8] sm:$0xff]  }
  0xc5   :  { %7582 = vmatpush3.bf16.msra.mxu0 %v8372_v50  ;;  %v8420_v50 = vld [vmem:[#allocation2 + $0x638] sm:$0xff]  }
  0xc6   :  { %7604 = vmatpush3.bf16.msra.mxu1 %v8373_v51  ;;  %7583 = vmatprep.subr.bf16.mxu0 %v8374_v52  ;;  %v8421_v51 = vld [vmem:[#allocation2 + $0x6b8] sm:$0xff]   ;;  %v8422_v52 = vld [vmem:[#allocation2 + $0x670] sm:$0xff]  }
  0xc7   :  { %7605 = vmatprep.subr.bf16.mxu1 %v8375_v53  ;;  %v8423_v53 = vld [vmem:[#allocation2 + $0x6f0] sm:$0xff]  }
  0xc9   :  { %7584 = vmatpush3.bf16.msra.mxu0 %v8376_v54  ;;  %v8424_v54 = vld [vmem:[#allocation2 + $0x630] sm:$0xff]  }
  0xca   :  { %7606 = vmatpush3.bf16.msra.mxu1 %v8377_v55  ;;  %7585 = vmatprep.subr.bf16.mxu0 %v8378_v56  ;;  %v8425_v55 = vld [vmem:[#allocation2 + $0x6b0] sm:$0xff]   ;;  %v8426_v56 = vld [vmem:[#allocation2 + $0x668] sm:$0xff]  }
  0xcb   :  { %7607 = vmatprep.subr.bf16.mxu1 %v8379_v57  ;;  %v8427_v57 = vld [vmem:[#allocation2 + $0x6e8] sm:$0xff]  }
  0xcd   :  { %7586 = vmatpush3.bf16.msra.mxu0 %v8380_v58  ;;  %v8428_v58 = vld [vmem:[#allocation2 + $0x628] sm:$0xff]  }
  0xce   :  { %7608 = vmatpush3.bf16.msra.mxu1 %v8381_v59  ;;  %7587 = vmatprep.subr.bf16.mxu0 %v8382_v60  ;;  %v8429_v59 = vld [vmem:[#allocation2 + $0x6a8] sm:$0xff]   ;;  %v8430_v60 = vld [vmem:[#allocation2 + $0x660] sm:$0xff]  }
  0xcf   :  { %7609 = vmatprep.subr.bf16.mxu1 %v8383_v61  ;;  %v8431_v61 = vld [vmem:[#allocation2 + $0x6e0] sm:$0xff]  }
  0xd1   :  { %7588 = vmatpush3.bf16.msra.mxu0 %v8384_v62  ;;  %v8432_v62 = vld [vmem:[#allocation2 + $0x620] sm:$0xff]  }
  0xd2   :  { %7610 = vmatpush3.bf16.msra.mxu1 %v8385_v63  ;;  %7617 = vmatprep.subr.bf16.mxu0 %v8386_v8  ;;  %v8433_v63 = vld [vmem:[#allocation2 + $0x6a0] sm:$0xff]   ;;  %v8442_v8 = vld [vmem:[#allocation2 + $0x648] sm:$0xff]  }
  0xd3   :  { %7639 = vmatprep.subr.bf16.mxu1 %v8387_v9  ;;  %v8443_v9 = vld [vmem:[#allocation2 + $0x6c8] sm:$0xff]  }
  0xd4   :  { %5480 = vmatmul.mubr.bf16.vlgmr.msra.gmra.mxu0 %v6756_v2  ;;  %v8436_v2 = vld [vmem:[#allocation2 + $0x618] sm:$0xff]  }
  0xd5   :  { %5521 = vmatmul.mubr.bf16.vlgmr.msra.gmra.mxu1 %v6758_v6  ;;  %7618 = vmatpush3.bf16.msra.mxu0 %v8388_v10  ;;  %v8440_v6 = vld [vmem:[#allocation2 + $0x610] sm:$0xff]   ;;  %v8444_v10 = vld [vmem:[#allocation2 + $0x608] sm:$0xff]  }
  0xd6   :  { %7640 = vmatpush3.bf16.msra.mxu1 %v8389_v11  ;;  %7619 = vmatprep.subr.bf16.mxu0 %v8390_v12  ;;  %v8445_v11 = vld [vmem:[#allocation2 + $0x688] sm:$0xff]   ;;  %v8446_v12 = vld [vmem:[#allocation2 + $0x640] sm:$0xff]  }
  0xd7   :  { %7641 = vmatprep.subr.bf16.mxu1 %v8391_v13  ;;  %5561 = vmatprep.mubr.bf16.mxu0 %v6761_v45 }
  0xd8   :  { %5602 = vmatprep.mubr.bf16.mxu1 %v6763_v47 }
  0xd9   :  { %7620 = vmatpush3.bf16.msra.mxu0 %v8392_v14  ;;  %v8447_v14 = vld [vmem:[#allocation2 + $0x6c0] sm:$0xff]  }
  0xda   :  { %7642 = vmatpush3.bf16.msra.mxu1 %v8393_v15  ;;  %7621 = vmatprep.subr.bf16.mxu0 %v8394_v16  ;;  %v8448_v16 = vld [vmem:[#allocation2 + $0x600] sm:$0xff]  }
  0xdb   :  { %7643 = vmatprep.subr.bf16.mxu1 %v8395_v17 }
  0xdd   :  { %7622 = vmatpush3.bf16.msra.mxu0 %v8396_v18  ;;  %v8449_v18 = vld [vmem:[#allocation2 + $0x680] sm:$0xff]  }
  0xde   :  { %7644 = vmatpush3.bf16.msra.mxu1 %v8397_v19  ;;  %7623 = vmatprep.subr.bf16.mxu0 %v8398_v20 }
  0xdf   :  { %7645 = vmatprep.subr.bf16.mxu1 %v8399_v21  ;;  %v84_v21 = vld [vmem:[%s9449_s0 + $0x60] sm:$0xff] }
  0xe1   :  { %7624 = vmatpush3.bf16.msra.mxu0 %v8400_v22  ;;  %v120_v22 = vld [vmem:[%s9449_s0 + $0x180] sm:$0xff] }
  0xe2   :  { %7646 = vmatpush3.bf16.msra.mxu1 %v8401_v23  ;;  %7625 = vmatprep.subr.bf16.mxu0 %v8402_v24  ;;  %v85_v23 = vld [vmem:[%s9449_s0 + $0x68] sm:$0xff] }
  0xe3   :  { %7647 = vmatprep.subr.bf16.mxu1 %v8403_v25 }
  0xe5   :  { %7626 = vmatpush3.bf16.msra.mxu0 %v8404_v26  ;;  %v6764_v26 = vcombine.low %v84_v21, %v120_v22 }
  0xe6   :  { %7648 = vmatpush3.bf16.msra.mxu1 %v8405_v27  ;;  %7627 = vmatprep.subr.bf16.mxu0 %v8406_v28  ;;  %v6765_v27 = vcombine.high %v84_v21, %v120_v22  ;;  %v121_v28 = vld [vmem:[%s9449_s0 + $0x188] sm:$0xff] }
  0xe7   :  { %7649 = vmatprep.subr.bf16.mxu1 %v8407_v29 }
  0xe9   :  { %7628 = vmatpush3.bf16.msra.mxu0 %v8408_v30  ;;  %v6766_v30 = vcombine.low %v85_v23, %v121_v28 }
  0xea   :  { %7650 = vmatpush3.bf16.msra.mxu1 %v8409_v31  ;;  %7629 = vmatprep.subr.bf16.mxu0 %v8410_v32  ;;  %v6767_v31 = vcombine.high %v85_v23, %v121_v28  ;;  %v8450_v32 = vld [vmem:[#allocation2 + $0x778] sm:$0xff]  }
  0xeb   :  { %7651 = vmatprep.subr.bf16.mxu1 %v8411_v33  ;;  %v8483_v28 = vld [vmem:[#allocation2 + $0x8f8] sm:$0xff]  }
  0xed   :  { %7630 = vmatpush3.bf16.msra.mxu0 %v8412_v34  ;;  %v8451_v34 = vld [vmem:[#allocation2 + $0x7f8] sm:$0xff]  }
  0xee   :  { %7652 = vmatpush3.bf16.msra.mxu1 %v8413_v35  ;;  %7631 = vmatprep.subr.bf16.mxu0 %v8414_v36 }
  0xef   :  { %7653 = vmatprep.subr.bf16.mxu1 %v8415_v37  ;;  %v8452_v37 = vld [vmem:[#allocation2 + $0x738] sm:$0xff]  }
  0xf1   :  { %7632 = vmatpush3.bf16.msra.mxu0 %v8416_v38 }
  0xf2   :  { %7654 = vmatpush3.bf16.msra.mxu1 %v8417_v39  ;;  %7661 = vmatprep.subr.bf16.mxu0 %v8418_v48  ;;  %v8453_v39 = vld [vmem:[#allocation2 + $0x7b8] sm:$0xff]   ;;  %v8457_v48 = vld [vmem:[#allocation2 + $0x7b0] sm:$0xff]  }
  0xf3   :  { %7683 = vmatprep.subr.bf16.mxu1 %v8419_v49  ;;  %v8458_v49 = vld [vmem:[#allocation2 + $0x768] sm:$0xff]  }
  0xf4   :  { %5562 = vmatmul.mubr.bf16.vlgmr.msra.gmra.mxu0 %v6760_v44  ;;  %v8455_v44 = vld [vmem:[#allocation2 + $0x7f0] sm:$0xff]  }
  0xf5   :  { %5603 = vmatmul.mubr.bf16.vlgmr.msra.gmra.mxu1 %v6762_v46  ;;  %7662 = vmatpush3.bf16.msra.mxu0 %v8420_v50  ;;  %v8456_v46 = vld [vmem:[#allocation2 + $0x730] sm:$0xff]   ;;  %v8459_v50 = vld [vmem:[#allocation2 + $0x7e8] sm:$0xff]  }
  0xf6   :  { %7684 = vmatpush3.bf16.msra.mxu1 %v8421_v51  ;;  %7663 = vmatprep.subr.bf16.mxu0 %v8422_v52  ;;  %v8460_v51 = vld [vmem:[#allocation2 + $0x728] sm:$0xff]  }
  0xf7   :  { %7685 = vmatprep.subr.bf16.mxu1 %v8423_v53  ;;  %5643 = vmatprep.mubr.bf16.mxu0 %v6765_v27  ;;  %v8461_v52 = vld [vmem:[#allocation2 + $0x7a8] sm:$0xff]   ;;  %v8462_v53 = vld [vmem:[#allocation2 + $0x760] sm:$0xff]  }
  0xf8   :  { %5684 = vmatprep.mubr.bf16.mxu1 %v6767_v31 }
  0xf9   :  { %7664 = vmatpush3.bf16.msra.mxu0 %v8424_v54  ;;  %v8463_v54 = vld [vmem:[#allocation2 + $0x7e0] sm:$0xff]  }
  0xfa   :  { %7686 = vmatpush3.bf16.msra.mxu1 %v8425_v55  ;;  %7665 = vmatprep.subr.bf16.mxu0 %v8426_v56  ;;  %v8464_v55 = vld [vmem:[#allocation2 + $0x720] sm:$0xff]  }
  0xfb   :  { %7687 = vmatprep.subr.bf16.mxu1 %v8427_v57  ;;  %v8465_v56 = vld [vmem:[#allocation2 + $0x7a0] sm:$0xff]   ;;  %v8466_v57 = vld [vmem:[#allocation2 + $0x758] sm:$0xff]  }
  0xfd   :  { %7666 = vmatpush3.bf16.msra.mxu0 %v8428_v58  ;;  %v8467_v58 = vld [vmem:[#allocation2 + $0x7d8] sm:$0xff]  }
  0xfe   :  { %7688 = vmatpush3.bf16.msra.mxu1 %v8429_v59  ;;  %7667 = vmatprep.subr.bf16.mxu0 %v8430_v60  ;;  %v8468_v59 = vld [vmem:[#allocation2 + $0x718] sm:$0xff]  }
  0xff   :  { %7689 = vmatprep.subr.bf16.mxu1 %v8431_v61  ;;  %v8469_v60 = vld [vmem:[#allocation2 + $0x798] sm:$0xff]   ;;  %v8470_v61 = vld [vmem:[#allocation2 + $0x750] sm:$0xff]  }
 0x101   :  { %7668 = vmatpush3.bf16.msra.mxu0 %v8432_v62  ;;  %v8471_v62 = vld [vmem:[#allocation2 + $0x7d0] sm:$0xff]  }
 0x102   :  { %7690 = vmatpush3.bf16.msra.mxu1 %v8433_v63  ;;  %7669 = vmatprep.subr.bf16.mxu0 %v8434_v0  ;;  %v8472_v63 = vld [vmem:[#allocation2 + $0x710] sm:$0xff]  }
 0x103   :  { %7691 = vmatprep.subr.bf16.mxu1 %v8435_v1  ;;  %v8473_v0 = vld [vmem:[#allocation2 + $0x790] sm:$0xff]   ;;  %v8474_v1 = vld [vmem:[#allocation2 + $0x748] sm:$0xff]  }
 0x105   :  { %7670 = vmatpush3.bf16.msra.mxu0 %v8436_v2  ;;  %v8475_v2 = vld [vmem:[#allocation2 + $0x7c8] sm:$0xff]  }
 0x106   :  { %7692 = vmatpush3.bf16.msra.mxu1 %v8437_v3  ;;  %7671 = vmatprep.subr.bf16.mxu0 %v8438_v4  ;;  %v8476_v3 = vld [vmem:[#allocation2 + $0x708] sm:$0xff]  }
 0x107   :  { %7693 = vmatprep.subr.bf16.mxu1 %v8439_v5  ;;  %v8477_v4 = vld [vmem:[#allocation2 + $0x788] sm:$0xff]  }
 0x109   :  { %7672 = vmatpush3.bf16.msra.mxu0 %v8440_v6  ;;  %v8478_v6 = vld [vmem:[#allocation2 + $0x740] sm:$0xff]  }
 0x10a   :  { %7694 = vmatpush3.bf16.msra.mxu1 %v8441_v7  ;;  %7673 = vmatprep.subr.bf16.mxu0 %v8442_v8  ;;  %v8479_v8 = vld [vmem:[#allocation2 + $0x7c0] sm:$0xff]  }
 0x10b   :  { %7695 = vmatprep.subr.bf16.mxu1 %v8443_v9 }
 0x10d   :  { %7674 = vmatpush3.bf16.msra.mxu0 %v8444_v10  ;;  %v8480_v10 = vld [vmem:[#allocation2 + $0x700] sm:$0xff]  }
 0x10e   :  { %7696 = vmatpush3.bf16.msra.mxu1 %v8445_v11  ;;  %7675 = vmatprep.subr.bf16.mxu0 %v8446_v12 }
 0x10f   :  { %7697 = vmatprep.subr.bf16.mxu1 %v8447_v14  ;;  %v86_v14 = vld [vmem:[%s9449_s0 + $0x70] sm:$0xff] }
 0x111   :  { %7676 = vmatpush3.bf16.msra.mxu0 %v8448_v16 }
 0x112   :  { %7698 = vmatpush3.bf16.msra.mxu1 %v8449_v18  ;;  %7705 = vmatprep.subr.bf16.mxu0 %v8450_v32  ;;  %v87_v18 = vld [vmem:[%s9449_s0 + $0x78] sm:$0xff] }
 0x113   :  { %7727 = vmatprep.subr.bf16.mxu1 %v8451_v34  ;;  %v8484_v32 = vld [vmem:[#allocation2 + $0x838] sm:$0xff]  }
 0x114   :  { %v7413_v13 = vpop.f32.mrf.mxu0  ;;  %5644 = vmatmul.mubr.bf16.vlgmr.msra.gmra.mxu0 %v6764_v26  ;;  %v8482_v26 = vld [vmem:[#allocation2 + $0x878] sm:$0xff]  }
 0x115   :  { %v7435_v15 = vpop.f32.mrf.mxu1  ;;  %5685 = vmatmul.mubr.bf16.vlgmr.msra.gmra.mxu1 %v6766_v30  ;;  %7706 = vmatpush3.bf16.msra.mxu0 %v8452_v37  ;;  %v8485_v34 = vld [vmem:[#allocation2 + $0x8b8] sm:$0xff]   ;;  %v8487_v37 = vld [vmem:[#allocation2 + $0x8f0] sm:$0xff]  }
 0x116   :  { %v7414_v17 = vpop.f32.mrf.mxu0  ;;  %7728 = vmatpush3.bf16.msra.mxu1 %v8453_v39  ;;  %7707 = vmatprep.subr.bf16.mxu0 %v8454_v42  ;;  %v8488_v39 = vld [vmem:[#allocation2 + $0x830] sm:$0xff]   ;;  %v8491_v42 = vld [vmem:[#allocation2 + $0x8e8] sm:$0xff]  }
 0x117   :  { %v7415_v19 = vadd.f32 %v7414_v17, %v7413_v13  ;;  %v7436_v20 = vpop.f32.mrf.mxu1  ;;  %7729 = vmatprep.subr.bf16.mxu1 %v8455_v44  ;;  %v8481_v13 = vld [vmem:[#allocation2 + $0x780] sm:$0xff]   ;;  %v122_v17 = vld [vmem:[%s9449_s0 + $0x190] sm:$0xff]  ;;  %v8493_v44 = vld [vmem:[#allocation2 + $0x8a8] sm:$0xff]  }
 0x118   :  { %v7437_v24 = vadd.f32 %v7436_v20, %v7435_v15  ;;  %v7416_v25 = vpop.f32.mrf.mxu0  ;;  %v6768_v22 = vcombine.low %v86_v14, %v122_v17  ;;  %v6769_v23 = vcombine.high %v86_v14, %v122_v17  ;;  %v8515_v17 = vld [vmem:[#allocation2 + $0x9f8] sm:$0xff]  }
 0x119   :  { %v7438_v29 = vpop.f32.mrf.mxu1  ;;  %v5154_v41 = vadd.f32 %v7415_v19, %v6739_v40  ;;  %7708 = vmatpush3.bf16.msra.mxu0 %v8456_v46  ;;  %v123_v19 = vld [vmem:[%s9449_s0 + $0x198] sm:$0xff]  ;;  %v8495_v46 = vld [vmem:[#allocation2 + $0x8e0] sm:$0xff]  }
 0x11a   :  { %v7417_v33 = vpop.f32.mrf.mxu0  ;;  %7730 = vmatpush3.bf16.msra.mxu1 %v8457_v48  ;;  %7709 = vmatprep.subr.bf16.mxu0 %v8458_v49  ;;  %v8497_v48 = vld [vmem:[#allocation2 + $0x8a0] sm:$0xff]   ;;  %v8498_v49 = vld [vmem:[#allocation2 + $0x858] sm:$0xff]  }
 0x11b   :  { %v7418_v35 = vadd.f32 %v7417_v33, %v7416_v25  ;;  %v7439_v36 = vpop.f32.mrf.mxu1  ;;  %v9038_v45 = vadd.f32 %v7437_v24, %v5154_v41  ;;  %7731 = vmatprep.subr.bf16.mxu1 %v8459_v50  ;;  %v6770_v24 = vcombine.low %v87_v18, %v123_v19  ;;  %v6771_v25 = vcombine.high %v87_v18, %v123_v19  ;;  %v8490_v41 = vld [vmem:[#allocation2 + $0x868] sm:$0xff]   ;;  %v8499_v50 = vld [vmem:[#allocation2 + $0x8d8] sm:$0xff]  }
 0x11c   :  { %v7440_v38 = vadd.f32 %v7439_v36, %v7438_v29  ;;  %5725 = vmatprep.mubr.bf16.mxu0 %v6769_v23  ;;  %v8486_v36 = vld [vmem:[#allocation2 + $0x870] sm:$0xff]   ;;  %v8516_v19 = vld [vmem:[#allocation2 + $0x938] sm:$0xff]  }
 0x11d   :  { %v5157_v43 = vadd.f32 %v7418_v35, %v6739_v40  ;;  %7710 = vmatpush3.bf16.msra.mxu0 %v8460_v51  ;;  %5766 = vmatprep.mubr.bf16.mxu1 %v6771_v25  ;;  %v8489_v40 = vld [vmem:[#allocation2 + $0x8b0] sm:$0xff]   ;;  %v8500_v51 = vld [vmem:[#allocation2 + $0x818] sm:$0xff]   ;;  %v8522_v25 = vld [vmem:[#allocation2 + $0x968] sm:$0xff]  }
 0x11e   :  { %7732 = vmatpush3.bf16.msra.mxu1 %v8461_v52  ;;  %7711 = vmatprep.subr.bf16.mxu0 %v8462_v53  ;;  %v8501_v52 = vld [vmem:[#allocation2 + $0x898] sm:$0xff]   ;;  %v8502_v53 = vld [vmem:[#allocation2 + $0x850] sm:$0xff]  }
 0x11f   :  { %v9040_v47 = vadd.f32 %v7440_v38, %v5157_v43  ;;  %7733 = vmatprep.subr.bf16.mxu1 %v8463_v54  ;;  %v8492_v43 = vld [vmem:[#allocation2 + $0x828] sm:$0xff]   ;;  %v8503_v54 = vld [vmem:[#allocation2 + $0x8d0] sm:$0xff]  }
 0x120   :  { %v8520_v23 = vld [vmem:[#allocation2 + $0x930] sm:$0xff]  }
 0x121   :  { %7712 = vmatpush3.bf16.msra.mxu0 %v8464_v55  ;;  %v8504_v55 = vld [vmem:[#allocation2 + $0x810] sm:$0xff]  }
 0x122   :  { %7734 = vmatpush3.bf16.msra.mxu1 %v8465_v56  ;;  %7713 = vmatprep.subr.bf16.mxu0 %v8466_v57  ;;  %v8505_v56 = vld [vmem:[#allocation2 + $0x890] sm:$0xff]   ;;  %v8506_v57 = vld [vmem:[#allocation2 + $0x848] sm:$0xff]  }
 0x123   :  { %7735 = vmatprep.subr.bf16.mxu1 %v8467_v58  ;;  %v8507_v58 = vld [vmem:[#allocation2 + $0x8c8] sm:$0xff]  }
 0x125   :  { %7714 = vmatpush3.bf16.msra.mxu0 %v8468_v59  ;;  %v8508_v59 = vld [vmem:[#allocation2 + $0x808] sm:$0xff]  }
 0x126   :  { %7736 = vmatpush3.bf16.msra.mxu1 %v8469_v60  ;;  %7715 = vmatprep.subr.bf16.mxu0 %v8470_v61  ;;  %v8509_v60 = vld [vmem:[#allocation2 + $0x888] sm:$0xff]   ;;  %v8510_v61 = vld [vmem:[#allocation2 + $0x840] sm:$0xff]  }
 0x127   :  { %7737 = vmatprep.subr.bf16.mxu1 %v8471_v62 }
 0x129   :  { %7716 = vmatpush3.bf16.msra.mxu0 %v8472_v63 }
 0x12a   :  { %7738 = vmatpush3.bf16.msra.mxu1 %v8473_v0  ;;  %7717 = vmatprep.subr.bf16.mxu0 %v8474_v1  ;;  %v8511_v0 = vld [vmem:[#allocation2 + $0x8c0] sm:$0xff]  }
 0x12b   :  { %7739 = vmatprep.subr.bf16.mxu1 %v8475_v2  ;;  %v8512_v1 = vld [vmem:[#allocation2 + $0x800] sm:$0xff]  }
 0x12d   :  { %7718 = vmatpush3.bf16.msra.mxu0 %v8476_v3 }
 0x12e   :  { %7740 = vmatpush3.bf16.msra.mxu1 %v8477_v4  ;;  %7719 = vmatprep.subr.bf16.mxu0 %v8478_v6  ;;  %v8513_v4 = vld [vmem:[#allocation2 + $0x880] sm:$0xff]  }
 0x12f   :  { %7741 = vmatprep.subr.bf16.mxu1 %v8479_v8  ;;  %v124_v8 = vld [vmem:[%s9449_s0 + $0x1a0] sm:$0xff] }
 0x131   :  { %7720 = vmatpush3.bf16.msra.mxu0 %v8480_v10 }
 0x132   :  { %7742 = vmatpush3.bf16.msra.mxu1 %v8481_v13  ;;  %7749 = vmatprep.subr.bf16.mxu0 %v8482_v26  ;;  %v8523_v26 = vld [vmem:[#allocation2 + $0x9e8] sm:$0xff]  }
 0x133   :  { %7771 = vmatprep.subr.bf16.mxu1 %v8483_v28  ;;  %v8525_v28 = vld [vmem:[#allocation2 + $0x9a8] sm:$0xff]  }
 0x134   :  { %v7457_v5 = vpop.f32.mrf.mxu0  ;;  %5726 = vmatmul.mubr.bf16.vlgmr.msra.gmra.mxu0 %v6768_v22  ;;  %v8519_v22 = vld [vmem:[#allocation2 + $0x9f0] sm:$0xff]  }
 0x135   :  { %v7479_v7 = vpop.f32.mrf.mxu1  ;;  %5767 = vmatmul.mubr.bf16.vlgmr.msra.gmra.mxu1 %v6770_v24  ;;  %7750 = vmatpush3.bf16.msra.mxu0 %v8484_v32  ;;  %v8521_v24 = vld [vmem:[#allocation2 + $0x9b0] sm:$0xff]   ;;  %v8529_v32 = vld [vmem:[#allocation2 + $0x9a0] sm:$0xff]  }
 0x136   :  { %v7458_v9 = vpop.f32.mrf.mxu0  ;;  %7772 = vmatpush3.bf16.msra.mxu1 %v8485_v34  ;;  %7751 = vmatprep.subr.bf16.mxu0 %v8486_v36  ;;  %v8531_v34 = vld [vmem:[#allocation2 + $0x9d8] sm:$0xff]  }
 0x137   :  { %v7459_v11 = vadd.f32 %v7458_v9, %v7457_v5  ;;  %v7480_v12 = vpop.f32.mrf.mxu1  ;;  %7773 = vmatprep.subr.bf16.mxu1 %v8487_v37  ;;  %v89_v9 = vld [vmem:[%s9449_s0 + $0x88] sm:$0xff]  ;;  %v8533_v36 = vld [vmem:[#allocation2 + $0x998] sm:$0xff]   ;;  %v8534_v37 = vld [vmem:[#allocation2 + $0x950] sm:$0xff]  }
 0x138   :  { %v7481_v15 = vadd.f32 %v7480_v12, %v7479_v7  ;;  %v7460_v16 = vpop.f32.mrf.mxu0  ;;  %v88_v7 = vld [vmem:[%s9449_s0 + $0x80] sm:$0xff]  ;;  %v125_v12 = vld [vmem:[%s9449_s0 + $0x1a8] sm:$0xff] }
 0x139   :  { %v5236_v20 = vadd.f32 %v7459_v11, %v9038_v45  ;;  %v7482_v21 = vpop.f32.mrf.mxu1  ;;  %7752 = vmatpush3.bf16.msra.mxu0 %v8488_v39  ;;  %v8494_v45 = vld [vmem:[#allocation2 + $0x860] sm:$0xff]   ;;  %v6772_v10 = vcombine.low %v88_v7, %v124_v8  ;;  %v6773_v11 = vcombine.high %v88_v7, %v124_v8  ;;  %v6774_v14 = vcombine.low %v89_v9, %v125_v12  ;;  %v8535_v39 = vld [vmem:[#allocation2 + $0x9d0] sm:$0xff]  }
 0x13a   :  { %v7461_v27 = vpop.f32.mrf.mxu0  ;;  %7774 = vmatpush3.bf16.msra.mxu1 %v8489_v40  ;;  %7753 = vmatprep.subr.bf16.mxu0 %v8490_v41  ;;  %v8536_v40 = vld [vmem:[#allocation2 + $0x910] sm:$0xff]   ;;  %v8559_v7 = vld [vmem:[#allocation2 + $0xae0] sm:$0xff]  }
 0x13b   :  { %v9055_v29 = vadd.f32 %v7481_v15, %v5236_v20  ;;  %v7462_v30 = vadd.f32 %v7461_v27, %v7460_v16  ;;  %v7483_v31 = vpop.f32.mrf.mxu1  ;;  %7775 = vmatprep.subr.bf16.mxu1 %v8491_v42  ;;  %v6775_v15 = vcombine.high %v89_v9, %v125_v12  ;;  %v8514_v16 = vld [vmem:[#allocation2 + $0x978] sm:$0xff]   ;;  %5807 = vmatprep.mubr.bf16.mxu0 %v6773_v11  ;;  %v8524_v27 = vld [vmem:[#allocation2 + $0x928] sm:$0xff]   ;;  %v8537_v41 = vld [vmem:[#allocation2 + $0x990] sm:$0xff]  }
 0x13c   :  { %v7484_v33 = vadd.f32 %v7483_v31, %v7482_v21  ;;  %v8517_v20 = vld [vmem:[#allocation2 + $0x9b8] sm:$0xff]   ;;  %v8518_v21 = vld [vmem:[#allocation2 + $0x970] sm:$0xff]   ;;  %v8528_v31 = vld [vmem:[#allocation2 + $0x920] sm:$0xff]  }
 0x13d   :  { %v5239_v35 = vadd.f32 %v7462_v30, %v9040_v47  ;;  %7754 = vmatpush3.bf16.msra.mxu0 %v8492_v43  ;;  %v8496_v47 = vld [vmem:[#allocation2 + $0x820] sm:$0xff]   ;;  %5848 = vmatprep.mubr.bf16.mxu1 %v6775_v15  ;;  %v8538_v42 = vld [vmem:[#allocation2 + $0x948] sm:$0xff]   ;;  %v8563_v11 = vld [vmem:[#allocation2 + $0xad8] sm:$0xff]  }
 0x13e   :  { %7776 = vmatpush3.bf16.msra.mxu1 %v8493_v44  ;;  %7755 = vmatprep.subr.bf16.mxu0 %v8494_v45  ;;  %v8527_v30 = vld [vmem:[#allocation2 + $0x9e0] sm:$0xff]   ;;  %v8539_v43 = vld [vmem:[#allocation2 + $0x9c8] sm:$0xff]   ;;  %v8564_v12 = vld [vmem:[#allocation2 + $0xa18] sm:$0xff]  }
 0x13f   :  { %v9058_v38 = vadd.f32 %v7484_v33, %v5239_v35  ;;  %7777 = vmatprep.subr.bf16.mxu1 %v8495_v46  ;;  %v8530_v33 = vld [vmem:[#allocation2 + $0x958] sm:$0xff]   ;;  %v8540_v44 = vld [vmem:[#allocation2 + $0x908] sm:$0xff]   ;;  %v8542_v46 = vld [vmem:[#allocation2 + $0x940] sm:$0xff]  }
 0x140   :  { %v8532_v35 = vld [vmem:[#allocation2 + $0x918] sm:$0xff]   ;;  %v8541_v45 = vld [vmem:[#allocation2 + $0x988] sm:$0xff]   ;;  %v8560_v8 = vld [vmem:[#allocation2 + $0xa20] sm:$0xff]  }
 0x141   :  { %7756 = vmatpush3.bf16.msra.mxu0 %v8496_v47  ;;  %v8543_v47 = vld [vmem:[#allocation2 + $0x9c0] sm:$0xff]   ;;  %v8567_v15 = vld [vmem:[#allocation2 + $0xad0] sm:$0xff]  }
 0x142   :  { %7778 = vmatpush3.bf16.msra.mxu1 %v8497_v48  ;;  %7757 = vmatprep.subr.bf16.mxu0 %v8498_v49  ;;  %v8544_v48 = vld [vmem:[#allocation2 + $0x900] sm:$0xff]  }
 0x143   :  { %7779 = vmatprep.subr.bf16.mxu1 %v8499_v50  ;;  %v8545_v49 = vld [vmem:[#allocation2 + $0x980] sm:$0xff]   ;;  %v90_v50 = vld [vmem:[%s9449_s0 + $0x90] sm:$0xff] }
 0x144   :  { %v8561_v9 = vld [vmem:[#allocation2 + $0xaa0] sm:$0xff]  }
 0x145   :  { %7758 = vmatpush3.bf16.msra.mxu0 %v8500_v51  ;;  %v126_v51 = vld [vmem:[%s9449_s0 + $0x1b0] sm:$0xff] }
 0x146   :  { %7780 = vmatpush3.bf16.msra.mxu1 %v8501_v52  ;;  %7759 = vmatprep.subr.bf16.mxu0 %v8502_v53  ;;  %v6776_v52 = vcombine.low %v90_v50, %v126_v51  ;;  %v6777_v53 = vcombine.high %v90_v50, %v126_v51  ;;  %v8592_v50 = vld [vmem:[#allocation2 + $0xb20] sm:$0xff]  }
 0x147   :  { %7781 = vmatprep.subr.bf16.mxu1 %v8503_v54  ;;  %v91_v54 = vld [vmem:[%s9449_s0 + $0x98] sm:$0xff]  ;;  %v8593_v51 = vld [vmem:[#allocation2 + $0xba0] sm:$0xff]  }
 0x149   :  { %7760 = vmatpush3.bf16.msra.mxu0 %v8504_v55  ;;  %v127_v55 = vld [vmem:[%s9449_s0 + $0x1b8] sm:$0xff] }
 0x14a   :  { %7782 = vmatpush3.bf16.msra.mxu1 %v8505_v56  ;;  %7761 = vmatprep.subr.bf16.mxu0 %v8506_v57  ;;  %v6778_v56 = vcombine.low %v91_v54, %v127_v55  ;;  %v6779_v57 = vcombine.high %v91_v54, %v127_v55  ;;  %v8596_v54 = vld [vmem:[#allocation2 + $0xb18] sm:$0xff]  }
 0x14b   :  { %7783 = vmatprep.subr.bf16.mxu1 %v8507_v58  ;;  %v8546_v58 = vld [vmem:[#allocation2 + $0xa78] sm:$0xff]  }
 0x14c   :  { %v8597_v55 = vld [vmem:[#allocation2 + $0xb98] sm:$0xff]  }
 0x14d   :  { %7762 = vmatpush3.bf16.msra.mxu0 %v8508_v59  ;;  %v8547_v59 = vld [vmem:[#allocation2 + $0xaf8] sm:$0xff]  }
 0x14e   :  { %7784 = vmatpush3.bf16.msra.mxu1 %v8509_v60  ;;  %7763 = vmatprep.subr.bf16.mxu0 %v8510_v61  ;;  %v8548_v60 = vld [vmem:[#allocation2 + $0xa38] sm:$0xff]  }
 0x14f   :  { %7785 = vmatprep.subr.bf16.mxu1 %v8511_v0  ;;  %v8549_v61 = vld [vmem:[#allocation2 + $0xab8] sm:$0xff]   ;;  %v8552_v0 = vld [vmem:[#allocation2 + $0xa30] sm:$0xff]  }
 0x151   :  { %7764 = vmatpush3.bf16.msra.mxu0 %v8512_v1  ;;  %v8553_v1 = vld [vmem:[#allocation2 + $0xab0] sm:$0xff]  }
 0x152   :  { %7786 = vmatpush3.bf16.msra.mxu1 %v8513_v4  ;;  %7793 = vmatprep.subr.bf16.mxu0 %v8514_v16  ;;  %v8556_v4 = vld [vmem:[#allocation2 + $0xa28] sm:$0xff]   ;;  %v8568_v16 = vld [vmem:[#allocation2 + $0xa10] sm:$0xff]  }
 0x153   :  { %7815 = vmatprep.subr.bf16.mxu1 %v8515_v17  ;;  %v8569_v17 = vld [vmem:[#allocation2 + $0xa90] sm:$0xff]  }
 0x154   :  { %v7501_v62 = vpop.f32.mrf.mxu0  ;;  %5808 = vmatmul.mubr.bf16.vlgmr.msra.gmra.mxu0 %v6772_v10  ;;  %v8562_v10 = vld [vmem:[#allocation2 + $0xa58] sm:$0xff]  }
 0x155   :  { %v7523_v63 = vpop.f32.mrf.mxu1  ;;  %5849 = vmatmul.mubr.bf16.vlgmr.msra.gmra.mxu1 %v6774_v14  ;;  %7794 = vmatpush3.bf16.msra.mxu0 %v8516_v19  ;;  %v8566_v14 = vld [vmem:[#allocation2 + $0xa50] sm:$0xff]   ;;  %v8570_v19 = vld [vmem:[#allocation2 + $0xa48] sm:$0xff]  }
 0x156   :  { %v7502_v2 = vpop.f32.mrf.mxu0  ;;  %7816 = vmatpush3.bf16.msra.mxu1 %v8517_v20  ;;  %7795 = vmatprep.subr.bf16.mxu0 %v8518_v21  ;;  %v8571_v20 = vld [vmem:[#allocation2 + $0xac8] sm:$0xff]  }
 0x157   :  { %v7524_v3 = vpop.f32.mrf.mxu1  ;;  %v7503_v5 = vadd.f32 %v7502_v2, %v7501_v62  ;;  %7817 = vmatprep.subr.bf16.mxu1 %v8519_v22  ;;  %5889 = vmatprep.mubr.bf16.mxu0 %v6777_v53  ;;  %v8550_v62 = vld [vmem:[#allocation2 + $0xa70] sm:$0xff]   ;;  %v8554_v2 = vld [vmem:[#allocation2 + $0xa68] sm:$0xff]   ;;  %v8595_v53 = vld [vmem:[#allocation2 + $0xbd8] sm:$0xff]  }
 0x158   :  { %v7525_v6 = vadd.f32 %v7524_v3, %v7523_v63  ;;  %5930 = vmatprep.mubr.bf16.mxu1 %v6779_v57  ;;  %v8551_v63 = vld [vmem:[#allocation2 + $0xaf0] sm:$0xff]   ;;  %v8555_v3 = vld [vmem:[#allocation2 + $0xae8] sm:$0xff]  }
 0x159   :  { %v5318_v13 = vadd.f32 %v7503_v5, %v9055_v29  ;;  %7796 = vmatpush3.bf16.msra.mxu0 %v8520_v23  ;;  %v8526_v29 = vld [vmem:[#allocation2 + $0x960] sm:$0xff]   ;;  %v8557_v5 = vld [vmem:[#allocation2 + $0xaa8] sm:$0xff]   ;;  %v8599_v57 = vld [vmem:[#allocation2 + $0xbd0] sm:$0xff]  }
 0x15a   :  { %7818 = vmatpush3.bf16.msra.mxu1 %v8521_v24  ;;  %7797 = vmatprep.subr.bf16.mxu0 %v8522_v25  ;;  %v8572_v21 = vld [vmem:[#allocation2 + $0xa08] sm:$0xff]   ;;  %v8574_v23 = vld [vmem:[#allocation2 + $0xa40] sm:$0xff]  }
 0x15b   :  { %v9073_v18 = vadd.f32 %v7525_v6, %v5318_v13  ;;  %7819 = vmatprep.subr.bf16.mxu1 %v8523_v26  ;;  %v8558_v6 = vld [vmem:[#allocation2 + $0xa60] sm:$0xff]   ;;  %v8565_v13 = vld [vmem:[#allocation2 + $0xa98] sm:$0xff]   ;;  %v8573_v22 = vld [vmem:[#allocation2 + $0xa88] sm:$0xff]  }
 0x15c   :  { %v8575_v24 = vld [vmem:[#allocation2 + $0xac0] sm:$0xff]  }
 0x15d   :  { %7798 = vmatpush3.bf16.msra.mxu0 %v8524_v27  ;;  %v8576_v25 = vld [vmem:[#allocation2 + $0xa00] sm:$0xff]  }
 0x15e   :  { %7820 = vmatpush3.bf16.msra.mxu1 %v8525_v28  ;;  %7799 = vmatprep.subr.bf16.mxu0 %v8526_v29  ;;  %v8577_v26 = vld [vmem:[#allocation2 + $0xa80] sm:$0xff]   ;;  %v93_v29 = vld [vmem:[%s9449_s0 + $0xa8] sm:$0xff] }
 0x15f   :  { %7821 = vmatprep.subr.bf16.mxu1 %v8527_v30  ;;  %v92_v27 = vld [vmem:[%s9449_s0 + $0xa0] sm:$0xff]  ;;  %v129_v30 = vld [vmem:[%s9449_s0 + $0x1c8] sm:$0xff] }
 0x160   :  { %v128_v28 = vld [vmem:[%s9449_s0 + $0x1c0] sm:$0xff] }
 0x161   :  { %7800 = vmatpush3.bf16.msra.mxu0 %v8528_v31  ;;  %v6780_v31 = vcombine.low %v92_v27, %v128_v28 }
 0x162   :  { %7822 = vmatpush3.bf16.msra.mxu1 %v8529_v32  ;;  %7801 = vmatprep.subr.bf16.mxu0 %v8530_v33  ;;  %v6781_v32 = vcombine.high %v92_v27, %v128_v28  ;;  %v6782_v33 = vcombine.low %v93_v29, %v129_v30  ;;  %v8624_v27 = vld [vmem:[#allocation2 + $0xc20] sm:$0xff]  }
 0x163   :  { %7823 = vmatprep.subr.bf16.mxu1 %v8531_v34  ;;  %v6783_v34 = vcombine.high %v93_v29, %v129_v30  ;;  %v8625_v28 = vld [vmem:[#allocation2 + $0xca0] sm:$0xff]   ;;  %v8626_v29 = vld [vmem:[#allocation2 + $0xc58] sm:$0xff]  }
 0x164   :  { %v8627_v30 = vld [vmem:[#allocation2 + $0xcd8] sm:$0xff]  }
 0x165   :  { %7802 = vmatpush3.bf16.msra.mxu0 %v8532_v35  ;;  %v8578_v35 = vld [vmem:[#allocation2 + $0xb78] sm:$0xff]  }
 0x166   :  { %7824 = vmatpush3.bf16.msra.mxu1 %v8533_v36  ;;  %7803 = vmatprep.subr.bf16.mxu0 %v8534_v37  ;;  %v8579_v36 = vld [vmem:[#allocation2 + $0xbf8] sm:$0xff]  }
 0x167   :  { %7825 = vmatprep.subr.bf16.mxu1 %v8535_v39  ;;  %v8580_v37 = vld [vmem:[#allocation2 + $0xb38] sm:$0xff]  }
 0x168   :  { %v8581_v39 = vld [vmem:[#allocation2 + $0xbb8] sm:$0xff]  }
 0x169   :  { %7804 = vmatpush3.bf16.msra.mxu0 %v8536_v40  ;;  %v8582_v40 = vld [vmem:[#allocation2 + $0xb70] sm:$0xff]  }
 0x16a   :  { %7826 = vmatpush3.bf16.msra.mxu1 %v8537_v41  ;;  %7805 = vmatprep.subr.bf16.mxu0 %v8538_v42  ;;  %v8583_v41 = vld [vmem:[#allocation2 + $0xbf0] sm:$0xff]  }
 0x16b   :  { %7827 = vmatprep.subr.bf16.mxu1 %v8539_v43  ;;  %v8584_v42 = vld [vmem:[#allocation2 + $0xb30] sm:$0xff]  }
 0x16c   :  { %v8585_v43 = vld [vmem:[#allocation2 + $0xbb0] sm:$0xff]  }
 0x16d   :  { %7806 = vmatpush3.bf16.msra.mxu0 %v8540_v44  ;;  %v8586_v44 = vld [vmem:[#allocation2 + $0xb68] sm:$0xff]  }
 0x16e   :  { %7828 = vmatpush3.bf16.msra.mxu1 %v8541_v45  ;;  %7807 = vmatprep.subr.bf16.mxu0 %v8542_v46  ;;  %v8587_v45 = vld [vmem:[#allocation2 + $0xbe8] sm:$0xff]  }
 0x16f   :  { %7829 = vmatprep.subr.bf16.mxu1 %v8543_v47  ;;  %v8588_v46 = vld [vmem:[#allocation2 + $0xb28] sm:$0xff]  }
 0x170   :  { %v8589_v47 = vld [vmem:[#allocation2 + $0xba8] sm:$0xff]  }
 0x171   :  { %7808 = vmatpush3.bf16.msra.mxu0 %v8544_v48  ;;  %v8590_v48 = vld [vmem:[#allocation2 + $0xb60] sm:$0xff]  }
 0x172   :  { %7830 = vmatpush3.bf16.msra.mxu1 %v8545_v49  ;;  %7837 = vmatprep.subr.bf16.mxu0 %v8546_v58  ;;  %v8591_v49 = vld [vmem:[#allocation2 + $0xbe0] sm:$0xff]   ;;  %v8600_v58 = vld [vmem:[#allocation2 + $0xb10] sm:$0xff]  }
 0x173   :  { %7859 = vmatprep.subr.bf16.mxu1 %v8547_v59  ;;  %v8601_v59 = vld [vmem:[#allocation2 + $0xb90] sm:$0xff]  }
 0x174   :  { %5890 = vmatmul.mubr.bf16.vlgmr.msra.gmra.mxu0 %v6776_v52  ;;  %v8594_v52 = vld [vmem:[#allocation2 + $0xb58] sm:$0xff]  }
 0x175   :  { %5931 = vmatmul.mubr.bf16.vlgmr.msra.gmra.mxu1 %v6778_v56  ;;  %7838 = vmatpush3.bf16.msra.mxu0 %v8548_v60  ;;  %v8598_v56 = vld [vmem:[#allocation2 + $0xb50] sm:$0xff]   ;;  %v8602_v60 = vld [vmem:[#allocation2 + $0xb48] sm:$0xff]  }
 0x176   :  { %7860 = vmatpush3.bf16.msra.mxu1 %v8549_v61  ;;  %7839 = vmatprep.subr.bf16.mxu0 %v8550_v62  ;;  %v8603_v61 = vld [vmem:[#allocation2 + $0xbc8] sm:$0xff]  }
 0x177   :  { %7861 = vmatprep.subr.bf16.mxu1 %v8551_v63  ;;  %5971 = vmatprep.mubr.bf16.mxu0 %v6781_v32  ;;  %v8604_v62 = vld [vmem:[#allocation2 + $0xb08] sm:$0xff]   ;;  %v8629_v32 = vld [vmem:[#allocation2 + $0xc98] sm:$0xff]  }
 0x178   :  { %6012 = vmatprep.mubr.bf16.mxu1 %v6783_v34  ;;  %v8605_v63 = vld [vmem:[#allocation2 + $0xb88] sm:$0xff]   ;;  %v8631_v34 = vld [vmem:[#allocation2 + $0xcd0] sm:$0xff]  }
 0x179   :  { %7840 = vmatpush3.bf16.msra.mxu0 %v8552_v0  ;;  %v8606_v0 = vld [vmem:[#allocation2 + $0xb40] sm:$0xff]  }
 0x17a   :  { %7862 = vmatpush3.bf16.msra.mxu1 %v8553_v1  ;;  %7841 = vmatprep.subr.bf16.mxu0 %v8554_v2  ;;  %v8607_v1 = vld [vmem:[#allocation2 + $0xbc0] sm:$0xff]  }
 0x17b   :  { %7863 = vmatprep.subr.bf16.mxu1 %v8555_v3  ;;  %v8608_v2 = vld [vmem:[#allocation2 + $0xb00] sm:$0xff]  }
 0x17c   :  { %v8609_v3 = vld [vmem:[#allocation2 + $0xb80] sm:$0xff]  }
 0x17d   :  { %7842 = vmatpush3.bf16.msra.mxu0 %v8556_v4  ;;  %v94_v4 = vld [vmem:[%s9449_s0 + $0xb0] sm:$0xff] }
 0x17e   :  { %7864 = vmatpush3.bf16.msra.mxu1 %v8557_v5  ;;  %7843 = vmatprep.subr.bf16.mxu0 %v8558_v6  ;;  %v130_v5 = vld [vmem:[%s9449_s0 + $0x1d0] sm:$0xff]  ;;  %v95_v6 = vld [vmem:[%s9449_s0 + $0xb8] sm:$0xff] }
 0x17f   :  { %7865 = vmatprep.subr.bf16.mxu1 %v8559_v7  ;;  %v6784_v7 = vcombine.low %v94_v4, %v130_v5 }
 0x181   :  { %7844 = vmatpush3.bf16.msra.mxu0 %v8560_v8  ;;  %v6785_v8 = vcombine.high %v94_v4, %v130_v5  ;;  %v8656_v4 = vld [vmem:[#allocation2 + $0xd20] sm:$0xff]  }
 0x182   :  { %7866 = vmatpush3.bf16.msra.mxu1 %v8561_v9  ;;  %7845 = vmatprep.subr.bf16.mxu0 %v8562_v10  ;;  %v131_v9 = vld [vmem:[%s9449_s0 + $0x1d8] sm:$0xff]  ;;  %v8657_v5 = vld [vmem:[#allocation2 + $0xda0] sm:$0xff]  }
 0x183   :  { %7867 = vmatprep.subr.bf16.mxu1 %v8563_v11  ;;  %v6786_v10 = vcombine.low %v95_v6, %v131_v9  ;;  %v6787_v11 = vcombine.high %v95_v6, %v131_v9  ;;  %v8658_v6 = vld [vmem:[#allocation2 + $0xd58] sm:$0xff]  }
 0x184   :  { %v8661_v9 = vld [vmem:[#allocation2 + $0xd98] sm:$0xff]  }
 0x185   :  { %7846 = vmatpush3.bf16.msra.mxu0 %v8564_v12  ;;  %v8610_v12 = vld [vmem:[#allocation2 + $0xc78] sm:$0xff]  }
 0x186   :  { %7868 = vmatpush3.bf16.msra.mxu1 %v8565_v13  ;;  %7847 = vmatprep.subr.bf16.mxu0 %v8566_v14  ;;  %v8611_v13 = vld [vmem:[#allocation2 + $0xcf8] sm:$0xff]  }
 0x187   :  { %7869 = vmatprep.subr.bf16.mxu1 %v8567_v15  ;;  %v8612_v14 = vld [vmem:[#allocation2 + $0xc38] sm:$0xff]  }
 0x188   :  { %v8613_v15 = vld [vmem:[#allocation2 + $0xcb8] sm:$0xff]  }
 0x189   :  { %7848 = vmatpush3.bf16.msra.mxu0 %v8568_v16  ;;  %v8614_v16 = vld [vmem:[#allocation2 + $0xc70] sm:$0xff]  }
 0x18a   :  { %7870 = vmatpush3.bf16.msra.mxu1 %v8569_v17  ;;  %7849 = vmatprep.subr.bf16.mxu0 %v8570_v19  ;;  %v8615_v17 = vld [vmem:[#allocation2 + $0xcf0] sm:$0xff]  }
 0x18b   :  { %7871 = vmatprep.subr.bf16.mxu1 %v8571_v20  ;;  %v8616_v19 = vld [vmem:[#allocation2 + $0xc30] sm:$0xff]  }
 0x18c   :  { %v8617_v20 = vld [vmem:[#allocation2 + $0xcb0] sm:$0xff]  }
 0x18d   :  { %7850 = vmatpush3.bf16.msra.mxu0 %v8572_v21  ;;  %v8618_v21 = vld [vmem:[#allocation2 + $0xc68] sm:$0xff]  }
 0x18e   :  { %7872 = vmatpush3.bf16.msra.mxu1 %v8573_v22  ;;  %7851 = vmatprep.subr.bf16.mxu0 %v8574_v23  ;;  %v8619_v22 = vld [vmem:[#allocation2 + $0xce8] sm:$0xff]  }
 0x18f   :  { %7873 = vmatprep.subr.bf16.mxu1 %v8575_v24  ;;  %v8620_v23 = vld [vmem:[#allocation2 + $0xc28] sm:$0xff]  }
 0x190   :  { %v8621_v24 = vld [vmem:[#allocation2 + $0xca8] sm:$0xff]  }
 0x191   :  { %7852 = vmatpush3.bf16.msra.mxu0 %v8576_v25  ;;  %v8622_v25 = vld [vmem:[#allocation2 + $0xc60] sm:$0xff]  }
 0x192   :  { %7874 = vmatpush3.bf16.msra.mxu1 %v8577_v26  ;;  %7881 = vmatprep.subr.bf16.mxu0 %v8578_v35  ;;  %v8623_v26 = vld [vmem:[#allocation2 + $0xce0] sm:$0xff]   ;;  %v8632_v35 = vld [vmem:[#allocation2 + $0xc10] sm:$0xff]  }
 0x193   :  { %7903 = vmatprep.subr.bf16.mxu1 %v8579_v36  ;;  %v8633_v36 = vld [vmem:[#allocation2 + $0xc90] sm:$0xff]  }
 0x194   :  { %5972 = vmatmul.mubr.bf16.vlgmr.msra.gmra.mxu0 %v6780_v31  ;;  %v8628_v31 = vld [vmem:[#allocation2 + $0xc18] sm:$0xff]  }
 0x195   :  { %6013 = vmatmul.mubr.bf16.vlgmr.msra.gmra.mxu1 %v6782_v33  ;;  %7882 = vmatpush3.bf16.msra.mxu0 %v8580_v37  ;;  %v8630_v33 = vld [vmem:[#allocation2 + $0xc50] sm:$0xff]   ;;  %v8634_v37 = vld [vmem:[#allocation2 + $0xc48] sm:$0xff]  }
 0x196   :  { %7904 = vmatpush3.bf16.msra.mxu1 %v8581_v39  ;;  %7883 = vmatprep.subr.bf16.mxu0 %v8582_v40  ;;  %v8635_v39 = vld [vmem:[#allocation2 + $0xcc8] sm:$0xff]  }
 0x197   :  { %7905 = vmatprep.subr.bf16.mxu1 %v8583_v41  ;;  %6053 = vmatprep.mubr.bf16.mxu0 %v6785_v8  ;;  %v8636_v40 = vld [vmem:[#allocation2 + $0xc08] sm:$0xff]   ;;  %v8660_v8 = vld [vmem:[#allocation2 + $0xd18] sm:$0xff]  }
 0x198   :  { %6094 = vmatprep.mubr.bf16.mxu1 %v6787_v11  ;;  %v8637_v41 = vld [vmem:[#allocation2 + $0xc88] sm:$0xff]   ;;  %v8663_v11 = vld [vmem:[#allocation2 + $0xdd0] sm:$0xff]  }
 0x199   :  { %7884 = vmatpush3.bf16.msra.mxu0 %v8584_v42  ;;  %v8638_v42 = vld [vmem:[#allocation2 + $0xc40] sm:$0xff]  }
 0x19a   :  { %7906 = vmatpush3.bf16.msra.mxu1 %v8585_v43  ;;  %7885 = vmatprep.subr.bf16.mxu0 %v8586_v44  ;;  %v8639_v43 = vld [vmem:[#allocation2 + $0xcc0] sm:$0xff]  }
 0x19b   :  { %7907 = vmatprep.subr.bf16.mxu1 %v8587_v45  ;;  %v8640_v44 = vld [vmem:[#allocation2 + $0xc00] sm:$0xff]  }
 0x19c   :  { %v8641_v45 = vld [vmem:[#allocation2 + $0xc80] sm:$0xff]  }
 0x19d   :  { %7886 = vmatpush3.bf16.msra.mxu0 %v8588_v46  ;;  %v96_v46 = vld [vmem:[%s9449_s0 + $0xc0] sm:$0xff] }
 0x19e   :  { %7908 = vmatpush3.bf16.msra.mxu1 %v8589_v47  ;;  %7887 = vmatprep.subr.bf16.mxu0 %v8590_v48  ;;  %v132_v47 = vld [vmem:[%s9449_s0 + $0x1e0] sm:$0xff] }
 0x19f   :  { %7909 = vmatprep.subr.bf16.mxu1 %v8591_v49  ;;  %v6788_v48 = vcombine.low %v96_v46, %v132_v47  ;;  %v6789_v49 = vcombine.high %v96_v46, %v132_v47  ;;  %v8688_v46 = vld [vmem:[#allocation2 + $0xe20] sm:$0xff]  }
 0x1a0   :  { %v8689_v47 = vld [vmem:[#allocation2 + $0xea0] sm:$0xff]  }
 0x1a1   :  { %7888 = vmatpush3.bf16.msra.mxu0 %v8592_v50  ;;  %v97_v50 = vld [vmem:[%s9449_s0 + $0xc8] sm:$0xff] }
 0x1a2   :  { %7910 = vmatpush3.bf16.msra.mxu1 %v8593_v51  ;;  %7889 = vmatprep.subr.bf16.mxu0 %v8594_v52  ;;  %v133_v51 = vld [vmem:[%s9449_s0 + $0x1e8] sm:$0xff] }
 0x1a3   :  { %7911 = vmatprep.subr.bf16.mxu1 %v8595_v53  ;;  %v6790_v52 = vcombine.low %v97_v50, %v133_v51  ;;  %v6791_v53 = vcombine.high %v97_v50, %v133_v51  ;;  %v8692_v50 = vld [vmem:[#allocation2 + $0xe18] sm:$0xff]  }
 0x1a4   :  { %v8693_v51 = vld [vmem:[#allocation2 + $0xe98] sm:$0xff]  }
 0x1a5   :  { %7890 = vmatpush3.bf16.msra.mxu0 %v8596_v54  ;;  %v8642_v54 = vld [vmem:[#allocation2 + $0xd78] sm:$0xff]  }
 0x1a6   :  { %7912 = vmatpush3.bf16.msra.mxu1 %v8597_v55  ;;  %7891 = vmatprep.subr.bf16.mxu0 %v8598_v56  ;;  %v8643_v55 = vld [vmem:[#allocation2 + $0xdf8] sm:$0xff]  }
 0x1a7   :  { %7913 = vmatprep.subr.bf16.mxu1 %v8599_v57  ;;  %v8644_v56 = vld [vmem:[#allocation2 + $0xd38] sm:$0xff]  }
 0x1a8   :  { %v8645_v57 = vld [vmem:[#allocation2 + $0xdb8] sm:$0xff]  }
 0x1a9   :  { %7892 = vmatpush3.bf16.msra.mxu0 %v8600_v58  ;;  %v8646_v58 = vld [vmem:[#allocation2 + $0xd70] sm:$0xff]  }
 0x1aa   :  { %7914 = vmatpush3.bf16.msra.mxu1 %v8601_v59  ;;  %7893 = vmatprep.subr.bf16.mxu0 %v8602_v60  ;;  %v8647_v59 = vld [vmem:[#allocation2 + $0xdf0] sm:$0xff]  }
 0x1ab   :  { %7915 = vmatprep.subr.bf16.mxu1 %v8603_v61  ;;  %v8648_v60 = vld [vmem:[#allocation2 + $0xd30] sm:$0xff]  }
 0x1ac   :  { %v8649_v61 = vld [vmem:[#allocation2 + $0xdb0] sm:$0xff]  }
 0x1ad   :  { %7894 = vmatpush3.bf16.msra.mxu0 %v8604_v62  ;;  %v8650_v62 = vld [vmem:[#allocation2 + $0xd68] sm:$0xff]  }
 0x1ae   :  { %7916 = vmatpush3.bf16.msra.mxu1 %v8605_v63  ;;  %7895 = vmatprep.subr.bf16.mxu0 %v8606_v0  ;;  %v8651_v63 = vld [vmem:[#allocation2 + $0xde8] sm:$0xff]  }
 0x1af   :  { %7917 = vmatprep.subr.bf16.mxu1 %v8607_v1  ;;  %v8652_v0 = vld [vmem:[#allocation2 + $0xd28] sm:$0xff]  }
 0x1b0   :  { %v8653_v1 = vld [vmem:[#allocation2 + $0xda8] sm:$0xff]  }
 0x1b1   :  { %7896 = vmatpush3.bf16.msra.mxu0 %v8608_v2  ;;  %v8654_v2 = vld [vmem:[#allocation2 + $0xd60] sm:$0xff]  }
 0x1b2   :  { %7918 = vmatpush3.bf16.msra.mxu1 %v8609_v3  ;;  %7925 = vmatprep.subr.bf16.mxu0 %v8610_v12  ;;  %v8655_v3 = vld [vmem:[#allocation2 + $0xde0] sm:$0xff]   ;;  %v8664_v12 = vld [vmem:[#allocation2 + $0xd10] sm:$0xff]  }
 0x1b3   :  { %7947 = vmatprep.subr.bf16.mxu1 %v8611_v13  ;;  %v8665_v13 = vld [vmem:[#allocation2 + $0xd90] sm:$0xff]  }
 0x1b4   :  { %6054 = vmatmul.mubr.bf16.vlgmr.msra.gmra.mxu0 %v6784_v7  ;;  %v8659_v7 = vld [vmem:[#allocation2 + $0xdd8] sm:$0xff]  }
 0x1b5   :  { %6095 = vmatmul.mubr.bf16.vlgmr.msra.gmra.mxu1 %v6786_v10  ;;  %7926 = vmatpush3.bf16.msra.mxu0 %v8612_v14  ;;  %v8662_v10 = vld [vmem:[#allocation2 + $0xd50] sm:$0xff]   ;;  %v8666_v14 = vld [vmem:[#allocation2 + $0xd48] sm:$0xff]  }
 0x1b6   :  { %7948 = vmatpush3.bf16.msra.mxu1 %v8613_v15  ;;  %7927 = vmatprep.subr.bf16.mxu0 %v8614_v16  ;;  %v8667_v15 = vld [vmem:[#allocation2 + $0xdc8] sm:$0xff]  }
 0x1b7   :  { %7949 = vmatprep.subr.bf16.mxu1 %v8615_v17  ;;  %6135 = vmatprep.mubr.bf16.mxu0 %v6789_v49  ;;  %v8668_v16 = vld [vmem:[#allocation2 + $0xd08] sm:$0xff]   ;;  %v8691_v49 = vld [vmem:[#allocation2 + $0xed8] sm:$0xff]  }
 0x1b8   :  { %6176 = vmatprep.mubr.bf16.mxu1 %v6791_v53  ;;  %v8669_v17 = vld [vmem:[#allocation2 + $0xd88] sm:$0xff]   ;;  %v8695_v53 = vld [vmem:[#allocation2 + $0xed0] sm:$0xff]  }
 0x1b9   :  { %7928 = vmatpush3.bf16.msra.mxu0 %v8616_v19  ;;  %v8670_v19 = vld [vmem:[#allocation2 + $0xd40] sm:$0xff]  }
 0x1ba   :  { %7950 = vmatpush3.bf16.msra.mxu1 %v8617_v20  ;;  %7929 = vmatprep.subr.bf16.mxu0 %v8618_v21  ;;  %v8671_v20 = vld [vmem:[#allocation2 + $0xdc0] sm:$0xff]  }
 0x1bb   :  { %7951 = vmatprep.subr.bf16.mxu1 %v8619_v22  ;;  %v8672_v21 = vld [vmem:[#allocation2 + $0xd00] sm:$0xff]  }
 0x1bc   :  { %v8673_v22 = vld [vmem:[#allocation2 + $0xd80] sm:$0xff]  }
 0x1bd   :  { %7930 = vmatpush3.bf16.msra.mxu0 %v8620_v23  ;;  %v98_v23 = vld [vmem:[%s9449_s0 + $0xd0] sm:$0xff] }
 0x1be   :  { %7952 = vmatpush3.bf16.msra.mxu1 %v8621_v24  ;;  %7931 = vmatprep.subr.bf16.mxu0 %v8622_v25  ;;  %v134_v24 = vld [vmem:[%s9449_s0 + $0x1f0] sm:$0xff]  ;;  %v99_v25 = vld [vmem:[%s9449_s0 + $0xd8] sm:$0xff] }
 0x1bf   :  { %7953 = vmatprep.subr.bf16.mxu1 %v8623_v26  ;;  %v135_v26 = vld [vmem:[%s9449_s0 + $0x1f8] sm:$0xff] }
 0x1c1   :  { %7932 = vmatpush3.bf16.msra.mxu0 %v8624_v27  ;;  %v6792_v27 = vcombine.low %v98_v23, %v134_v24 }
 0x1c2   :  { %7954 = vmatpush3.bf16.msra.mxu1 %v8625_v28  ;;  %7933 = vmatprep.subr.bf16.mxu0 %v8626_v29  ;;  %v6793_v28 = vcombine.high %v98_v23, %v134_v24  ;;  %v6794_v29 = vcombine.low %v99_v25, %v135_v26  ;;  %v8720_v23 = vld [vmem:[#allocation2 + $0xf20] sm:$0xff]  }
 0x1c3   :  { %7955 = vmatprep.subr.bf16.mxu1 %v8627_v30  ;;  %v6795_v30 = vcombine.high %v99_v25, %v135_v26  ;;  %v8721_v24 = vld [vmem:[#allocation2 + $0xfa0] sm:$0xff]   ;;  %v8722_v25 = vld [vmem:[#allocation2 + $0xf58] sm:$0xff]  }
 0x1c4   :  { %v8723_v26 = vld [vmem:[#allocation2 + $0xfd8] sm:$0xff]  }
 0x1c5   :  { %7934 = vmatpush3.bf16.msra.mxu0 %v8628_v31  ;;  %v8674_v31 = vld [vmem:[#allocation2 + $0xe78] sm:$0xff]  }
 0x1c6   :  { %7956 = vmatpush3.bf16.msra.mxu1 %v8629_v32  ;;  %7935 = vmatprep.subr.bf16.mxu0 %v8630_v33  ;;  %v8675_v32 = vld [vmem:[#allocation2 + $0xef8] sm:$0xff]  }
 0x1c7   :  { %7957 = vmatprep.subr.bf16.mxu1 %v8631_v34  ;;  %v8676_v33 = vld [vmem:[#allocation2 + $0xe38] sm:$0xff]  }
 0x1c8   :  { %v8677_v34 = vld [vmem:[#allocation2 + $0xeb8] sm:$0xff]  }
 0x1c9   :  { %7936 = vmatpush3.bf16.msra.mxu0 %v8632_v35  ;;  %v8678_v35 = vld [vmem:[#allocation2 + $0xe70] sm:$0xff]  }
 0x1ca   :  { %7958 = vmatpush3.bf16.msra.mxu1 %v8633_v36  ;;  %7937 = vmatprep.subr.bf16.mxu0 %v8634_v37  ;;  %v8679_v36 = vld [vmem:[#allocation2 + $0xef0] sm:$0xff]  }
 0x1cb   :  { %7959 = vmatprep.subr.bf16.mxu1 %v8635_v39  ;;  %v8680_v37 = vld [vmem:[#allocation2 + $0xe30] sm:$0xff]  }
 0x1cc   :  { %v8681_v39 = vld [vmem:[#allocation2 + $0xeb0] sm:$0xff]  }
 0x1cd   :  { %7938 = vmatpush3.bf16.msra.mxu0 %v8636_v40  ;;  %v8682_v40 = vld [vmem:[#allocation2 + $0xe68] sm:$0xff]  }
 0x1ce   :  { %7960 = vmatpush3.bf16.msra.mxu1 %v8637_v41  ;;  %7939 = vmatprep.subr.bf16.mxu0 %v8638_v42  ;;  %v8683_v41 = vld [vmem:[#allocation2 + $0xee8] sm:$0xff]  }
 0x1cf   :  { %7961 = vmatprep.subr.bf16.mxu1 %v8639_v43  ;;  %v8684_v42 = vld [vmem:[#allocation2 + $0xe28] sm:$0xff]  }
 0x1d0   :  { %v8685_v43 = vld [vmem:[#allocation2 + $0xea8] sm:$0xff]  }
 0x1d1   :  { %7940 = vmatpush3.bf16.msra.mxu0 %v8640_v44  ;;  %v8686_v44 = vld [vmem:[#allocation2 + $0xe60] sm:$0xff]  }
 0x1d2   :  { %7962 = vmatpush3.bf16.msra.mxu1 %v8641_v45  ;;  %7969 = vmatprep.subr.bf16.mxu0 %v8642_v54  ;;  %v8687_v45 = vld [vmem:[#allocation2 + $0xee0] sm:$0xff]   ;;  %v8696_v54 = vld [vmem:[#allocation2 + $0xe10] sm:$0xff]  }
 0x1d3   :  { %7991 = vmatprep.subr.bf16.mxu1 %v8643_v55  ;;  %v8697_v55 = vld [vmem:[#allocation2 + $0xe90] sm:$0xff]  }
 0x1d4   :  { %6136 = vmatmul.mubr.bf16.vlgmr.msra.gmra.mxu0 %v6788_v48  ;;  %v8690_v48 = vld [vmem:[#allocation2 + $0xe58] sm:$0xff]  }
 0x1d5   :  { %6177 = vmatmul.mubr.bf16.vlgmr.msra.gmra.mxu1 %v6790_v52  ;;  %7970 = vmatpush3.bf16.msra.mxu0 %v8644_v56  ;;  %v8694_v52 = vld [vmem:[#allocation2 + $0xe50] sm:$0xff]   ;;  %v8698_v56 = vld [vmem:[#allocation2 + $0xe48] sm:$0xff]  }
 0x1d6   :  { %7992 = vmatpush3.bf16.msra.mxu1 %v8645_v57  ;;  %7971 = vmatprep.subr.bf16.mxu0 %v8646_v58  ;;  %v8699_v57 = vld [vmem:[#allocation2 + $0xec8] sm:$0xff]  }
 0x1d7   :  { %7993 = vmatprep.subr.bf16.mxu1 %v8647_v59  ;;  %6217 = vmatprep.mubr.bf16.mxu0 %v6793_v28  ;;  %v8700_v58 = vld [vmem:[#allocation2 + $0xe08] sm:$0xff]   ;;  %v8725_v28 = vld [vmem:[#allocation2 + $0xf98] sm:$0xff]  }
 0x1d8   :  { %6258 = vmatprep.mubr.bf16.mxu1 %v6795_v30  ;;  %v8701_v59 = vld [vmem:[#allocation2 + $0xe88] sm:$0xff]   ;;  %v8727_v30 = vld [vmem:[#allocation2 + $0xfd0] sm:$0xff]  }
 0x1d9   :  { %7972 = vmatpush3.bf16.msra.mxu0 %v8648_v60  ;;  %v8702_v60 = vld [vmem:[#allocation2 + $0xe40] sm:$0xff]  }
 0x1da   :  { %7994 = vmatpush3.bf16.msra.mxu1 %v8649_v61  ;;  %7973 = vmatprep.subr.bf16.mxu0 %v8650_v62  ;;  %v8703_v61 = vld [vmem:[#allocation2 + $0xec0] sm:$0xff]  }
 0x1db   :  { %7995 = vmatprep.subr.bf16.mxu1 %v8651_v63  ;;  %v8704_v62 = vld [vmem:[#allocation2 + $0xe00] sm:$0xff]  }
 0x1dc   :  { %v8705_v63 = vld [vmem:[#allocation2 + $0xe80] sm:$0xff]  }
 0x1dd   :  { %7974 = vmatpush3.bf16.msra.mxu0 %v8652_v0  ;;  %v100_v0 = vld [vmem:[%s9449_s0 + $0xe0] sm:$0xff] }
 0x1de   :  { %7996 = vmatpush3.bf16.msra.mxu1 %v8653_v1  ;;  %7975 = vmatprep.subr.bf16.mxu0 %v8654_v2  ;;  %v136_v1 = vld [vmem:[%s9449_s0 + $0x200] sm:$0xff]  ;;  %v101_v2 = vld [vmem:[%s9449_s0 + $0xe8] sm:$0xff] }
 0x1df   :  { %7997 = vmatprep.subr.bf16.mxu1 %v8655_v3  ;;  %v6796_v3 = vcombine.low %v100_v0, %v136_v1 }
 0x1e1   :  { %7976 = vmatpush3.bf16.msra.mxu0 %v8656_v4  ;;  %v6797_v4 = vcombine.high %v100_v0, %v136_v1  ;;  %v8752_v0 = vld [vmem:[#allocation2 + $0x1020] sm:$0xff]  }
 0x1e2   :  { %7998 = vmatpush3.bf16.msra.mxu1 %v8657_v5  ;;  %7977 = vmatprep.subr.bf16.mxu0 %v8658_v6  ;;  %v137_v5 = vld [vmem:[%s9449_s0 + $0x208] sm:$0xff]  ;;  %v8753_v1 = vld [vmem:[#allocation2 + $0x10a0] sm:$0xff]  }
 0x1e3   :  { %7999 = vmatprep.subr.bf16.mxu1 %v8659_v7  ;;  %v6798_v6 = vcombine.low %v101_v2, %v137_v5  ;;  %v6799_v7 = vcombine.high %v101_v2, %v137_v5  ;;  %v8754_v2 = vld [vmem:[#allocation2 + $0x1058] sm:$0xff]  }
 0x1e4   :  { %v8757_v5 = vld [vmem:[#allocation2 + $0x1098] sm:$0xff]  }
 0x1e5   :  { %7978 = vmatpush3.bf16.msra.mxu0 %v8660_v8  ;;  %v8706_v8 = vld [vmem:[#allocation2 + $0xf78] sm:$0xff]  }
 0x1e6   :  { %8000 = vmatpush3.bf16.msra.mxu1 %v8661_v9  ;;  %7979 = vmatprep.subr.bf16.mxu0 %v8662_v10  ;;  %v8707_v9 = vld [vmem:[#allocation2 + $0xff8] sm:$0xff]  }
 0x1e7   :  { %8001 = vmatprep.subr.bf16.mxu1 %v8663_v11  ;;  %v8708_v10 = vld [vmem:[#allocation2 + $0xf38] sm:$0xff]  }
 0x1e8   :  { %v8709_v11 = vld [vmem:[#allocation2 + $0xfb8] sm:$0xff]  }
 0x1e9   :  { %7980 = vmatpush3.bf16.msra.mxu0 %v8664_v12  ;;  %v8710_v12 = vld [vmem:[#allocation2 + $0xf70] sm:$0xff]  }
 0x1ea   :  { %8002 = vmatpush3.bf16.msra.mxu1 %v8665_v13  ;;  %7981 = vmatprep.subr.bf16.mxu0 %v8666_v14  ;;  %v8711_v13 = vld [vmem:[#allocation2 + $0xff0] sm:$0xff]  }
 0x1eb   :  { %8003 = vmatprep.subr.bf16.mxu1 %v8667_v15  ;;  %v8712_v14 = vld [vmem:[#allocation2 + $0xf30] sm:$0xff]  }
 0x1ec   :  { %v8713_v15 = vld [vmem:[#allocation2 + $0xfb0] sm:$0xff]  }
 0x1ed   :  { %7982 = vmatpush3.bf16.msra.mxu0 %v8668_v16  ;;  %v8714_v16 = vld [vmem:[#allocation2 + $0xf68] sm:$0xff]  }
 0x1ee   :  { %8004 = vmatpush3.bf16.msra.mxu1 %v8669_v17  ;;  %7983 = vmatprep.subr.bf16.mxu0 %v8670_v19  ;;  %v8715_v17 = vld [vmem:[#allocation2 + $0xfe8] sm:$0xff]  }
 0x1ef   :  { %8005 = vmatprep.subr.bf16.mxu1 %v8671_v20  ;;  %v8716_v19 = vld [vmem:[#allocation2 + $0xf28] sm:$0xff]  }
 0x1f0   :  { %v8717_v20 = vld [vmem:[#allocation2 + $0xfa8] sm:$0xff]  }
 0x1f1   :  { %7984 = vmatpush3.bf16.msra.mxu0 %v8672_v21  ;;  %v8718_v21 = vld [vmem:[#allocation2 + $0xf60] sm:$0xff]  }
 0x1f2   :  { %8006 = vmatpush3.bf16.msra.mxu1 %v8673_v22  ;;  %8013 = vmatprep.subr.bf16.mxu0 %v8674_v31  ;;  %v8719_v22 = vld [vmem:[#allocation2 + $0xfe0] sm:$0xff]   ;;  %v8728_v31 = vld [vmem:[#allocation2 + $0xf10] sm:$0xff]  }
 0x1f3   :  { %8035 = vmatprep.subr.bf16.mxu1 %v8675_v32  ;;  %v8729_v32 = vld [vmem:[#allocation2 + $0xf90] sm:$0xff]  }
 0x1f4   :  { %6218 = vmatmul.mubr.bf16.vlgmr.msra.gmra.mxu0 %v6792_v27  ;;  %v8724_v27 = vld [vmem:[#allocation2 + $0xf18] sm:$0xff]  }
 0x1f5   :  { %6259 = vmatmul.mubr.bf16.vlgmr.msra.gmra.mxu1 %v6794_v29  ;;  %8014 = vmatpush3.bf16.msra.mxu0 %v8676_v33  ;;  %v8726_v29 = vld [vmem:[#allocation2 + $0xf50] sm:$0xff]   ;;  %v8730_v33 = vld [vmem:[#allocation2 + $0xf48] sm:$0xff]  }
 0x1f6   :  { %8036 = vmatpush3.bf16.msra.mxu1 %v8677_v34  ;;  %8015 = vmatprep.subr.bf16.mxu0 %v8678_v35  ;;  %v8731_v34 = vld [vmem:[#allocation2 + $0xfc8] sm:$0xff]  }
 0x1f7   :  { %8037 = vmatprep.subr.bf16.mxu1 %v8679_v36  ;;  %6299 = vmatprep.mubr.bf16.mxu0 %v6797_v4  ;;  %v8732_v35 = vld [vmem:[#allocation2 + $0xf08] sm:$0xff]   ;;  %v8756_v4 = vld [vmem:[#allocation2 + $0x1018] sm:$0xff]  }
 0x1f8   :  { %6340 = vmatprep.mubr.bf16.mxu1 %v6799_v7  ;;  %v8733_v36 = vld [vmem:[#allocation2 + $0xf88] sm:$0xff]   ;;  %v8759_v7 = vld [vmem:[#allocation2 + $0x10d0] sm:$0xff]  }
 0x1f9   :  { %8016 = vmatpush3.bf16.msra.mxu0 %v8680_v37  ;;  %v8734_v37 = vld [vmem:[#allocation2 + $0xf40] sm:$0xff]  }
 0x1fa   :  { %8038 = vmatpush3.bf16.msra.mxu1 %v8681_v39  ;;  %8017 = vmatprep.subr.bf16.mxu0 %v8682_v40  ;;  %v8735_v39 = vld [vmem:[#allocation2 + $0xfc0] sm:$0xff]  }
 0x1fb   :  { %8039 = vmatprep.subr.bf16.mxu1 %v8683_v41  ;;  %v8736_v40 = vld [vmem:[#allocation2 + $0xf00] sm:$0xff]  }
 0x1fc   :  { %v8737_v41 = vld [vmem:[#allocation2 + $0xf80] sm:$0xff]  }
 0x1fd   :  { %8018 = vmatpush3.bf16.msra.mxu0 %v8684_v42  ;;  %v102_v42 = vld [vmem:[%s9449_s0 + $0xf0] sm:$0xff] }
 0x1fe   :  { %8040 = vmatpush3.bf16.msra.mxu1 %v8685_v43  ;;  %8019 = vmatprep.subr.bf16.mxu0 %v8686_v44  ;;  %v138_v43 = vld [vmem:[%s9449_s0 + $0x210] sm:$0xff] }
 0x1ff   :  { %8041 = vmatprep.subr.bf16.mxu1 %v8687_v45  ;;  %v6800_v44 = vcombine.low %v102_v42, %v138_v43  ;;  %v6801_v45 = vcombine.high %v102_v42, %v138_v43  ;;  %v8784_v42 = vld [vmem:[#allocation2 + $0x1120] sm:$0xff]  }
 0x200   :  { %v8785_v43 = vld [vmem:[#allocation2 + $0x11a0] sm:$0xff]  }
 0x201   :  { %8020 = vmatpush3.bf16.msra.mxu0 %v8688_v46  ;;  %v103_v46 = vld [vmem:[%s9449_s0 + $0xf8] sm:$0xff] }
 0x202   :  { %8042 = vmatpush3.bf16.msra.mxu1 %v8689_v47  ;;  %8021 = vmatprep.subr.bf16.mxu0 %v8690_v48  ;;  %v139_v47 = vld [vmem:[%s9449_s0 + $0x218] sm:$0xff] }
 0x203   :  { %8043 = vmatprep.subr.bf16.mxu1 %v8691_v49  ;;  %v6802_v48 = vcombine.low %v103_v46, %v139_v47  ;;  %v6803_v49 = vcombine.high %v103_v46, %v139_v47  ;;  %v8788_v46 = vld [vmem:[#allocation2 + $0x1118] sm:$0xff]  }
 0x204   :  { %v8789_v47 = vld [vmem:[#allocation2 + $0x1198] sm:$0xff]  }
 0x205   :  { %8022 = vmatpush3.bf16.msra.mxu0 %v8692_v50  ;;  %v8738_v50 = vld [vmem:[#allocation2 + $0x1078] sm:$0xff]  }
 0x206   :  { %8044 = vmatpush3.bf16.msra.mxu1 %v8693_v51  ;;  %8023 = vmatprep.subr.bf16.mxu0 %v8694_v52  ;;  %v8739_v51 = vld [vmem:[#allocation2 + $0x10f8] sm:$0xff]  }
 0x207   :  { %8045 = vmatprep.subr.bf16.mxu1 %v8695_v53  ;;  %v8740_v52 = vld [vmem:[#allocation2 + $0x1038] sm:$0xff]  }
 0x208   :  { %v8741_v53 = vld [vmem:[#allocation2 + $0x10b8] sm:$0xff]  }
 0x209   :  { %8024 = vmatpush3.bf16.msra.mxu0 %v8696_v54  ;;  %v8742_v54 = vld [vmem:[#allocation2 + $0x1070] sm:$0xff]  }
 0x20a   :  { %8046 = vmatpush3.bf16.msra.mxu1 %v8697_v55  ;;  %8025 = vmatprep.subr.bf16.mxu0 %v8698_v56  ;;  %v8743_v55 = vld [vmem:[#allocation2 + $0x10f0] sm:$0xff]  }
 0x20b   :  { %8047 = vmatprep.subr.bf16.mxu1 %v8699_v57  ;;  %v8744_v56 = vld [vmem:[#allocation2 + $0x1030] sm:$0xff]  }
 0x20c   :  { %v8745_v57 = vld [vmem:[#allocation2 + $0x10b0] sm:$0xff]  }
 0x20d   :  { %8026 = vmatpush3.bf16.msra.mxu0 %v8700_v58  ;;  %v8746_v58 = vld [vmem:[#allocation2 + $0x1068] sm:$0xff]  }
 0x20e   :  { %8048 = vmatpush3.bf16.msra.mxu1 %v8701_v59  ;;  %8027 = vmatprep.subr.bf16.mxu0 %v8702_v60  ;;  %v8747_v59 = vld [vmem:[#allocation2 + $0x10e8] sm:$0xff]  }
 0x20f   :  { %8049 = vmatprep.subr.bf16.mxu1 %v8703_v61  ;;  %v8748_v60 = vld [vmem:[#allocation2 + $0x1028] sm:$0xff]  }
 0x210   :  { %v8749_v61 = vld [vmem:[#allocation2 + $0x10a8] sm:$0xff]  }
 0x211   :  { %8028 = vmatpush3.bf16.msra.mxu0 %v8704_v62  ;;  %v8750_v62 = vld [vmem:[#allocation2 + $0x1060] sm:$0xff]  }
 0x212   :  { %8050 = vmatpush3.bf16.msra.mxu1 %v8705_v63  ;;  %8057 = vmatprep.subr.bf16.mxu0 %v8706_v8  ;;  %v8751_v63 = vld [vmem:[#allocation2 + $0x10e0] sm:$0xff]   ;;  %v8760_v8 = vld [vmem:[#allocation2 + $0x1010] sm:$0xff]  }
 0x213   :  { %8079 = vmatprep.subr.bf16.mxu1 %v8707_v9  ;;  %v8761_v9 = vld [vmem:[#allocation2 + $0x1090] sm:$0xff]  }
 0x214   :  { %6300 = vmatmul.mubr.bf16.vlgmr.msra.gmra.mxu0 %v6796_v3  ;;  %v8755_v3 = vld [vmem:[#allocation2 + $0x10d8] sm:$0xff]  }
 0x215   :  { %6341 = vmatmul.mubr.bf16.vlgmr.msra.gmra.mxu1 %v6798_v6  ;;  %8058 = vmatpush3.bf16.msra.mxu0 %v8708_v10  ;;  %v8758_v6 = vld [vmem:[#allocation2 + $0x1050] sm:$0xff]   ;;  %v8762_v10 = vld [vmem:[#allocation2 + $0x1048] sm:$0xff]  }
 0x216   :  { %8080 = vmatpush3.bf16.msra.mxu1 %v8709_v11  ;;  %8059 = vmatprep.subr.bf16.mxu0 %v8710_v12  ;;  %v8763_v11 = vld [vmem:[#allocation2 + $0x10c8] sm:$0xff]  }
 0x217   :  { %8081 = vmatprep.subr.bf16.mxu1 %v8711_v13  ;;  %6381 = vmatprep.mubr.bf16.mxu0 %v6801_v45  ;;  %v8764_v12 = vld [vmem:[#allocation2 + $0x1008] sm:$0xff]   ;;  %v8787_v45 = vld [vmem:[#allocation2 + $0x11d8] sm:$0xff]  }
 0x218   :  { %6422 = vmatprep.mubr.bf16.mxu1 %v6803_v49  ;;  %v8765_v13 = vld [vmem:[#allocation2 + $0x1088] sm:$0xff]   ;;  %v8791_v49 = vld [vmem:[#allocation2 + $0x11d0] sm:$0xff]  }
 0x219   :  { %8060 = vmatpush3.bf16.msra.mxu0 %v8712_v14  ;;  %v8766_v14 = vld [vmem:[#allocation2 + $0x1040] sm:$0xff]  }
 0x21a   :  { %8082 = vmatpush3.bf16.msra.mxu1 %v8713_v15  ;;  %8061 = vmatprep.subr.bf16.mxu0 %v8714_v16  ;;  %v8767_v15 = vld [vmem:[#allocation2 + $0x10c0] sm:$0xff]  }
 0x21b   :  { %8083 = vmatprep.subr.bf16.mxu1 %v8715_v17  ;;  %v8768_v16 = vld [vmem:[#allocation2 + $0x1000] sm:$0xff]  }
 0x21c   :  { %v8769_v17 = vld [vmem:[#allocation2 + $0x1080] sm:$0xff]  }
 0x21d   :  { %8062 = vmatpush3.bf16.msra.mxu0 %v8716_v19  ;;  %v104_v19 = vld [vmem:[%s9449_s0 + $0x100] sm:$0xff] }
 0x21e   :  { %8084 = vmatpush3.bf16.msra.mxu1 %v8717_v20  ;;  %8063 = vmatprep.subr.bf16.mxu0 %v8718_v21  ;;  %v140_v20 = vld [vmem:[%s9449_s0 + $0x220] sm:$0xff]  ;;  %v105_v21 = vld [vmem:[%s9449_s0 + $0x108] sm:$0xff] }
 0x21f   :  { %8085 = vmatprep.subr.bf16.mxu1 %v8719_v22  ;;  %v141_v22 = vld [vmem:[%s9449_s0 + $0x228] sm:$0xff] }
 0x221   :  { %8064 = vmatpush3.bf16.msra.mxu0 %v8720_v23  ;;  %v6804_v23 = vcombine.low %v104_v19, %v140_v20 }
 0x222   :  { %8086 = vmatpush3.bf16.msra.mxu1 %v8721_v24  ;;  %8065 = vmatprep.subr.bf16.mxu0 %v8722_v25  ;;  %v6805_v24 = vcombine.high %v104_v19, %v140_v20  ;;  %v6806_v25 = vcombine.low %v105_v21, %v141_v22 }
 0x223   :  { %8087 = vmatprep.subr.bf16.mxu1 %v8723_v26  ;;  %v6807_v26 = vcombine.high %v105_v21, %v141_v22 }
 0x225   :  { %8066 = vmatpush3.bf16.msra.mxu0 %v8724_v27  ;;  %v8770_v27 = vld [vmem:[#allocation2 + $0x1178] sm:$0xff]  }
 0x226   :  { %8088 = vmatpush3.bf16.msra.mxu1 %v8725_v28  ;;  %8067 = vmatprep.subr.bf16.mxu0 %v8726_v29  ;;  %v8771_v28 = vld [vmem:[#allocation2 + $0x11f8] sm:$0xff]  }
 0x227   :  { %8089 = vmatprep.subr.bf16.mxu1 %v8727_v30  ;;  %v8772_v29 = vld [vmem:[#allocation2 + $0x1138] sm:$0xff]  }
 0x228   :  { %v8773_v30 = vld [vmem:[#allocation2 + $0x11b8] sm:$0xff]  }
 0x229   :  { %8068 = vmatpush3.bf16.msra.mxu0 %v8728_v31  ;;  %v8774_v31 = vld [vmem:[#allocation2 + $0x1170] sm:$0xff]  }
 0x22a   :  { %8090 = vmatpush3.bf16.msra.mxu1 %v8729_v32  ;;  %8069 = vmatprep.subr.bf16.mxu0 %v8730_v33  ;;  %v8775_v32 = vld [vmem:[#allocation2 + $0x11f0] sm:$0xff]  }
 0x22b   :  { %8091 = vmatprep.subr.bf16.mxu1 %v8731_v34  ;;  %v8776_v33 = vld [vmem:[#allocation2 + $0x1130] sm:$0xff]  }
 0x22c   :  { %v8777_v34 = vld [vmem:[#allocation2 + $0x11b0] sm:$0xff]  }
 0x22d   :  { %8070 = vmatpush3.bf16.msra.mxu0 %v8732_v35  ;;  %v8778_v35 = vld [vmem:[#allocation2 + $0x1168] sm:$0xff]  }
 0x22e   :  { %8092 = vmatpush3.bf16.msra.mxu1 %v8733_v36  ;;  %8071 = vmatprep.subr.bf16.mxu0 %v8734_v37  ;;  %v8779_v36 = vld [vmem:[#allocation2 + $0x11e8] sm:$0xff]  }
 0x22f   :  { %8093 = vmatprep.subr.bf16.mxu1 %v8735_v39  ;;  %v8780_v37 = vld [vmem:[#allocation2 + $0x1128] sm:$0xff]  }
 0x230   :  { %v8781_v39 = vld [vmem:[#allocation2 + $0x11a8] sm:$0xff]  }
 0x231   :  { %8072 = vmatpush3.bf16.msra.mxu0 %v8736_v40  ;;  %v8782_v40 = vld [vmem:[#allocation2 + $0x1160] sm:$0xff]  }
 0x232   :  { %8094 = vmatpush3.bf16.msra.mxu1 %v8737_v41  ;;  %8101 = vmatprep.subr.bf16.mxu0 %v8738_v50  ;;  %v8783_v41 = vld [vmem:[#allocation2 + $0x11e0] sm:$0xff]   ;;  %v8792_v50 = vld [vmem:[#allocation2 + $0x1110] sm:$0xff]  }
 0x233   :  { %8123 = vmatprep.subr.bf16.mxu1 %v8739_v51  ;;  %v8793_v51 = vld [vmem:[#allocation2 + $0x1190] sm:$0xff]  }
 0x234   :  { %6382 = vmatmul.mubr.bf16.vlgmr.msra.gmra.mxu0 %v6800_v44  ;;  %v8786_v44 = vld [vmem:[#allocation2 + $0x1158] sm:$0xff]  }
 0x235   :  { %6423 = vmatmul.mubr.bf16.vlgmr.msra.gmra.mxu1 %v6802_v48  ;;  %8102 = vmatpush3.bf16.msra.mxu0 %v8740_v52  ;;  %v8790_v48 = vld [vmem:[#allocation2 + $0x1150] sm:$0xff]   ;;  %v9171_v52 = vpop.f32.mrf.mxu0 }
 0x236   :  { %8124 = vmatpush3.bf16.msra.mxu1 %v8741_v53  ;;  %8103 = vmatprep.subr.bf16.mxu0 %v8742_v54  ;;  %v8794_v53 = vld [vmem:[#allocation2 + $0x1148] sm:$0xff]  }
 0x237   :  { %8125 = vmatprep.subr.bf16.mxu1 %v8743_v55  ;;  %6463 = vmatprep.mubr.bf16.mxu0 %v6805_v24  ;;  %v8795_v54 = vld [vmem:[#allocation2 + $0x11c8] sm:$0xff]  }
 0x238   :  { %6504 = vmatprep.mubr.bf16.mxu1 %v6807_v26  ;;  %v8796_v55 = vld [vmem:[#allocation2 + $0x1108] sm:$0xff]  }
 0x239   :  { %8104 = vmatpush3.bf16.msra.mxu0 %v8744_v56  ;;  %v9173_v56 = vpop.f32.mrf.mxu1 }
 0x23a   :  { %8126 = vmatpush3.bf16.msra.mxu1 %v8745_v57  ;;  %8105 = vmatprep.subr.bf16.mxu0 %v8746_v58  ;;  %v8797_v57 = vld [vmem:[#allocation2 + $0x1188] sm:$0xff]   ;;  %v9175_v58 = vpop.f32.mrf.mxu0 }
 0x23b   :  { %8127 = vmatprep.subr.bf16.mxu1 %v8747_v59  ;;  %v8798_v59 = vld [vmem:[#allocation2 + $0x1140] sm:$0xff]  }
 0x23d   :  { %8106 = vmatpush3.bf16.msra.mxu0 %v8748_v60  ;;  %v8799_v60 = vld [vmem:[#allocation2 + $0x11c0] sm:$0xff]  }
 0x23e   :  { %8128 = vmatpush3.bf16.msra.mxu1 %v8749_v61  ;;  %8107 = vmatprep.subr.bf16.mxu0 %v8750_v62  ;;  %v9177_v61 = vpop.f32.mrf.mxu0  ;;  %v8800_v62 = vld [vmem:[#allocation2 + $0x1100] sm:$0xff]  }
 0x23f   :  { %8129 = vmatprep.subr.bf16.mxu1 %v8751_v63  ;;  %v9179_v63 = vpop.f32.mrf.mxu1 }
 0x241   :  { %8108 = vmatpush3.bf16.msra.mxu0 %v8752_v0  ;;  %v8801_v0 = vld [vmem:[#allocation2 + $0x1180] sm:$0xff]  }
 0x242   :  { %8130 = vmatpush3.bf16.msra.mxu1 %v8753_v1  ;;  %8109 = vmatprep.subr.bf16.mxu0 %v8754_v2  ;;  %v106_v1 = vld [vmem:[%s9449_s0 + $0x110] sm:$0xff] }
 0x243   :  { %8131 = vmatprep.subr.bf16.mxu1 %v8755_v3  ;;  %v142_v2 = vld [vmem:[%s9449_s0 + $0x230] sm:$0xff]  ;;  %v107_v3 = vld [vmem:[%s9449_s0 + $0x118] sm:$0xff] }
 0x245   :  { %8110 = vmatpush3.bf16.msra.mxu0 %v8756_v4  ;;  %v9190_v4 = vpop.f32.mrf.mxu1 }
 0x246   :  { %8132 = vmatpush3.bf16.msra.mxu1 %v8757_v5  ;;  %8111 = vmatprep.subr.bf16.mxu0 %v8758_v6  ;;  %v6808_v5 = vcombine.low %v106_v1, %v142_v2  ;;  %v6809_v6 = vcombine.high %v106_v1, %v142_v2 }
 0x247   :  { %8133 = vmatprep.subr.bf16.mxu1 %v8759_v7  ;;  %v143_v7 = vld [vmem:[%s9449_s0 + $0x238] sm:$0xff] }
 0x249   :  { %8112 = vmatpush3.bf16.msra.mxu0 %v8760_v8  ;;  %v9195_v8 = vpop.f32.mrf.mxu0 }
 0x24a   :  { %8134 = vmatpush3.bf16.msra.mxu1 %v8761_v9  ;;  %8113 = vmatprep.subr.bf16.mxu0 %v8762_v10  ;;  %v6810_v9 = vcombine.low %v107_v3, %v143_v7  ;;  %v6811_v10 = vcombine.high %v107_v3, %v143_v7  ;;  %v8808_v3 = vld [vmem:[#allocation6 + $0x8] sm:$0xff]   ;;  %v8809_v7 = vld [vmem:[#allocation6] sm:$0xff]  }
 0x24b   :  { %8135 = vmatprep.subr.bf16.mxu1 %v8763_v11  ;;  %v9197_v11 = vpop.f32.mrf.mxu1 }
 0x24d   :  { %8114 = vmatpush3.bf16.msra.mxu0 %v8764_v12  ;;  %v9199_v12 = vpop.f32.mrf.mxu0 }
 0x24e   :  { %8136 = vmatpush3.bf16.msra.mxu1 %v8765_v13  ;;  %8115 = vmatprep.subr.bf16.mxu0 %v8766_v14  ;;  %v9201_v13 = vpop.f32.mrf.mxu1 }
 0x24f   :  { %8137 = vmatprep.subr.bf16.mxu1 %v8767_v15  ;;  %v9203_v14 = vpop.f32.mrf.mxu0 }
 0x251   :  { %8116 = vmatpush3.bf16.msra.mxu0 %v8768_v16  ;;  %v9205_v15 = vpop.f32.mrf.mxu0  ;;  %v9207_v16 = vpop.f32.mrf.mxu1 }
 0x252   :  { %8138 = vmatpush3.bf16.msra.mxu1 %v8769_v17  ;;  %8145 = vmatprep.subr.bf16.mxu0 %v8770_v27 }
 0x253   :  { %8167 = vmatprep.subr.bf16.mxu1 %v8771_v28  ;;  %v9209_v17 = vpop.f32.mrf.mxu1  ;;  %v9211_v19 = vpop.f32.mrf.mxu0 }
 0x254   :  { %6464 = vmatmul.mubr.bf16.vlgmr.msra.gmra.mxu0 %v6804_v23 }
 0x255   :  { %6505 = vmatmul.mubr.bf16.vlgmr.msra.gmra.mxu1 %v6806_v25  ;;  %8146 = vmatpush3.bf16.msra.mxu0 %v8772_v29  ;;  %v9213_v20 = vpop.f32.mrf.mxu1  ;;  %v9215_v21 = vpop.f32.mrf.mxu0 }
 0x256   :  { %8168 = vmatpush3.bf16.msra.mxu1 %v8773_v30  ;;  %8147 = vmatprep.subr.bf16.mxu0 %v8774_v31 }
 0x257   :  { %8169 = vmatprep.subr.bf16.mxu1 %v8775_v32  ;;  %6545 = vmatprep.mubr.bf16.mxu0 %v6809_v6  ;;  %v9217_v22 = vpop.f32.mrf.mxu1  ;;  %v9219_v23 = vpop.f32.mrf.mxu0 }
 0x258   :  { %6586 = vmatprep.mubr.bf16.mxu1 %v6811_v10 }
 0x259   :  { %8148 = vmatpush3.bf16.msra.mxu0 %v8776_v33  ;;  %v9221_v24 = vpop.f32.mrf.mxu0  ;;  %v9223_v25 = vpop.f32.mrf.mxu1 }
 0x25a   :  { %8170 = vmatpush3.bf16.msra.mxu1 %v8777_v34  ;;  %8149 = vmatprep.subr.bf16.mxu0 %v8778_v35 }
 0x25b   :  { %8171 = vmatprep.subr.bf16.mxu1 %v8779_v36  ;;  %v9225_v26 = vpop.f32.mrf.mxu1  ;;  %v9227_v27 = vpop.f32.mrf.mxu0  ;;  %v8802_v36 = vld [vmem:[#allocation6 + $0x38] sm:$0xff]  }
 0x25d   :  { %8150 = vmatpush3.bf16.msra.mxu0 %v8780_v37  ;;  %v9229_v28 = vpop.f32.mrf.mxu1  ;;  %v9231_v29 = vpop.f32.mrf.mxu0 }
 0x25e   :  { %8172 = vmatpush3.bf16.msra.mxu1 %v8781_v39  ;;  %8151 = vmatprep.subr.bf16.mxu0 %v8782_v40  ;;  %v8910_v39 = vmov 0.0  }
 0x25f   :  { %8173 = vmatprep.subr.bf16.mxu1 %v8783_v41  ;;  %v9233_v30 = vpop.f32.mrf.mxu1  ;;  %v9235_v31 = vpop.f32.mrf.mxu0  ;;  %v8803_v41 = vld [vmem:[#allocation6 + $0x30] sm:$0xff]  }
 0x261   :  { %8152 = vmatpush3.bf16.msra.mxu0 %v8784_v42  ;;  %v9237_v32 = vpop.f32.mrf.mxu0  ;;  %v9239_v33 = vpop.f32.mrf.mxu1 }
 0x262   :  { %8174 = vmatpush3.bf16.msra.mxu1 %v8785_v43  ;;  %8153 = vmatprep.subr.bf16.mxu0 %v8786_v44  ;;  %v8804_v44 = vld [vmem:[#allocation6 + $0x28] sm:$0xff]  }
 0x263   :  { %8175 = vmatprep.subr.bf16.mxu1 %v8787_v45  ;;  %v9241_v34 = vpop.f32.mrf.mxu1  ;;  %v9243_v35 = vpop.f32.mrf.mxu0 }
 0x265   :  { %8154 = vmatpush3.bf16.msra.mxu0 %v8788_v46  ;;  %v9245_v37 = vpop.f32.mrf.mxu1  ;;  %v9247_v40 = vpop.f32.mrf.mxu0 }
 0x266   :  { %8176 = vmatpush3.bf16.msra.mxu1 %v8789_v47  ;;  %8155 = vmatprep.subr.bf16.mxu0 %v8790_v48  ;;  %v8805_v47 = vld [vmem:[#allocation6 + $0x20] sm:$0xff]  }
 0x267   :  { %8177 = vmatprep.subr.bf16.mxu1 %v8791_v49  ;;  %v9249_v42 = vpop.f32.mrf.mxu1  ;;  %v9251_v43 = vpop.f32.mrf.mxu0 }
 0x269   :  { %8156 = vmatpush3.bf16.msra.mxu0 %v8792_v50  ;;  %v9253_v45 = vpop.f32.mrf.mxu0  ;;  %v9255_v46 = vpop.f32.mrf.mxu1 }
 0x26a   :  { %8178 = vmatpush3.bf16.msra.mxu1 %v8793_v51  ;;  %8157 = vmatprep.subr.bf16.mxu0 %v8794_v53 }
 0x26b   :  { %8179 = vmatprep.subr.bf16.mxu1 %v8795_v54  ;;  %v9257_v48 = vpop.f32.mrf.mxu1  ;;  %v9259_v49 = vpop.f32.mrf.mxu0 }
 0x26d   :  { %8158 = vmatpush3.bf16.msra.mxu0 %v8796_v55  ;;  %v9261_v50 = vpop.f32.mrf.mxu1  ;;  %v9263_v51 = vpop.f32.mrf.mxu0 }
 0x26e   :  { %8180 = vmatpush3.bf16.msra.mxu1 %v8797_v57  ;;  %8159 = vmatprep.subr.bf16.mxu0 %v8798_v59  ;;  %v8806_v59 = vld [vmem:[#allocation6 + $0x18] sm:$0xff]  }
 0x26f   :  { %8181 = vmatprep.subr.bf16.mxu1 %v8799_v60  ;;  %v9265_v53 = vpop.f32.mrf.mxu1  ;;  %v9267_v54 = vpop.f32.mrf.mxu0 }
 0x271   :  { %8160 = vmatpush3.bf16.msra.mxu0 %v8800_v62  ;;  %v9269_v55 = vpop.f32.mrf.mxu0  ;;  %v9271_v57 = vpop.f32.mrf.mxu1 }
 0x272   :  { %8182 = vmatpush3.bf16.msra.mxu1 %v8801_v0  ;;  %8198 = vmatprep.subr.bf16.mxu0 %v8910_v39  ;;  %v8807_v0 = vld [vmem:[#allocation6 + $0x10] sm:$0xff]  }
 0x273   :  { %v9273_v60 = vpop.f32.mrf.mxu1  ;;  %v9275_v62 = vpop.f32.mrf.mxu0 }
 0x274   :  { %6546 = vmatmul.mubr.bf16.vlgmr.msra.gmra.mxu0 %v6808_v5 }
 0x275   :  { %6587 = vmatmul.mubr.bf16.vlgmr.msra.gmra.mxu1 %v6810_v9  ;;  %8199 = vmatpush3.bf16.msra.mxu0 %v8802_v36  ;;  %v9277_v1 = vpop.f32.mrf.mxu1  ;;  %v9279_v2 = vpop.f32.mrf.mxu0 }
 0x276   :  { %8200 = vmatprep.subr.bf16.mxu0 %v8910_v39  ;;  %8214 = vmatprep.mubr.msk.bf16.mxu0 %vm8911_vm0, %v8910_v39 }
 0x277   :  { %v9281_v5 = vpop.f32.mrf.mxu1  ;;  %v9283_v6 = vpop.f32.mrf.mxu0 }
 0x278   :  { %9455 = vst [vmem:[#allocation12_spill] sm:$0xff] %v9281_v5 }
 0x279   :  { %8201 = vmatpush3.bf16.msra.mxu0 %v8803_v41  ;;  %v9285_v9 = vpop.f32.mrf.mxu0  ;;  %v9287_v10 = vpop.f32.mrf.mxu1 }
 0x27a   :  { %8202 = vmatprep.subr.bf16.mxu0 %v8910_v39  ;;  %9456 = vst [vmem:[#allocation13_spill] sm:$0xff] %v9287_v10 }
 0x27b   :  { %v9289_v36 = vpop.f32.mrf.mxu1  ;;  %v9291_v41 = vpop.f32.mrf.mxu0 }
 0x27c   :  { %9457 = vst [vmem:[#allocation14_spill] sm:$0xff] %v9289_v36  ;;  %9458 = vst [vmem:[#allocation15_spill] sm:$0xff] %v9291_v41 }
 0x27d   :  { %8203 = vmatpush3.bf16.msra.mxu0 %v8804_v44  ;;  %v9293_v44 = vpop.f32.mrf.mxu1 }
 0x27e   :  { %8204 = vmatprep.subr.bf16.mxu0 %v8910_v39  ;;  %9459 = vst [vmem:[#allocation16_spill] sm:$0xff] %v9293_v44 }
 0x281   :  { %8205 = vmatpush3.bf16.msra.mxu0 %v8805_v47  ;;  %v9295_v47 = vpop.f32.mrf.mxu0 }
 0x282   :  { %8206 = vmatprep.subr.bf16.mxu0 %v8910_v39  ;;  %9460 = vst [vmem:[#allocation17_spill] sm:$0xff] %v9295_v47 }
 0x285   :  { %8207 = vmatpush3.bf16.msra.mxu0 %v8806_v59  ;;  %v9297_v59 = vpop.f32.mrf.mxu1 }
 0x286   :  { %8208 = vmatprep.subr.bf16.mxu0 %v8910_v39  ;;  %9461 = vst [vmem:[#allocation18_spill] sm:$0xff] %v9297_v59  ;;  %v7506_v59 = vadd.f32 %v9175_v58, %v9171_v52  ;;  %v7550_v52 = vadd.f32 %v9203_v14, %v9199_v12 }
 0x287   :  { %v9303_v5 = vpop.f32.mrf.mxu1 }
 0x288   :  { %9463 = vst [vmem:[#allocation20_spill] sm:$0xff] %v9303_v5 }
 0x289   :  { %8209 = vmatpush3.bf16.msra.mxu0 %v8807_v0  ;;  %v9299_v0 = vpop.f32.mrf.mxu0  ;;  %v9305_v10 = vpop.f32.mrf.mxu1 }
 0x28a   :  { %8210 = vmatprep.subr.bf16.mxu0 %v8910_v39  ;;  %9464 = vst [vmem:[#allocation21_spill] sm:$0xff] %v9305_v10  ;;  %v7547_v10 = vadd.f32 %v9195_v8, %v9177_v61 }
 0x28d   :  { %8211 = vmatpush3.bf16.msra.mxu0 %v8808_v3  ;;  %v9301_v3 = vpop.f32.mrf.mxu0 }
 0x28e   :  { %8212 = vmatprep.subr.bf16.mxu0 %v8910_v39  ;;  %9462 = vst [vmem:[#allocation19_spill] sm:$0xff] %v9301_v3  ;;  %v9309_v39 = vpop.f32.mrf.mxu1 }
 0x290   :  { %v9313_v41 = vpop.f32.mrf.mxu1 }
 0x291   :  { %8213 = vmatpush3.bf16.msra.mxu0 %v8809_v7  ;;  %v9307_v7 = vpop.f32.mrf.mxu0  ;;  %9467 = vst [vmem:[#allocation24_spill] sm:$0xff] %v9313_v41  ;;  %v7528_v41 = vadd.f32 %v9179_v63, %v9173_v56 }
 0x292   :  { %9465 = vst [vmem:[#allocation22_spill] sm:$0xff] %v9307_v7  ;;  %v9321_v3 = vpop.f32.mrf.mxu1 }
 0x293   :  { %v9311_v36 = vpop.f32.mrf.mxu0  ;;  %9470 = vst [vmem:[#allocation27_spill] sm:$0xff] %v9321_v3 }
 0x294   :  { %9466 = vst [vmem:[#allocation23_spill] sm:$0xff] %v9311_v36  ;;  %v9325_v5 = vpop.f32.mrf.mxu1  ;;  %v5321_v36 = vadd.f32 %v7506_v59, %v9058_v38 }
 0x295   :  { %v9315_v44 = vpop.f32.mrf.mxu0  ;;  %9471 = vst [vmem:[#allocation28_spill] sm:$0xff] %v9325_v5  ;;  %v7591_v5 = vadd.f32 %v9211_v19, %v9205_v15  ;;  %v7635_v15 = vadd.f32 %v9227_v27, %v9221_v24  ;;  %v7679_v24 = vadd.f32 %v9243_v35, %v9237_v32  ;;  %v7723_v35 = vadd.f32 %v9259_v49, %v9253_v45 }
 0x296   :  { %9468 = vst [vmem:[#allocation25_spill] sm:$0xff] %v9315_v44  ;;  %v5400_v44 = vadd.f32 %v7547_v10, %v9073_v18  ;;  %v9337_v58 = vpop.f32.mrf.mxu1  ;;  %v5362_v8 = vadd.f32 %v7528_v41, %v5321_v36  ;;  %v7572_v18 = vadd.f32 %v9207_v16, %v9201_v13  ;;  %v7616_v16 = vadd.f32 %v9223_v25, %v9217_v22 }
 0x297   :  { %v9317_v47 = vpop.f32.mrf.mxu0  ;;  %v7660_v22 = vadd.f32 %v9239_v33, %v9233_v30  ;;  %v7704_v33 = vadd.f32 %v9255_v46, %v9249_v42  ;;  %v7767_v49 = vadd.f32 %v9275_v62, %v9269_v55  ;;  %v7748_v42 = vadd.f32 %v9271_v57, %v9265_v53  ;;  %v9475_v57 = vld [vmem:[#allocation14_spill] sm:$0xff] }
 0x298   :  { %9469 = vst [vmem:[#allocation26_spill] sm:$0xff] %v9317_v47  ;;  %v7569_v47 = vadd.f32 %v9197_v11, %v9190_v4  ;;  %v5403_v59 = vadd.f32 %v7550_v52, %v5362_v8  ;;  %v9343_v3 = vpop.f32.mrf.mxu1  ;;  %v7613_v4 = vadd.f32 %v9213_v20, %v9209_v17  ;;  %v7594_v11 = vadd.f32 %v9219_v23, %v9215_v21 }
 0x299   :  { %v9327_v7 = vpop.f32.mrf.mxu0  ;;  %v7657_v20 = vadd.f32 %v9229_v28, %v9225_v26  ;;  %v7638_v21 = vadd.f32 %v9235_v31, %v9231_v29  ;;  %v7701_v26 = vadd.f32 %v9245_v37, %v9241_v34  ;;  %v7682_v28 = vadd.f32 %v9251_v43, %v9247_v40 }
 0x29a   :  { %v5441_v38 = vadd.f32 %v7569_v47, %v5400_v44  ;;  %v5444_v14 = vadd.f32 %v7572_v18, %v5403_v59  ;;  %v9357_v19 = vpop.f32.mrf.mxu1  ;;  %v7745_v37 = vadd.f32 %v9261_v50, %v9257_v48  ;;  %v7726_v40 = vadd.f32 %v9267_v54, %v9263_v51  ;;  %v9472_v54 = vld [vmem:[#allocation15_spill] sm:$0xff] }
 0x29b   :  { %v9339_v61 = vpop.f32.mrf.mxu0  ;;  %v7789_v48 = vadd.f32 %v9277_v1, %v9273_v60  ;;  %v7770_v50 = vadd.f32 %v9283_v6, %v9279_v2  ;;  %v9477_v60 = vld [vmem:[#allocation17_spill] sm:$0xff] }
 0x29c   :  { %v5482_v63 = vadd.f32 %v7591_v5, %v5441_v38  ;;  %v5485_v36 = vadd.f32 %v7594_v11, %v5444_v14  ;;  %v9359_v41 = vpop.f32.mrf.mxu1  ;;  %v7811_v14 = vadd.f32 %v9472_v54, %v9285_v9  ;;  %v7814_v1 = vadd.f32 %v9299_v0, %v9477_v60  ;;  %v9487_v54 = vld [vmem:[#allocation27_spill] sm:$0xff] }
 0x29d   :  { %v9345_v56 = vpop.f32.mrf.mxu0 }
 0x29e   :  { %v5523_v10 = vadd.f32 %v7613_v4, %v5482_v63  ;;  %v5526_v23 = vadd.f32 %v7616_v16, %v5485_v36  ;;  %v9371_v27 = vpop.f32.mrf.mxu1  ;;  %v9473_v16 = vld [vmem:[#allocation12_spill] sm:$0xff] }
 0x29f   :  { %v9353_v12 = vpop.f32.mrf.mxu0 }
 0x2a0   :  { %v5564_v17 = vadd.f32 %v7635_v15, %v5523_v10  ;;  %v5567_v47 = vadd.f32 %v7638_v21, %v5526_v23  ;;  %v9381_v29 = vpop.f32.mrf.mxu1  ;;  %v9476_v21 = vld [vmem:[#allocation16_spill] sm:$0xff] }
 0x2a1   :  { %v9361_v13 = vpop.f32.mrf.mxu0  ;;  %v7833_v23 = vadd.f32 %v9476_v21, %v9475_v57 }
 0x2a2   :  { %v5605_v44 = vadd.f32 %v7657_v20, %v5564_v17  ;;  %v5608_v32 = vadd.f32 %v7660_v22, %v5567_v47  ;;  %v9389_v30 = vpop.f32.mrf.mxu1  ;;  %v9474_v17 = vld [vmem:[#allocation13_spill] sm:$0xff] }
 0x2a3   :  { %v9373_v5 = vpop.f32.mrf.mxu0  ;;  %v7792_v20 = vadd.f32 %v9474_v17, %v9473_v16  ;;  %v7902_v16 = vadd.f32 %v9345_v56, %v9339_v61 }
 0x2a4   :  { %v5646_v25 = vadd.f32 %v7679_v24, %v5605_v44  ;;  %v5649_v38 = vadd.f32 %v7682_v28, %v5608_v32  ;;  %v9478_v24 = vld [vmem:[#allocation19_spill] sm:$0xff]  ;;  %v9479_v44 = vld [vmem:[#allocation22_spill] sm:$0xff]  ;;  %v9481_v32 = vld [vmem:[#allocation20_spill] sm:$0xff] }
 0x2a5   :  { %v9383_v31 = vpop.f32.mrf.mxu0  ;;  %v7855_v9 = vadd.f32 %v9479_v44, %v9478_v24  ;;  %v9480_v28 = vld [vmem:[#allocation18_spill] sm:$0xff] }
 0x2a6   :  { %v5687_v8 = vadd.f32 %v7701_v26, %v5646_v25  ;;  %v5690_v45 = vadd.f32 %v7704_v33, %v5649_v38  ;;  %v9482_v38 = vld [vmem:[#allocation21_spill] sm:$0xff]  ;;  %v7946_v61 = vadd.f32 %v9383_v31, %v9373_v5 }
 0x2a7   :  { %v7877_v33 = vadd.f32 %v9309_v39, %v9482_v38 }
 0x2a8   :  { %v5728_v34 = vadd.f32 %v7723_v35, %v5687_v8  ;;  %v5731_v63 = vadd.f32 %v7726_v40, %v5690_v45  ;;  %v7836_v35 = vadd.f32 %v9481_v32, %v9480_v28 }
 0x2aa   :  { %v5769_v18 = vadd.f32 %v7745_v37, %v5728_v34  ;;  %v5772_v51 = vadd.f32 %v7748_v42, %v5731_v63  ;;  %v9483_v34 = vld [vmem:[#allocation23_spill] sm:$0xff]  ;;  %v9484_v37 = vld [vmem:[#allocation25_spill] sm:$0xff] }
 0x2ab   :  { %v7858_v40 = vadd.f32 %v9484_v37, %v9483_v34 }
 0x2ac   :  { %v5810_v46 = vadd.f32 %v7767_v49, %v5769_v18  ;;  %v5813_v10 = vadd.f32 %v7770_v50, %v5772_v51  ;;  %v9485_v18 = vld [vmem:[#allocation26_spill] sm:$0xff]  ;;  %v9486_v51 = vld [vmem:[#allocation24_spill] sm:$0xff] }
 0x2ad   :  { %v7899_v63 = vadd.f32 %v9327_v7, %v9485_v18 }
 0x2ae   :  { %v5851_v62 = vadd.f32 %v7789_v48, %v5810_v46  ;;  %v5854_v6 = vadd.f32 %v7792_v20, %v5813_v10  ;;  %v9488_v10 = vld [vmem:[#allocation28_spill] sm:$0xff] }
 0x2af   :  { %v7921_v39 = vadd.f32 %v9337_v58, %v9488_v10  ;;  %v7965_v58 = vadd.f32 %v9371_v27, %v9359_v41 }
 0x2b0   :  { %v5892_v53 = vadd.f32 %v7811_v14, %v5851_v62  ;;  %v5895_v26 = vadd.f32 %v7814_v1, %v5854_v6  ;;  %v7880_v14 = vadd.f32 %v9487_v54, %v9486_v51  ;;  %v7924_v1 = vadd.f32 %v9357_v19, %v9343_v3 }
 0x2b2   :  { %v5933_v25 = vadd.f32 %v7833_v23, %v5892_v53  ;;  %v5936_v49 = vadd.f32 %v7836_v35, %v5895_v26  ;;  %v7943_v53 = vadd.f32 %v9361_v13, %v9353_v12 }
 0x2b4   :  { %v9387_v52 = vpop.f32.mrf.mxu0  ;;  %v5974_v8 = vadd.f32 %v7855_v9, %v5933_v25  ;;  %v5977_v46 = vadd.f32 %v7858_v40, %v5936_v49  ;;  %v7968_v25 = vadd.f32 %v9389_v30, %v9381_v29 }
 0x2b5   :  { %v9397_v43 = vpop.f32.mrf.mxu1 }
 0x2b6   :  { %v7986_v59 = vpop.f32.mrf.mxu0  ;;  %v6015_v42 = vadd.f32 %v7877_v33, %v5974_v8  ;;  %v6018_v20 = vadd.f32 %v7880_v14, %v5977_v46 }
 0x2b7   :  { %v8008_v4 = vpop.f32.mrf.mxu1  ;;  %v7987_v24 = vadd.f32 %v7986_v59, %v9387_v52 }
 0x2b8   :  { %v7988_v11 = vpop.f32.mrf.mxu0  ;;  %v6056_v62 = vadd.f32 %v7899_v63, %v6015_v42  ;;  %v6059_v21 = vadd.f32 %v7902_v16, %v6018_v20  ;;  %v8009_v3 = vadd.f32 %v8008_v4, %v9397_v43 }
 0x2b9   :  { %v8010_v15 = vpop.f32.mrf.mxu1 }
 0x2ba   :  { %v7989_v55 = vpop.f32.mrf.mxu0  ;;  %v6097_v57 = vadd.f32 %v7921_v39, %v6056_v62  ;;  %v6100_v56 = vadd.f32 %v7924_v1, %v6059_v21 }
 0x2bb   :  { %v8011_v2 = vpop.f32.mrf.mxu1  ;;  %v7990_v19 = vadd.f32 %v7989_v55, %v7988_v11 }
 0x2bc   :  { %v6138_v6 = vadd.f32 %v7943_v53, %v6097_v57  ;;  %v6141_v9 = vadd.f32 %v7946_v61, %v6100_v56  ;;  %v8012_v52 = vadd.f32 %v8011_v2, %v8010_v15 }
 0x2be   :  { %v6179_v13 = vadd.f32 %v7965_v58, %v6138_v6  ;;  %v6182_v41 = vadd.f32 %v7968_v25, %v6141_v9  ;;  %v7388_v9 = vld [vmem:[#allocation7] ss:$0 sm:$0xff] }
 0x2c0   :  { %v6220_v26 = vadd.f32 %v7987_v24, %v6179_v13  ;;  %v6223_v31 = vadd.f32 %v7990_v19, %v6182_v41 }
 0x2c2   :  { %v6261_v5 = vadd.f32 %v8009_v3, %v6220_v26  ;;  %v6264_v40 = vadd.f32 %v8012_v52, %v6223_v31 }
 0x2d4   :  { %v8029_v36 = vpop.f32.mrf.mxu0 }
 0x2d5   :  { %v8051_v47 = vpop.f32.mrf.mxu1 }
 0x2d6   :  { %v8030_v22 = vpop.f32.mrf.mxu0 }
 0x2d7   :  { %v8052_v0 = vpop.f32.mrf.mxu1  ;;  %v8031_v27 = vadd.f32 %v8030_v22, %v8029_v36 }
 0x2d8   :  { %v8032_v45 = vpop.f32.mrf.mxu0  ;;  %v8053_v38 = vadd.f32 %v8052_v0, %v8051_v47 }
 0x2d9   :  { %v8054_v48 = vpop.f32.mrf.mxu1  ;;  %v6302_v59 = vadd.f32 %v8031_v27, %v6261_v5 }
 0x2da   :  { %v8033_v50 = vpop.f32.mrf.mxu0 }
 0x2db   :  { %v8055_v7 = vpop.f32.mrf.mxu1  ;;  %v8034_v33 = vadd.f32 %v8033_v50, %v8032_v45  ;;  %v6343_v30 = vadd.f32 %v8053_v38, %v6302_v59 }
 0x2dc   :  { %v8056_v11 = vadd.f32 %v8055_v7, %v8054_v48 }
 0x2dd   :  { %v6305_v49 = vadd.f32 %v8034_v33, %v6264_v40 }
 0x2df   :  { %v6346_v22 = vadd.f32 %v8056_v11, %v6305_v49 }
 0x2f4   :  { %v8073_v17 = vpop.f32.mrf.mxu0 }
 0x2f5   :  { %v8095_v23 = vpop.f32.mrf.mxu1 }
 0x2f6   :  { %v8074_v60 = vpop.f32.mrf.mxu0 }
 0x2f7   :  { %v8096_v44 = vpop.f32.mrf.mxu1  ;;  %v8075_v29 = vadd.f32 %v8074_v60, %v8073_v17 }
 0x2f8   :  { %v8076_v12 = vpop.f32.mrf.mxu0  ;;  %v8097_v18 = vadd.f32 %v8096_v44, %v8095_v23 }
 0x2f9   :  { %v8098_v28 = vpop.f32.mrf.mxu1  ;;  %v6384_v55 = vadd.f32 %v8075_v29, %v6343_v30 }
 0x2fa   :  { %v8077_v32 = vpop.f32.mrf.mxu0 }
 0x2fb   :  { %v8099_v8 = vpop.f32.mrf.mxu1  ;;  %v8078_v36 = vadd.f32 %v8077_v32, %v8076_v12  ;;  %v6425_v15 = vadd.f32 %v8097_v18, %v6384_v55 }
 0x2fc   :  { %v8100_v47 = vadd.f32 %v8099_v8, %v8098_v28 }
 0x2fd   :  { %v6387_v2 = vadd.f32 %v8078_v36, %v6346_v22 }
 0x2ff   :  { %v6428_v14 = vadd.f32 %v8100_v47, %v6387_v2 }
 0x314   :  { %v8117_v35 = vpop.f32.mrf.mxu0 }
 0x315   :  { %v8139_v34 = vpop.f32.mrf.mxu1 }
 0x316   :  { %v8118_v37 = vpop.f32.mrf.mxu0 }
 0x317   :  { %v8140_v43 = vpop.f32.mrf.mxu1  ;;  %v8119_v63 = vadd.f32 %v8118_v37, %v8117_v35 }
 0x318   :  { %v8120_v4 = vpop.f32.mrf.mxu0  ;;  %v8141_v45 = vadd.f32 %v8140_v43, %v8139_v34 }
 0x319   :  { %v8142_v42 = vpop.f32.mrf.mxu1  ;;  %v6466_v0 = vadd.f32 %v8119_v63, %v6425_v15 }
 0x31a   :  { %v8121_v46 = vpop.f32.mrf.mxu0 }
 0x31b   :  { %v8122_v50 = vadd.f32 %v8121_v46, %v8120_v4  ;;  %v8143_v51 = vpop.f32.mrf.mxu1  ;;  %v6507_v39 = vadd.f32 %v8141_v45, %v6466_v0 }
 0x31c   :  { %v8144_v53 = vadd.f32 %v8143_v51, %v8142_v42 }
 0x31d   :  { %v6469_v48 = vadd.f32 %v8122_v50, %v6428_v14 }
 0x31f   :  { %v6510_v23 = vadd.f32 %v8144_v53, %v6469_v48 }
 0x334   :  { %v8161_v54 = vpop.f32.mrf.mxu0 }
 0x335   :  { %v8183_v62 = vpop.f32.mrf.mxu1 }
 0x336   :  { %v8162_v10 = vpop.f32.mrf.mxu0 }
 0x337   :  { %v8163_v16 = vadd.f32 %v8162_v10, %v8161_v54  ;;  %v8184_v17 = vpop.f32.mrf.mxu1 }
 0x338   :  { %v8164_v20 = vpop.f32.mrf.mxu0  ;;  %v8185_v60 = vadd.f32 %v8184_v17, %v8183_v62 }
 0x339   :  { %v6548_v7 = vadd.f32 %v8163_v16, %v6507_v39  ;;  %v8186_v57 = vpop.f32.mrf.mxu1 }
 0x33a   :  { %v8165_v21 = vpop.f32.mrf.mxu0 }
 0x33b   :  { %v8166_v1 = vadd.f32 %v8165_v21, %v8164_v20  ;;  %v8187_v6 = vpop.f32.mrf.mxu1  ;;  %v6589_v58 = vadd.f32 %v8185_v60, %v6548_v7 }
 0x33c   :  { %v8188_v56 = vadd.f32 %v8187_v6, %v8186_v57 }
 0x33d   :  { %v6551_v61 = vadd.f32 %v8166_v1, %v6510_v23  ;;  %v6595_v44 = vmax.f32 %v6589_v58, 0.0 }
 0x33f   :  { %v6592_v24 = vadd.f32 %v8188_v56, %v6551_v61 }
 0x341   :  { %v6596_v12 = vmax.f32 %v6592_v24, 0.0 }
 0x343   :  { %v6597_v13 = vpack.c.bf16 %v6596_v12, %v6595_v44 }
 0x345   :  { %8215 = vmatmul.mubr.bf16.vlgmr.msra.gmra.mxu0 %v6597_v13 }
 0x405   :  { %v6703_v25 = vpop.f32.mrf.mxu0 }
 0x406   :  { %v6704_v26 = vadd.f32 %v7388_v9, %v6703_v25 }
 0x407   :  { %v8216_v3 = vpop.f32.mrf.mxu0 }
 0x408   :  { %6710 = vmax.xlane.f32.xlu0 %v6704_v26 }
 0x409   :  { %v6706_v19 = vpop.f32.mrf.mxu0 }
 0x40a   :  { %v6707_v28 = vadd.f32 %v7388_v9, %v6706_v19 }
 0x40b   :  { %v8217_v32 = vpop.f32.mrf.mxu0 }
 0x40c   :  { %6712 = vmax.xlane.f32.xlu0 %v6707_v28 }
 0x491   :  { %v6711_v41 = vpop.xlane.xlu0 %6710 }
 0x492   :  { %v6714_v27 = vsub.f32 %v6704_v26, %v6711_v41 }
 0x494   :  { %v6716_v35 = vmul.f32 1.442695, %v6714_v27 }
 0x495   :  { %v6713_v5 = vpop.xlane.xlu0 %6712 }
 0x496   :  { %v6715_v31 = vsub.f32 %v6707_v28, %v6713_v5  ;;  %8810 = vpow2.f32 %v6716_v35 }
 0x498   :  { %v6718_v8 = vmul.f32 1.442695, %v6715_v31 }
 0x49a   :  { %8812 = vpow2.f32 %v6718_v8 }
 0x4a3   :  { %v8811_v52 = vpop.eup %8810 }
 0x4a4   :  { %6720 = vadd.xlane.f32.xlu1 %v8811_v52 }
 0x4a7   :  { %v8813_v59 = vpop.eup %8812 }
 0x4a8   :  { %6722 = vadd.xlane.f32.xlu1 %v8813_v59 }
 0x52d   :  { %v6721_v38 = vpop.xlane.xlu1 %6720 }
 0x52e   :  { %8814 = vlog2.f32 %v6721_v38 }
 0x531   :  { %v6723_v33 = vpop.xlane.xlu1 %6722 }
 0x532   :  { %8816 = vlog2.f32 %v6723_v33 }
 0x53b   :  { %v8815_v34 = vpop.eup %8814 }
 0x53c   :  { %v6725_v37 = vmul.f32 0.6931472, %v8815_v34 }
 0x53e   :  { %v6728_v40 = vsub.f32 %v6714_v27, %v6725_v37 }
 0x53f   :  { %v8817_v29 = vpop.eup %8816 }
 0x540   :  { %6730 = vst [vmem:[%s9454_s5] sm:$0xff] %v6728_v40  ;;  %v6727_v30 = vmul.f32 0.6931472, %v8817_v29 }
 0x542   :  { %v6729_v49 = vsub.f32 %v6715_v31, %v6727_v30 }
 0x544   :  { %6731 = vst [vmem:[%s9454_s5 + $0x8] sm:$0xff] %v6729_v49 }
 0x545   :  { %6736 = vsyncpa [#allocation3], 1 }
 0x546   :  { %6737 = vsyncpa [#allocation5], 1 }
 0x547   :  { %6738 = vsyncpa [#allocation8], 1 }

</bundles_post_ra>
